<compile_context>
chip_gen: v7x
topology: tpu7x:2x2x1
jax: 0.10.0
libtpu: 0.0.40
codegen_flags: <defaults>
</compile_context>

<pallas_src>
import functools

import jax
import jax.numpy as jnp
from jax.experimental import pallas as pl
from jax.experimental.pallas import tpu as pltpu

EPS = 1e-5
F_CONV = 4        # spatial fold for stage 1 (4 * 32 out-ch = 128 lanes)
F_DS = 8          # spatial fold for DSConv stages (8*32=256, 8*48=384, 8*64=512)
VMEM_LIMIT = 64 * 1024 * 1024


def _round_up(x, m):
    return (x + m - 1) // m * m


# ----------------------------- in-kernel helpers ----------------------------


def _lane_group_sum(row, f, ch):
    """(1, f*ch) -> (1, ch): sum the f folded lane groups (spatial fold)."""
    out = row[:, 0:ch]
    for i in range(1, f):
        out = out + row[:, i * ch:(i + 1) * ch]
    return out


def _in_relu_fold(a, f, ch, count, mask):
    """InstanceNorm2d(affine=False, eps=1e-5) + ReLU on a lane-folded block.

    `a` is (P, f*ch) f32 holding f consecutive spatial positions per row
    (lane-dense layout).  Column-padded positions must already be zero in `a`;
    `mask` (same shape, 1/0, or None when there is no padding) re-zeroes them
    after centering so they don't pollute the variance or downstream consumers.
    Per-channel statistics over `count` true positions, two-pass (mean, then
    centered biased variance) -- matches PyTorch InstanceNorm2d.
    """
    inv = 1.0 / float(count)
    s1 = jnp.sum(a, axis=0, keepdims=True)                        # (1, f*ch)
    mean_c = _lane_group_sum(s1, f, ch) * inv                     # (1, ch)
    mean = jnp.concatenate([mean_c] * f, axis=1)                  # (1, f*ch)
    d = a - mean
    if mask is not None:
        d = d * mask                                              # zero padded cols
    s2 = jnp.sum(d * d, axis=0, keepdims=True)
    var_c = _lane_group_sum(s2, f, ch) * inv                      # (1, ch)
    scale = jnp.concatenate([jax.lax.rsqrt(var_c + EPS)] * f, axis=1)
    return jnp.maximum(d * scale, 0.0)


# --------------------------------- kernels ----------------------------------


def _conv1_kernel(s_ref, w_ref, *rest, f, cout, count):
    # Full 3x3 / stride-2 conv (cin=3 -> cout) + IN + ReLU, one sample.
    #   s_ref: (1, po/f, f*27)  lane-folded im2col taps, bf16 (27 = 9 taps * 3 cin)
    #   w_ref: (f*27, f*cout)   block-diagonal kron(I_f, W) weight, bf16
    #   rest:  [mask (po/f, f*cout) bf16]?, o_ref (1, po/f, f*cout)
    o_ref = rest[-1]
    mask = rest[0][...].astype(jnp.float32) if len(rest) == 2 else None
    a = jnp.dot(s_ref[0], w_ref[...], preferred_element_type=jnp.float32)  # MXU
    o_ref[0] = _in_relu_fold(a, f, cout, count, mask).astype(o_ref.dtype)


def _dsconv_kernel(s_ref, wdw_ref, wpw_ref, *rest, f, c, cout, count,
                   wop_groups, po_groups):
    # Depthwise 3x3/s2 + IN + ReLU + pointwise 1x1 + IN + ReLU, one sample.
    #   s_ref:   (1, 6, G, f*c)   6-variant stride-2 tap slab, bf16, lane-folded
    #   wdw_ref: (9, f*c)         depthwise weights, tap-major, pre-tiled, f32
    #   wpw_ref: (f*c, f*cout)    block-diagonal kron(I_f, W_pw), bf16
    #   rest:    [m1 (po/f, f*c), m2 (po/f, f*cout)]?, o_ref (1, po/f, f*cout)
    o_ref = rest[-1]
    if len(rest) == 3:
        m1 = rest[0][...].astype(jnp.float32)
        m2 = rest[1][...].astype(jnp.float32)
    else:
        m1 = m2 = None
    wdw = wdw_ref[...]                                            # (9, f*c) f32, hoisted
    acc = jnp.zeros((po_groups, f * c), jnp.float32)
    for dy in range(3):
        for dx in range(3):
            k = dy * 3 + dx
            v = (dy % 2) * 3 + dx                                 # row-parity x col-offset
            off = (dy // 2) * wop_groups                          # whole-group, 8-aligned
            tap = s_ref[0, v, pl.ds(off, po_groups), :].astype(jnp.float32)
            acc = acc + tap * wdw[k:k + 1, :]                     # depthwise FMA, full lanes
    y = _in_relu_fold(acc, f, c, count, m1)                       # IN + ReLU (dw channels)
    z = jnp.dot(y.astype(jnp.bfloat16), wpw_ref[...],
                preferred_element_type=jnp.float32)               # 1x1 conv (MXU)
    o_ref[0] = _in_relu_fold(z, f, cout, count, m2).astype(o_ref.dtype)


# --------------------------- wrapper-side layout -----------------------------


def _fold_mask(ho, wo, wop, f, ch):
    """(po/f, f*ch) bf16 validity mask (1 for real columns, 0 for padding)."""
    if wop == wo:
        return None
    valid = jnp.arange(wop) < wo
    m = jnp.broadcast_to(valid[None, :, None], (ho, wop, ch))
    return m.reshape(ho * wop // f, f * ch).astype(jnp.bfloat16)


def _conv1_slab(x, f):
    """(N,H,W,3) -> lane-folded im2col slab for 3x3/s2/p0: (N, po/f, f*27)."""
    n, h, w, cin = x.shape
    ho = (h - 3) // 2 + 1
    wo = (w - 3) // 2 + 1
    wop = _round_up(wo, max(8, f))
    taps = []
    for dy in range(3):
        for dx in range(3):
            taps.append(x[:, dy::2, dx::2, :][:, :ho, :wo, :])    # (n, ho, wo, cin)
    slab = jnp.stack(taps, axis=-2).reshape(n, ho, wo, 9 * cin)   # tap-major = HWIO order
    slab = jnp.pad(slab, ((0, 0), (0, 0), (0, wop - wo), (0, 0)))
    return slab.reshape(n, ho * wop // f, f * 9 * cin), ho, wo, wop


def _dsconv_slab(x, f):
    """(N,H,W,C) -> 6-variant stride-2 tap slab for 3x3/s2/p1, lane-folded.

    Variant (r, dx) holds zero-padded-input rows r::2 and columns dx::2; conv
    tap (dy, dx) is the group range [(dy//2)*wop/f, +po/f) of variant
    ((dy%2)*3 + dx).  wop is rounded up to a multiple of 8*f so those slices
    start on whole 8-sublane boundaries; padded columns are exactly zero.
    ~1.5x of the (bf16) input -- far below a 9x im2col.
    """
    n, h, w, c = x.shape
    ho = (h - 1) // 2 + 1
    wo = (w - 1) // 2 + 1
    wop = _round_up(wo, 8 * f)
    hh = ho + 1                               # one extra row so dy=2 is a pure row shift
    hp = 2 * ho + 2
    wp = 2 * wo + 1
    xp = jnp.pad(x, ((0, 0), (1, hp - h - 1), (1, wp - w - 1), (0, 0)))
    variants = []
    for r in range(2):
        for dx in range(3):
            v = xp[:, r::2, dx::2, :][:, :hh, :wo, :]             # (n, hh, wo, c)
            variants.append(jnp.pad(v, ((0, 0), (0, 0), (0, wop - wo), (0, 0))))
    slab = jnp.stack(variants, axis=1)                            # (n, 6, hh, wop, c)
    return slab.reshape(n, 6, hh * wop // f, f * c), ho, wo, wop


def _mosaic_params():
    return pltpu.CompilerParams(
        dimension_semantics=("parallel",),
        vmem_limit_bytes=VMEM_LIMIT)


def _conv_in_relu(x, w_hwio, *, out_dtype):
    """Conv2d(3x3, s2, p0, bias=False) + InstanceNorm2d + ReLU.  x: (N,H,W,3) bf16."""
    n = x.shape[0]
    cin, cout = w_hwio.shape[2], w_hwio.shape[3]
    f = F_CONV
    slab, ho, wo, wop = _conv1_slab(x, f)
    pof = ho * wop // f
    w_bd = jnp.kron(jnp.eye(f, dtype=w_hwio.dtype),
                    w_hwio.reshape(9 * cin, cout)).astype(jnp.bfloat16)
    mask = _fold_mask(ho, wo, wop, f, cout)
    args = [slab, w_bd]
    in_specs = [
        pl.BlockSpec((1, pof, f * 9 * cin), lambda i: (i, 0, 0)),
        pl.BlockSpec((f * 9 * cin, f * cout), lambda i: (0, 0)),
    ]
    if mask is not None:
        args.append(mask)
        in_specs.append(pl.BlockSpec((pof, f * cout), lambda i: (0, 0)))
    cost = pl.CostEstimate(
        flops=2 * n * pof * (f * 9 * cin) * (f * cout) + 10 * n * pof * f * cout,
        transcendentals=n * cout,
        bytes_accessed=(slab.size * slab.dtype.itemsize
                        + w_bd.size * w_bd.dtype.itemsize
                        + n * pof * f * cout * jnp.dtype(out_dtype).itemsize))
    out = pl.pallas_call(
        functools.partial(_conv1_kernel, f=f, cout=cout, count=ho * wo),
        out_shape=jax.ShapeDtypeStruct((n, pof, f * cout), out_dtype),
        grid_spec=pltpu.PrefetchScalarGridSpec(
            num_scalar_prefetch=0, grid=(n,),
            in_specs=in_specs,
            out_specs=pl.BlockSpec((1, pof, f * cout), lambda i: (i, 0, 0))),
        compiler_params=_mosaic_params(),
        cost_estimate=cost,
    )(*args)
    return out.reshape(n, ho, wop, cout)[:, :, :wo, :]


def _dsconv(x, w_dw, w_pw, *, out_dtype):
    """Depthwise 3x3/s2/p1 + IN + ReLU + pointwise 1x1 + IN + ReLU (fused)."""
    n, _, _, c = x.shape
    cout = w_pw.shape[1]
    f = F_DS
    slab, ho, wo, wop = _dsconv_slab(x, f)
    pof = ho * wop // f
    g = slab.shape[2]
    wdw_t = jnp.tile(w_dw, (1, f))                                # (9, f*c) f32
    wpw_bd = jnp.kron(jnp.eye(f, dtype=w_pw.dtype), w_pw).astype(jnp.bfloat16)
    m1 = _fold_mask(ho, wo, wop, f, c)
    m2 = _fold_mask(ho, wo, wop, f, cout)
    args = [slab, wdw_t, wpw_bd]
    in_specs = [
        pl.BlockSpec((1, 6, g, f * c), lambda i: (i, 0, 0, 0)),
        pl.BlockSpec((9, f * c), lambda i: (0, 0)),
        pl.BlockSpec((f * c, f * cout), lambda i: (0, 0)),
    ]
    if m1 is not None:
        args += [m1, m2]
        in_specs += [pl.BlockSpec((pof, f * c), lambda i: (0, 0)),
                     pl.BlockSpec((pof, f * cout), lambda i: (0, 0))]
    cost = pl.CostEstimate(
        flops=n * (2 * 9 * pof * f * c + 2 * pof * (f * c) * (f * cout)
                   + 12 * pof * f * (c + cout)),
        transcendentals=n * (c + cout),
        bytes_accessed=(slab.size * slab.dtype.itemsize
                        + wdw_t.size * 4 + wpw_bd.size * 2
                        + n * pof * f * cout * jnp.dtype(out_dtype).itemsize))
    out = pl.pallas_call(
        functools.partial(_dsconv_kernel, f=f, c=c, cout=cout, count=ho * wo,
                          wop_groups=wop // f, po_groups=pof),
        out_shape=jax.ShapeDtypeStruct((n, pof, f * cout), out_dtype),
        grid_spec=pltpu.PrefetchScalarGridSpec(
            num_scalar_prefetch=0, grid=(n,),
            in_specs=in_specs,
            out_specs=pl.BlockSpec((1, pof, f * cout), lambda i: (i, 0, 0))),
        compiler_params=_mosaic_params(),
        cost_estimate=cost,
    )(*args)
    return out.reshape(n, ho, wop, cout)[:, :, :wo, :]


def learning_to_downsample(x_nchw, params):
    """Forward pass; input/output are NCHW (PyTorch convention)."""
    x = jnp.transpose(x_nchw, (0, 2, 3, 1)).astype(jnp.bfloat16)            # NHWC, bf16
    x = _conv_in_relu(x, params["w1"], out_dtype=jnp.bfloat16)              # _ConvINReLU
    x = _dsconv(x, params["w_dw1"], params["w_pw1"], out_dtype=jnp.bfloat16)  # DSConv1
    x = _dsconv(x, params["w_dw2"], params["w_pw2"], out_dtype=jnp.float32)   # DSConv2
    return jnp.transpose(x, (0, 3, 1, 2))                                   # -> NCHW


def init_params(key, dw1=32, dw2=48, out_ch=64):
    # Layout notes vs PyTorch:
    #   Conv2d weight (Cout, Cin, 3, 3)      -> HWIO via w.transpose(2, 3, 1, 0)
    #   depthwise weight (C, 1, 3, 3)        -> (9, C) tap-major via w.reshape(C, 9).T
    #   pointwise 1x1 weight (Cout, Cin,1,1) -> (Cin, Cout) via w[:, :, 0, 0].T
    k1, k2, k3, k4, k5 = jax.random.split(key, 5)
    return {
        "w1": jax.random.normal(k1, (3, 3, 3, dw1), jnp.float32) * 0.1,
        "w_dw1": jax.random.normal(k2, (9, dw1), jnp.float32) * 0.1,
        "w_pw1": jax.random.normal(k3, (dw1, dw2), jnp.float32) * 0.1,
        "w_dw2": jax.random.normal(k4, (9, dw2), jnp.float32) * 0.1,
        "w_pw2": jax.random.normal(k5, (dw2, out_ch), jnp.float32) * 0.1,
    }


# ------------------------- pure-JAX reference (self-test) -------------------


def _reference_forward(x_nchw, params):
    """f32 XLA reference of the PyTorch module (for the self-test only)."""
    hi = jax.lax.Precision.HIGHEST

    def in_relu(y):
        m = jnp.mean(y, axis=(1, 2), keepdims=True)
        v = jnp.mean((y - m) ** 2, axis=(1, 2), keepdims=True)
        return jnp.maximum((y - m) * jax.lax.rsqrt(v + EPS), 0.0)

    x = jnp.transpose(x_nchw, (0, 2, 3, 1))
    x = in_relu(jax.lax.conv_general_dilated(
        x, params["w1"], (2, 2), [(0, 0), (0, 0)],
        dimension_numbers=("NHWC", "HWIO", "NHWC"), precision=hi))
    for wdw, wpw in ((params["w_dw1"], params["w_pw1"]),
                     (params["w_dw2"], params["w_pw2"])):
        c = wdw.shape[1]
        wdw_hwio = wdw.reshape(3, 3, c)[:, :, None, :]            # (3, 3, 1, C)
        x = in_relu(jax.lax.conv_general_dilated(
            x, wdw_hwio, (2, 2), [(1, 1), (1, 1)],
            dimension_numbers=("NHWC", "HWIO", "NHWC"),
            feature_group_count=c, precision=hi))
        x = in_relu(jnp.einsum("nhwc,cd->nhwd", x, wpw, precision=hi))
    return jnp.transpose(x, (0, 3, 1, 2))


if __name__ == "__main__":
    key = jax.random.PRNGKey(0)
    k_params, k_x = jax.random.split(key)
    params = init_params(k_params)

    # NCHW input, in_channels must be 3 (as in the PyTorch module).
    x = jax.random.normal(k_x, (2, 3, 32, 32), jnp.float32)

    y = jax.block_until_ready(jax.jit(learning_to_downsample)(x, params))

    # 32 -> conv s2 p0 -> 15 -> dsconv s2 p1 -> 8 -> dsconv s2 p1 -> 4
    assert y.shape == (2, 64, 4, 4), y.shape
    assert bool(jnp.all(jnp.isfinite(y)))
    assert bool(jnp.all(y >= 0.0))  # ends in ReLU

    # Numerical check vs an f32 XLA reference (kernel path uses bf16 weights /
    # activations in HBM and bf16 MXU operands, so use a loose tolerance).
    y_ref = jax.block_until_ready(jax.jit(_reference_forward)(x, params))
    max_err = float(jnp.max(jnp.abs(y - y_ref)))
    assert max_err < 0.3, max_err

    print("KERNEL_OK")
</pallas_src>

<mosaic_0001>
module attributes {stable_mosaic.version = 11 : i64} {
  func.func @_conv1_kernel(%arg0: i32, %arg1: memref<1x60x108xbf16, #tpu.memory_space<vmem>>, %arg2: memref<108x128xbf16, #tpu.memory_space<vmem>>, %arg3: memref<60x128xbf16, #tpu.memory_space<vmem>>, %arg4: memref<1x60x128xbf16, #tpu.memory_space<vmem>>) attributes {dimension_semantics = [#tpu.dimension_semantics<parallel>], iteration_bounds = array<i64: 2>, scalar_prefetch = 0 : i64, scratch_operands = 0 : i64, tpu.core_type = #tpu.core_type<tc>, window_params = [{transform_indices = @transform_0, window_bounds = array<i64: 1, 60, 108>}, {pipeline_mode = #tpu.pipeline_mode<synchronous>, transform_indices = @transform_1, window_bounds = array<i64: 108, 128>}, {pipeline_mode = #tpu.pipeline_mode<synchronous>, transform_indices = @transform_2, window_bounds = array<i64: 60, 128>}, {transform_indices = @transform_3, window_bounds = array<i64: 1, 60, 128>}]} {
    %c0 = arith.constant 0 : index
    %c0_0 = arith.constant 0 : index
    %0 = vector.load %arg3[%c0, %c0_0] : memref<60x128xbf16, #tpu.memory_space<vmem>>, vector<60x128xbf16>
    %1 = arith.extf %0 : vector<60x128xbf16> to vector<60x128xf32>
    %c0_1 = arith.constant 0 : index
    %c0_2 = arith.constant 0 : index
    %c0_3 = arith.constant 0 : index
    %2 = vector.load %arg1[%c0_1, %c0_2, %c0_3] : memref<1x60x108xbf16, #tpu.memory_space<vmem>>, vector<1x60x108xbf16>
    %3 = vector.shape_cast %2 : vector<1x60x108xbf16> to vector<60x108xbf16>
    %c0_4 = arith.constant 0 : index
    %c0_5 = arith.constant 0 : index
    %4 = vector.load %arg2[%c0_4, %c0_5] : memref<108x128xbf16, #tpu.memory_space<vmem>>, vector<108x128xbf16>
    %cst = arith.constant dense<0.000000e+00> : vector<60x128xf32>
    %5 = tpu.matmul %3, %4, %cst {dimension_numbers = #tpu.dot_dimension_numbers<[1], [0], [0], [1], [0, 0, 1, 1], [], []>} : vector<60x108xbf16>, vector<108x128xbf16>, vector<60x128xf32> -> vector<60x128xf32>
    %cst_6 = arith.constant dense<0.000000e+00> : vector<128xf32>
    %6 = vector.multi_reduction <add>, %5, %cst_6 [0] : vector<60x128xf32> to vector<128xf32>
    %7 = vector.shape_cast %6 : vector<128xf32> to vector<1x128xf32>
    %8 = vector.extract_strided_slice %7 {offsets = [0, 0], sizes = [1, 32], strides = [1, 1]} : vector<1x128xf32> to vector<1x32xf32>
    %9 = vector.extract_strided_slice %7 {offsets = [0, 32], sizes = [1, 32], strides = [1, 1]} : vector<1x128xf32> to vector<1x32xf32>
    %10 = arith.addf %8, %9 : vector<1x32xf32>
    %11 = vector.extract_strided_slice %7 {offsets = [0, 64], sizes = [1, 32], strides = [1, 1]} : vector<1x128xf32> to vector<1x32xf32>
    %12 = arith.addf %10, %11 : vector<1x32xf32>
    %13 = vector.extract_strided_slice %7 {offsets = [0, 96], sizes = [1, 32], strides = [1, 1]} : vector<1x128xf32> to vector<1x32xf32>
    %14 = arith.addf %12, %13 : vector<1x32xf32>
    %cst_7 = arith.constant 0.00444444455 : f32
    %15 = vector.broadcast %cst_7 : f32 to vector<1x32xf32>
    %16 = arith.mulf %14, %15 : vector<1x32xf32>
    %17 = tpu.concatenate %16, %16, %16, %16 in 1 : vector<1x32xf32>, vector<1x32xf32>, vector<1x32xf32>, vector<1x32xf32> -> vector<1x128xf32>
    %18 = vector.broadcast %17 : vector<1x128xf32> to vector<60x128xf32>
    %19 = arith.subf %5, %18 : vector<60x128xf32>
    %20 = arith.mulf %19, %1 : vector<60x128xf32>
    %21 = arith.mulf %20, %20 : vector<60x128xf32>
    %cst_8 = arith.constant dense<0.000000e+00> : vector<128xf32>
    %22 = vector.multi_reduction <add>, %21, %cst_8 [0] : vector<60x128xf32> to vector<128xf32>
    %23 = vector.shape_cast %22 : vector<128xf32> to vector<1x128xf32>
    %24 = vector.extract_strided_slice %23 {offsets = [0, 0], sizes = [1, 32], strides = [1, 1]} : vector<1x128xf32> to vector<1x32xf32>
    %25 = vector.extract_strided_slice %23 {offsets = [0, 32], sizes = [1, 32], strides = [1, 1]} : vector<1x128xf32> to vector<1x32xf32>
    %26 = arith.addf %24, %25 : vector<1x32xf32>
    %27 = vector.extract_strided_slice %23 {offsets = [0, 64], sizes = [1, 32], strides = [1, 1]} : vector<1x128xf32> to vector<1x32xf32>
    %28 = arith.addf %26, %27 : vector<1x32xf32>
    %29 = vector.extract_strided_slice %23 {offsets = [0, 96], sizes = [1, 32], strides = [1, 1]} : vector<1x128xf32> to vector<1x32xf32>
    %30 = arith.addf %28, %29 : vector<1x32xf32>
    %cst_9 = arith.constant 0.00444444455 : f32
    %31 = vector.broadcast %cst_9 : f32 to vector<1x32xf32>
    %32 = arith.mulf %30, %31 : vector<1x32xf32>
    %cst_10 = arith.constant 9.99999974E-6 : f32
    %33 = vector.broadcast %cst_10 : f32 to vector<1x32xf32>
    %34 = arith.addf %32, %33 : vector<1x32xf32>
    %35 = math.rsqrt %34 : vector<1x32xf32>
    %36 = tpu.concatenate %35, %35, %35, %35 in 1 : vector<1x32xf32>, vector<1x32xf32>, vector<1x32xf32>, vector<1x32xf32> -> vector<1x128xf32>
    %37 = vector.broadcast %36 : vector<1x128xf32> to vector<60x128xf32>
    %38 = arith.mulf %20, %37 : vector<60x128xf32>
    %cst_11 = arith.constant 0.000000e+00 : f32
    %39 = vector.broadcast %cst_11 : f32 to vector<60x128xf32>
    %40 = arith.maximumf %38, %39 : vector<60x128xf32>
    %41 = arith.truncf %40 : vector<60x128xf32> to vector<60x128xbf16>
    %c0_12 = arith.constant 0 : index
    %c0_13 = arith.constant 0 : index
    %c0_14 = arith.constant 0 : index
    %42 = vector.load %arg4[%c0_12, %c0_13, %c0_14] : memref<1x60x128xbf16, #tpu.memory_space<vmem>>, vector<1x60x128xbf16>
    %43 = vector.shape_cast %42 : vector<1x60x128xbf16> to vector<60x128xbf16>
    %44 = vector.shape_cast %41 : vector<60x128xbf16> to vector<1x60x128xbf16>
    tpu.vector_store %arg4[%c0_12, %c0_13, %c0_14], %44 {strides = array<i32>} : memref<1x60x128xbf16, #tpu.memory_space<vmem>>, vector<1x60x128xbf16>,
    return
  }
  func.func @transform_0(%arg0: i32) -> (i32, i32, i32) {
    %c0_i32 = arith.constant 0 : i32
    %c0_i32_0 = arith.constant 0 : i32
    %c0_i32_1 = arith.constant 0 : i32
    return %arg0, %c0_i32, %c0_i32_0 : i32, i32, i32
  }
  func.func @transform_1(%arg0: i32) -> (i32, i32) {
    %c0_i32 = arith.constant 0 : i32
    %c0_i32_0 = arith.constant 0 : i32
    %c0_i32_1 = arith.constant 0 : i32
    return %c0_i32, %c0_i32_0 : i32, i32
  }
  func.func @transform_2(%arg0: i32) -> (i32, i32) {
    %c0_i32 = arith.constant 0 : i32
    %c0_i32_0 = arith.constant 0 : i32
    %c0_i32_1 = arith.constant 0 : i32
    return %c0_i32, %c0_i32_0 : i32, i32
  }
  func.func @transform_3(%arg0: i32) -> (i32, i32, i32) {
    %c0_i32 = arith.constant 0 : i32
    %c0_i32_0 = arith.constant 0 : i32
    %c0_i32_1 = arith.constant 0 : i32
    return %arg0, %c0_i32, %c0_i32_0 : i32, i32, i32
  }
}

module attributes {stable_mosaic.version = 11 : i64} {
  func.func @_dsconv_kernel(%arg0: i32, %arg1: memref<1x6x72x256xbf16, #tpu.memory_space<vmem>>, %arg2: memref<9x256xf32, #tpu.memory_space<vmem>>, %arg3: memref<256x384xbf16, #tpu.memory_space<vmem>>, %arg4: memref<64x256xbf16, #tpu.memory_space<vmem>>, %arg5: memref<64x384xbf16, #tpu.memory_space<vmem>>, %arg6: memref<1x64x384xbf16, #tpu.memory_space<vmem>>) attributes {dimension_semantics = [#tpu.dimension_semantics<parallel>], iteration_bounds = array<i64: 2>, scalar_prefetch = 0 : i64, scratch_operands = 0 : i64, tpu.core_type = #tpu.core_type<tc>, window_params = [{transform_indices = @transform_0, window_bounds = array<i64: 1, 6, 72, 256>}, {pipeline_mode = #tpu.pipeline_mode<synchronous>, transform_indices = @transform_1, window_bounds = array<i64: 9, 256>}, {pipeline_mode = #tpu.pipeline_mode<synchronous>, transform_indices = @transform_2, window_bounds = array<i64: 256, 384>}, {pipeline_mode = #tpu.pipeline_mode<synchronous>, transform_indices = @transform_3, window_bounds = array<i64: 64, 256>}, {pipeline_mode = #tpu.pipeline_mode<synchronous>, transform_indices = @transform_4, window_bounds = array<i64: 64, 384>}, {transform_indices = @transform_5, window_bounds = array<i64: 1, 64, 384>}]} {
    %c0 = arith.constant 0 : index
    %c0_0 = arith.constant 0 : index
    %0 = vector.load %arg4[%c0, %c0_0] : memref<64x256xbf16, #tpu.memory_space<vmem>>, vector<64x256xbf16>
    %1 = arith.extf %0 : vector<64x256xbf16> to vector<64x256xf32>
    %c0_1 = arith.constant 0 : index
    %c0_2 = arith.constant 0 : index
    %2 = vector.load %arg5[%c0_1, %c0_2] : memref<64x384xbf16, #tpu.memory_space<vmem>>, vector<64x384xbf16>
    %3 = arith.extf %2 : vector<64x384xbf16> to vector<64x384xf32>
    %c0_3 = arith.constant 0 : index
    %c0_4 = arith.constant 0 : index
    %4 = vector.load %arg2[%c0_3, %c0_4] : memref<9x256xf32, #tpu.memory_space<vmem>>, vector<9x256xf32>
    %cst = arith.constant 0.000000e+00 : f32
    %5 = vector.broadcast %cst : f32 to vector<64x256xf32>
    %c0_5 = arith.constant 0 : index
    %c0_6 = arith.constant 0 : index
    %c0_7 = arith.constant 0 : index
    %c0_8 = arith.constant 0 : index
    %6 = vector.load %arg1[%c0_5, %c0_6, %c0_7, %c0_8] : memref<1x6x72x256xbf16, #tpu.memory_space<vmem>>, vector<1x1x64x256xbf16>
    %7 = vector.shape_cast %6 : vector<1x1x64x256xbf16> to vector<64x256xbf16>
    %8 = arith.extf %7 : vector<64x256xbf16> to vector<64x256xf32>
    %9 = vector.extract_strided_slice %4 {offsets = [0, 0], sizes = [1, 256], strides = [1, 1]} : vector<9x256xf32> to vector<1x256xf32>
    %10 = vector.broadcast %9 : vector<1x256xf32> to vector<64x256xf32>
    %11 = arith.mulf %8, %10 : vector<64x256xf32>
    %12 = arith.addf %5, %11 : vector<64x256xf32>
    %c0_9 = arith.constant 0 : index
    %c1 = arith.constant 1 : index
    %c0_10 = arith.constant 0 : index
    %c0_11 = arith.constant 0 : index
    %13 = vector.load %arg1[%c0_9, %c1, %c0_10, %c0_11] : memref<1x6x72x256xbf16, #tpu.memory_space<vmem>>, vector<1x1x64x256xbf16>
    %14 = vector.shape_cast %13 : vector<1x1x64x256xbf16> to vector<64x256xbf16>
    %15 = arith.extf %14 : vector<64x256xbf16> to vector<64x256xf32>
    %16 = vector.extract_strided_slice %4 {offsets = [1, 0], sizes = [1, 256], strides = [1, 1]} : vector<9x256xf32> to vector<1x256xf32>
    %17 = vector.broadcast %16 : vector<1x256xf32> to vector<64x256xf32>
    %18 = arith.mulf %15, %17 : vector<64x256xf32>
    %19 = arith.addf %12, %18 : vector<64x256xf32>
    %c0_12 = arith.constant 0 : index
    %c2 = arith.constant 2 : index
    %c0_13 = arith.constant 0 : index
    %c0_14 = arith.constant 0 : index
    %20 = vector.load %arg1[%c0_12, %c2, %c0_13, %c0_14] : memref<1x6x72x256xbf16, #tpu.memory_space<vmem>>, vector<1x1x64x256xbf16>
    %21 = vector.shape_cast %20 : vector<1x1x64x256xbf16> to vector<64x256xbf16>
    %22 = arith.extf %21 : vector<64x256xbf16> to vector<64x256xf32>
    %23 = vector.extract_strided_slice %4 {offsets = [2, 0], sizes = [1, 256], strides = [1, 1]} : vector<9x256xf32> to vector<1x256xf32>
    %24 = vector.broadcast %23 : vector<1x256xf32> to vector<64x256xf32>
    %25 = arith.mulf %22, %24 : vector<64x256xf32>
    %26 = arith.addf %19, %25 : vector<64x256xf32>
    %c0_15 = arith.constant 0 : index
    %c3 = arith.constant 3 : index
    %c0_16 = arith.constant 0 : index
    %c0_17 = arith.constant 0 : index
    %27 = vector.load %arg1[%c0_15, %c3, %c0_16, %c0_17] : memref<1x6x72x256xbf16, #tpu.memory_space<vmem>>, vector<1x1x64x256xbf16>
    %28 = vector.shape_cast %27 : vector<1x1x64x256xbf16> to vector<64x256xbf16>
    %29 = arith.extf %28 : vector<64x256xbf16> to vector<64x256xf32>
    %30 = vector.extract_strided_slice %4 {offsets = [3, 0], sizes = [1, 256], strides = [1, 1]} : vector<9x256xf32> to vector<1x256xf32>
    %31 = vector.broadcast %30 : vector<1x256xf32> to vector<64x256xf32>
    %32 = arith.mulf %29, %31 : vector<64x256xf32>
    %33 = arith.addf %26, %32 : vector<64x256xf32>
    %c0_18 = arith.constant 0 : index
    %c4 = arith.constant 4 : index
    %c0_19 = arith.constant 0 : index
    %c0_20 = arith.constant 0 : index
    %34 = vector.load %arg1[%c0_18, %c4, %c0_19, %c0_20] : memref<1x6x72x256xbf16, #tpu.memory_space<vmem>>, vector<1x1x64x256xbf16>
    %35 = vector.shape_cast %34 : vector<1x1x64x256xbf16> to vector<64x256xbf16>
    %36 = arith.extf %35 : vector<64x256xbf16> to vector<64x256xf32>
    %37 = vector.extract_strided_slice %4 {offsets = [4, 0], sizes = [1, 256], strides = [1, 1]} : vector<9x256xf32> to vector<1x256xf32>
    %38 = vector.broadcast %37 : vector<1x256xf32> to vector<64x256xf32>
    %39 = arith.mulf %36, %38 : vector<64x256xf32>
    %40 = arith.addf %33, %39 : vector<64x256xf32>
    %c0_21 = arith.constant 0 : index
    %c5 = arith.constant 5 : index
    %c0_22 = arith.constant 0 : index
    %c0_23 = arith.constant 0 : index
    %41 = vector.load %arg1[%c0_21, %c5, %c0_22, %c0_23] : memref<1x6x72x256xbf16, #tpu.memory_space<vmem>>, vector<1x1x64x256xbf16>
    %42 = vector.shape_cast %41 : vector<1x1x64x256xbf16> to vector<64x256xbf16>
    %43 = arith.extf %42 : vector<64x256xbf16> to vector<64x256xf32>
    %44 = vector.extract_strided_slice %4 {offsets = [5, 0], sizes = [1, 256], strides = [1, 1]} : vector<9x256xf32> to vector<1x256xf32>
    %45 = vector.broadcast %44 : vector<1x256xf32> to vector<64x256xf32>
    %46 = arith.mulf %43, %45 : vector<64x256xf32>
    %47 = arith.addf %40, %46 : vector<64x256xf32>
    %c0_24 = arith.constant 0 : index
    %c0_25 = arith.constant 0 : index
    %c8 = arith.constant 8 : index
    %c0_26 = arith.constant 0 : index
    %48 = vector.load %arg1[%c0_24, %c0_25, %c8, %c0_26] : memref<1x6x72x256xbf16, #tpu.memory_space<vmem>>, vector<1x1x64x256xbf16>
    %49 = vector.shape_cast %48 : vector<1x1x64x256xbf16> to vector<64x256xbf16>
    %50 = arith.extf %49 : vector<64x256xbf16> to vector<64x256xf32>
    %51 = vector.extract_strided_slice %4 {offsets = [6, 0], sizes = [1, 256], strides = [1, 1]} : vector<9x256xf32> to vector<1x256xf32>
    %52 = vector.broadcast %51 : vector<1x256xf32> to vector<64x256xf32>
    %53 = arith.mulf %50, %52 : vector<64x256xf32>
    %54 = arith.addf %47, %53 : vector<64x256xf32>
    %c0_27 = arith.constant 0 : index
    %c1_28 = arith.constant 1 : index
    %c8_29 = arith.constant 8 : index
    %c0_30 = arith.constant 0 : index
    %55 = vector.load %arg1[%c0_27, %c1_28, %c8_29, %c0_30] : memref<1x6x72x256xbf16, #tpu.memory_space<vmem>>, vector<1x1x64x256xbf16>
    %56 = vector.shape_cast %55 : vector<1x1x64x256xbf16> to vector<64x256xbf16>
    %57 = arith.extf %56 : vector<64x256xbf16> to vector<64x256xf32>
    %58 = vector.extract_strided_slice %4 {offsets = [7, 0], sizes = [1, 256], strides = [1, 1]} : vector<9x256xf32> to vector<1x256xf32>
    %59 = vector.broadcast %58 : vector<1x256xf32> to vector<64x256xf32>
    %60 = arith.mulf %57, %59 : vector<64x256xf32>
    %61 = arith.addf %54, %60 : vector<64x256xf32>
    %c0_31 = arith.constant 0 : index
    %c2_32 = arith.constant 2 : index
    %c8_33 = arith.constant 8 : index
    %c0_34 = arith.constant 0 : index
    %62 = vector.load %arg1[%c0_31, %c2_32, %c8_33, %c0_34] : memref<1x6x72x256xbf16, #tpu.memory_space<vmem>>, vector<1x1x64x256xbf16>
    %63 = vector.shape_cast %62 : vector<1x1x64x256xbf16> to vector<64x256xbf16>
    %64 = arith.extf %63 : vector<64x256xbf16> to vector<64x256xf32>
    %65 = vector.extract_strided_slice %4 {offsets = [8, 0], sizes = [1, 256], strides = [1, 1]} : vector<9x256xf32> to vector<1x256xf32>
    %66 = vector.broadcast %65 : vector<1x256xf32> to vector<64x256xf32>
    %67 = arith.mulf %64, %66 : vector<64x256xf32>
    %68 = arith.addf %61, %67 : vector<64x256xf32>
    %cst_35 = arith.constant dense<0.000000e+00> : vector<256xf32>
    %69 = vector.multi_reduction <add>, %68, %cst_35 [0] : vector<64x256xf32> to vector<256xf32>
    %70 = vector.shape_cast %69 : vector<256xf32> to vector<1x256xf32>
    %71 = vector.extract_strided_slice %70 {offsets = [0, 0], sizes = [1, 32], strides = [1, 1]} : vector<1x256xf32> to vector<1x32xf32>
    %72 = vector.extract_strided_slice %70 {offsets = [0, 32], sizes = [1, 32], strides = [1, 1]} : vector<1x256xf32> to vector<1x32xf32>
    %73 = arith.addf %71, %72 : vector<1x32xf32>
    %74 = vector.extract_strided_slice %70 {offsets = [0, 64], sizes = [1, 32], strides = [1, 1]} : vector<1x256xf32> to vector<1x32xf32>
    %75 = arith.addf %73, %74 : vector<1x32xf32>
    %76 = vector.extract_strided_slice %70 {offsets = [0, 96], sizes = [1, 32], strides = [1, 1]} : vector<1x256xf32> to vector<1x32xf32>
    %77 = arith.addf %75, %76 : vector<1x32xf32>
    %78 = vector.extract_strided_slice %70 {offsets = [0, 128], sizes = [1, 32], strides = [1, 1]} : vector<1x256xf32> to vector<1x32xf32>
    %79 = arith.addf %77, %78 : vector<1x32xf32>
    %80 = vector.extract_strided_slice %70 {offsets = [0, 160], sizes = [1, 32], strides = [1, 1]} : vector<1x256xf32> to vector<1x32xf32>
    %81 = arith.addf %79, %80 : vector<1x32xf32>
    %82 = vector.extract_strided_slice %70 {offsets = [0, 192], sizes = [1, 32], strides = [1, 1]} : vector<1x256xf32> to vector<1x32xf32>
    %83 = arith.addf %81, %82 : vector<1x32xf32>
    %84 = vector.extract_strided_slice %70 {offsets = [0, 224], sizes = [1, 32], strides = [1, 1]} : vector<1x256xf32> to vector<1x32xf32>
    %85 = arith.addf %83, %84 : vector<1x32xf32>
    %cst_36 = arith.constant 1.562500e-02 : f32
    %86 = vector.broadcast %cst_36 : f32 to vector<1x32xf32>
    %87 = arith.mulf %85, %86 : vector<1x32xf32>
    %88 = tpu.concatenate %87, %87, %87, %87, %87, %87, %87, %87 in 1 : vector<1x32xf32>, vector<1x32xf32>, vector<1x32xf32>, vector<1x32xf32>, vector<1x32xf32>, vector<1x32xf32>, vector<1x32xf32>, vector<1x32xf32> -> vector<1x256xf32>
    %89 = vector.broadcast %88 : vector<1x256xf32> to vector<64x256xf32>
    %90 = arith.subf %68, %89 : vector<64x256xf32>
    %91 = arith.mulf %90, %1 : vector<64x256xf32>
    %92 = arith.mulf %91, %91 : vector<64x256xf32>
    %cst_37 = arith.constant dense<0.000000e+00> : vector<256xf32>
    %93 = vector.multi_reduction <add>, %92, %cst_37 [0] : vector<64x256xf32> to vector<256xf32>
    %94 = vector.shape_cast %93 : vector<256xf32> to vector<1x256xf32>
    %95 = vector.extract_strided_slice %94 {offsets = [0, 0], sizes = [1, 32], strides = [1, 1]} : vector<1x256xf32> to vector<1x32xf32>
    %96 = vector.extract_strided_slice %94 {offsets = [0, 32], sizes = [1, 32], strides = [1, 1]} : vector<1x256xf32> to vector<1x32xf32>
    %97 = arith.addf %95, %96 : vector<1x32xf32>
    %98 = vector.extract_strided_slice %94 {offsets = [0, 64], sizes = [1, 32], strides = [1, 1]} : vector<1x256xf32> to vector<1x32xf32>
    %99 = arith.addf %97, %98 : vector<1x32xf32>
    %100 = vector.extract_strided_slice %94 {offsets = [0, 96], sizes = [1, 32], strides = [1, 1]} : vector<1x256xf32> to vector<1x32xf32>
    %101 = arith.addf %99, %100 : vector<1x32xf32>
    %102 = vector.extract_strided_slice %94 {offsets = [0, 128], sizes = [1, 32], strides = [1, 1]} : vector<1x256xf32> to vector<1x32xf32>
    %103 = arith.addf %101, %102 : vector<1x32xf32>
    %104 = vector.extract_strided_slice %94 {offsets = [0, 160], sizes = [1, 32], strides = [1, 1]} : vector<1x256xf32> to vector<1x32xf32>
    %105 = arith.addf %103, %104 : vector<1x32xf32>
    %106 = vector.extract_strided_slice %94 {offsets = [0, 192], sizes = [1, 32], strides = [1, 1]} : vector<1x256xf32> to vector<1x32xf32>
    %107 = arith.addf %105, %106 : vector<1x32xf32>
    %108 = vector.extract_strided_slice %94 {offsets = [0, 224], sizes = [1, 32], strides = [1, 1]} : vector<1x256xf32> to vector<1x32xf32>
    %109 = arith.addf %107, %108 : vector<1x32xf32>
    %cst_38 = arith.constant 1.562500e-02 : f32
    %110 = vector.broadcast %cst_38 : f32 to vector<1x32xf32>
    %111 = arith.mulf %109, %110 : vector<1x32xf32>
    %cst_39 = arith.constant 9.99999974E-6 : f32
    %112 = vector.broadcast %cst_39 : f32 to vector<1x32xf32>
    %113 = arith.addf %111, %112 : vector<1x32xf32>
    %114 = math.rsqrt %113 : vector<1x32xf32>
    %115 = tpu.concatenate %114, %114, %114, %114, %114, %114, %114, %114 in 1 : vector<1x32xf32>, vector<1x32xf32>, vector<1x32xf32>, vector<1x32xf32>, vector<1x32xf32>, vector<1x32xf32>, vector<1x32xf32>, vector<1x32xf32> -> vector<1x256xf32>
    %116 = vector.broadcast %115 : vector<1x256xf32> to vector<64x256xf32>
    %117 = arith.mulf %91, %116 : vector<64x256xf32>
    %cst_40 = arith.constant 0.000000e+00 : f32
    %118 = vector.broadcast %cst_40 : f32 to vector<64x256xf32>
    %119 = arith.maximumf %117, %118 : vector<64x256xf32>
    %120 = arith.truncf %119 : vector<64x256xf32> to vector<64x256xbf16>
    %c0_41 = arith.constant 0 : index
    %c0_42 = arith.constant 0 : index
    %121 = vector.load %arg3[%c0_41, %c0_42] : memref<256x384xbf16, #tpu.memory_space<vmem>>, vector<256x384xbf16>
    %cst_43 = arith.constant dense<0.000000e+00> : vector<64x384xf32>
    %122 = tpu.matmul %120, %121, %cst_43 {dimension_numbers = #tpu.dot_dimension_numbers<[1], [0], [0], [1], [0, 0, 1, 1], [], []>} : vector<64x256xbf16>, vector<256x384xbf16>, vector<64x384xf32> -> vector<64x384xf32>
    %cst_44 = arith.constant dense<0.000000e+00> : vector<384xf32>
    %123 = vector.multi_reduction <add>, %122, %cst_44 [0] : vector<64x384xf32> to vector<384xf32>
    %124 = vector.shape_cast %123 : vector<384xf32> to vector<1x384xf32>
    %125 = vector.extract_strided_slice %124 {offsets = [0, 0], sizes = [1, 48], strides = [1, 1]} : vector<1x384xf32> to vector<1x48xf32>
    %126 = vector.extract_strided_slice %124 {offsets = [0, 48], sizes = [1, 48], strides = [1, 1]} : vector<1x384xf32> to vector<1x48xf32>
    %127 = arith.addf %125, %126 : vector<1x48xf32>
    %128 = vector.extract_strided_slice %124 {offsets = [0, 96], sizes = [1, 48], strides = [1, 1]} : vector<1x384xf32> to vector<1x48xf32>
    %129 = arith.addf %127, %128 : vector<1x48xf32>
    %130 = vector.extract_strided_slice %124 {offsets = [0, 144], sizes = [1, 48], strides = [1, 1]} : vector<1x384xf32> to vector<1x48xf32>
    %131 = arith.addf %129, %130 : vector<1x48xf32>
    %132 = vector.extract_strided_slice %124 {offsets = [0, 192], sizes = [1, 48], strides = [1, 1]} : vector<1x384xf32> to vector<1x48xf32>
    %133 = arith.addf %131, %132 : vector<1x48xf32>
    %134 = vector.extract_strided_slice %124 {offsets = [0, 240], sizes = [1, 48], strides = [1, 1]} : vector<1x384xf32> to vector<1x48xf32>
    %135 = arith.addf %133, %134 : vector<1x48xf32>
    %136 = vector.extract_strided_slice %124 {offsets = [0, 288], sizes = [1, 48], strides = [1, 1]} : vector<1x384xf32> to vector<1x48xf32>
    %137 = arith.addf %135, %136 : vector<1x48xf32>
    %138 = vector.extract_strided_slice %124 {offsets = [0, 336], sizes = [1, 48], strides = [1, 1]} : vector<1x384xf32> to vector<1x48xf32>
    %139 = arith.addf %137, %138 : vector<1x48xf32>
    %cst_45 = arith.constant 1.562500e-02 : f32
    %140 = vector.broadcast %cst_45 : f32 to vector<1x48xf32>
    %141 = arith.mulf %139, %140 : vector<1x48xf32>
    %142 = tpu.concatenate %141, %141, %141, %141, %141, %141, %141, %141 in 1 : vector<1x48xf32>, vector<1x48xf32>, vector<1x48xf32>, vector<1x48xf32>, vector<1x48xf32>, vector<1x48xf32>, vector<1x48xf32>, vector<1x48xf32> -> vector<1x384xf32>
    %143 = vector.broadcast %142 : vector<1x384xf32> to vector<64x384xf32>
    %144 = arith.subf %122, %143 : vector<64x384xf32>
    %145 = arith.mulf %144, %3 : vector<64x384xf32>
    %146 = arith.mulf %145, %145 : vector<64x384xf32>
    %cst_46 = arith.constant dense<0.000000e+00> : vector<384xf32>
    %147 = vector.multi_reduction <add>, %146, %cst_46 [0] : vector<64x384xf32> to vector<384xf32>
    %148 = vector.shape_cast %147 : vector<384xf32> to vector<1x384xf32>
    %149 = vector.extract_strided_slice %148 {offsets = [0, 0], sizes = [1, 48], strides = [1, 1]} : vector<1x384xf32> to vector<1x48xf32>
    %150 = vector.extract_strided_slice %148 {offsets = [0, 48], sizes = [1, 48], strides = [1, 1]} : vector<1x384xf32> to vector<1x48xf32>
    %151 = arith.addf %149, %150 : vector<1x48xf32>
    %152 = vector.extract_strided_slice %148 {offsets = [0, 96], sizes = [1, 48], strides = [1, 1]} : vector<1x384xf32> to vector<1x48xf32>
    %153 = arith.addf %151, %152 : vector<1x48xf32>
    %154 = vector.extract_strided_slice %148 {offsets = [0, 144], sizes = [1, 48], strides = [1, 1]} : vector<1x384xf32> to vector<1x48xf32>
    %155 = arith.addf %153, %154 : vector<1x48xf32>
    %156 = vector.extract_strided_slice %148 {offsets = [0, 192], sizes = [1, 48], strides = [1, 1]} : vector<1x384xf32> to vector<1x48xf32>
    %157 = arith.addf %155, %156 : vector<1x48xf32>
    %158 = vector.extract_strided_slice %148 {offsets = [0, 240], sizes = [1, 48], strides = [1, 1]} : vector<1x384xf32> to vector<1x48xf32>
    %159 = arith.addf %157, %158 : vector<1x48xf32>
    %160 = vector.extract_strided_slice %148 {offsets = [0, 288], sizes = [1, 48], strides = [1, 1]} : vector<1x384xf32> to vector<1x48xf32>
    %161 = arith.addf %159, %160 : vector<1x48xf32>
    %162 = vector.extract_strided_slice %148 {offsets = [0, 336], sizes = [1, 48], strides = [1, 1]} : vector<1x384xf32> to vector<1x48xf32>
    %163 = arith.addf %161, %162 : vector<1x48xf32>
    %cst_47 = arith.constant 1.562500e-02 : f32
    %164 = vector.broadcast %cst_47 : f32 to vector<1x48xf32>
    %165 = arith.mulf %163, %164 : vector<1x48xf32>
    %cst_48 = arith.constant 9.99999974E-6 : f32
    %166 = vector.broadcast %cst_48 : f32 to vector<1x48xf32>
    %167 = arith.addf %165, %166 : vector<1x48xf32>
    %168 = math.rsqrt %167 : vector<1x48xf32>
    %169 = tpu.concatenate %168, %168, %168, %168, %168, %168, %168, %168 in 1 : vector<1x48xf32>, vector<1x48xf32>, vector<1x48xf32>, vector<1x48xf32>, vector<1x48xf32>, vector<1x48xf32>, vector<1x48xf32>, vector<1x48xf32> -> vector<1x384xf32>
    %170 = vector.broadcast %169 : vector<1x384xf32> to vector<64x384xf32>
    %171 = arith.mulf %145, %170 : vector<64x384xf32>
    %cst_49 = arith.constant 0.000000e+00 : f32
    %172 = vector.broadcast %cst_49 : f32 to vector<64x384xf32>
    %173 = arith.maximumf %171, %172 : vector<64x384xf32>
    %174 = arith.truncf %173 : vector<64x384xf32> to vector<64x384xbf16>
    %c0_50 = arith.constant 0 : index
    %c0_51 = arith.constant 0 : index
    %c0_52 = arith.constant 0 : index
    %175 = vector.load %arg6[%c0_50, %c0_51, %c0_52] : memref<1x64x384xbf16, #tpu.memory_space<vmem>>, vector<1x64x384xbf16>
    %176 = vector.shape_cast %175 : vector<1x64x384xbf16> to vector<64x384xbf16>
    %177 = vector.shape_cast %174 : vector<64x384xbf16> to vector<1x64x384xbf16>
    tpu.vector_store %arg6[%c0_50, %c0_51, %c0_52], %177 {strides = array<i32>} : memref<1x64x384xbf16, #tpu.memory_space<vmem>>, vector<1x64x384xbf16>,
    return
  }
  func.func @transform_0(%arg0: i32) -> (i32, i32, i32, i32) {
    %c0_i32 = arith.constant 0 : i32
    %c0_i32_0 = arith.constant 0 : i32
    %c0_i32_1 = arith.constant 0 : i32
    %c0_i32_2 = arith.constant 0 : i32
    return %arg0, %c0_i32, %c0_i32_0, %c0_i32_1 : i32, i32, i32, i32
  }
  func.func @transform_1(%arg0: i32) -> (i32, i32) {
    %c0_i32 = arith.constant 0 : i32
    %c0_i32_0 = arith.constant 0 : i32
    %c0_i32_1 = arith.constant 0 : i32
    return %c0_i32, %c0_i32_0 : i32, i32
  }
  func.func @transform_2(%arg0: i32) -> (i32, i32) {
    %c0_i32 = arith.constant 0 : i32
    %c0_i32_0 = arith.constant 0 : i32
    %c0_i32_1 = arith.constant 0 : i32
    return %c0_i32, %c0_i32_0 : i32, i32
  }
  func.func @transform_3(%arg0: i32) -> (i32, i32) {
    %c0_i32 = arith.constant 0 : i32
    %c0_i32_0 = arith.constant 0 : i32
    %c0_i32_1 = arith.constant 0 : i32
    return %c0_i32, %c0_i32_0 : i32, i32
  }
  func.func @transform_4(%arg0: i32) -> (i32, i32) {
    %c0_i32 = arith.constant 0 : i32
    %c0_i32_0 = arith.constant 0 : i32
    %c0_i32_1 = arith.constant 0 : i32
    return %c0_i32, %c0_i32_0 : i32, i32
  }
  func.func @transform_5(%arg0: i32) -> (i32, i32, i32) {
    %c0_i32 = arith.constant 0 : i32
    %c0_i32_0 = arith.constant 0 : i32
    %c0_i32_1 = arith.constant 0 : i32
    return %arg0, %c0_i32, %c0_i32_0 : i32, i32, i32
  }
}

module attributes {stable_mosaic.version = 11 : i64} {
  func.func @_dsconv_kernel(%arg0: i32, %arg1: memref<1x6x40x384xbf16, #tpu.memory_space<vmem>>, %arg2: memref<9x384xf32, #tpu.memory_space<vmem>>, %arg3: memref<384x512xbf16, #tpu.memory_space<vmem>>, %arg4: memref<32x384xbf16, #tpu.memory_space<vmem>>, %arg5: memref<32x512xbf16, #tpu.memory_space<vmem>>, %arg6: memref<1x32x512xf32, #tpu.memory_space<vmem>>) attributes {dimension_semantics = [#tpu.dimension_semantics<parallel>], iteration_bounds = array<i64: 2>, scalar_prefetch = 0 : i64, scratch_operands = 0 : i64, tpu.core_type = #tpu.core_type<tc>, window_params = [{transform_indices = @transform_0, window_bounds = array<i64: 1, 6, 40, 384>}, {pipeline_mode = #tpu.pipeline_mode<synchronous>, transform_indices = @transform_1, window_bounds = array<i64: 9, 384>}, {pipeline_mode = #tpu.pipeline_mode<synchronous>, transform_indices = @transform_2, window_bounds = array<i64: 384, 512>}, {pipeline_mode = #tpu.pipeline_mode<synchronous>, transform_indices = @transform_3, window_bounds = array<i64: 32, 384>}, {pipeline_mode = #tpu.pipeline_mode<synchronous>, transform_indices = @transform_4, window_bounds = array<i64: 32, 512>}, {transform_indices = @transform_5, window_bounds = array<i64: 1, 32, 512>}]} {
    %c0 = arith.constant 0 : index
    %c0_0 = arith.constant 0 : index
    %0 = vector.load %arg4[%c0, %c0_0] : memref<32x384xbf16, #tpu.memory_space<vmem>>, vector<32x384xbf16>
    %1 = arith.extf %0 : vector<32x384xbf16> to vector<32x384xf32>
    %c0_1 = arith.constant 0 : index
    %c0_2 = arith.constant 0 : index
    %2 = vector.load %arg5[%c0_1, %c0_2] : memref<32x512xbf16, #tpu.memory_space<vmem>>, vector<32x512xbf16>
    %3 = arith.extf %2 : vector<32x512xbf16> to vector<32x512xf32>
    %c0_3 = arith.constant 0 : index
    %c0_4 = arith.constant 0 : index
    %4 = vector.load %arg2[%c0_3, %c0_4] : memref<9x384xf32, #tpu.memory_space<vmem>>, vector<9x384xf32>
    %cst = arith.constant 0.000000e+00 : f32
    %5 = vector.broadcast %cst : f32 to vector<32x384xf32>
    %c0_5 = arith.constant 0 : index
    %c0_6 = arith.constant 0 : index
    %c0_7 = arith.constant 0 : index
    %c0_8 = arith.constant 0 : index
    %6 = vector.load %arg1[%c0_5, %c0_6, %c0_7, %c0_8] : memref<1x6x40x384xbf16, #tpu.memory_space<vmem>>, vector<1x1x32x384xbf16>
    %7 = vector.shape_cast %6 : vector<1x1x32x384xbf16> to vector<32x384xbf16>
    %8 = arith.extf %7 : vector<32x384xbf16> to vector<32x384xf32>
    %9 = vector.extract_strided_slice %4 {offsets = [0, 0], sizes = [1, 384], strides = [1, 1]} : vector<9x384xf32> to vector<1x384xf32>
    %10 = vector.broadcast %9 : vector<1x384xf32> to vector<32x384xf32>
    %11 = arith.mulf %8, %10 : vector<32x384xf32>
    %12 = arith.addf %5, %11 : vector<32x384xf32>
    %c0_9 = arith.constant 0 : index
    %c1 = arith.constant 1 : index
    %c0_10 = arith.constant 0 : index
    %c0_11 = arith.constant 0 : index
    %13 = vector.load %arg1[%c0_9, %c1, %c0_10, %c0_11] : memref<1x6x40x384xbf16, #tpu.memory_space<vmem>>, vector<1x1x32x384xbf16>
    %14 = vector.shape_cast %13 : vector<1x1x32x384xbf16> to vector<32x384xbf16>
    %15 = arith.extf %14 : vector<32x384xbf16> to vector<32x384xf32>
    %16 = vector.extract_strided_slice %4 {offsets = [1, 0], sizes = [1, 384], strides = [1, 1]} : vector<9x384xf32> to vector<1x384xf32>
    %17 = vector.broadcast %16 : vector<1x384xf32> to vector<32x384xf32>
    %18 = arith.mulf %15, %17 : vector<32x384xf32>
    %19 = arith.addf %12, %18 : vector<32x384xf32>
    %c0_12 = arith.constant 0 : index
    %c2 = arith.constant 2 : index
    %c0_13 = arith.constant 0 : index
    %c0_14 = arith.constant 0 : index
    %20 = vector.load %arg1[%c0_12, %c2, %c0_13, %c0_14] : memref<1x6x40x384xbf16, #tpu.memory_space<vmem>>, vector<1x1x32x384xbf16>
    %21 = vector.shape_cast %20 : vector<1x1x32x384xbf16> to vector<32x384xbf16>
    %22 = arith.extf %21 : vector<32x384xbf16> to vector<32x384xf32>
    %23 = vector.extract_strided_slice %4 {offsets = [2, 0], sizes = [1, 384], strides = [1, 1]} : vector<9x384xf32> to vector<1x384xf32>
    %24 = vector.broadcast %23 : vector<1x384xf32> to vector<32x384xf32>
    %25 = arith.mulf %22, %24 : vector<32x384xf32>
    %26 = arith.addf %19, %25 : vector<32x384xf32>
    %c0_15 = arith.constant 0 : index
    %c3 = arith.constant 3 : index
    %c0_16 = arith.constant 0 : index
    %c0_17 = arith.constant 0 : index
    %27 = vector.load %arg1[%c0_15, %c3, %c0_16, %c0_17] : memref<1x6x40x384xbf16, #tpu.memory_space<vmem>>, vector<1x1x32x384xbf16>
    %28 = vector.shape_cast %27 : vector<1x1x32x384xbf16> to vector<32x384xbf16>
    %29 = arith.extf %28 : vector<32x384xbf16> to vector<32x384xf32>
    %30 = vector.extract_strided_slice %4 {offsets = [3, 0], sizes = [1, 384], strides = [1, 1]} : vector<9x384xf32> to vector<1x384xf32>
    %31 = vector.broadcast %30 : vector<1x384xf32> to vector<32x384xf32>
    %32 = arith.mulf %29, %31 : vector<32x384xf32>
    %33 = arith.addf %26, %32 : vector<32x384xf32>
    %c0_18 = arith.constant 0 : index
    %c4 = arith.constant 4 : index
    %c0_19 = arith.constant 0 : index
    %c0_20 = arith.constant 0 : index
    %34 = vector.load %arg1[%c0_18, %c4, %c0_19, %c0_20] : memref<1x6x40x384xbf16, #tpu.memory_space<vmem>>, vector<1x1x32x384xbf16>
    %35 = vector.shape_cast %34 : vector<1x1x32x384xbf16> to vector<32x384xbf16>
    %36 = arith.extf %35 : vector<32x384xbf16> to vector<32x384xf32>
    %37 = vector.extract_strided_slice %4 {offsets = [4, 0], sizes = [1, 384], strides = [1, 1]} : vector<9x384xf32> to vector<1x384xf32>
    %38 = vector.broadcast %37 : vector<1x384xf32> to vector<32x384xf32>
    %39 = arith.mulf %36, %38 : vector<32x384xf32>
    %40 = arith.addf %33, %39 : vector<32x384xf32>
    %c0_21 = arith.constant 0 : index
    %c5 = arith.constant 5 : index
    %c0_22 = arith.constant 0 : index
    %c0_23 = arith.constant 0 : index
    %41 = vector.load %arg1[%c0_21, %c5, %c0_22, %c0_23] : memref<1x6x40x384xbf16, #tpu.memory_space<vmem>>, vector<1x1x32x384xbf16>
    %42 = vector.shape_cast %41 : vector<1x1x32x384xbf16> to vector<32x384xbf16>
    %43 = arith.extf %42 : vector<32x384xbf16> to vector<32x384xf32>
    %44 = vector.extract_strided_slice %4 {offsets = [5, 0], sizes = [1, 384], strides = [1, 1]} : vector<9x384xf32> to vector<1x384xf32>
    %45 = vector.broadcast %44 : vector<1x384xf32> to vector<32x384xf32>
    %46 = arith.mulf %43, %45 : vector<32x384xf32>
    %47 = arith.addf %40, %46 : vector<32x384xf32>
    %c0_24 = arith.constant 0 : index
    %c0_25 = arith.constant 0 : index
    %c8 = arith.constant 8 : index
    %c0_26 = arith.constant 0 : index
    %48 = vector.load %arg1[%c0_24, %c0_25, %c8, %c0_26] : memref<1x6x40x384xbf16, #tpu.memory_space<vmem>>, vector<1x1x32x384xbf16>
    %49 = vector.shape_cast %48 : vector<1x1x32x384xbf16> to vector<32x384xbf16>
    %50 = arith.extf %49 : vector<32x384xbf16> to vector<32x384xf32>
    %51 = vector.extract_strided_slice %4 {offsets = [6, 0], sizes = [1, 384], strides = [1, 1]} : vector<9x384xf32> to vector<1x384xf32>
    %52 = vector.broadcast %51 : vector<1x384xf32> to vector<32x384xf32>
    %53 = arith.mulf %50, %52 : vector<32x384xf32>
    %54 = arith.addf %47, %53 : vector<32x384xf32>
    %c0_27 = arith.constant 0 : index
    %c1_28 = arith.constant 1 : index
    %c8_29 = arith.constant 8 : index
    %c0_30 = arith.constant 0 : index
    %55 = vector.load %arg1[%c0_27, %c1_28, %c8_29, %c0_30] : memref<1x6x40x384xbf16, #tpu.memory_space<vmem>>, vector<1x1x32x384xbf16>
    %56 = vector.shape_cast %55 : vector<1x1x32x384xbf16> to vector<32x384xbf16>
    %57 = arith.extf %56 : vector<32x384xbf16> to vector<32x384xf32>
    %58 = vector.extract_strided_slice %4 {offsets = [7, 0], sizes = [1, 384], strides = [1, 1]} : vector<9x384xf32> to vector<1x384xf32>
    %59 = vector.broadcast %58 : vector<1x384xf32> to vector<32x384xf32>
    %60 = arith.mulf %57, %59 : vector<32x384xf32>
    %61 = arith.addf %54, %60 : vector<32x384xf32>
    %c0_31 = arith.constant 0 : index
    %c2_32 = arith.constant 2 : index
    %c8_33 = arith.constant 8 : index
    %c0_34 = arith.constant 0 : index
    %62 = vector.load %arg1[%c0_31, %c2_32, %c8_33, %c0_34] : memref<1x6x40x384xbf16, #tpu.memory_space<vmem>>, vector<1x1x32x384xbf16>
    %63 = vector.shape_cast %62 : vector<1x1x32x384xbf16> to vector<32x384xbf16>
    %64 = arith.extf %63 : vector<32x384xbf16> to vector<32x384xf32>
    %65 = vector.extract_strided_slice %4 {offsets = [8, 0], sizes = [1, 384], strides = [1, 1]} : vector<9x384xf32> to vector<1x384xf32>
    %66 = vector.broadcast %65 : vector<1x384xf32> to vector<32x384xf32>
    %67 = arith.mulf %64, %66 : vector<32x384xf32>
    %68 = arith.addf %61, %67 : vector<32x384xf32>
    %cst_35 = arith.constant dense<0.000000e+00> : vector<384xf32>
    %69 = vector.multi_reduction <add>, %68, %cst_35 [0] : vector<32x384xf32> to vector<384xf32>
    %70 = vector.shape_cast %69 : vector<384xf32> to vector<1x384xf32>
    %71 = vector.extract_strided_slice %70 {offsets = [0, 0], sizes = [1, 48], strides = [1, 1]} : vector<1x384xf32> to vector<1x48xf32>
    %72 = vector.extract_strided_slice %70 {offsets = [0, 48], sizes = [1, 48], strides = [1, 1]} : vector<1x384xf32> to vector<1x48xf32>
    %73 = arith.addf %71, %72 : vector<1x48xf32>
    %74 = vector.extract_strided_slice %70 {offsets = [0, 96], sizes = [1, 48], strides = [1, 1]} : vector<1x384xf32> to vector<1x48xf32>
    %75 = arith.addf %73, %74 : vector<1x48xf32>
    %76 = vector.extract_strided_slice %70 {offsets = [0, 144], sizes = [1, 48], strides = [1, 1]} : vector<1x384xf32> to vector<1x48xf32>
    %77 = arith.addf %75, %76 : vector<1x48xf32>
    %78 = vector.extract_strided_slice %70 {offsets = [0, 192], sizes = [1, 48], strides = [1, 1]} : vector<1x384xf32> to vector<1x48xf32>
    %79 = arith.addf %77, %78 : vector<1x48xf32>
    %80 = vector.extract_strided_slice %70 {offsets = [0, 240], sizes = [1, 48], strides = [1, 1]} : vector<1x384xf32> to vector<1x48xf32>
    %81 = arith.addf %79, %80 : vector<1x48xf32>
    %82 = vector.extract_strided_slice %70 {offsets = [0, 288], sizes = [1, 48], strides = [1, 1]} : vector<1x384xf32> to vector<1x48xf32>
    %83 = arith.addf %81, %82 : vector<1x48xf32>
    %84 = vector.extract_strided_slice %70 {offsets = [0, 336], sizes = [1, 48], strides = [1, 1]} : vector<1x384xf32> to vector<1x48xf32>
    %85 = arith.addf %83, %84 : vector<1x48xf32>
    %cst_36 = arith.constant 6.250000e-02 : f32
    %86 = vector.broadcast %cst_36 : f32 to vector<1x48xf32>
    %87 = arith.mulf %85, %86 : vector<1x48xf32>
    %88 = tpu.concatenate %87, %87, %87, %87, %87, %87, %87, %87 in 1 : vector<1x48xf32>, vector<1x48xf32>, vector<1x48xf32>, vector<1x48xf32>, vector<1x48xf32>, vector<1x48xf32>, vector<1x48xf32>, vector<1x48xf32> -> vector<1x384xf32>
    %89 = vector.broadcast %88 : vector<1x384xf32> to vector<32x384xf32>
    %90 = arith.subf %68, %89 : vector<32x384xf32>
    %91 = arith.mulf %90, %1 : vector<32x384xf32>
    %92 = arith.mulf %91, %91 : vector<32x384xf32>
    %cst_37 = arith.constant dense<0.000000e+00> : vector<384xf32>
    %93 = vector.multi_reduction <add>, %92, %cst_37 [0] : vector<32x384xf32> to vector<384xf32>
    %94 = vector.shape_cast %93 : vector<384xf32> to vector<1x384xf32>
    %95 = vector.extract_strided_slice %94 {offsets = [0, 0], sizes = [1, 48], strides = [1, 1]} : vector<1x384xf32> to vector<1x48xf32>
    %96 = vector.extract_strided_slice %94 {offsets = [0, 48], sizes = [1, 48], strides = [1, 1]} : vector<1x384xf32> to vector<1x48xf32>
    %97 = arith.addf %95, %96 : vector<1x48xf32>
    %98 = vector.extract_strided_slice %94 {offsets = [0, 96], sizes = [1, 48], strides = [1, 1]} : vector<1x384xf32> to vector<1x48xf32>
    %99 = arith.addf %97, %98 : vector<1x48xf32>
    %100 = vector.extract_strided_slice %94 {offsets = [0, 144], sizes = [1, 48], strides = [1, 1]} : vector<1x384xf32> to vector<1x48xf32>
    %101 = arith.addf %99, %100 : vector<1x48xf32>
    %102 = vector.extract_strided_slice %94 {offsets = [0, 192], sizes = [1, 48], strides = [1, 1]} : vector<1x384xf32> to vector<1x48xf32>
    %103 = arith.addf %101, %102 : vector<1x48xf32>
    %104 = vector.extract_strided_slice %94 {offsets = [0, 240], sizes = [1, 48], strides = [1, 1]} : vector<1x384xf32> to vector<1x48xf32>
    %105 = arith.addf %103, %104 : vector<1x48xf32>
    %106 = vector.extract_strided_slice %94 {offsets = [0, 288], sizes = [1, 48], strides = [1, 1]} : vector<1x384xf32> to vector<1x48xf32>
    %107 = arith.addf %105, %106 : vector<1x48xf32>
    %108 = vector.extract_strided_slice %94 {offsets = [0, 336], sizes = [1, 48], strides = [1, 1]} : vector<1x384xf32> to vector<1x48xf32>
    %109 = arith.addf %107, %108 : vector<1x48xf32>
    %cst_38 = arith.constant 6.250000e-02 : f32
    %110 = vector.broadcast %cst_38 : f32 to vector<1x48xf32>
    %111 = arith.mulf %109, %110 : vector<1x48xf32>
    %cst_39 = arith.constant 9.99999974E-6 : f32
    %112 = vector.broadcast %cst_39 : f32 to vector<1x48xf32>
    %113 = arith.addf %111, %112 : vector<1x48xf32>
    %114 = math.rsqrt %113 : vector<1x48xf32>
    %115 = tpu.concatenate %114, %114, %114, %114, %114, %114, %114, %114 in 1 : vector<1x48xf32>, vector<1x48xf32>, vector<1x48xf32>, vector<1x48xf32>, vector<1x48xf32>, vector<1x48xf32>, vector<1x48xf32>, vector<1x48xf32> -> vector<1x384xf32>
    %116 = vector.broadcast %115 : vector<1x384xf32> to vector<32x384xf32>
    %117 = arith.mulf %91, %116 : vector<32x384xf32>
    %cst_40 = arith.constant 0.000000e+00 : f32
    %118 = vector.broadcast %cst_40 : f32 to vector<32x384xf32>
    %119 = arith.maximumf %117, %118 : vector<32x384xf32>
    %120 = arith.truncf %119 : vector<32x384xf32> to vector<32x384xbf16>
    %c0_41 = arith.constant 0 : index
    %c0_42 = arith.constant 0 : index
    %121 = vector.load %arg3[%c0_41, %c0_42] : memref<384x512xbf16, #tpu.memory_space<vmem>>, vector<384x512xbf16>
    %cst_43 = arith.constant dense<0.000000e+00> : vector<32x512xf32>
    %122 = tpu.matmul %120, %121, %cst_43 {dimension_numbers = #tpu.dot_dimension_numbers<[1], [0], [0], [1], [0, 0, 1, 1], [], []>} : vector<32x384xbf16>, vector<384x512xbf16>, vector<32x512xf32> -> vector<32x512xf32>
    %cst_44 = arith.constant dense<0.000000e+00> : vector<512xf32>
    %123 = vector.multi_reduction <add>, %122, %cst_44 [0] : vector<32x512xf32> to vector<512xf32>
    %124 = vector.shape_cast %123 : vector<512xf32> to vector<1x512xf32>
    %125 = vector.extract_strided_slice %124 {offsets = [0, 0], sizes = [1, 64], strides = [1, 1]} : vector<1x512xf32> to vector<1x64xf32>
    %126 = vector.extract_strided_slice %124 {offsets = [0, 64], sizes = [1, 64], strides = [1, 1]} : vector<1x512xf32> to vector<1x64xf32>
    %127 = arith.addf %125, %126 : vector<1x64xf32>
    %128 = vector.extract_strided_slice %124 {offsets = [0, 128], sizes = [1, 64], strides = [1, 1]} : vector<1x512xf32> to vector<1x64xf32>
    %129 = arith.addf %127, %128 : vector<1x64xf32>
    %130 = vector.extract_strided_slice %124 {offsets = [0, 192], sizes = [1, 64], strides = [1, 1]} : vector<1x512xf32> to vector<1x64xf32>
    %131 = arith.addf %129, %130 : vector<1x64xf32>
    %132 = vector.extract_strided_slice %124 {offsets = [0, 256], sizes = [1, 64], strides = [1, 1]} : vector<1x512xf32> to vector<1x64xf32>
    %133 = arith.addf %131, %132 : vector<1x64xf32>
    %134 = vector.extract_strided_slice %124 {offsets = [0, 320], sizes = [1, 64], strides = [1, 1]} : vector<1x512xf32> to vector<1x64xf32>
    %135 = arith.addf %133, %134 : vector<1x64xf32>
    %136 = vector.extract_strided_slice %124 {offsets = [0, 384], sizes = [1, 64], strides = [1, 1]} : vector<1x512xf32> to vector<1x64xf32>
    %137 = arith.addf %135, %136 : vector<1x64xf32>
    %138 = vector.extract_strided_slice %124 {offsets = [0, 448], sizes = [1, 64], strides = [1, 1]} : vector<1x512xf32> to vector<1x64xf32>
    %139 = arith.addf %137, %138 : vector<1x64xf32>
    %cst_45 = arith.constant 6.250000e-02 : f32
    %140 = vector.broadcast %cst_45 : f32 to vector<1x64xf32>
    %141 = arith.mulf %139, %140 : vector<1x64xf32>
    %142 = tpu.concatenate %141, %141, %141, %141, %141, %141, %141, %141 in 1 : vector<1x64xf32>, vector<1x64xf32>, vector<1x64xf32>, vector<1x64xf32>, vector<1x64xf32>, vector<1x64xf32>, vector<1x64xf32>, vector<1x64xf32> -> vector<1x512xf32>
    %143 = vector.broadcast %142 : vector<1x512xf32> to vector<32x512xf32>
    %144 = arith.subf %122, %143 : vector<32x512xf32>
    %145 = arith.mulf %144, %3 : vector<32x512xf32>
    %146 = arith.mulf %145, %145 : vector<32x512xf32>
    %cst_46 = arith.constant dense<0.000000e+00> : vector<512xf32>
    %147 = vector.multi_reduction <add>, %146, %cst_46 [0] : vector<32x512xf32> to vector<512xf32>
    %148 = vector.shape_cast %147 : vector<512xf32> to vector<1x512xf32>
    %149 = vector.extract_strided_slice %148 {offsets = [0, 0], sizes = [1, 64], strides = [1, 1]} : vector<1x512xf32> to vector<1x64xf32>
    %150 = vector.extract_strided_slice %148 {offsets = [0, 64], sizes = [1, 64], strides = [1, 1]} : vector<1x512xf32> to vector<1x64xf32>
    %151 = arith.addf %149, %150 : vector<1x64xf32>
    %152 = vector.extract_strided_slice %148 {offsets = [0, 128], sizes = [1, 64], strides = [1, 1]} : vector<1x512xf32> to vector<1x64xf32>
    %153 = arith.addf %151, %152 : vector<1x64xf32>
    %154 = vector.extract_strided_slice %148 {offsets = [0, 192], sizes = [1, 64], strides = [1, 1]} : vector<1x512xf32> to vector<1x64xf32>
    %155 = arith.addf %153, %154 : vector<1x64xf32>
    %156 = vector.extract_strided_slice %148 {offsets = [0, 256], sizes = [1, 64], strides = [1, 1]} : vector<1x512xf32> to vector<1x64xf32>
    %157 = arith.addf %155, %156 : vector<1x64xf32>
    %158 = vector.extract_strided_slice %148 {offsets = [0, 320], sizes = [1, 64], strides = [1, 1]} : vector<1x512xf32> to vector<1x64xf32>
    %159 = arith.addf %157, %158 : vector<1x64xf32>
    %160 = vector.extract_strided_slice %148 {offsets = [0, 384], sizes = [1, 64], strides = [1, 1]} : vector<1x512xf32> to vector<1x64xf32>
    %161 = arith.addf %159, %160 : vector<1x64xf32>
    %162 = vector.extract_strided_slice %148 {offsets = [0, 448], sizes = [1, 64], strides = [1, 1]} : vector<1x512xf32> to vector<1x64xf32>
    %163 = arith.addf %161, %162 : vector<1x64xf32>
    %cst_47 = arith.constant 6.250000e-02 : f32
    %164 = vector.broadcast %cst_47 : f32 to vector<1x64xf32>
    %165 = arith.mulf %163, %164 : vector<1x64xf32>
    %cst_48 = arith.constant 9.99999974E-6 : f32
    %166 = vector.broadcast %cst_48 : f32 to vector<1x64xf32>
    %167 = arith.addf %165, %166 : vector<1x64xf32>
    %168 = math.rsqrt %167 : vector<1x64xf32>
    %169 = tpu.concatenate %168, %168, %168, %168, %168, %168, %168, %168 in 1 : vector<1x64xf32>, vector<1x64xf32>, vector<1x64xf32>, vector<1x64xf32>, vector<1x64xf32>, vector<1x64xf32>, vector<1x64xf32>, vector<1x64xf32> -> vector<1x512xf32>
    %170 = vector.broadcast %169 : vector<1x512xf32> to vector<32x512xf32>
    %171 = arith.mulf %145, %170 : vector<32x512xf32>
    %cst_49 = arith.constant 0.000000e+00 : f32
    %172 = vector.broadcast %cst_49 : f32 to vector<32x512xf32>
    %173 = arith.maximumf %171, %172 : vector<32x512xf32>
    %c0_50 = arith.constant 0 : index
    %c0_51 = arith.constant 0 : index
    %c0_52 = arith.constant 0 : index
    %174 = vector.load %arg6[%c0_50, %c0_51, %c0_52] : memref<1x32x512xf32, #tpu.memory_space<vmem>>, vector<1x32x512xf32>
    %175 = vector.shape_cast %174 : vector<1x32x512xf32> to vector<32x512xf32>
    %176 = vector.shape_cast %173 : vector<32x512xf32> to vector<1x32x512xf32>
    tpu.vector_store %arg6[%c0_50, %c0_51, %c0_52], %176 {strides = array<i32>} : memref<1x32x512xf32, #tpu.memory_space<vmem>>, vector<1x32x512xf32>,
    return
  }
  func.func @transform_0(%arg0: i32) -> (i32, i32, i32, i32) {
    %c0_i32 = arith.constant 0 : i32
    %c0_i32_0 = arith.constant 0 : i32
    %c0_i32_1 = arith.constant 0 : i32
    %c0_i32_2 = arith.constant 0 : i32
    return %arg0, %c0_i32, %c0_i32_0, %c0_i32_1 : i32, i32, i32, i32
  }
  func.func @transform_1(%arg0: i32) -> (i32, i32) {
    %c0_i32 = arith.constant 0 : i32
    %c0_i32_0 = arith.constant 0 : i32
    %c0_i32_1 = arith.constant 0 : i32
    return %c0_i32, %c0_i32_0 : i32, i32
  }
  func.func @transform_2(%arg0: i32) -> (i32, i32) {
    %c0_i32 = arith.constant 0 : i32
    %c0_i32_0 = arith.constant 0 : i32
    %c0_i32_1 = arith.constant 0 : i32
    return %c0_i32, %c0_i32_0 : i32, i32
  }
  func.func @transform_3(%arg0: i32) -> (i32, i32) {
    %c0_i32 = arith.constant 0 : i32
    %c0_i32_0 = arith.constant 0 : i32
    %c0_i32_1 = arith.constant 0 : i32
    return %c0_i32, %c0_i32_0 : i32, i32
  }
  func.func @transform_4(%arg0: i32) -> (i32, i32) {
    %c0_i32 = arith.constant 0 : i32
    %c0_i32_0 = arith.constant 0 : i32
    %c0_i32_1 = arith.constant 0 : i32
    return %c0_i32, %c0_i32_0 : i32, i32
  }
  func.func @transform_5(%arg0: i32) -> (i32, i32, i32) {
    %c0_i32 = arith.constant 0 : i32
    %c0_i32_0 = arith.constant 0 : i32
    %c0_i32_1 = arith.constant 0 : i32
    return %arg0, %c0_i32, %c0_i32_0 : i32, i32, i32
  }
}

</mosaic_0001>

<bundles_post_ra>
// kernel: mul.4
= control target key start
LH: loop header
LB: loop body
LE: loop exit
PB: predicated region body
PF: predicated region fallthrough
CT: control target
= control target key end

     0   :  { %vm46_vm0 = vcmask 261120   ;;  %s184_s0 = inlined_call_operand.vmem [shape: f32[3,3,3,32], index: 0, kind: input, shape index: {}]   ;;  %s185_s1 = inlined_call_operand.vmem [shape: f32[27,32], index: 1, kind: output, shape index: {}]  }
   0x1   :  { %v95_v0 = vld [vmem:[%s184_s0 + $0x20] sm:$0xf]  ;;  %v96_v1 = vld [vmem:[%s184_s0 + $0x1c] sm:$0xf]  ;;  %v97_v2 = vld [vmem:[%s184_s0 + $0x18] sm:$0xf] }
   0x2   :  { %8 = vst [vmem:[#allocation0 + $0x40] sm:$0xf] %v95_v0  ;;  %13 = vst [vmem:[#allocation0 + $0x38] sm:$0xf] %v96_v1  ;;  %v98_v3 = vld [vmem:[%s184_s0 + $0x14] sm:$0xf] }
   0x3   :  { %18 = vst [vmem:[#allocation0 + $0x30] sm:$0xf] %v97_v2  ;;  %v99_v4 = vld [vmem:[%s184_s0 + $0x10] sm:$0xf]  ;;  %v100_v5 = vld [vmem:[%s184_s0 + $0xc] sm:$0xf] }
   0x4   :  { %23 = vst [vmem:[#allocation0 + $0x28] sm:$0xf] %v98_v3  ;;  %28 = vst [vmem:[#allocation0 + $0x20] sm:$0xf] %v99_v4  ;;  %v101_v6 = vld [vmem:[%s184_s0 + $0x8] sm:$0xf] }
   0x5   :  { %33 = vst [vmem:[#allocation0 + $0x18] sm:$0xf] %v100_v5  ;;  %v102_v7 = vld [vmem:[%s184_s0 + $0x4] sm:$0xf]  ;;  %v43_v8 = vld [vmem:[%s184_s0] sm:$0xf] }
   0x6   :  { %38 = vst [vmem:[#allocation0 + $0x10] sm:$0xf] %v101_v6  ;;  %42 = vst [vmem:[#allocation0 + $0x8] sm:$0xf] %v102_v7 }
   0x7   :  { %44 = vst [vmem:[#allocation0] sm:$0xf] %v43_v8 }
   0x9   :  { %v79_v10 = vld [vmem:[#allocation0 + $0x38] sm:$0x7]   ;;  %v84_v11 = vld [vmem:[#allocation0 + $0x40] sm:$0x7]  }
   0xa   :  { %v74_v9 = vld [vmem:[#allocation0 + $0x30] sm:$0x7]   ;;  %109 = vst.msk [vmem:[%s185_s1 + $0x15] sm:$0x7] %vm46_vm0, %v79_v10   ;;  %110 = vst.msk [vmem:[%s185_s1 + $0x18] sm:$0x7] %vm46_vm0, %v84_v11  }
   0xb   :  { %v64_v13 = vld [vmem:[#allocation0 + $0x20] sm:$0x7]   ;;  %v69_v14 = vld [vmem:[#allocation0 + $0x28] sm:$0x7]   ;;  %108 = vst.msk [vmem:[%s185_s1 + $0x12] sm:$0x7] %vm46_vm0, %v74_v9  }
   0xc   :  { %v59_v12 = vld [vmem:[#allocation0 + $0x18] sm:$0x7]   ;;  %106 = vst.msk [vmem:[%s185_s1 + $0xc] sm:$0x7] %vm46_vm0, %v64_v13   ;;  %107 = vst.msk [vmem:[%s185_s1 + $0xf] sm:$0x7] %vm46_vm0, %v69_v14  }
   0xd   :  { %v49_v16 = vld [vmem:[#allocation0 + $0x8] sm:$0x7]   ;;  %v54_v17 = vld [vmem:[#allocation0 + $0x10] sm:$0x7]   ;;  %105 = vst.msk [vmem:[%s185_s1 + $0x9] sm:$0x7] %vm46_vm0, %v59_v12  }
   0xe   :  { %v45_v15 = vld [vmem:[#allocation0] sm:$0x7]   ;;  %103 = vst.msk [vmem:[%s185_s1 + $0x3] sm:$0x7] %vm46_vm0, %v49_v16   ;;  %104 = vst.msk [vmem:[%s185_s1 + $0x6] sm:$0x7] %vm46_vm0, %v54_v17  }
   0xf   :  { %47 = vst.msk [vmem:[%s185_s1] sm:$0x7] %vm46_vm0, %v45_v15  }

// kernel: learning_to_downsample.3
= control target key start
LH: loop header
LB: loop body
LE: loop exit
PB: predicated region body
PF: predicated region fallthrough
CT: control target
= control target key end

     0   :  { %8 = vsyncpa [#allocation3], 0  ;;  %s1405_s0 = inlined_call_operand.hbm [shape: bf16[2,60,108], index: 0, kind: input, shape index: {}]   ;;  %s1406_s1 = inlined_call_operand.hbm [shape: bf16[108,128], index: 1, kind: input, shape index: {}]   ;;  %s1407_s2 = inlined_call_operand.hbm [shape: bf16[60,128], index: 2, kind: input, shape index: {}]   ;;  %s1408_s3 = inlined_call_operand.hbm [shape: bf16[2,60,128], index: 3, kind: output, shape index: {}]  }
   0x1   :  { %10 = vsyncpa [#allocation3 + $0x1], 0 }
   0x2   :  { %11 = vsyncpa [#allocation6], 0 }
   0x3   :  { %12 = vsyncpa [#allocation4], 0 }
   0x4   :  { %14 = vsyncpa [#allocation4 + $0x1], 0  ;;  %s1087_s12 = smov 0   ;;  %s1089_s13 = smov 0  }
   0x5   :  { %s1091_s14 = smov 0   ;;  %s1093_s15 = smov 0  }
   0x6 LB: > { %s1108_s16 = sadd.s32 4294967295, %s1055_s15   ;;  %s682_s17 = sadd.s32 4294967294, %s1055_s15   ;;  %s1055_s15 = sphi %s1093_s15, %s1428_s15   ;;  %s1051_s14 = sphi %s1091_s14, %s1427_s14   ;;  %s1047_s13 = sphi %s1089_s13, %s1426_s13   ;;  %s1043_s12 = sphi %s1087_s12, %s1425_s12  }
   0x7   : > { %p40_p0 = scmp.ne.s32.totalorder %s1047_s13, %s1043_s12  ;;  %p1409_p1 = scmp.eq.s32.totalorder %s1108_s16, 0 }
   0x8   : > { %p112_p3 = scmp.eq.s32.totalorder %s682_s17, 1  ;;  %p683_p5 = scmp.ge.s32.totalorder %s1055_s15, 1 }
   0x9   : > { %p1117_p4 = por %p1409_p1, %p40_p0  ;;  %p119_p7 = scmp.lt.s32.totalorder %s1055_s15, 3 }
   0xa   : > { %p1122_p6 = por %p112_p3, %p40_p0  ;;  %s1057_s21 = smov [#allocation5]  }
   0xb   : > { %s1412_s18 = scalar_select %p1117_p4, 1, 0 }
   0xc   : > { %s1413_s19 = scalar_select %p1122_p6, 1, 0 }
   0xd   : > { %p1127_p8 = pnand %p683_p5, %p119_p7  ;;  %s131_s22 = sshll.u32 %s1057_s21, 4  ;;  %s1131_s22 = int_to_ptr.vmem [resolvable:$true] %s131_s22 }
   0xe   : > { %s1058_s24 = smov [#allocation7]   ;;  %s899_s28 = scalar_lea.hbm %s1406_s1, 896 }
   0xf   : > { %p825_p9 = pneg %p1127_p8  ;;  %s144_s25 = sshll.u32 %s1058_s24, 4  ;;  %s1142_s25 = int_to_ptr.vmem [resolvable:$true] %s144_s25 }
  0x10   : > { %p900_p12 = scmp.ne.s32.totalorder %s1406_s1, %s899_s28  ;;  %p906_p5 = scmp.lt.u32.totalorder %s899_s28, %s1406_s1 }
  0x11   : > { %p1138_p11 = pnand %p825_p9, %p1409_p1 }
  0x13   : > { %p901_p13 = pneg %p1138_p11 }
  0x15   : > { %p902_p0 = pnand %p901_p13, %p900_p12 }
  0x17   : > { %p903_p3 = pneg %p902_p0 }
  0x19   : > { %p908_p7 = pnand %p906_p5, %p903_p3 }
  0x1b   : > { %911 = shalt.err (!%p908_p7)
}
  0x1c   : > { %s912_s6 = scalar_lea.vmem %s1131_s22, 896  ;;  %p920_p2 = scmp.lt.s32.totalorder %s1131_s22, %s1131_s22 }
  0x1d   : > { %p913_p9 = scmp.ne.s32.totalorder %s1131_s22, %s912_s6  ;;  %p921_p12 = scmp.lt.s32.totalorder %s912_s6, %s912_s6 }
  0x1f   : > { %p915_p10 = pnand %p913_p9, %p901_p13  ;;  %p922_p0 = por %p921_p12, %p920_p2 }
  0x21   : > { %p916_p1 = pneg %p915_p10 }
  0x23   : > { %p923_p6 = pnand %p922_p0, %p916_p1 }
  0x25   : > { %926 = shalt.err (!%p923_p6)
}
  0x26   : > { %s1059_s7 = smov 64   ;;  %s1060_s8 = smov 4  }
  0x27   : > { %828 = dma.hbm_to_vmem [thread:$0]  (!%p1138_p11), %s1406_s1, 896, %s1131_s22, [#allocation6], %s1059_s7, %s1059_s7, %s1060_s8  }
  0x28   : > { %s927_s21 = scalar_lea.hbm %s1407_s2, 512 }
  0x29   : > { %p928_p1 = scmp.ne.s32.totalorder %s1407_s2, %s927_s21  ;;  %p934_p10 = scmp.lt.u32.totalorder %s927_s21, %s1407_s2 }
  0x2b   : > { %p930_p2 = pnand %p928_p1, %p901_p13 }
  0x2d   : > { %p931_p6 = pneg %p930_p2 }
  0x2f   : > { %p936_p3 = pnand %p934_p10, %p931_p6 }
  0x31   : > { %939 = shalt.err (!%p936_p3)
}
  0x32   : > { %s940_s22 = scalar_lea.vmem %s1142_s25, 512  ;;  %p948_p12 = scmp.lt.s32.totalorder %s1142_s25, %s1142_s25 }
  0x33   : > { %p941_p5 = scmp.ne.s32.totalorder %s1142_s25, %s940_s22  ;;  %p949_p0 = scmp.lt.s32.totalorder %s940_s22, %s940_s22 }
  0x35   : > { %p943_p7 = pnand %p941_p5, %p901_p13  ;;  %p950_p1 = por %p949_p0, %p948_p12 }
  0x37   : > { %p944_p9 = pneg %p943_p7 }
  0x39   : > { %p951_p2 = pnand %p950_p1, %p944_p9 }
  0x3b   : > { %954 = shalt.err (!%p951_p2)
}
  0x3c   : > { %831 = dma.hbm_to_vmem [thread:$0]  (!%p1138_p11), %s1407_s2, 512, %s1142_s25, [#allocation6], %s1059_s7, %s1059_s7, %s1060_s8  }
  0x3d   : > { %s1203_s23 = sadd.s32 1, %s1055_s15   ;;  %s27_s4 = sadd.s32 1, %s1051_s14 }
  0x3e   : > { %s24_s5 = ssub.s32 %s1055_s15, %s1203_s23  ;;  %p34_p13 = scmp.ne.s32.totalorder %s1051_s14, %s1047_s13 }
  0x3f   : > { %p25_p6 = scmp.eq.s32.totalorder %s24_s5, 0  ;;  %p35_p10 = scmp.eq.s32.totalorder %s1055_s15, 0 }
  0x40   : > { %p1416_p3 = scmp.eq.s32.totalorder %s1108_s16, 1  ;;  %p842_p7 = scmp.lt.s32.totalorder %s1055_s15, 2 }
  0x41   : > { %s1219_s9 = scalar_select %p25_p6, %s1051_s14, %s27_s4  }
  0x42   : > { %p1213_p5 = por %p1416_p3, %p34_p13  ;;  %p36_p9 = por %p35_p10, %p34_p13 }
  0x43   : > { %s158_s10 = sand.u32 1, %s1051_s14   ;;  %s723_s25 = sshll.u32 %s1055_s15, 9 }
  0x44   : > { %s1417_s6 = scalar_select %p1213_p5, 1, 0 }
  0x45   : > { %s687_s11 = sshll.u32 %s158_s10, 5  ;;  %s1226_s24 = scalar_lea.hbm %s1405_s0, %s723_s25 }
  0x46   : > { %s162_s26 = scalar_lea.vmem [#allocation2], %s687_s11  ;;  %p1230_p11 = pnand %p842_p7, %p36_p9 }
  0x47   : > { %s169_s27 = sshll.u32 %s162_s26, 4  ;;  %s1234_s22 = scalar_lea.sflag [#allocation3], %s158_s10  ;;  %s1228_s27 = int_to_ptr.vmem [resolvable:$true] %s169_s27 }
  0x48   : > { %s955_s29 = scalar_lea.hbm %s1226_s24, 512  ;;  %p957_p0 = pneg %p1230_p11 }
  0x49   : > { %p956_p12 = scmp.ne.s32.totalorder %s1226_s24, %s955_s29  ;;  %s960_s5 = scalar_lea.hbm %s1405_s0, 1024 }
  0x4a   : > { %p961_p13 = scmp.lt.u32.totalorder %s1226_s24, %s1405_s0  ;;  %p962_p6 = scmp.lt.u32.totalorder %s960_s5, %s955_s29 }
  0x4b   : > { %p958_p1 = pnand %p957_p0, %p956_p12  ;;  %p964_p3 = scmp.lt.u32.totalorder %s955_s29, %s1226_s24 }
  0x4c   : > { %p963_p10 = por %p962_p6, %p961_p13 }
  0x4d   : > { %p959_p2 = pneg %p958_p1 }
  0x4e   : > { %p965_p7 = por %p964_p3, %p963_p10 }
  0x50   : > { %p966_p9 = pnand %p965_p7, %p959_p2 }
  0x52   : > { %969 = shalt.err (!%p966_p9)
}
  0x53   : > { %s970_s10 = scalar_lea.vmem %s1228_s27, 512  ;;  %s1061_s17 = smov [#allocation2]  }
  0x54   : > { %p971_p12 = scmp.ne.s32.totalorder %s1228_s27, %s970_s10  ;;  %s975_s21 = sshll.u32 %s1061_s17, 4  ;;  %s976_s21 = int_to_ptr.vmem [resolvable:$false] %s975_s21 }
  0x55   : > { %s977_s26 = scalar_lea.vmem %s976_s21, 1024  ;;  %p978_p4 = scmp.lt.s32.totalorder %s1228_s27, %s976_s21 }
  0x56   : > { %p973_p1 = pnand %p971_p12, %p957_p0  ;;  %p979_p13 = scmp.lt.s32.totalorder %s977_s26, %s970_s10 }
  0x58   : > { %p974_p5 = pneg %p973_p1  ;;  %p980_p6 = por %p979_p13, %p978_p4 }
  0x5a   : > { %p981_p10 = pnand %p980_p6, %p974_p5 }
  0x5c   : > { %984 = shalt.err (!%p981_p10)
}
  0x5d   : > { %835 = dma.hbm_to_vmem [thread:$0]  (!%p1230_p11), %s1226_s24, 512, %s1228_s27, %s1234_s22, %s1059_s7, %s1059_s7, %s1060_s8  }
  0x5e   : > { %181 = sbr.rel (%p1127_p8) target bundleno = 935 (0x3a7), region = 32  ;;  %s1268_s29 = sand.u32 (!%p1127_p8), 1, %s1047_s13  }
  0x5f   : > { %s691_s30 = sshll.u32 (!%p1127_p8), %s1268_s29, 5  ;;  %s184_s4 = scalar_lea.sflag (!%p1127_p8), [#allocation3], %s1268_s29 }
  0x60   : > { %s1274_s28 = scalar_lea.vmem (!%p1127_p8), [#allocation2], %s691_s30  ;;  %p1419_p4 = scmp.ne.s32.totalorder (!%p1127_p8), %s1412_s18, 0 }
  0x65   : > { %1030 = dma.done.wait (%p1419_p4), %s184_s4, 512  }
  0x66   : > { %1032 = vsyncadd (%p1419_p4), %s184_s4, 4294966784  ;;  %p1420_p5 = scmp.eq.s32.totalorder %s1108_s16, 0 }
  0x68   : > { %1034 = dma.done.wait (%p1420_p5), [#allocation6], 1408   ;;  %p1421_p8 = pmov %p1420_p5 }
  0x69   : > { %v886_v0 = vld [vmem:[#allocation5] sm:$0xff]   ;;  %v887_v1 = vld [vmem:[#allocation5 + $0x8] sm:$0xff]   ;;  %v888_v2 = vld [vmem:[#allocation5 + $0x10] sm:$0xff]   ;;  %vm318_vm0 = vcmask 883712   ;;  %vm331_vm1 = vcmask 1045504   ;;  %vm406_vm2 = vcmask 1043456   ;;  %v445_v41 = vlaneseq }
  0x6a   : > { %1036 = vsyncadd (%p1421_p8), [#allocation6], 4294965888  ;;  %775 = vmatprep.subr.bf16.mxu0 %v886_v0  ;;  %797 = vmatprep.subr.bf16.mxu1 %v886_v0  ;;  %v893_v3 = vld [vmem:[%s1274_s28] sm:$0xff]   ;;  %v889_v4 = vld [vmem:[#allocation5 + $0x18] sm:$0xff]   ;;  %s1062_s18 = smov 32   ;;  %s1063_s20 = smov 96  }
  0x6b   : > { %776 = vmatpush3.bf16.msra.mxu0 %v886_v0  ;;  %804 = vmatpush3.bf16.msra.mxu1 %v886_v0  ;;  %v895_v5 = vld [vmem:[%s1274_s28 + $0x10] sm:$0xff]   ;;  %v890_v6 = vld [vmem:[#allocation5 + $0x20] sm:$0xff]   ;;  %v891_v7 = vld [vmem:[#allocation5 + $0x28] sm:$0xff]   ;;  %s1064_s7 = smov 64   ;;  %vm439_vm3 = vcmask 261120   ;;  %v1323_v42 = vshrl.u32 %v445_v41, 7 }
  0x6c   : > { %777 = vmatprep.subr.bf16.mxu0 %v887_v1  ;;  %798 = vmatprep.subr.bf16.mxu1 %v887_v1  ;;  %v892_v8 = vld [vmem:[#allocation5 + $0x30] sm:$0x3f]   ;;  %v894_v10 = vld [vmem:[%s1274_s28 + $0x8] sm:$0xff]   ;;  %v896_v11 = vld [vmem:[%s1274_s28 + $0x18] sm:$0x3f]   ;;  %vm441_vm4 = vcmask 523264  }
  0x6d   : > { %789 = vmatprep.mubr.msk.bf16.mxu0 %vm318_vm0, %v893_v3  ;;  %793 = vmatprep.mubr.msk.bf16.mxu1 %vm318_vm0, %v895_v5  ;;  %v333_v9 = vsel %vm331_vm1, %v892_v8, 0  ;;  %vm443_vm5 = vcmask 785408   ;;  %v447_v46 = vsub.s32 0, %v1323_v42  ;;  %v734_v47 = vld [vmem:[#allocation7] sm:$0xff]   ;;  %v760_v48 = vld [vmem:[#allocation7 + $0x8] sm:$0xff]   ;;  %v761_v56 = vld [vmem:[#allocation7 + $0x10] sm:$0xff]  }
  0x6e   : > { %v735_v53 = vunpack.c.l.bf16 %v734_v47  ;;  %v736_v54 = vunpack.c.h.bf16 %v734_v47  ;;  %v739_v55 = vunpack.c.l.bf16 %v760_v48  ;;  %v740_v57 = vunpack.c.h.bf16 %v760_v48  ;;  %v225_v63 = vld [vmem:[#allocation7 + $0x18] sm:$0xf]  ;;  %v226_v0 = vld [vmem:[#allocation7 + $0x1c] sm:$0x3]  ;;  %s732_s8 = sshll.u32 %s1108_s16, 9  ;;  %s217_s24 = scalar_lea.vmem [#allocation8], %s691_s30 }
  0x6f   : > { %778 = vmatpush3.bf16.msra.mxu0 %v887_v1  ;;  %805 = vmatpush3.bf16.msra.mxu1 %v887_v1  ;;  %v743_v62 = vunpack.c.l.bf16 %v761_v56  ;;  %v744_v5 = vunpack.c.h.bf16 %v761_v56  ;;  %s590_s27 = sshll.u32 %s217_s24, 4  ;;  %s1357_s11 = scalar_lea.hbm %s1408_s3, %s732_s8  ;;  %s1359_s27 = int_to_ptr.vmem [resolvable:$true] %s590_s27 }
  0x70   : > { %779 = vmatprep.subr.bf16.mxu0 %v888_v2  ;;  %799 = vmatprep.subr.bf16.mxu1 %v888_v2  ;;  %s577_s16 = scalar_lea.sflag [#allocation4], %s1268_s29  ;;  %s985_s25 = scalar_lea.vmem %s1359_s27, 512 }
  0x71   : > { %p986_p11 = scmp.ne.s32.totalorder %s1359_s27, %s985_s25  ;;  %p1422_p0 = scmp.ne.s32.totalorder %s1417_s6, 0 }
  0x72   : > { %s1065_s10 = smov [#allocation8]  }
  0x73   : > { %780 = vmatpush3.bf16.msra.mxu0 %v888_v2  ;;  %806 = vmatpush3.bf16.msra.mxu1 %v888_v2  ;;  %p987_p2 = pnand %p986_p11, %p1422_p0  ;;  %s989_s17 = sshll.u32 %s1065_s10, 4  ;;  %s990_s17 = int_to_ptr.vmem [resolvable:$false] %s989_s17 }
  0x74   : > { %781 = vmatprep.subr.bf16.mxu0 %v889_v4  ;;  %800 = vmatprep.subr.bf16.mxu1 %v889_v4  ;;  %s991_s21 = scalar_lea.vmem %s990_s17, 1024  ;;  %p992_p7 = scmp.lt.s32.totalorder %s1359_s27, %s990_s17 }
  0x75   : > { %p988_p3 = pneg %p987_p2  ;;  %p993_p9 = scmp.lt.s32.totalorder %s991_s21, %s985_s25 }
  0x77   : > { %782 = vmatpush3.bf16.msra.mxu0 %v889_v4  ;;  %807 = vmatpush3.bf16.msra.mxu1 %v889_v4  ;;  %p994_p12 = por %p993_p9, %p992_p7 }
  0x78   : > { %783 = vmatprep.subr.bf16.mxu0 %v890_v6  ;;  %801 = vmatprep.subr.bf16.mxu1 %v890_v6 }
  0x79   : > { %p995_p1 = pnand %p994_p12, %p988_p3 }
  0x7b   : > { %784 = vmatpush3.bf16.msra.mxu0 %v890_v6  ;;  %808 = vmatpush3.bf16.msra.mxu1 %v890_v6 }
  0x7c   : > { %785 = vmatprep.subr.bf16.mxu0 %v891_v7  ;;  %802 = vmatprep.subr.bf16.mxu1 %v891_v7 }
  0x7f   : > { %786 = vmatpush3.bf16.msra.mxu0 %v891_v7  ;;  %809 = vmatpush3.bf16.msra.mxu1 %v891_v7 }
  0x80   : > { %811 = vmatprep.subr.msk.bf16.mxu0 %vm331_vm1, %v892_v8  ;;  %812 = vmatprep.subr.msk.bf16.mxu1 %vm331_vm1, %v892_v8 }
  0x83   : > { %788 = vmatpush3.bf16.msra.mxu0 %v333_v9  ;;  %810 = vmatpush3.bf16.msra.mxu1 %v333_v9 }
  0x86   : > { %790 = vmatmul.mubr.msk.bf16.vlgmr.msra.gmra.mrb[0].mxu0 %vm318_vm0, %v894_v10  ;;  %794 = vmatmul.mubr.msk.bf16.vlgmr.msra.gmra.mrb[0].mxu1 %vm318_vm0, %v896_v11  ;;  %v233_v10 = vunpack.c.l.bf16 %v225_v63  ;;  %v234_v11 = vunpack.c.l.bf16 %v226_v0 }
 0x159   : > { %v1292_v12 = vpop.f32.mrb[0].mxu0  ;;  %v1294_v13 = vpop.f32.mrb[0].mxu1 }
 0x15a   : > { %v1296_v14 = vpop.f32.mrb[1].mxu0  ;;  %v1298_v15 = vpop.f32.mrb[1].mxu1 }
 0x15b   : > { %v1300_v16 = vpop.f32.mrb[2].mxu0  ;;  %v1302_v17 = vpop.f32.mrb[2].mxu1 }
 0x15c   : > { %v1304_v18 = vpop.f32.mrb[3].mxu0  ;;  %v1306_v19 = vpop.f32.mrb[3].mxu1  ;;  %v407_v26 = vsel %vm406_vm2, %v1302_v17, 0.0 }
 0x15d   : > { %v400_v20 = vadd.f32 %v1304_v18, %v1296_v14 }
 0x15f   : > { %v401_v21 = vadd.f32 %v1292_v12, %v400_v20 }
 0x161   : > { %v402_v22 = vadd.f32 %v1300_v16, %v401_v21 }
 0x163   : > { %v403_v23 = vadd.f32 %v402_v22, %v1298_v15 }
 0x165   : > { %v404_v24 = vadd.f32 %v403_v23, %v1306_v19 }
 0x167   : > { %v405_v25 = vadd.f32 %v1294_v13, %v404_v24 }
 0x169   : > { %v408_v27 = vadd.f32 %v407_v26, %v405_v25 }
 0x16b   : > { %v409_v28 = vrot.slane %v408_v27, 4 }
 0x16d   : > { %v410_v29 = vadd.f32 %v409_v28, %v408_v27 }
 0x16f   : > { %v411_v30 = vrot.slane %v410_v29, 2 }
 0x171   : > { %v412_v31 = vadd.f32 %v411_v30, %v410_v29 }
 0x173   : > { %v413_v32 = vrot.slane %v412_v31, 1 }
 0x175   : > { %v414_v33 = vadd.f32 %v413_v32, %v412_v31 }
 0x177   : > { %424 = vrot.lane.b32.xlu1 %v414_v33, %s1062_s18  ;;  %416 = vrot.lane.b32.xlu0 %v414_v33, %s1063_s20 }
 0x17b   : > { %420 = vrot.lane.b32.xlu0 %v414_v33, %s1064_s7 }
 0x1e9   : > { %v417_v34 = vpop.permute.xlu0 %416  ;;  %v425_v38 = vpop.permute.xlu1 %424 }
 0x1ea   : > { %v419_v35 = vadd.f32 %v417_v34, %v414_v33 }
 0x1ed   : > { %v421_v36 = vpop.permute.xlu0 %420 }
 0x1ee   : > { %v423_v37 = vadd.f32 %v421_v36, %v419_v35 }
 0x1f0   : > { %v427_v39 = vadd.f32 %v425_v38, %v423_v37 }
 0x1f2   : > { %v428_v40 = vmul.f32 0.0044444446, %v427_v39 }
 0x1f4   : > { %433 = vrot.lane.b32.xlu0 %v428_v40, %s1064_s7  ;;  %430 = vrot.lane.b32.xlu1 %v428_v40, %s1062_s18 }
 0x1f8   : > { %436 = vrot.lane.b32.xlu1 %v428_v40, %s1063_s20 }
 0x266   : > { %v431_v43 = vpop.permute.xlu1 %430  ;;  %v434_v44 = vpop.permute.xlu0 %433 }
 0x267   : > { %v440_v45 = vsel %vm439_vm3, %v428_v40, %v431_v43 }
 0x268   : > { %v442_v49 = vsel %vm441_vm4, %v440_v45, %v434_v44 }
 0x26a   : > { %v437_v50 = vpop.permute.xlu1 %436 }
 0x26b   : > { %v444_v51 = vsel %vm443_vm5, %v442_v49, %v437_v50 }
 0x26c   : > { %v448_v52 = vrot.slane %v444_v51, %v447_v46 }
 0x26e   : > { %v449_v58 = vsub.f32 %v1296_v14, %v448_v52  ;;  %v450_v59 = vsub.f32 %v1304_v18, %v448_v52  ;;  %v451_v60 = vsub.f32 %v1292_v12, %v448_v52  ;;  %v452_v61 = vsub.f32 %v1300_v16, %v448_v52 }
 0x26f   : > { %v453_v1 = vsub.f32 %v1298_v15, %v448_v52  ;;  %v454_v6 = vsub.f32 %v1306_v19, %v448_v52  ;;  %v456_v12 = vsub.f32 %v1302_v17, %v448_v52  ;;  %v455_v14 = vsub.f32 %v1294_v13, %v448_v52 }
 0x270   : > { %v457_v2 = vmul.f32 %v735_v53, %v449_v58  ;;  %v458_v3 = vmul.f32 %v736_v54, %v450_v59  ;;  %v459_v4 = vmul.f32 %v739_v55, %v451_v60  ;;  %v460_v7 = vmul.f32 %v740_v57, %v452_v61 }
 0x271   : > { %v461_v16 = vmul.f32 %v743_v62, %v453_v1  ;;  %v462_v21 = vmul.f32 %v744_v5, %v454_v6  ;;  %v464_v23 = vmul.f32 %v456_v12, %v234_v11  ;;  %v463_v24 = vmul.f32 %v455_v14, %v233_v10 }
 0x272   : > { %v465_v8 = vmul.f32 %v457_v2, %v457_v2  ;;  %v466_v9 = vmul.f32 %v458_v3, %v458_v3  ;;  %v467_v18 = vmul.f32 %v459_v4, %v459_v4  ;;  %v468_v15 = vmul.f32 %v460_v7, %v460_v7 }
 0x273   : > { %v469_v25 = vmul.f32 %v461_v16, %v461_v16  ;;  %v470_v19 = vmul.f32 %v462_v21, %v462_v21  ;;  %v472_v28 = vmul.f32 %v464_v23, %v464_v23  ;;  %v471_v29 = vmul.f32 %v463_v24, %v463_v24 }
 0x274   : > { %v473_v20 = vadd.f32 %v466_v9, %v465_v8 }
 0x275   : > { %v479_v17 = vsel %vm406_vm2, %v472_v28, 0.0 }
 0x276   : > { %v474_v22 = vadd.f32 %v473_v20, %v467_v18 }
 0x278   : > { %v475_v26 = vadd.f32 %v474_v22, %v468_v15 }
 0x27a   : > { %v476_v27 = vadd.f32 %v475_v26, %v469_v25 }
 0x27c   : > { %v477_v30 = vadd.f32 %v476_v27, %v470_v19 }
 0x27e   : > { %v478_v31 = vadd.f32 %v477_v30, %v471_v29 }
 0x280   : > { %v480_v32 = vadd.f32 %v479_v17, %v478_v31 }
 0x282   : > { %v481_v13 = vrot.slane %v480_v32, 4 }
 0x284   : > { %v482_v33 = vadd.f32 %v481_v13, %v480_v32 }
 0x286   : > { %v483_v34 = vrot.slane %v482_v33, 2 }
 0x288   : > { %v484_v35 = vadd.f32 %v483_v34, %v482_v33 }
 0x28a   : > { %v485_v36 = vrot.slane %v484_v35, 1 }
 0x28c   : > { %v486_v37 = vadd.f32 %v485_v36, %v484_v35 }
 0x28e   : > { %492 = vrot.lane.b32.xlu1 %v486_v37, %s1064_s7  ;;  %488 = vrot.lane.b32.xlu0 %v486_v37, %s1063_s20 }
 0x292   : > { %496 = vrot.lane.b32.xlu0 %v486_v37, %s1062_s18 }
 0x300   : > { %v489_v38 = vpop.permute.xlu0 %488  ;;  %v493_v40 = vpop.permute.xlu1 %492 }
 0x301   : > { %v491_v39 = vadd.f32 %v489_v38, %v486_v37 }
 0x303   : > { %v495_v41 = vadd.f32 %v493_v40, %v491_v39 }
 0x304   : > { %v497_v43 = vpop.permute.xlu0 %496 }
 0x305   : > { %v499_v44 = vadd.f32 %v497_v43, %v495_v41 }
 0x307   : > { %v500_v45 = vmul.f32 0.0044444446, %v499_v44 }
 0x309   : > { %v501_v47 = vadd.f32 1e-05, %v500_v45 }
 0x30b   : > { %897 = vrsqrt.f32 %v501_v47 }
 0x315   : > { %v898_v48 = vpop.eup %897 }
 0x316   : > { %507 = vrot.lane.b32.xlu0 %v898_v48, %s1064_s7  ;;  %504 = vrot.lane.b32.xlu1 %v898_v48, %s1062_s18 }
 0x31a   : > { %510 = vrot.lane.b32.xlu1 %v898_v48, %s1063_s20 }
 0x388   : > { %v505_v49 = vpop.permute.xlu1 %504  ;;  %v508_v50 = vpop.permute.xlu0 %507 }
 0x389   : > { %v513_v51 = vsel %vm439_vm3, %v898_v48, %v505_v49 }
 0x38a   : > { %v514_v52 = vsel %vm441_vm4, %v513_v51, %v508_v50 }
 0x38c   : > { %v511_v53 = vpop.permute.xlu1 %510 }
 0x38d   : > { %v515_v54 = vsel %vm443_vm5, %v514_v52, %v511_v53 }
 0x38e   : > { %v519_v55 = vrot.slane %v515_v54, %v447_v46 }
 0x390   : > { %v520_v56 = vmul.f32 %v519_v55, %v457_v2  ;;  %v521_v57 = vmul.f32 %v519_v55, %v458_v3  ;;  %v522_v58 = vmul.f32 %v519_v55, %v459_v4  ;;  %v523_v59 = vmul.f32 %v519_v55, %v460_v7 }
 0x391   : > { %v524_v60 = vmul.f32 %v519_v55, %v461_v16  ;;  %v525_v61 = vmul.f32 %v519_v55, %v462_v21  ;;  %v526_v62 = vmul.f32 %v519_v55, %v463_v24  ;;  %v527_v63 = vmul.f32 %v519_v55, %v464_v23 }
 0x392   : > { %v528_v0 = vmax.f32 %v520_v56, 0.0  ;;  %v529_v1 = vmax.f32 %v521_v57, 0.0  ;;  %v530_v5 = vmax.f32 %v522_v58, 0.0  ;;  %v531_v6 = vmax.f32 %v523_v59, 0.0 }
 0x393   : > { %v532_v8 = vmax.f32 %v524_v60, 0.0  ;;  %v533_v42 = vmax.f32 %v525_v61, 0.0  ;;  %v534_v46 = vmax.f32 %v526_v62, 0.0  ;;  %v535_v2 = vmax.f32 %v527_v63, 0.0 }
 0x394   : > { %v748_v3 = vpack.c.bf16 %v529_v1, %v528_v0  ;;  %v753_v4 = vpack.c.bf16 %v531_v6, %v530_v5 }
 0x395   : > { %v730_v7 = vpack.c.bf16 %v534_v46, %v534_v46  ;;  %v731_v9 = vpack.c.bf16 %v535_v2, %v535_v2  ;;  %v758_v10 = vpack.c.bf16 %v533_v42, %v532_v8 }
 0x396   : > { %749 = vst [vmem:[%s217_s24] sm:$0xff] %v748_v3   ;;  %762 = vst [vmem:[%s217_s24 + $0x8] sm:$0xff] %v753_v4  }
 0x397   : > { %763 = vst [vmem:[%s217_s24 + $0x10] sm:$0xff] %v758_v10   ;;  %574 = vst [vmem:[%s217_s24 + $0x18] sm:$0xf] %v730_v7 }
 0x398   : > { %575 = vst [vmem:[%s217_s24 + $0x1c] sm:$0x3] %v731_v9 }
 0x399   : > { %998 = shalt.err (!%p995_p1)
}
 0x39a   : > { %s999_s26 = scalar_lea.hbm %s1357_s11, 512  ;;  %s1003_s28 = scalar_lea.hbm %s1408_s3, 1024 }
 0x39b   : > { %p1000_p13 = scmp.ne.s32.totalorder %s1357_s11, %s999_s26  ;;  %p1004_p4 = scmp.lt.u32.totalorder %s1357_s11, %s1408_s3 }
 0x39c   : > { %p1005_p5 = scmp.lt.u32.totalorder %s1003_s28, %s999_s26  ;;  %p1007_p11 = scmp.lt.u32.totalorder %s999_s26, %s1357_s11 }
 0x39d   : > { %p1001_p6 = pnand %p1000_p13, %p1422_p0 }
 0x39e   : > { %p1006_p8 = por %p1005_p5, %p1004_p4 }
 0x39f   : > { %p1002_p10 = pneg %p1001_p6 }
 0x3a0   : > { %p1008_p2 = por %p1007_p11, %p1006_p8 }
 0x3a2   : > { %p1009_p3 = pnand %p1008_p2, %p1002_p10 }
 0x3a4   : > { %1012 = shalt.err (!%p1009_p3)
}
 0x3a5   : > { %s1066_s8 = smov 4  }
 0x3a6   : > { %823 = dma.vmem_to_hbm [thread:$0]  (%p1422_p0), %s1359_s27, 512, %s1357_s11, %s577_s16, %s1064_s7, %s1064_s7, %s1066_s8  }
 0x3a7 PF: > { %s605_s24 = sand.u32 1, %s1043_s12   ;;  %p1423_p7 = scmp.ne.s32.totalorder %s1413_s19, 0 }
 0x3a8   : > { %p1424_p9 = scmp.ge.s32.totalorder %s1055_s15, 2  ;;  %s606_s22 = scalar_lea.sflag [#allocation4], %s605_s24 }
 0x3aa   : > { %p837_p12 = pnand %p1424_p9, %p1423_p7 }
 0x3ac   : > { %1038 = dma.done.wait (!%p837_p12), %s606_s22, 512  }
 0x3ad   : > { %1040 = vsyncadd (!%p837_p12), %s606_s22, 4294966784  ;;  %p17_p1 = scmp.ge.s32.totalorder %s1203_s23, 4   ;;  %s1425_s12 = smov %s1047_s13 }
 0x3ae   : > { %s1426_s13 = smov %s1051_s14  ;;  %s1427_s14 = smov %s1219_s9 }
 0x3af   : > { %s1428_s15 = smov %s1203_s23  ;;  %19 = sbr.rel (!%p17_p1) target bundleno = 6 (0x6), region = 85 }
 0x3b6   :  { %611 = vsyncpa [#allocation3], 1 }
 0x3b7   :  { %613 = vsyncpa [#allocation3 + $0x1], 1 }
 0x3b8   :  { %614 = vsyncpa [#allocation6], 1 }
 0x3b9   :  { %615 = vsyncpa [#allocation4], 1 }
 0x3ba   :  { %617 = vsyncpa [#allocation4 + $0x1], 1 }

// kernel: tile.14
= control target key start
LH: loop header
LB: loop body
LE: loop exit
PB: predicated region body
PF: predicated region fallthrough
CT: control target
= control target key end

     0   :  { %vm33_vm0 = vcmask 1047556   ;;  %s51_s10 = smov 3  ;;  %s171_s17 = smov 96   ;;  %vm4_vm1 = vcmask 261120   ;;  %s257_s0 = inlined_call_operand.vmem [shape: f32[9,8,32], index: 0, kind: input, shape index: {}]   ;;  %s258_s1 = inlined_call_operand.hbm [shape: f32[9,256], index: 1, kind: output, shape index: {}]  }
   0x1   :  { %v128_v0 = vld [vmem:[%s257_s0 + $0x3] ss:$8 sm:$0xf]   ;;  %v130_v2 = vld [vmem:[%s257_s0 + $0x7] ss:$8 sm:$0xf]  }
   0x2   :  { %v129_v1 = vld [vmem:[%s257_s0 + $0x3] ss:$8 sm:$0xf0]   ;;  %v131_v5 = vld [vmem:[%s257_s0 + $0x7] ss:$8 sm:$0xf0]  }
   0x3   :  { %v34_v3 = vsel %vm33_vm0, %v129_v1, %v128_v0  ;;  %v132_v4 = vld [vmem:[%s257_s0 + $0x43] ss:$4 sm:%s51_s10]   ;;  %v133_v6 = vld [vmem:[%s257_s0 + $0x2] ss:$8 sm:$0xf]   ;;  %v44_v8 = vsel %vm33_vm0, %v131_v5, %v130_v2  ;;  %s80_s26 = smov 3 }
   0x4   :  { %35 = vrot.lane.b32.xlu0 %v34_v3, %s171_s17  ;;  %53 = vrot.lane.b32.xlu1 %v132_v4, %s171_s17  ;;  %v134_v7 = vld [vmem:[%s257_s0 + $0x2] ss:$8 sm:$0xf0]   ;;  %v135_v10 = vld [vmem:[%s257_s0 + $0x6] ss:$8 sm:$0xf]  }
   0x5   :  { %v63_v9 = vsel %vm33_vm0, %v134_v7, %v133_v6  ;;  %v136_v11 = vld [vmem:[%s257_s0 + $0x6] ss:$8 sm:$0xf0]   ;;  %s172_s29 = smov 64   ;;  %s24_s9 = smov 3 }
   0x6   :  { %v137_v12 = vld [vmem:[%s257_s0 + $0x42] ss:$4 sm:%s80_s26]   ;;  %v138_v13 = vld [vmem:[%s257_s0 + $0x1] ss:$8 sm:$0xf]   ;;  %v73_v16 = vsel %vm33_vm0, %v136_v11, %v135_v10 }
   0x7   :  { %v139_v14 = vld [vmem:[%s257_s0 + $0x1] ss:$8 sm:$0xf0]   ;;  %v140_v15 = vld [vmem:[%s257_s0 + $0x5] ss:$8 sm:$0xf]  }
   0x8   :  { %45 = vrot.lane.b32.xlu0 %v44_v8, %s171_s17  ;;  %64 = vrot.lane.b32.xlu1 %v63_v9, %s172_s29  ;;  %v141_v17 = vld [vmem:[%s257_s0 + $0x5] ss:$8 sm:$0xf0]   ;;  %v3_v19 = vld [vmem:[%s257_s0] ss:$4 sm:$0xff]  }
   0x9   :  { %v127_v18 = vld [vmem:[%s257_s0 + $0x40] ss:$4 sm:%s24_s9]   ;;  %5 = vst.msk [vmem:[#allocation0] ss:$8 sm:$0x3] %vm4_vm1, %v3_v19  }
   0xa   :  { %v126_v20 = vld [vmem:[%s257_s0 + $0x20] ss:$4 sm:$0xff]   ;;  %28 = vst.msk [vmem:[#allocation0 + $0x10] ss:$8 sm:$0x3] %vm4_vm1, %v127_v18  }
   0xb   :  { %7 = vst.msk [vmem:[#allocation0 - $0xf] ss:$8 sm:$0xc] %vm4_vm1, %v3_v19   ;;  %9 = vst.msk [vmem:[#allocation0 - $0x1e] ss:$8 sm:$0x30] %vm4_vm1, %v3_v19  }
   0xc   :  { %11 = vst.msk [vmem:[#allocation0 - $0x2d] ss:$8 sm:$0xc0] %vm4_vm1, %v3_v19   ;;  %16 = vst.msk [vmem:[#allocation0 + $0x4] ss:$8 sm:$0x3] %vm4_vm1, %v126_v20  }
   0xd   :  { %18 = vst.msk [vmem:[#allocation0 - $0xb] ss:$8 sm:$0xc] %vm4_vm1, %v126_v20   ;;  %20 = vst.msk [vmem:[#allocation0 - $0x1a] ss:$8 sm:$0x30] %vm4_vm1, %v126_v20  }
   0xe   :  { %22 = vst.msk [vmem:[#allocation0 - $0x29] ss:$8 sm:$0xc0] %vm4_vm1, %v126_v20  }
   0xf   :  { %2 = vsyncpa [#allocation1], 0  ;;  %74 = vrot.lane.b32.xlu0 %v73_v16, %s172_s29  ;;  %82 = vrot.lane.b32.xlu1 %v137_v12, %s172_s29  ;;  %v92_v21 = vsel %vm33_vm0, %v139_v14, %v138_v13  ;;  %v102_v22 = vsel %vm33_vm0, %v141_v17, %v140_v15  ;;  %s109_s16 = smov 3  ;;  %s173_s17 = smov 32   ;;  %vm37_vm2 = vcmask 1048320   ;;  %vm66_vm3 = vcmask 785920  }
  0x10   :  { %v142_v23 = vld [vmem:[%s257_s0 + $0x41] ss:$4 sm:%s109_s16]   ;;  %vm95_vm4 = vcmask 523520   ;;  %s174_s0 = smov [#allocation0]  }
  0x11   :  { %s120_s20 = sshll.u32 %s174_s0, 4  ;;  %s121_s20 = int_to_ptr.vmem [resolvable:$true] %s120_s20 }
  0x12   :  { %s147_s21 = scalar_lea.vmem %s121_s20, 512  ;;  %p152_p1 = scmp.lt.s32.totalorder %s121_s20, %s121_s20 }
  0x13   :  { %93 = vrot.lane.b32.xlu0 %v92_v21, %s173_s17  ;;  %103 = vrot.lane.b32.xlu1 %v102_v22, %s173_s17  ;;  %p148_p0 = scmp.ne.s32.totalorder %s121_s20, %s147_s21  ;;  %p153_p2 = scmp.lt.s32.totalorder %s147_s21, %s147_s21 }
  0x15   :  { %p154_p3 = por %p153_p2, %p152_p1 }
  0x17   :  { %111 = vrot.lane.b32.xlu0 %v142_v23, %s173_s17  ;;  %p155_p4 = pnand %p154_p3, %p148_p0 }
  0x76   :  { %v36_v24 = vpop.permute.xlu0 %35   ;;  %v54_v25 = vpop.permute.xlu1 %53  }
  0x77   :  { %57 = vst.msk [vmem:[#allocation0 + $0x10] ss:$8 sm:$0x3] %vm37_vm2, %v54_v25   ;;  %38 = vst.msk [vmem:[#allocation0] sm:$0xff] %vm37_vm2, %v36_v24  }
  0x7a   :  { %v46_v26 = vpop.permute.xlu0 %45   ;;  %v65_v27 = vpop.permute.xlu1 %64  }
  0x7b   :  { %67 = vst.msk [vmem:[#allocation0] sm:$0xff] %vm66_vm3, %v65_v27  }
  0x7c   :  { %49 = vst.msk [vmem:[#allocation0 + $0x8] sm:$0xff] %vm37_vm2, %v46_v26  }
  0x81   :  { %v75_v28 = vpop.permute.xlu0 %74   ;;  %v83_v29 = vpop.permute.xlu1 %82  }
  0x82   :  { %78 = vst.msk [vmem:[#allocation0 + $0x8] sm:$0xff] %vm66_vm3, %v75_v28   ;;  %86 = vst.msk [vmem:[#allocation0 + $0x10] ss:$8 sm:$0x3] %vm66_vm3, %v83_v29  }
  0x85   :  { %v94_v30 = vpop.permute.xlu0 %93   ;;  %v104_v31 = vpop.permute.xlu1 %103  }
  0x86   :  { %96 = vst.msk [vmem:[#allocation0] sm:$0xff] %vm95_vm4, %v94_v30   ;;  %107 = vst.msk [vmem:[#allocation0 + $0x8] sm:$0xff] %vm95_vm4, %v104_v31  }
  0x89   :  { %v112_v32 = vpop.permute.xlu0 %111  }
  0x8a   :  { %115 = vst.msk [vmem:[#allocation0 + $0x10] ss:$8 sm:$0x3] %vm95_vm4, %v112_v32  }
  0x8b   :  { %158 = shalt.err (!%p155_p4)
}
  0x8c   :  { %s159_s24 = scalar_lea.hbm %s258_s1, 512 }
  0x8d   :  { %p160_p5 = scmp.ne.s32.totalorder %s258_s1, %s159_s24  ;;  %p163_p6 = scmp.lt.u32.totalorder %s159_s24, %s258_s1 }
  0x8f   :  { %p165_p7 = pnand %p163_p6, %p160_p5 }
  0x91   :  { %168 = shalt.err (!%p165_p7)
}
  0x92   :  { %123 = dma.vmem_to_hbm [thread:$0]  %s121_s20, 512, %s258_s1, [#allocation1]  }
  0x93   :  { %169 = dma.done.wait [#allocation1], 512  }
  0x94   :  { %170 = vsyncadd [#allocation1], 4294966784 }
  0x95   :  { %125 = vsyncpa [#allocation1], 1 }

// kernel: learning_to_downsample.4
= control target key start
LH: loop header
LB: loop body
LE: loop exit
PB: predicated region body
PF: predicated region fallthrough
CT: control target
= control target key end

     0   :  { %10 = vsyncpa [#allocation3], 0  ;;  %s4159_s0 = inlined_call_operand.hbm [shape: bf16[2,6,72,256], index: 0, kind: input, shape index: {}]   ;;  %s4160_s1 = inlined_call_operand.hbm [shape: f32[9,256], index: 1, kind: input, shape index: {}]   ;;  %s4161_s2 = inlined_call_operand.hbm [shape: bf16[256,384], index: 2, kind: input, shape index: {}]   ;;  %s4162_s3 = inlined_call_operand.hbm [shape: bf16[64,256], index: 3, kind: input, shape index: {}]   ;;  %s4163_s4 = inlined_call_operand.hbm [shape: bf16[64,384], index: 4, kind: input, shape index: {}]   ;;  %s4164_s5 = inlined_call_operand.hbm [shape: bf16[2,64,384], index: 5, kind: output, shape index: {}]  }
   0x1   :  { %12 = vsyncpa [#allocation3 + $0x1], 0 }
   0x2   :  { %13 = vsyncpa [#allocation6], 0 }
   0x3   :  { %14 = vsyncpa [#allocation9], 0 }
   0x4   :  { %15 = vsyncpa [#allocation4], 0 }
   0x5   :  { %17 = vsyncpa [#allocation4 + $0x1], 0  ;;  %s2788_s18 = smov 0   ;;  %s2790_s19 = smov 0  }
   0x6   :  { %s2792_s20 = smov 0   ;;  %s2794_s21 = smov 0  }
   0x7 LB: > { %s2809_s22 = sadd.s32 4294967295, %s2735_s21   ;;  %s2164_s23 = sadd.s32 4294967294, %s2735_s21   ;;  %s2735_s21 = sphi %s2794_s21, %s4419_s21   ;;  %s2731_s20 = sphi %s2792_s20, %s4418_s20   ;;  %s2727_s19 = sphi %s2790_s19, %s4417_s19   ;;  %s2723_s18 = sphi %s2788_s18, %s4416_s18  }
   0x8   : > { %p43_p0 = scmp.ne.s32.totalorder %s2727_s19, %s2723_s18  ;;  %p4165_p1 = scmp.eq.s32.totalorder %s2809_s22, 0 }
   0x9   : > { %p157_p3 = scmp.eq.s32.totalorder %s2164_s23, 1  ;;  %p2165_p5 = scmp.ge.s32.totalorder %s2735_s21, 1 }
   0xa   : > { %p2818_p4 = por %p4165_p1, %p43_p0  ;;  %p164_p7 = scmp.lt.s32.totalorder %s2735_s21, 3 }
   0xb   : > { %p2823_p6 = por %p157_p3, %p43_p0  ;;  %s2737_s27 = smov [#allocation5]  }
   0xc   : > { %s4256_s24 = scalar_select %p2818_p4, 1, 0 }
   0xd   : > { %s4257_s25 = scalar_select %p2823_p6, 1, 0 }
   0xe   : > { %p2828_p8 = pnand %p2165_p5, %p164_p7  ;;  %s176_s28 = sshll.u32 %s2737_s27, 4  ;;  %s2832_s28 = int_to_ptr.vmem [resolvable:$true] %s176_s28 }
   0xf   : > { %s2738_s30 = smov [#allocation8]   ;;  %s2519_s9 = scalar_lea.hbm %s4160_s1, 512 }
  0x10   : > { %s4258_s26 = scalar_select %p2828_p8, 1, 0 }
  0x11   : > { %p2369_p9 = pneg %p2828_p8  ;;  %s202_s6 = sshll.u32 %s2738_s30, 4  ;;  %s2843_s6 = int_to_ptr.vmem [resolvable:$true] %s202_s6 }
  0x12   : > { %p2520_p12 = scmp.ne.s32.totalorder %s4160_s1, %s2519_s9  ;;  %p2526_p5 = scmp.lt.u32.totalorder %s2519_s9, %s4160_s1 }
  0x13   : > { %p2839_p11 = pnand %p2369_p9, %p4165_p1 }
  0x15   : > { %p2853_p13 = pneg %p2839_p11 }
  0x17   : > { %p2522_p0 = pnand %p2853_p13, %p2520_p12 }
  0x19   : > { %p2523_p3 = pneg %p2522_p0 }
  0x1b   : > { %p2528_p7 = pnand %p2526_p5, %p2523_p3 }
  0x1d   : > { %2531 = shalt.err (!%p2528_p7)
}
  0x1e   : > { %s2532_s15 = scalar_lea.vmem %s2832_s28, 512  ;;  %p2540_p2 = scmp.lt.s32.totalorder %s2832_s28, %s2832_s28 }
  0x1f   : > { %p2533_p9 = scmp.ne.s32.totalorder %s2832_s28, %s2532_s15  ;;  %p2541_p6 = scmp.lt.s32.totalorder %s2532_s15, %s2532_s15 }
  0x21   : > { %p2535_p10 = pnand %p2533_p9, %p2853_p13  ;;  %p2542_p12 = por %p2541_p6, %p2540_p2 }
  0x23   : > { %p2536_p1 = pneg %p2535_p10 }
  0x25   : > { %p2543_p0 = pnand %p2542_p12, %p2536_p1 }
  0x27   : > { %2546 = shalt.err (!%p2543_p0)
}
  0x28   : > { %s2739_s16 = smov 256   ;;  %s2740_s17 = smov 16  }
  0x29   : > { %2372 = dma.hbm_to_vmem [thread:$0]  (!%p2839_p11), %s4160_s1, 512, %s2832_s28, [#allocation6], %s2739_s16, %s2739_s16, %s2740_s17  }
  0x2a   : > { %s2547_s8 = scalar_lea.hbm %s4162_s3, 1024 }
  0x2b   : > { %p2548_p2 = scmp.ne.s32.totalorder %s4162_s3, %s2547_s8  ;;  %p2554_p10 = scmp.lt.u32.totalorder %s2547_s8, %s4162_s3 }
  0x2d   : > { %p2550_p1 = pnand %p2548_p2, %p2853_p13 }
  0x2f   : > { %p2551_p6 = pneg %p2550_p1 }
  0x31   : > { %p2556_p3 = pnand %p2554_p10, %p2551_p6 }
  0x33   : > { %2559 = shalt.err (!%p2556_p3)
}
  0x34   : > { %s2560_s28 = scalar_lea.vmem %s2843_s6, 1024  ;;  %p2568_p12 = scmp.lt.s32.totalorder %s2843_s6, %s2843_s6 }
  0x35   : > { %p2561_p5 = scmp.ne.s32.totalorder %s2843_s6, %s2560_s28  ;;  %p2569_p0 = scmp.lt.s32.totalorder %s2560_s28, %s2560_s28 }
  0x37   : > { %p2563_p7 = pnand %p2561_p5, %p2853_p13  ;;  %p2570_p2 = por %p2569_p0, %p2568_p12 }
  0x39   : > { %p2564_p9 = pneg %p2563_p7 }
  0x3b   : > { %p2571_p1 = pnand %p2570_p2, %p2564_p9 }
  0x3d   : > { %2574 = shalt.err (!%p2571_p1)
}
  0x3e   : > { %s4168_s14 = smov 128   ;;  %s2742_s15 = smov 8  }
  0x3f   : > { %2378 = dma.hbm_to_vmem [thread:$0]  (!%p2839_p11), %s4162_s3, 1024, %s2843_s6, [#allocation9], %s4168_s14, %s4168_s14, %s2742_s15  }
  0x40   : > { %s2743_s23 = smov [#allocation7]   ;;  %s2575_s8 = scalar_lea.hbm %s4161_s2, 6144 }
  0x41   : > { %s189_s27 = sshll.u32 %s2743_s23, 4  ;;  %p2576_p6 = scmp.ne.s32.totalorder %s4161_s2, %s2575_s8  ;;  %s190_s27 = int_to_ptr.vmem [resolvable:$true] %s189_s27 }
  0x42   : > { %p2582_p5 = scmp.lt.u32.totalorder %s2575_s8, %s4161_s2 }
  0x43   : > { %p2578_p10 = pnand %p2576_p6, %p2853_p13 }
  0x45   : > { %p2579_p3 = pneg %p2578_p10 }
  0x47   : > { %p2584_p7 = pnand %p2582_p5, %p2579_p3 }
  0x49   : > { %2587 = shalt.err (!%p2584_p7)
}
  0x4a   : > { %s2588_s6 = scalar_lea.vmem %s190_s27, 6144  ;;  %p2596_p2 = scmp.lt.s32.totalorder %s190_s27, %s190_s27 }
  0x4b   : > { %p2589_p9 = scmp.ne.s32.totalorder %s190_s27, %s2588_s6  ;;  %p2597_p1 = scmp.lt.s32.totalorder %s2588_s6, %s2588_s6 }
  0x4d   : > { %p2591_p12 = pnand %p2589_p9, %p2853_p13  ;;  %p2598_p4 = por %p2597_p1, %p2596_p2 }
  0x4f   : > { %p2592_p0 = pneg %p2591_p12 }
  0x51   : > { %p2599_p8 = pnand %p2598_p4, %p2592_p0 }
  0x53   : > { %2602 = shalt.err (!%p2599_p8)
}
  0x54   : > { %s2744_s28 = smov 192   ;;  %s2745_s16 = smov 12  }
  0x55   : > { %2375 = dma.hbm_to_vmem [thread:$0]  (!%p2839_p11), %s4161_s2, 6144, %s190_s27, [#allocation6], %s2744_s28, %s2744_s28, %s2745_s16  }
  0x56   : > { %s2746_s30 = smov [#allocation10]   ;;  %s2603_s10 = scalar_lea.hbm %s4163_s4, 1536 }
  0x57   : > { %s215_s7 = sshll.u32 %s2746_s30, 4  ;;  %p2604_p4 = scmp.ne.s32.totalorder %s4163_s4, %s2603_s10  ;;  %s216_s7 = int_to_ptr.vmem [resolvable:$true] %s215_s7 }
  0x58   : > { %p2610_p10 = scmp.lt.u32.totalorder %s2603_s10, %s4163_s4 }
  0x59   : > { %p2606_p8 = pnand %p2604_p4, %p2853_p13 }
  0x5b   : > { %p2607_p6 = pneg %p2606_p8 }
  0x5d   : > { %p2612_p3 = pnand %p2610_p10, %p2607_p6 }
  0x5f   : > { %2615 = shalt.err (!%p2612_p3)
}
  0x60   : > { %s2616_s27 = scalar_lea.vmem %s216_s7, 1536  ;;  %p2624_p12 = scmp.lt.s32.totalorder %s216_s7, %s216_s7 }
  0x61   : > { %p2617_p5 = scmp.ne.s32.totalorder %s216_s7, %s2616_s27  ;;  %p2625_p0 = scmp.lt.s32.totalorder %s2616_s27, %s2616_s27 }
  0x63   : > { %p2619_p7 = pnand %p2617_p5, %p2853_p13  ;;  %p2626_p2 = por %p2625_p0, %p2624_p12 }
  0x65   : > { %p2620_p9 = pneg %p2619_p7 }
  0x67   : > { %p2627_p1 = pnand %p2626_p2, %p2620_p9 }
  0x69   : > { %2630 = shalt.err (!%p2627_p1)
}
  0x6a   : > { %2381 = dma.hbm_to_vmem [thread:$0]  (!%p2839_p11), %s4163_s4, 1536, %s216_s7, [#allocation9], %s2744_s28, %s2744_s28, %s2745_s16  }
  0x6b   : > { %s2937_s12 = sadd.s32 1, %s2735_s21   ;;  %s30_s14 = sadd.s32 1, %s2731_s20 }
  0x6c   : > { %s27_s29 = ssub.s32 %s2735_s21, %s2937_s12  ;;  %p37_p13 = scmp.ne.s32.totalorder %s2731_s20, %s2727_s19 }
  0x6d   : > { %p28_p4 = scmp.eq.s32.totalorder %s27_s29, 0  ;;  %p38_p8 = scmp.eq.s32.totalorder %s2735_s21, 0 }
  0x6e   : > { %p4261_p6 = scmp.eq.s32.totalorder %s2809_s22, 1  ;;  %p2394_p3 = scmp.lt.s32.totalorder %s2735_s21, 2 }
  0x6f   : > { %s2953_s8 = scalar_select %p28_p4, %s2731_s20, %s30_s14  }
  0x70   : > { %p2947_p10 = por %p4261_p6, %p37_p13  ;;  %p39_p5 = por %p38_p8, %p37_p13 }
  0x71   : > { %s229_s9 = sand.u32 1, %s2731_s20   ;;  %s2345_s28 = smul.u32 6912, %s2735_s21 }
  0x72   : > { %s2344_s10 = smul.u32 432, %s229_s9  ;;  %p2957_p11 = pnand %p2394_p3, %p39_p5 }
  0x73   : > { %s2964_s13 = scalar_lea.hbm %s4159_s0, %s2345_s28  ;;  %s2968_s17 = scalar_lea.sflag [#allocation3], %s229_s9 }
  0x74   : > { %s233_s6 = scalar_lea.vmem [#allocation2], %s2344_s10  ;;  %s2631_s23 = scalar_lea.hbm %s2964_s13, 6912 }
  0x75   : > { %s240_s27 = sshll.u32 %s233_s6, 4  ;;  %p2632_p7 = scmp.ne.s32.totalorder %s2964_s13, %s2631_s23  ;;  %s2966_s27 = int_to_ptr.vmem [resolvable:$true] %s240_s27 }
  0x76   : > { %p2633_p9 = pneg %p2957_p11  ;;  %s2636_s28 = scalar_lea.hbm %s4159_s0, 13824 }
  0x77   : > { %p2637_p2 = scmp.lt.u32.totalorder %s2964_s13, %s4159_s0  ;;  %p2638_p1 = scmp.lt.u32.totalorder %s2636_s28, %s2631_s23 }
  0x78   : > { %p2634_p12 = pnand %p2633_p9, %p2632_p7  ;;  %p2640_p4 = scmp.lt.u32.totalorder %s2631_s23, %s2964_s13 }
  0x79   : > { %p2639_p13 = por %p2638_p1, %p2637_p2 }
  0x7a   : > { %p2635_p0 = pneg %p2634_p12 }
  0x7b   : > { %p2641_p8 = por %p2640_p4, %p2639_p13 }
  0x7d   : > { %p2642_p6 = pnand %p2641_p8, %p2635_p0 }
  0x7f   : > { %2645 = shalt.err (!%p2642_p6)
}
  0x80   : > { %s2646_s9 = scalar_lea.vmem %s2966_s27, 6912  ;;  %s2747_s10 = smov [#allocation2]  }
  0x81   : > { %p2647_p3 = scmp.ne.s32.totalorder %s2966_s27, %s2646_s9  ;;  %s2651_s6 = sshll.u32 %s2747_s10, 4  ;;  %s2652_s6 = int_to_ptr.vmem [resolvable:$false] %s2651_s6 }
  0x82   : > { %s2653_s14 = scalar_lea.vmem %s2652_s6, 13824  ;;  %p2654_p12 = scmp.lt.s32.totalorder %s2966_s27, %s2652_s6 }
  0x83   : > { %p2649_p5 = pnand %p2647_p3, %p2633_p9  ;;  %p2655_p2 = scmp.lt.s32.totalorder %s2653_s14, %s2646_s9 }
  0x85   : > { %p2650_p7 = pneg %p2649_p5  ;;  %p2656_p1 = por %p2655_p2, %p2654_p12 }
  0x87   : > { %p2657_p13 = pnand %p2656_p1, %p2650_p7 }
  0x89   : > { %2660 = shalt.err (!%p2657_p13)
}
  0x8a   : > { %s4264_s23 = smov 128   ;;  %p4265_p9 = scmp.ne.s32.totalorder %s4258_s26, 0 }
  0x8b   : > { %2385 = dma.hbm_to_vmem [thread:$0]  (!%p2957_p11), %s2964_s13, 6912, %s2966_s27, %s2968_s17, %s4264_s23, %s4264_s23, %s2742_s15  }
  0x8c   : > { %252 = sbr.rel (%p4265_p9) target bundleno = 1704 (0x6a8), region = 40 }
  0x93   : > { %s3002_s29 = sand.u32 1, %s2727_s19   ;;  %p4266_p0 = scmp.ne.s32.totalorder %s4256_s24, 0 }
  0x94   : > { %s2346_s28 = smul.u32 432, %s3002_s29  ;;  %s255_s7 = scalar_lea.sflag [#allocation3], %s3002_s29 }
  0x96   : > { %s3006_s11 = scalar_lea.vmem [#allocation2], %s2346_s28 }
  0x97   : > { %2706 = dma.done.wait (%p4266_p0), %s255_s7, 6912  }
  0x98   : > { %2708 = vsyncadd (%p4266_p0), %s255_s7, 4294960384  ;;  %p4267_p11 = scmp.eq.s32.totalorder %s2809_s22, 0 }
  0x9a   : > { %2710 = dma.done.wait (%p4267_p11), [#allocation6], 6656   ;;  %p4268_p4 = pmov %p4267_p11 }
  0x9c   : > { %2712 = vsyncadd (%p4268_p4), [#allocation6], 4294960640  ;;  %p4269_p8 = pmov %p4268_p4 }
  0x9d   : > { %p4270_p6 = pmov %p4268_p4 }
  0x9e   : > { %2714 = dma.done.wait (%p4269_p8), [#allocation9], 2560  }
  0x9f   : > { %2716 = vsyncadd (%p4270_p6), [#allocation9], 4294964736  ;;  %v394_v0 = vlaneseq  ;;  %v3028_v6 = vld [vmem:[#allocation5] sm:$0xff]  ;;  %v3037_v11 = vld [vmem:[%s3006_s11 + $0x8] sm:$0xff]  ;;  %s2748_s24 = smov 96   ;;  %s2749_s26 = smov 32  }
  0xa0   : > { %v3031_v7 = vld [vmem:[%s3006_s11] sm:$0xff]  ;;  %v3040_v12 = vld [vmem:[%s3006_s11 + $0x10] sm:$0xff]  ;;  %v3043_v13 = vld [vmem:[%s3006_s11 + $0x18] sm:$0xff]  ;;  %v4190_v21 = vunpack.c.l.bf16 %v3037_v11  ;;  %s2750_s15 = smov 64   ;;  %vm952_vm0 = vcmask 261120   ;;  %vm954_vm1 = vcmask 523264  }
  0xa1   : > { %v3020_v1 = vshrl.u32 %v394_v0, 7  ;;  %4272 = vst [vmem:[#allocation17_spill] sm:$0xff] %v3031_v7  ;;  %v378_v14 = vunpack.c.l.bf16 %v3031_v7  ;;  %v3053_v18 = vld [vmem:[%s3006_s11 + $0x20] sm:$0xff]  ;;  %v3056_v19 = vld [vmem:[%s3006_s11 + $0x28] sm:$0xff]  ;;  %v3059_v20 = vld [vmem:[%s3006_s11 + $0x30] sm:$0xff]  ;;  %v4189_v22 = vunpack.c.l.bf16 %v3040_v12  ;;  %v4186_v23 = vunpack.c.l.bf16 %v3043_v13  ;;  %s2751_s16 = smov 80  }
  0xa2   : > { %v3070_v25 = vld [vmem:[%s3006_s11 + $0x38] sm:$0xff]  ;;  %v4185_v26 = vunpack.c.l.bf16 %v3053_v18  ;;  %v4180_v27 = vunpack.c.l.bf16 %v3056_v19  ;;  %v4179_v28 = vunpack.c.l.bf16 %v3059_v20  ;;  %v3076_v29 = vld [vmem:[%s3006_s11 + $0x48] sm:$0xff]  ;;  %v3079_v30 = vld [vmem:[%s3006_s11 + $0x50] sm:$0xff]  ;;  %vm956_vm2 = vcmask 785408   ;;  %s2752_s13 = smov 112   ;;  %s2753_s27 = smov 16  }
  0xa3   : > { %v3023_v2 = vsub.s32 0, %v3020_v1  ;;  %v4171_v3 = vsub.s32 1, %v3020_v1  ;;  %v4170_v4 = vsub.s32 2, %v3020_v1  ;;  %v4169_v5 = vsub.s32 3, %v3020_v1  ;;  %4273 = vst [vmem:[#allocation18_spill] sm:$0xff] %v3076_v29  ;;  %v3092_v36 = vld [vmem:[%s3006_s11 + $0x58] sm:$0xff] }
  0xa4   : > { %v4178_v32 = vunpack.c.l.bf16 %v3070_v25  ;;  %v3095_v37 = vld [vmem:[%s3006_s11 + $0x60] sm:$0xff]  ;;  %v3098_v38 = vld [vmem:[%s3006_s11 + $0x68] sm:$0xff]  ;;  %v3107_v42 = vld [vmem:[%s3006_s11 + $0x70] sm:$0xff]  ;;  %v443_v45 = vunpack.c.l.bf16 %v3076_v29  ;;  %v4177_v47 = vunpack.c.l.bf16 %v3079_v30  ;;  %v4175_v48 = vunpack.c.l.bf16 %v3092_v36  ;;  %s2754_s17 = smov 48   ;;  %s2347_s9 = smul.u32 96, %s3002_s29 }
  0xa5   : > { %4271 = vst [vmem:[#allocation16_spill] sm:$0xff] %v3023_v2  ;;  %v397_v15 = vrot.slane %v3028_v6, %v3023_v2  ;;  %v462_v16 = vrot.slane %v3028_v6, %v4171_v3  ;;  %v3067_v24 = vrot.slane %v3028_v6, %v4170_v4  ;;  %v3084_v31 = vrot.slane %v3028_v6, %v4169_v5  ;;  %v3110_v43 = vld [vmem:[%s3006_s11 + $0x78] sm:$0xff]  ;;  %v3113_v44 = vld [vmem:[%s3006_s11 + $0x80] sm:$0xff]  ;;  %v3132_v58 = vld [vmem:[%s3006_s11 + $0x90] sm:$0xff]  ;;  %s2348_s6 = smul.u32 1536, %s2809_s22  ;;  %s2040_s7 = scalar_lea.sflag [#allocation4], %s3002_s29 }
  0xa6   : > { %4274 = vst [vmem:[#allocation19_spill] sm:$0xff] %v3113_v44  ;;  %v4172_v49 = vunpack.c.l.bf16 %v3095_v37  ;;  %v4173_v50 = vunpack.c.l.bf16 %v3098_v38  ;;  %v4174_v51 = vunpack.c.l.bf16 %v3107_v42  ;;  %v4176_v52 = vunpack.c.l.bf16 %v3110_v43  ;;  %4275 = vst [vmem:[#allocation20_spill] sm:$0xff] %v3132_v58  ;;  %v3135_v59 = vld [vmem:[%s3006_s11 + $0x98] sm:$0xff]  ;;  %v3146_v0 = vld [vmem:[%s3006_s11 + $0xa0] sm:$0xff]  ;;  %s4082_s10 = scalar_lea.vmem [#allocation11], %s2347_s9 }
  0xa7   : > { %v402_v33 = vmul.f32 %v397_v15, %v378_v14  ;;  %v404_v34 = vmul.f32 %v397_v15, %v4190_v21  ;;  %v406_v35 = vmul.f32 %v397_v15, %v4189_v22  ;;  %v408_v39 = vmul.f32 %v397_v15, %v4186_v23  ;;  %v3149_v14 = vld [vmem:[%s3006_s11 + $0xa8] sm:$0xff]  ;;  %v3211_v23 = vld [vmem:[%s3006_s11 + $0x100] sm:$0xff]  ;;  %v3250_v8 = vld [vmem:[%s3006_s11 + $0x150] sm:$0xff]  ;;  %s2053_s14 = sshll.u32 %s4082_s10, 4  ;;  %s4105_s28 = scalar_lea.hbm %s4164_s5, %s2348_s6  ;;  %s4107_s14 = int_to_ptr.vmem [resolvable:$true] %s2053_s14 }
  0xa8   : > { %v410_v40 = vmul.f32 %v397_v15, %v4185_v26  ;;  %v412_v41 = vmul.f32 %v397_v15, %v4180_v27  ;;  %v414_v46 = vmul.f32 %v397_v15, %v4179_v28  ;;  %v4183_v53 = vunpack.c.l.bf16 %v3113_v44  ;;  %4285 = vst [vmem:[#allocation30_spill] sm:$0xff] %v3211_v23  ;;  %v3247_v9 = vld [vmem:[%s3006_s11 + $0x148] sm:$0xff]  ;;  %4294 = vst [vmem:[#allocation39_spill] sm:$0xff] %v3250_v8 }
  0xa9   : > { %v467_v54 = vmul.f32 %v462_v16, %v443_v45  ;;  %v469_v55 = vmul.f32 %v462_v16, %v4177_v47  ;;  %v471_v56 = vmul.f32 %v462_v16, %v4175_v48  ;;  %v473_v57 = vmul.f32 %v462_v16, %v4172_v49  ;;  %v3152_v45 = vld [vmem:[%s3006_s11 + $0xb0] sm:$0xff]  ;;  %v3157_v49 = vld [vmem:[%s3006_s11 + $0xb8] sm:$0xff]  ;;  %4293 = vst [vmem:[#allocation38_spill] sm:$0xff] %v3247_v9 }
  0xaa   : > { %v416_v60 = vmul.f32 %v397_v15, %v4178_v32  ;;  %v475_v61 = vmul.f32 %v462_v16, %v4173_v50  ;;  %v477_v62 = vmul.f32 %v462_v16, %v4174_v51  ;;  %v479_v63 = vmul.f32 %v462_v16, %v4176_v52  ;;  %4276 = vst [vmem:[#allocation21_spill] sm:$0xff] %v3152_v45  ;;  %v3160_v50 = vld [vmem:[%s3006_s11 + $0xc0] sm:$0xff]  ;;  %v3163_v51 = vld [vmem:[%s3006_s11 + $0xc8] sm:$0xff] }
  0xab   : > { %v481_v5 = vmul.f32 %v462_v16, %v4183_v53  ;;  %v483_v4 = vadd.f32 %v467_v54, %v402_v33  ;;  %v485_v15 = vadd.f32 %v469_v55, %v404_v34  ;;  %v487_v3 = vadd.f32 %v471_v56, %v406_v35  ;;  %4277 = vst [vmem:[#allocation22_spill] sm:$0xff] %v3157_v49  ;;  %v3184_v56 = vld [vmem:[%s3006_s11 + $0xd8] sm:$0xff] }
  0xac   : > { %4278 = vst [vmem:[#allocation23_spill] sm:$0xff] %v3160_v50  ;;  %4279 = vst [vmem:[#allocation24_spill] sm:$0xff] %v3163_v51  ;;  %v489_v48 = vadd.f32 %v473_v57, %v408_v39  ;;  %v491_v52 = vadd.f32 %v475_v61, %v410_v40  ;;  %v493_v47 = vadd.f32 %v477_v62, %v412_v41  ;;  %v508_v28 = vunpack.c.l.bf16 %v3132_v58  ;;  %v3187_v57 = vld [vmem:[%s3006_s11 + $0xe0] sm:$0xff]  ;;  %v3205_v53 = vld [vmem:[%s3006_s11 + $0xf8] sm:$0xff] }
  0xad   : > { %v495_v32 = vadd.f32 %v479_v63, %v414_v46  ;;  %v4191_v27 = vunpack.c.l.bf16 %v3135_v59  ;;  %v4181_v16 = vunpack.c.l.bf16 %v3146_v0  ;;  %v4182_v33 = vunpack.c.l.bf16 %v3149_v14  ;;  %4280 = vst [vmem:[#allocation25_spill] sm:$0xff] %v3184_v56  ;;  %4281 = vst [vmem:[#allocation26_spill] sm:$0xff] %v3187_v57  ;;  %v3269_v58 = vld [vmem:[%s3006_s11 + $0x180] sm:$0xff] }
  0xae   : > { %v4184_v34 = vunpack.c.l.bf16 %v3152_v45  ;;  %v4187_v35 = vunpack.c.l.bf16 %v3157_v49  ;;  %v4188_v39 = vunpack.c.l.bf16 %v3160_v50  ;;  %v4192_v40 = vunpack.c.l.bf16 %v3163_v51  ;;  %4284 = vst [vmem:[#allocation29_spill] sm:$0xff] %v3205_v53  ;;  %4299 = vst [vmem:[#allocation44_spill] sm:$0xff] %v3269_v58 }
  0xaf   : > { %v532_v41 = vmul.f32 %v3067_v24, %v508_v28  ;;  %v534_v46 = vmul.f32 %v3067_v24, %v4191_v27  ;;  %v536_v54 = vmul.f32 %v3067_v24, %v4181_v16  ;;  %v538_v55 = vmul.f32 %v3067_v24, %v4182_v33  ;;  %v3199_v16 = vld [vmem:[%s3006_s11 + $0xe8] sm:$0xff]  ;;  %v3202_v33 = vld [vmem:[%s3006_s11 + $0xf0] sm:$0xff] }
  0xb0   : > { %v497_v28 = vadd.f32 %v481_v5, %v416_v60  ;;  %v540_v61 = vmul.f32 %v3067_v24, %v4184_v34  ;;  %v542_v62 = vmul.f32 %v3067_v24, %v4187_v35  ;;  %v544_v63 = vmul.f32 %v3067_v24, %v4188_v39  ;;  %4282 = vst [vmem:[#allocation27_spill] sm:$0xff] %v3199_v16  ;;  %v3214_v35 = vld [vmem:[%s3006_s11 + $0x108] sm:$0xff]  ;;  %v3217_v39 = vld [vmem:[%s3006_s11 + $0x110] sm:$0xff] }
  0xb1   : > { %4283 = vst [vmem:[#allocation28_spill] sm:$0xff] %v3202_v33  ;;  %v546_v5 = vmul.f32 %v3067_v24, %v4192_v40  ;;  %v548_v60 = vadd.f32 %v532_v41, %v483_v4  ;;  %v550_v34 = vadd.f32 %v534_v46, %v485_v15  ;;  %v552_v26 = vadd.f32 %v536_v54, %v487_v3  ;;  %v3234_v46 = vld [vmem:[%s3006_s11 + $0x130] sm:$0xff]  ;;  %v3237_v54 = vld [vmem:[%s3006_s11 + $0x138] sm:$0xff]  ;;  %v3244_v40 = vld [vmem:[%s3006_s11 + $0x140] sm:$0xff] }
  0xb2   : > { %4286 = vst [vmem:[#allocation31_spill] sm:$0xff] %v3214_v35  ;;  %4287 = vst [vmem:[#allocation32_spill] sm:$0xff] %v3217_v39  ;;  %v554_v22 = vadd.f32 %v538_v55, %v489_v48  ;;  %v556_v21 = vadd.f32 %v540_v61, %v491_v52  ;;  %v558_v27 = vadd.f32 %v542_v62, %v493_v47  ;;  %v573_v10 = vunpack.c.l.bf16 %v3184_v56  ;;  %v3228_v47 = vld [vmem:[%s3006_s11 + $0x120] sm:$0xff]  ;;  %v3231_v52 = vld [vmem:[%s3006_s11 + $0x128] sm:$0xff] }
  0xb3   : > { %v560_v17 = vadd.f32 %v544_v63, %v495_v32  ;;  %v575_v4 = vunpack.c.l.bf16 %v3187_v57  ;;  %v577_v3 = vunpack.c.l.bf16 %v3199_v16  ;;  %v579_v24 = vunpack.c.l.bf16 %v3202_v33  ;;  %4288 = vst [vmem:[#allocation33_spill] sm:$0xff] %v3228_v47  ;;  %4289 = vst [vmem:[#allocation34_spill] sm:$0xff] %v3231_v52  ;;  %v3266_v56 = vld [vmem:[%s3006_s11 + $0x178] sm:$0xff] }
  0xb4   : > { %v581_v15 = vunpack.c.l.bf16 %v3205_v53  ;;  %v583_v41 = vunpack.c.l.bf16 %v3211_v23  ;;  %v585_v48 = vunpack.c.l.bf16 %v3214_v35  ;;  %v587_v32 = vunpack.c.l.bf16 %v3217_v39  ;;  %4290 = vst [vmem:[#allocation35_spill] sm:$0xff] %v3234_v46  ;;  %4291 = vst [vmem:[#allocation36_spill] sm:$0xff] %v3237_v54  ;;  %v3253_v39 = vld [vmem:[%s3006_s11 + $0x158] sm:$0xff]  ;;  %v3259_v23 = vld [vmem:[%s3006_s11 + $0x168] sm:$0xff] }
  0xb5   : > { %v597_v55 = vmul.f32 %v3084_v31, %v573_v10  ;;  %v599_v61 = vmul.f32 %v3084_v31, %v575_v4  ;;  %v601_v62 = vmul.f32 %v3084_v31, %v577_v3  ;;  %v603_v63 = vmul.f32 %v3084_v31, %v579_v24  ;;  %4292 = vst [vmem:[#allocation37_spill] sm:$0xff] %v3244_v40  ;;  %v3262_v24 = vld [vmem:[%s3006_s11 + $0x170] sm:$0xff] }
  0xb6   : > { %4295 = vst [vmem:[#allocation40_spill] sm:$0xff] %v3253_v39  ;;  %v562_v35 = vadd.f32 %v546_v5, %v497_v28  ;;  %v605_v10 = vmul.f32 %v3084_v31, %v581_v15  ;;  %v607_v4 = vmul.f32 %v3084_v31, %v583_v41  ;;  %v609_v3 = vmul.f32 %v3084_v31, %v585_v48  ;;  %v3272_v28 = vld [vmem:[%s3006_s11 + $0x188] sm:$0xff]  ;;  %v3275_v5 = vld [vmem:[%s3006_s11 + $0x190] sm:$0xff] }
  0xb7   : > { %4296 = vst [vmem:[#allocation41_spill] sm:$0xff] %v3259_v23  ;;  %4297 = vst [vmem:[#allocation42_spill] sm:$0xff] %v3262_v24  ;;  %v611_v53 = vmul.f32 %v3084_v31, %v587_v32  ;;  %v613_v33 = vadd.f32 %v597_v55, %v548_v60  ;;  %v615_v16 = vadd.f32 %v599_v61, %v550_v34  ;;  %v638_v2 = vunpack.c.l.bf16 %v3228_v47 }
  0xb8   : > { %v617_v57 = vadd.f32 %v601_v62, %v552_v26  ;;  %4298 = vst [vmem:[#allocation43_spill] sm:$0xff] %v3266_v56  ;;  %4300 = vst [vmem:[#allocation45_spill] sm:$0xff] %v3272_v28  ;;  %v619_v15 = vadd.f32 %v603_v63, %v554_v22  ;;  %v621_v41 = vadd.f32 %v605_v10, %v556_v21  ;;  %v640_v31 = vunpack.c.l.bf16 %v3231_v52  ;;  %v3286_v22 = vld [vmem:[%s3006_s11 + $0x198] sm:$0xff]  ;;  %v3294_v10 = vld [vmem:[%s3006_s11 + $0x1a0] sm:$0xff] }
  0xb9   : > { %4301 = vst [vmem:[#allocation46_spill] sm:$0xff] %v3275_v5  ;;  %v623_v48 = vadd.f32 %v607_v4, %v558_v27  ;;  %v625_v29 = vadd.f32 %v609_v3, %v560_v17  ;;  %v642_v26 = vunpack.c.l.bf16 %v3234_v46  ;;  %v644_v34 = vunpack.c.l.bf16 %v3237_v54  ;;  %v3306_v54 = vld [vmem:[%s3006_s11 + $0x88] sm:$0xff] }
  0xba   : > { %v646_v60 = vunpack.c.l.bf16 %v3244_v40  ;;  %v648_v32 = vunpack.c.l.bf16 %v3247_v9  ;;  %v650_v55 = vunpack.c.l.bf16 %v3250_v8  ;;  %v652_v21 = vunpack.c.l.bf16 %v3253_v39  ;;  %v3301_v9 = vld [vmem:[%s3006_s11 + $0x40] sm:$0xff] }
  0xbb   : > { %v627_v17 = vadd.f32 %v611_v53, %v562_v35  ;;  %v4302_v27 = vsub.s32 4, %v3020_v1  ;;  %v703_v62 = vunpack.c.l.bf16 %v3259_v23  ;;  %v705_v63 = vunpack.c.l.bf16 %v3262_v24  ;;  %v3303_v53 = vld [vmem:[#allocation5 + $0x10] ss:$0 sm:$0xff] }
  0xbc   : > { %v707_v4 = vunpack.c.l.bf16 %v3266_v56  ;;  %v709_v3 = vunpack.c.l.bf16 %v3269_v58  ;;  %v711_v39 = vunpack.c.l.bf16 %v3272_v28  ;;  %v713_v8 = vunpack.c.l.bf16 %v3275_v5 }
  0xbd   : > { %v657_v61 = vrot.slane %v3028_v6, %v4302_v27  ;;  %v715_v28 = vunpack.c.l.bf16 %v3286_v22  ;;  %vm1646_vm3 = vcmask 130048   ;;  %vm1681_vm4 = vcmask 392192  }
  0xbe   : > { %vm1686_vm5 = vcmask 916480   ;;  %vm1689_vm6 = vcmask 654336  }
  0xbf   : > { %v662_v35 = vmul.f32 %v657_v61, %v638_v2  ;;  %v664_v27 = vmul.f32 %v657_v61, %v640_v31  ;;  %v666_v40 = vmul.f32 %v657_v61, %v642_v26  ;;  %v668_v23 = vmul.f32 %v657_v61, %v644_v34 }
  0xc0   : > { %v670_v24 = vmul.f32 %v657_v61, %v646_v60  ;;  %v672_v46 = vmul.f32 %v657_v61, %v648_v32  ;;  %v674_v52 = vmul.f32 %v657_v61, %v650_v55  ;;  %v676_v56 = vmul.f32 %v657_v61, %v652_v21 }
  0xc1   : > { %v678_v47 = vadd.f32 %v662_v35, %v613_v33  ;;  %v680_v58 = vadd.f32 %v664_v27, %v615_v16  ;;  %v682_v7 = vadd.f32 %v666_v40, %v617_v57  ;;  %v684_v5 = vadd.f32 %v668_v23, %v619_v15 }
  0xc2   : > { %v686_v51 = vadd.f32 %v670_v24, %v621_v41  ;;  %v688_v50 = vadd.f32 %v672_v46, %v623_v48  ;;  %v690_v49 = vadd.f32 %v674_v52, %v625_v29  ;;  %v692_v45 = vadd.f32 %v676_v56, %v627_v17 }
  0xc3   : > { %v717_v2 = vunpack.c.l.bf16 %v3294_v10  ;;  %v4303_v31 = vsub.s32 5, %v3020_v1  ;;  %v760_v34 = vunpack.c.l.bf16 %v3301_v9  ;;  %v4304_v60 = vsub.s32 6, %v3020_v1 }
  0xc4   : > { %v803_v33 = vunpack.c.l.bf16 %v3306_v54  ;;  %v4305_v23 = vsub.s32 7, %v3020_v1  ;;  %v4306_v29 = vunpack.c.l.bf16 %v3135_v59 }
  0xc5   : > { %v722_v26 = vrot.slane %v3028_v6, %v4303_v31  ;;  %v765_v16 = vrot.slane %v3028_v6, %v4304_v60  ;;  %v4307_v60 = vunpack.c.l.bf16 %v3037_v11 }
  0xc6   : > { %v808_v40 = vrot.slane %v3028_v6, %v4305_v23  ;;  %v856_v56 = vmul.f32 %v3303_v53, %v4306_v29 }
  0xc7   : > { %v727_v57 = vmul.f32 %v722_v26, %v703_v62  ;;  %v729_v52 = vmul.f32 %v722_v26, %v705_v63  ;;  %v731_v46 = vmul.f32 %v722_v26, %v707_v4  ;;  %v733_v24 = vmul.f32 %v722_v26, %v709_v3 }
  0xc8   : > { %v735_v15 = vmul.f32 %v722_v26, %v711_v39  ;;  %v737_v41 = vmul.f32 %v722_v26, %v713_v8  ;;  %v739_v48 = vmul.f32 %v722_v26, %v715_v28  ;;  %v741_v32 = vmul.f32 %v722_v26, %v717_v2 }
  0xc9   : > { %v743_v55 = vadd.f32 %v727_v57, %v678_v47  ;;  %v745_v21 = vadd.f32 %v729_v52, %v680_v58  ;;  %v747_v17 = vadd.f32 %v731_v46, %v682_v7  ;;  %v749_v61 = vadd.f32 %v733_v24, %v684_v5  ;;  %v3339_v24 = vld [vmem:[%s3006_s11 + $0xd0] sm:$0xff]  ;;  %s2661_s11 = scalar_lea.vmem %s4107_s14, 1536 }
  0xca   : > { %v751_v35 = vadd.f32 %v735_v15, %v686_v51  ;;  %v753_v27 = vadd.f32 %v737_v41, %v688_v50  ;;  %v755_v31 = vadd.f32 %v739_v48, %v690_v49  ;;  %v757_v6 = vadd.f32 %v741_v32, %v692_v45  ;;  %4314 = vst [vmem:[#allocation47_spill] sm:$0xff] %v3339_v24  ;;  %p2662_p3 = scmp.ne.s32.totalorder %s4107_s14, %s2661_s11 }
  0xcb   : > { %v770_v23 = vmul.f32 %v765_v16, %v4307_v60  ;;  %v4308_v62 = vunpack.c.l.bf16 %v3040_v12  ;;  %v4309_v39 = vunpack.c.l.bf16 %v3043_v13  ;;  %v4310_v28 = vunpack.c.l.bf16 %v3053_v18 }
  0xcc   : > { %v4311_v7 = vunpack.c.l.bf16 %v3056_v19  ;;  %v4312_v50 = vunpack.c.l.bf16 %v3059_v20  ;;  %v4313_v51 = vunpack.c.l.bf16 %v3070_v25  ;;  %v784_v5 = vmul.f32 %v765_v16, %v760_v34  ;;  %p2663_p5 = pnand %p2662_p3, %p2947_p10 }
  0xcd   : > { %v772_v63 = vmul.f32 %v765_v16, %v4308_v62  ;;  %v774_v8 = vmul.f32 %v765_v16, %v4309_v39  ;;  %v776_v47 = vmul.f32 %v765_v16, %v4310_v28  ;;  %v786_v4 = vadd.f32 %v770_v23, %v743_v55 }
  0xce   : > { %v778_v58 = vmul.f32 %v765_v16, %v4311_v7  ;;  %v780_v49 = vmul.f32 %v765_v16, %v4312_v50  ;;  %v782_v45 = vmul.f32 %v765_v16, %v4313_v51  ;;  %v800_v46 = vadd.f32 %v784_v5, %v757_v6  ;;  %p2664_p7 = pneg %p2663_p5 }
  0xcf   : > { %v788_v3 = vadd.f32 %v772_v63, %v745_v21  ;;  %v790_v2 = vadd.f32 %v774_v8, %v747_v17  ;;  %v792_v26 = vadd.f32 %v776_v47, %v749_v61  ;;  %v4315_v15 = vunpack.c.l.bf16 %v3079_v30 }
  0xd0   : > { %v794_v29 = vadd.f32 %v778_v58, %v751_v35  ;;  %v796_v57 = vadd.f32 %v780_v49, %v753_v27  ;;  %v798_v52 = vadd.f32 %v782_v45, %v755_v31  ;;  %v4316_v48 = vunpack.c.l.bf16 %v3092_v36  ;;  %v4324_v45 = vld [vmem:[#allocation21_spill] sm:$0xff] }
  0xd1   : > { %v813_v41 = vmul.f32 %v808_v40, %v4315_v15  ;;  %v4317_v60 = vunpack.c.l.bf16 %v3095_v37  ;;  %v4318_v34 = vunpack.c.l.bf16 %v3098_v38  ;;  %v4319_v55 = vunpack.c.l.bf16 %v3107_v42  ;;  %v4331_v15 = vld [vmem:[#allocation24_spill] sm:$0xff] }
  0xd2   : > { %v815_v32 = vmul.f32 %v808_v40, %v4316_v48  ;;  %v4320_v17 = vunpack.c.l.bf16 %v3110_v43  ;;  %v4321_v35 = vunpack.c.l.bf16 %v3113_v44  ;;  %v827_v31 = vmul.f32 %v808_v40, %v803_v33 }
  0xd3   : > { %v817_v62 = vmul.f32 %v808_v40, %v4317_v60  ;;  %v819_v16 = vmul.f32 %v808_v40, %v4318_v34  ;;  %v821_v21 = vmul.f32 %v808_v40, %v4319_v55  ;;  %v829_v6 = vadd.f32 %v813_v41, %v786_v4  ;;  %v4326_v4 = vld [vmem:[#allocation22_spill] sm:$0xff] }
  0xd4   : > { %v823_v61 = vmul.f32 %v808_v40, %v4320_v17  ;;  %v825_v27 = vmul.f32 %v808_v40, %v4321_v35  ;;  %v831_v23 = vadd.f32 %v815_v32, %v788_v3  ;;  %v846_v39 = vunpack.c.l.bf16 %v3339_v24 }
  0xd5   : > { %v833_v63 = vadd.f32 %v817_v62, %v790_v2  ;;  %v835_v8 = vadd.f32 %v819_v16, %v792_v26  ;;  %v837_v28 = vadd.f32 %v821_v21, %v794_v29  ;;  %v4322_v58 = vunpack.c.l.bf16 %v3146_v0  ;;  %v4328_v26 = vld [vmem:[#allocation23_spill] sm:$0xff]  ;;  %v3385_v16 = vld [vmem:[#allocation5 + $0x8] sm:$0xff] }
  0xd6   : > { %v839_v47 = vadd.f32 %v823_v61, %v796_v57  ;;  %v841_v7 = vadd.f32 %v825_v27, %v798_v52  ;;  %v4323_v49 = vunpack.c.l.bf16 %v3149_v14  ;;  %v4325_v5 = vunpack.c.l.bf16 %v4324_v45  ;;  %v4340_v61 = vld [vmem:[#allocation17_spill] sm:$0xff] }
  0xd7   : > { %v858_v50 = vmul.f32 %v3303_v53, %v4322_v58  ;;  %v843_v40 = vadd.f32 %v827_v31, %v800_v46  ;;  %v4327_v3 = vunpack.c.l.bf16 %v4326_v4  ;;  %v4329_v29 = vunpack.c.l.bf16 %v4328_v26  ;;  %v4342_v58 = vld [vmem:[#allocation18_spill] sm:$0xff] }
  0xd8   : > { %v860_v51 = vmul.f32 %v3303_v53, %v4323_v49  ;;  %v862_v33 = vmul.f32 %v3303_v53, %v4325_v5  ;;  %v3371_v52 = vadd.f32 %v856_v56, %v829_v6  ;;  %v4332_v41 = vunpack.c.l.bf16 %v4331_v15 }
  0xd9   : > { %v864_v2 = vmul.f32 %v3303_v53, %v4327_v3  ;;  %v866_v57 = vmul.f32 %v3303_v53, %v4329_v29  ;;  %v870_v32 = vmul.f32 %v3303_v53, %v846_v39  ;;  %v3377_v60 = vadd.f32 %v858_v50, %v831_v23  ;;  %v4341_v23 = vld [vmem:[#allocation16_spill] sm:$0xff] }
  0xda   : > { %4330 = vst [vmem:[#allocation21_spill] sm:$0xff] %v3371_v52  ;;  %v868_v48 = vmul.f32 %v3303_v53, %v4332_v41  ;;  %v3379_v62 = vadd.f32 %v860_v51, %v833_v63  ;;  %v3381_v46 = vadd.f32 %v862_v33, %v835_v8  ;;  %v379_v35 = vunpack.c.h.bf16 %v4340_v61 }
  0xdb   : > { %4333 = vst [vmem:[#allocation48_spill] sm:$0xff] %v3377_v60  ;;  %v888_v34 = vadd.f32 %v3377_v60, %v3371_v52  ;;  %v3387_v55 = vadd.f32 %v864_v2, %v837_v28  ;;  %v3389_v56 = vadd.f32 %v866_v57, %v839_v47  ;;  %v3393_v17 = vadd.f32 %v870_v32, %v843_v40 }
  0xdc   : > { %4334 = vst [vmem:[#allocation49_spill] sm:$0xff] %v3379_v62  ;;  %4335 = vst [vmem:[#allocation50_spill] sm:$0xff] %v3381_v46  ;;  %v3391_v21 = vadd.f32 %v868_v48, %v841_v7  ;;  %v4230_v27 = vunpack.c.h.bf16 %v3037_v11  ;;  %v4228_v31 = vunpack.c.h.bf16 %v3040_v12  ;;  %v4229_v6 = vunpack.c.h.bf16 %v3043_v13 }
  0xdd   : > { %4336 = vst [vmem:[#allocation51_spill] sm:$0xff] %v3387_v55  ;;  %4337 = vst [vmem:[#allocation52_spill] sm:$0xff] %v3389_v56  ;;  %v889_v53 = vadd.f32 %v888_v34, %v3379_v62  ;;  %v401_v63 = vrot.slane %v3385_v16, %v4341_v23  ;;  %v4231_v8 = vunpack.c.h.bf16 %v3053_v18  ;;  %v4232_v28 = vunpack.c.h.bf16 %v3056_v19 }
  0xde   : > { %4338 = vst [vmem:[#allocation53_spill] sm:$0xff] %v3391_v21  ;;  %4339 = vst [vmem:[#allocation54_spill] sm:$0xff] %v3393_v17  ;;  %v4233_v47 = vunpack.c.h.bf16 %v3059_v20  ;;  %v4234_v7 = vunpack.c.h.bf16 %v3070_v25  ;;  %v444_v50 = vunpack.c.h.bf16 %v4342_v58  ;;  %v4235_v49 = vunpack.c.h.bf16 %v3079_v30 }
  0xdf   : > { %v890_v39 = vadd.f32 %v889_v53, %v3381_v46  ;;  %v4236_v51 = vunpack.c.h.bf16 %v3092_v36  ;;  %v4237_v33 = vunpack.c.h.bf16 %v3095_v37  ;;  %v4239_v40 = vunpack.c.h.bf16 %v3098_v38 }
  0xe0   : > { %v4241_v3 = vunpack.c.h.bf16 %v3107_v42  ;;  %v403_v2 = vmul.f32 %v401_v63, %v379_v35  ;;  %v405_v29 = vmul.f32 %v401_v63, %v4230_v27  ;;  %v407_v57 = vmul.f32 %v401_v63, %v4228_v31  ;;  %v4344_v27 = vld [vmem:[#allocation20_spill] sm:$0xff] }
  0xe1   : > { %v891_v5 = vadd.f32 %v890_v39, %v3387_v55  ;;  %v4343_v41 = vsub.s32 1, %v3020_v1  ;;  %v409_v34 = vmul.f32 %v401_v63, %v4229_v6  ;;  %v4243_v53 = vunpack.c.h.bf16 %v3110_v43 }
  0xe2   : > { %v411_v35 = vmul.f32 %v401_v63, %v4231_v8  ;;  %v413_v39 = vmul.f32 %v401_v63, %v4232_v28  ;;  %v415_v58 = vmul.f32 %v401_v63, %v4233_v47  ;;  %v509_v61 = vunpack.c.h.bf16 %v4344_v27 }
  0xe3   : > { %v466_v48 = vrot.slane %v3385_v16, %v4343_v41  ;;  %v892_v32 = vadd.f32 %v891_v5, %v3389_v56  ;;  %v417_v41 = vmul.f32 %v401_v63, %v4234_v7  ;;  %v4345_v7 = vunpack.c.h.bf16 %v3113_v44 }
  0xe5   : > { %v893_v5 = vadd.f32 %v892_v32, %v3391_v21  ;;  %v468_v31 = vmul.f32 %v466_v48, %v444_v50  ;;  %v470_v6 = vmul.f32 %v466_v48, %v4235_v49  ;;  %v472_v8 = vmul.f32 %v466_v48, %v4236_v51 }
  0xe6   : > { %v474_v28 = vmul.f32 %v466_v48, %v4237_v33  ;;  %v476_v47 = vmul.f32 %v466_v48, %v4239_v40  ;;  %v478_v63 = vmul.f32 %v466_v48, %v4241_v3  ;;  %v480_v50 = vmul.f32 %v466_v48, %v4243_v53 }
  0xe7   : > { %v894_v32 = vadd.f32 %v893_v5, %v3393_v17  ;;  %v482_v27 = vmul.f32 %v466_v48, %v4345_v7  ;;  %v484_v3 = vadd.f32 %v468_v31, %v403_v2  ;;  %v486_v55 = vadd.f32 %v470_v6, %v405_v29  ;;  %v4348_v6 = vld [vmem:[#allocation25_spill] sm:$0xff] }
  0xe8   : > { %v4346_v5 = vsub.s32 2, %v3020_v1  ;;  %v488_v17 = vadd.f32 %v472_v8, %v407_v57  ;;  %v490_v46 = vadd.f32 %v474_v28, %v409_v34  ;;  %v492_v7 = vadd.f32 %v476_v47, %v411_v35 }
  0xe9   : > { %v895_v56 = vrot.slane %v894_v32, 4  ;;  %v494_v48 = vadd.f32 %v478_v63, %v413_v39  ;;  %v496_v62 = vadd.f32 %v480_v50, %v415_v58  ;;  %v498_v51 = vadd.f32 %v482_v27, %v417_v41  ;;  %v4353_v39 = vld [vmem:[#allocation26_spill] sm:$0xff]  ;;  %v4354_v58 = vld [vmem:[#allocation27_spill] sm:$0xff]  ;;  %v4356_v27 = vld [vmem:[#allocation29_spill] sm:$0xff] }
  0xea   : > { %v531_v53 = vrot.slane %v3385_v16, %v4346_v5  ;;  %v4251_v33 = vunpack.c.h.bf16 %v4328_v26  ;;  %v4255_v21 = vunpack.c.h.bf16 %v4331_v15  ;;  %v4347_v40 = vunpack.c.h.bf16 %v3135_v59  ;;  %v4359_v26 = vld [vmem:[#allocation31_spill] sm:$0xff] }
  0xeb   : > { %v896_v49 = vadd.f32 %v895_v56, %v894_v32  ;;  %v574_v2 = vunpack.c.h.bf16 %v4348_v6  ;;  %v4349_v5 = vunpack.c.h.bf16 %v3146_v0  ;;  %v4350_v28 = vunpack.c.h.bf16 %v3149_v14 }
  0xec   : > { %v533_v60 = vmul.f32 %v531_v53, %v509_v61  ;;  %v535_v31 = vmul.f32 %v531_v53, %v4347_v40  ;;  %v4351_v56 = vunpack.c.h.bf16 %v4324_v45  ;;  %v4352_v34 = vunpack.c.h.bf16 %v4326_v4  ;;  %v4355_v40 = vld [vmem:[#allocation28_spill] sm:$0xff] }
  0xed   : > { %v897_v29 = vrot.slane %v896_v49, 2  ;;  %v537_v8 = vmul.f32 %v531_v53, %v4349_v5  ;;  %v539_v47 = vmul.f32 %v531_v53, %v4350_v28  ;;  %v576_v61 = vunpack.c.h.bf16 %v4353_v39  ;;  %v4357_v5 = vld [vmem:[#allocation30_spill] sm:$0xff]  ;;  %v4360_v4 = vld [vmem:[#allocation32_spill] sm:$0xff] }
  0xee   : > { %v541_v57 = vmul.f32 %v531_v53, %v4351_v56  ;;  %v543_v35 = vmul.f32 %v531_v53, %v4352_v34  ;;  %v578_v41 = vunpack.c.h.bf16 %v4354_v58  ;;  %v580_v63 = vunpack.c.h.bf16 %v4355_v40 }
  0xef   : > { %v898_v32 = vadd.f32 %v897_v29, %v896_v49  ;;  %v545_v50 = vmul.f32 %v531_v53, %v4251_v33  ;;  %v582_v6 = vunpack.c.h.bf16 %v4356_v27  ;;  %v584_v28 = vunpack.c.h.bf16 %v4357_v5 }
  0xf0   : > { %v547_v56 = vmul.f32 %v531_v53, %v4255_v21  ;;  %v549_v52 = vadd.f32 %v533_v60, %v484_v3  ;;  %v551_v23 = vadd.f32 %v535_v31, %v486_v55  ;;  %v4358_v34 = vsub.s32 3, %v3020_v1  ;;  %v4361_v21 = vld [vmem:[#allocation33_spill] sm:$0xff] }
  0xf1   : > { %v899_v58 = vrot.slane %v898_v32, 1  ;;  %v553_v24 = vadd.f32 %v537_v8, %v488_v17  ;;  %v555_v40 = vadd.f32 %v539_v47, %v490_v46  ;;  %v557_v49 = vadd.f32 %v541_v57, %v492_v7  ;;  %v4363_v17 = vld [vmem:[#allocation35_spill] sm:$0xff]  ;;  %v4365_v47 = vld [vmem:[#allocation37_spill] sm:$0xff] }
  0xf2   : > { %v596_v39 = vrot.slane %v3385_v16, %v4358_v34  ;;  %v559_v29 = vadd.f32 %v543_v35, %v494_v48  ;;  %v586_v33 = vunpack.c.h.bf16 %v4359_v26  ;;  %v588_v27 = vunpack.c.h.bf16 %v4360_v4  ;;  %v4362_v26 = vld [vmem:[#allocation34_spill] sm:$0xff]  ;;  %v4364_v48 = vld [vmem:[#allocation36_spill] sm:$0xff] }
  0xf3   : > { %v3486_v5 = vadd.f32 %v899_v58, %v898_v32  ;;  %v561_v55 = vadd.f32 %v545_v50, %v496_v62  ;;  %v563_v3 = vadd.f32 %v547_v56, %v498_v51  ;;  %v639_v34 = vunpack.c.h.bf16 %v4361_v21  ;;  %v4367_v50 = vld [vmem:[#allocation38_spill] sm:$0xff]  ;;  %v4369_v58 = vld [vmem:[#allocation40_spill] sm:$0xff] }
  0xf4   : > { %v598_v44 = vmul.f32 %v596_v39, %v574_v2  ;;  %v600_v15 = vmul.f32 %v596_v39, %v576_v61  ;;  %v602_v53 = vmul.f32 %v596_v39, %v578_v41  ;;  %v604_v60 = vmul.f32 %v596_v39, %v580_v63 }
  0xf5   : > { %v606_v31 = vmul.f32 %v596_v39, %v582_v6  ;;  %915 = vrot.lane.b32.xlu0 %v3486_v5, %s2748_s24  ;;  %923 = vrot.lane.b32.xlu1 %v3486_v5, %s2749_s26  ;;  %v608_v4 = vmul.f32 %v596_v39, %v584_v28  ;;  %v641_v46 = vunpack.c.h.bf16 %v4362_v26  ;;  %v643_v7 = vunpack.c.h.bf16 %v4363_v17  ;;  %v4368_v28 = vld [vmem:[#allocation39_spill] sm:$0xff]  ;;  %v4373_v17 = vld [vmem:[#allocation44_spill] sm:$0xff] }
  0xf6   : > { %v645_v2 = vunpack.c.h.bf16 %v4364_v48  ;;  %v610_v62 = vmul.f32 %v596_v39, %v586_v33  ;;  %v612_v51 = vmul.f32 %v596_v39, %v588_v27  ;;  %v614_v8 = vadd.f32 %v598_v44, %v549_v52 }
  0xf7   : > { %v647_v21 = vunpack.c.h.bf16 %v4365_v47  ;;  %v616_v57 = vadd.f32 %v600_v15, %v551_v23  ;;  %v618_v35 = vadd.f32 %v602_v53, %v553_v24  ;;  %v620_v61 = vadd.f32 %v604_v60, %v555_v40  ;;  %v4370_v40 = vld [vmem:[#allocation41_spill] sm:$0xff]  ;;  %v4372_v60 = vld [vmem:[#allocation43_spill] sm:$0xff] }
  0xf8   : > { %v4366_v41 = vsub.s32 4, %v3020_v1  ;;  %v622_v32 = vadd.f32 %v606_v31, %v557_v49  ;;  %v649_v6 = vunpack.c.h.bf16 %v4367_v50  ;;  %v651_v56 = vunpack.c.h.bf16 %v4368_v28  ;;  %v4371_v49 = vld [vmem:[#allocation42_spill] sm:$0xff]  ;;  %v4374_v47 = vld [vmem:[#allocation45_spill] sm:$0xff] }
  0xf9   : > { %v653_v26 = vunpack.c.h.bf16 %v4369_v58  ;;  %919 = vrot.lane.b32.xlu0 %v3486_v5, %s2750_s15  ;;  %v624_v44 = vadd.f32 %v608_v4, %v559_v29  ;;  %v626_v23 = vadd.f32 %v610_v62, %v561_v55  ;;  %v628_v33 = vadd.f32 %v612_v51, %v563_v3 }
  0xfa   : > { %v661_v63 = vrot.slane %v3385_v16, %v4366_v41  ;;  %v704_v27 = vunpack.c.h.bf16 %v4370_v40  ;;  %v706_v53 = vunpack.c.h.bf16 %v4371_v49  ;;  %v708_v31 = vunpack.c.h.bf16 %v4372_v60 }
  0xfb   : > { %v710_v48 = vunpack.c.h.bf16 %v4373_v17  ;;  %v712_v41 = vunpack.c.h.bf16 %v4374_v47  ;;  %v4375_v55 = vsub.s32 5, %v3020_v1  ;;  %v716_v51 = vunpack.c.h.bf16 %v3286_v22 }
  0xfc   : > { %v663_v52 = vmul.f32 %v661_v63, %v639_v34  ;;  %v665_v15 = vmul.f32 %v661_v63, %v641_v46  ;;  %v667_v24 = vmul.f32 %v661_v63, %v643_v7  ;;  %v669_v39 = vmul.f32 %v661_v63, %v645_v2  ;;  %v4376_v2 = vld [vmem:[#allocation46_spill] sm:$0xff] }
  0xfd   : > { %v671_v50 = vmul.f32 %v661_v63, %v647_v21  ;;  %v673_v28 = vmul.f32 %v661_v63, %v649_v6  ;;  %v675_v58 = vmul.f32 %v661_v63, %v651_v56  ;;  %v677_v29 = vmul.f32 %v661_v63, %v653_v26 }
  0xfe   : > { %v679_v34 = vadd.f32 %v663_v52, %v614_v8  ;;  %v681_v4 = vadd.f32 %v665_v15, %v616_v57  ;;  %v683_v46 = vadd.f32 %v667_v24, %v618_v35  ;;  %v726_v3 = vrot.slane %v3385_v16, %v4375_v55 }
  0xff   : > { %v685_v7 = vadd.f32 %v669_v39, %v620_v61  ;;  %v714_v62 = vunpack.c.h.bf16 %v4376_v2  ;;  %v4377_v40 = vsub.s32 6, %v3020_v1  ;;  %v687_v8 = vadd.f32 %v671_v50, %v622_v32 }
 0x100   : > { %v728_v21 = vmul.f32 %v726_v3, %v704_v27  ;;  %v730_v6 = vmul.f32 %v726_v3, %v706_v53  ;;  %v732_v56 = vmul.f32 %v726_v3, %v708_v31  ;;  %v734_v63 = vmul.f32 %v726_v3, %v710_v48 }
 0x101   : > { %v769_v49 = vrot.slane %v3385_v16, %v4377_v40  ;;  %v689_v57 = vadd.f32 %v673_v28, %v624_v44  ;;  %v691_v35 = vadd.f32 %v675_v58, %v626_v23  ;;  %v736_v26 = vmul.f32 %v726_v3, %v712_v41 }
 0x102   : > { %v693_v52 = vadd.f32 %v677_v29, %v628_v33  ;;  %v744_v15 = vadd.f32 %v728_v21, %v679_v34  ;;  %v746_v24 = vadd.f32 %v730_v6, %v681_v4  ;;  %v748_v61 = vadd.f32 %v732_v56, %v683_v46 }
 0x103   : > { %v718_v39 = vunpack.c.h.bf16 %v3294_v10  ;;  %v738_v60 = vmul.f32 %v726_v3, %v714_v62  ;;  %v750_v22 = vadd.f32 %v734_v63, %v685_v7  ;;  %v4378_v17 = vsub.s32 7, %v3020_v1 }
 0x104   : > { %v4379_v27 = vunpack.c.h.bf16 %v3037_v11  ;;  %v4380_v32 = vunpack.c.h.bf16 %v3040_v12  ;;  %v4381_v23 = vunpack.c.h.bf16 %v3043_v13  ;;  %v4382_v31 = vunpack.c.h.bf16 %v3053_v18 }
 0x105   : > { %v812_v47 = vrot.slane %v3385_v16, %v4378_v17  ;;  %v740_v41 = vmul.f32 %v726_v3, %v716_v51  ;;  %v752_v10 = vadd.f32 %v736_v26, %v687_v8  ;;  %v761_v50 = vunpack.c.h.bf16 %v3301_v9  ;;  %v2220_v16 = vld [vmem:[#allocation5 + $0x18] ss:$0 sm:$0xff] }
 0x106   : > { %v771_v53 = vmul.f32 %v769_v49, %v4379_v27  ;;  %v773_v44 = vmul.f32 %v769_v49, %v4380_v32  ;;  %v775_v33 = vmul.f32 %v769_v49, %v4381_v23  ;;  %v777_v48 = vmul.f32 %v769_v49, %v4382_v31  ;;  %v4396_v17 = vld [vmem:[#allocation19_spill] sm:$0xff]  ;;  %v4398_v32 = vld [vmem:[#allocation22_spill] sm:$0xff] }
 0x107   : > { %v4383_v1 = vunpack.c.h.bf16 %v3056_v19  ;;  %v804_v12 = vunpack.c.h.bf16 %v3306_v54  ;;  %v742_v34 = vmul.f32 %v726_v3, %v718_v39  ;;  %v754_v4 = vadd.f32 %v738_v60, %v689_v57  ;;  %v4400_v31 = vld [vmem:[#allocation47_spill] sm:$0xff] }
 0x108   : > { %v787_v58 = vadd.f32 %v771_v53, %v744_v15  ;;  %v789_v11 = vadd.f32 %v773_v44, %v746_v24  ;;  %v791_v29 = vadd.f32 %v775_v33, %v748_v61  ;;  %v4384_v13 = vunpack.c.h.bf16 %v3059_v20 }
 0x109   : > { %v779_v28 = vmul.f32 %v769_v49, %v4383_v1  ;;  %v793_v18 = vadd.f32 %v777_v48, %v750_v22  ;;  %v4385_v55 = vunpack.c.h.bf16 %v3079_v30  ;;  %v4386_v9 = vunpack.c.h.bf16 %v3092_v36 }
 0x10a   : > { %v781_v46 = vmul.f32 %v769_v49, %v4384_v13  ;;  %v4387_v19 = vunpack.c.h.bf16 %v3095_v37  ;;  %v4388_v51 = vunpack.c.h.bf16 %v3098_v38  ;;  %v756_v21 = vadd.f32 %v740_v41, %v691_v35  ;;  %v4401_v41 = vld [vmem:[#allocation23_spill] sm:$0xff] }
 0x10b   : > { %v814_v7 = vmul.f32 %v812_v47, %v4385_v55  ;;  %v816_v2 = vmul.f32 %v812_v47, %v4386_v9  ;;  %v4389_v54 = vunpack.c.h.bf16 %v3070_v25  ;;  %v795_v6 = vadd.f32 %v779_v28, %v752_v10 }
 0x10c   : > { %v818_v62 = vmul.f32 %v812_v47, %v4387_v19  ;;  %v820_v40 = vmul.f32 %v812_v47, %v4388_v51  ;;  %v4390_v20 = vunpack.c.h.bf16 %v3135_v59  ;;  %v4391_v30 = vunpack.c.h.bf16 %v3107_v42 }
 0x10d   : > { %v783_v3 = vmul.f32 %v769_v49, %v4389_v54  ;;  %v830_v8 = vadd.f32 %v814_v7, %v787_v58  ;;  %v832_v36 = vadd.f32 %v816_v2, %v789_v11  ;;  %v758_v26 = vadd.f32 %v742_v34, %v693_v52  ;;  %v4403_v11 = vld [vmem:[#allocation24_spill] sm:$0xff] }
 0x10e   : > { %v857_v56 = vmul.f32 %v2220_v16, %v4390_v20  ;;  %v822_v63 = vmul.f32 %v812_v47, %v4391_v30  ;;  %v834_v57 = vadd.f32 %v818_v62, %v791_v29  ;;  %v785_v37 = vmul.f32 %v769_v49, %v761_v50 }
 0x10f   : > { %v797_v15 = vadd.f32 %v781_v46, %v754_v4  ;;  %v4392_v38 = vunpack.c.h.bf16 %v3110_v43  ;;  %v836_v35 = vadd.f32 %v820_v40, %v793_v18  ;;  %v4393_v25 = vunpack.c.h.bf16 %v3146_v0 }
 0x110   : > { %v4394_v39 = vunpack.c.h.bf16 %v3149_v14  ;;  %v4395_v60 = vunpack.c.h.bf16 %v4324_v45  ;;  %v799_v22 = vadd.f32 %v783_v3, %v756_v21  ;;  %v4397_v27 = vunpack.c.h.bf16 %v4396_v17  ;;  %v305_v17 = vld [vmem:[#allocation8 + $0x18] sm:$0xff] }
 0x111   : > { %v824_v24 = vmul.f32 %v812_v47, %v4392_v38  ;;  %v859_v61 = vmul.f32 %v2220_v16, %v4393_v25  ;;  %v3560_v52 = vadd.f32 %v857_v56, %v830_v8  ;;  %v838_v49 = vadd.f32 %v822_v63, %v795_v6 }
 0x112   : > { %v861_v59 = vmul.f32 %v2220_v16, %v4394_v39  ;;  %v863_v42 = vmul.f32 %v2220_v16, %v4395_v60  ;;  %v826_v53 = vmul.f32 %v812_v47, %v4397_v27  ;;  %v4399_v43 = vunpack.c.h.bf16 %v4398_v32  ;;  %v302_v39 = vld [vmem:[#allocation8] sm:$0xff]  ;;  %v304_v60 = vld [vmem:[#allocation8 + $0x10] sm:$0xff] }
 0x113   : > { %v3564_v23 = vadd.f32 %v859_v61, %v832_v36  ;;  %v801_v33 = vadd.f32 %v785_v37, %v758_v26  ;;  %v828_v14 = vmul.f32 %v812_v47, %v804_v12  ;;  %v847_v48 = vunpack.c.h.bf16 %v4400_v31  ;;  %v306_v32 = vld [vmem:[#allocation8 + $0x20] sm:$0xff] }
 0x114   : > { %v865_v44 = vmul.f32 %v2220_v16, %v4399_v43  ;;  %v3566_v0 = vadd.f32 %v861_v59, %v834_v57  ;;  %v840_v45 = vadd.f32 %v824_v24, %v797_v15  ;;  %v4402_v10 = vunpack.c.h.bf16 %v4401_v41  ;;  %v303_v59 = vld [vmem:[#allocation8 + $0x8] sm:$0xff] }
 0x115   : > { %v3571_v1 = vadd.f32 %v863_v42, %v836_v35  ;;  %v901_v28 = vadd.f32 %v3564_v23, %v3560_v52  ;;  %v842_v58 = vadd.f32 %v826_v53, %v799_v22  ;;  %v4404_v29 = vunpack.c.h.bf16 %v4403_v11  ;;  %v4405_v53 = vld [vmem:[#allocation16_spill] sm:$0xff]  ;;  %v4406_v41 = vld [vmem:[#allocation21_spill] sm:$0xff] }
 0x116   : > { %v867_v50 = vmul.f32 %v2220_v16, %v4402_v10  ;;  %v3577_v4 = vadd.f32 %v865_v44, %v838_v49  ;;  %v844_v47 = vadd.f32 %v828_v14, %v801_v33  ;;  %v871_v12 = vmul.f32 %v2220_v16, %v847_v48  ;;  %v307_v14 = vld [vmem:[#allocation8 + $0x28] sm:$0xff]  ;;  %v3604_v48 = vld [vmem:[#allocation8 + $0x30] sm:$0xff] }
 0x117   : > { %v869_v34 = vmul.f32 %v2220_v16, %v4404_v29  ;;  %v902_v13 = vadd.f32 %v901_v28, %v3566_v0  ;;  %v310_v43 = vunpack.c.l.bf16 %v302_v39  ;;  %v312_v44 = vunpack.c.l.bf16 %v303_v59  ;;  %v4409_v29 = vld [vmem:[#allocation50_spill] sm:$0xff] }
 0x118   : > { %v3580_v46 = vadd.f32 %v867_v50, %v840_v45  ;;  %v3586_v9 = vadd.f32 %v871_v12, %v844_v47  ;;  %v314_v33 = vunpack.c.l.bf16 %v304_v60  ;;  %v316_v31 = vunpack.c.l.bf16 %v305_v17  ;;  %v3606_v45 = vld [vmem:[#allocation8 + $0x38] sm:$0xff]  ;;  %v4407_v50 = vld [vmem:[#allocation48_spill] sm:$0xff] }
 0x119   : > { %v903_v18 = vadd.f32 %v902_v13, %v3571_v1  ;;  %v3583_v55 = vadd.f32 %v869_v34, %v842_v58  ;;  %v4408_v58 = vld [vmem:[#allocation49_spill] sm:$0xff]  ;;  %v318_v13 = vunpack.c.l.bf16 %v306_v32  ;;  %v4410_v47 = vld [vmem:[#allocation51_spill] sm:$0xff] }
 0x11b   : > { %v904_v7 = vadd.f32 %v903_v18, %v3577_v4  ;;  %v320_v18 = vunpack.c.l.bf16 %v307_v14 }
 0x11d   : > { %v905_v2 = vadd.f32 %v904_v7, %v3580_v46 }
 0x11f   : > { %v906_v19 = vadd.f32 %v905_v2, %v3583_v55 }
 0x121   : > { %v907_v62 = vadd.f32 %v906_v19, %v3586_v9 }
 0x123   : > { %v908_v51 = vrot.slane %v907_v62, 4 }
 0x125   : > { %v909_v40 = vadd.f32 %v908_v51, %v907_v62  ;;  %v322_v62 = vunpack.c.l.bf16 %v3604_v48  ;;  %v324_v51 = vunpack.c.l.bf16 %v3606_v45 }
 0x127   : > { %v910_v21 = vrot.slane %v909_v40, 2 }
 0x129   : > { %v911_v16 = vadd.f32 %v910_v21, %v909_v40  ;;  %v4411_v40 = vld [vmem:[#allocation52_spill] sm:$0xff] }
 0x12b   : > { %v912_v54 = vrot.slane %v911_v16, 1 }
 0x12d   : > { %v913_v3 = vadd.f32 %v912_v54, %v911_v16  ;;  %v311_v16 = vunpack.c.h.bf16 %v302_v39 }
 0x12f   : > { %929 = vrot.lane.b32.xlu1 %v913_v3, %s2748_s24  ;;  %933 = vrot.lane.b32.xlu0 %v913_v3, %s2750_s15 }
 0x133   : > { %937 = vrot.lane.b32.xlu1 %v913_v3, %s2749_s26 }
 0x167   : > { %v916_v6 = vpop.permute.xlu0 %915  ;;  %v924_v63 = vpop.permute.xlu1 %923 }
 0x168   : > { %v918_v56 = vadd.f32 %v916_v6, %v3486_v5 }
 0x16b   : > { %v920_v20 = vpop.permute.xlu0 %919 }
 0x16c   : > { %v922_v30 = vadd.f32 %v920_v20, %v918_v56  ;;  %v313_v20 = vunpack.c.h.bf16 %v303_v59  ;;  %v4412_v56 = vld [vmem:[#allocation53_spill] sm:$0xff] }
 0x16e   : > { %v926_v8 = vadd.f32 %v924_v63, %v922_v30 }
 0x170   : > { %v927_v36 = vadd.f32 %v926_v8, %v913_v3 }
 0x1a1   : > { %v930_v57 = vpop.permute.xlu1 %929  ;;  %v934_v26 = vpop.permute.xlu0 %933 }
 0x1a2   : > { %v932_v37 = vadd.f32 %v930_v57, %v927_v36  ;;  %v315_v36 = vunpack.c.h.bf16 %v304_v60 }
 0x1a4   : > { %v936_v15 = vadd.f32 %v934_v26, %v932_v37 }
 0x1a5   : > { %v938_v38 = vpop.permute.xlu1 %937 }
 0x1a6   : > { %v940_v24 = vadd.f32 %v938_v38, %v936_v15  ;;  %v4413_v38 = vld [vmem:[#allocation54_spill] sm:$0xff] }
 0x1a8   : > { %v941_v35 = vmul.f32 0.015625, %v940_v24 }
 0x1aa   : > { %946 = vrot.lane.b32.xlu1 %v941_v35, %s2750_s15  ;;  %943 = vrot.lane.b32.xlu0 %v941_v35, %s2749_s26 }
 0x1ae   : > { %949 = vrot.lane.b32.xlu0 %v941_v35, %s2748_s24 }
 0x21c   : > { %v944_v25 = vpop.permute.xlu0 %943  ;;  %v947_v5 = vpop.permute.xlu1 %946 }
 0x21d   : > { %v953_v61 = vsel %vm952_vm0, %v941_v35, %v944_v25  ;;  %v317_v25 = vunpack.c.h.bf16 %v305_v17 }
 0x21e   : > { %v955_v42 = vsel %vm954_vm1, %v953_v61, %v947_v5 }
 0x220   : > { %v950_v22 = vpop.permute.xlu0 %949 }
 0x221   : > { %v957_v27 = vsel %vm956_vm2, %v955_v42, %v950_v22 }
 0x222   : > { %v3602_v49 = vrot.slane %v957_v27, %v4405_v53  ;;  %v321_v27 = vunpack.c.h.bf16 %v307_v14 }
 0x224   : > { %v962_v10 = vsub.f32 %v4406_v41, %v3602_v49  ;;  %v964_v28 = vsub.f32 %v4407_v50, %v3602_v49  ;;  %v966_v11 = vsub.f32 %v4408_v58, %v3602_v49  ;;  %v968_v34 = vsub.f32 %v4409_v29, %v3602_v49 }
 0x225   : > { %v970_v12 = vsub.f32 %v4410_v47, %v3602_v49  ;;  %v972_v21 = vsub.f32 %v4411_v40, %v3602_v49  ;;  %v974_v30 = vsub.f32 %v4412_v56, %v3602_v49  ;;  %v963_v26 = vsub.f32 %v3560_v52, %v3602_v49 }
 0x226   : > { %v3618_v7 = vmul.f32 %v962_v10, %v310_v43  ;;  %v3620_v2 = vmul.f32 %v964_v28, %v312_v44  ;;  %v3622_v19 = vmul.f32 %v966_v11, %v314_v33  ;;  %v3628_v54 = vmul.f32 %v968_v34, %v316_v31 }
 0x227   : > { %v3636_v63 = vmul.f32 %v970_v12, %v318_v13  ;;  %v965_v37 = vsub.f32 %v3564_v23, %v3602_v49  ;;  %v967_v15 = vsub.f32 %v3566_v0, %v3602_v49  ;;  %v976_v24 = vsub.f32 %v4413_v38, %v3602_v49 }
 0x228   : > { %v994_v3 = vmul.f32 %v3618_v7, %v3618_v7  ;;  %v996_v6 = vmul.f32 %v3620_v2, %v3620_v2  ;;  %v998_v8 = vmul.f32 %v3622_v19, %v3622_v19  ;;  %v3648_v35 = vmul.f32 %v972_v21, %v320_v18 }
 0x229   : > { %v969_v5 = vsub.f32 %v3571_v1, %v3602_v49  ;;  %v1000_v61 = vmul.f32 %v3628_v54, %v3628_v54  ;;  %v3654_v52 = vmul.f32 %v963_v26, %v311_v16  ;;  %v3656_v59 = vmul.f32 %v965_v37, %v313_v20 }
 0x22a   : > { %v1010_v57 = vadd.f32 %v996_v6, %v994_v3  ;;  %v319_v23 = vunpack.c.h.bf16 %v306_v32  ;;  %v971_v0 = vsub.f32 %v3577_v4, %v3602_v49  ;;  %v3660_v60 = vmul.f32 %v967_v15, %v315_v36 }
 0x22b   : > { %v3662_v42 = vmul.f32 %v974_v30, %v322_v62  ;;  %v1002_v22 = vmul.f32 %v3636_v63, %v3636_v63  ;;  %v995_v17 = vmul.f32 %v3654_v52, %v3654_v52  ;;  %v973_v43 = vsub.f32 %v3580_v46, %v3602_v49 }
 0x22c   : > { %v1011_v39 = vadd.f32 %v1010_v57, %v998_v8  ;;  %v3670_v44 = vmul.f32 %v969_v5, %v317_v25  ;;  %v997_v4 = vmul.f32 %v3656_v59, %v3656_v59  ;;  %v3674_v32 = vmul.f32 %v976_v24, %v324_v51  ;;  %v2451_v5 = vld [vmem:[#allocation7 + $0x4] ss:$12 sps:$4 sm:$0xff]  }
 0x22d   : > { %v1004_v33 = vmul.f32 %v3648_v35, %v3648_v35  ;;  %v323_v41 = vunpack.c.h.bf16 %v3604_v48  ;;  %v975_v10 = vsub.f32 %v3583_v55, %v3602_v49  ;;  %v3681_v14 = vmul.f32 %v971_v0, %v319_v23  ;;  %1443 = vmatprep.subr.bf16.mxu0 %v2451_v5  ;;  %v2456_v23 = vld [vmem:[#allocation7 + $0x18] ss:$12 sps:$4 sm:$0xff]   ;;  %v2457_v0 = vld [vmem:[#allocation7 + $0x34] ss:$12 sps:$4 sm:$0xff]  }
 0x22e   : > { %v1012_v1 = vadd.f32 %v1011_v39, %v1000_v61  ;;  %v999_v46 = vmul.f32 %v3660_v60, %v3660_v60  ;;  %v1023_v50 = vadd.f32 %v997_v4, %v995_v17  ;;  %v1006_v28 = vmul.f32 %v3662_v42, %v3662_v42  ;;  %v2453_v61 = vld [vmem:[#allocation7] ss:$12 sps:$4 sm:$0xff]   ;;  %v2454_v39 = vld [vmem:[#allocation7 + $0x1c] ss:$12 sps:$4 sm:$0xff]  }
 0x22f   : > { %v325_v11 = vunpack.c.h.bf16 %v3606_v45  ;;  %v977_v29 = vsub.f32 %v3586_v9, %v3602_v49  ;;  %v3690_v34 = vmul.f32 %v973_v43, %v321_v27  ;;  %v1001_v55 = vmul.f32 %v3670_v44, %v3670_v44  ;;  %1444 = vmatpush1.bf16.msra.mxu0 %v2453_v61  ;;  %v2459_v17 = vld [vmem:[#allocation7 + $0x30] ss:$12 sps:$4 sm:$0xff]   ;;  %v2482_v27 = vld [vmem:[#allocation7 + $0xe0] ss:$12 sps:$4 sm:$0xff]  }
 0x230   : > { %v1013_v31 = vadd.f32 %v1012_v1, %v1002_v22  ;;  %v1024_v48 = vadd.f32 %v1023_v50, %v999_v46  ;;  %v1008_v13 = vmul.f32 %v3674_v32, %v3674_v32  ;;  %v3696_v12 = vmul.f32 %v975_v10, %v323_v41  ;;  %1445 = vmatprep.subr.bf16.mxu0 %v2454_v39  ;;  %v2477_v22 = vld [vmem:[#allocation7 + $0xc8] ss:$12 sps:$4 sm:$0xff]   ;;  %v2460_v43 = vld [vmem:[#allocation7 + $0x4c] ss:$12 sps:$4 sm:$0xff]   ;;  %v2463_v41 = vld [vmem:[#allocation7 + $0x64] ss:$12 sps:$4 sm:$0xff]  }
 0x231   : > { %v1003_v18 = vmul.f32 %v3681_v14, %v3681_v14  ;;  %v3700_v51 = vmul.f32 %v977_v29, %v325_v11  ;;  %v1005_v9 = vmul.f32 %v3690_v34, %v3690_v34  ;;  %v2479_v1 = vld [vmem:[#allocation7 + $0x8] ss:$12 sps:$4 sm:$0xff]   ;;  %2304 = vmatprep.subr.bf16.mxu1 %v2477_v22  ;;  %v2484_v4 = vld [vmem:[#allocation7 + $0x20] ss:$12 sps:$4 sm:$0xff]   ;;  %v2489_v10 = vld [vmem:[#allocation7 + $0x38] ss:$12 sps:$4 sm:$0xff]  }
 0x232   : > { %v1014_v58 = vadd.f32 %v1013_v31, %v1004_v33  ;;  %v1025_v62 = vadd.f32 %v1024_v48, %v1001_v55  ;;  %v1007_v21 = vmul.f32 %v3696_v12, %v3696_v12  ;;  %2305 = vmatpush3.bf16.msra.mxu1 %v2479_v1  ;;  %v2487_v33 = vld [vmem:[#allocation7 + $0xf8] ss:$12 sps:$4 sm:$0xff]   ;;  %v2462_v31 = vld [vmem:[#allocation7 + $0x48] ss:$12 sps:$4 sm:$0xff]   ;;  %v2492_v46 = vld [vmem:[#allocation7 + $0x110] ss:$12 sps:$4 sm:$0xff]  }
 0x233   : > { %v1009_v6 = vmul.f32 %v3700_v51, %v3700_v51  ;;  %1446 = vmatpush1.bf16.msra.mxu0 %v2456_v23  ;;  %2306 = vmatprep.subr.bf16.mxu1 %v2482_v27  ;;  %v2465_v50 = vld [vmem:[#allocation7 + $0x60] ss:$12 sps:$4 sm:$0xff]   ;;  %v2497_v11 = vld [vmem:[#allocation7 + $0x128] ss:$12 sps:$4 sm:$0xff]   ;;  %v2468_v29 = vld [vmem:[#allocation7 + $0x78] ss:$12 sps:$4 sm:$0xff]  }
 0x234   : > { %v1015_v47 = vadd.f32 %v1014_v58, %v1006_v28  ;;  %v1026_v49 = vadd.f32 %v1025_v62, %v1003_v18  ;;  %1447 = vmatprep.subr.bf16.mxu0 %v2457_v0  ;;  %v2466_v28 = vld [vmem:[#allocation7 + $0x7c] ss:$12 sps:$4 sm:$0xff]   ;;  %v2469_v55 = vld [vmem:[#allocation7 + $0x94] ss:$12 sps:$4 sm:$0xff]   ;;  %v2475_v62 = vld [vmem:[#allocation7 + $0xc4] ss:$12 sps:$4 sm:$0xff]  }
 0x235   : > { %v2494_v58 = vld [vmem:[#allocation7 + $0x50] ss:$12 sps:$4 sm:$0xff]   ;;  %v2499_v48 = vld [vmem:[#allocation7 + $0x68] ss:$12 sps:$4 sm:$0xff]   ;;  %v2503_v27 = vld [vmem:[#allocation7 + $0x138] ss:$12 sps:$4 sm:$0xff]  }
 0x236   : > { %v1016_v45 = vadd.f32 %v1015_v47, %v1008_v13  ;;  %v1027_v16 = vadd.f32 %v1026_v49, %v1005_v9  ;;  %2307 = vmatpush3.bf16.msra.mxu1 %v2484_v4  ;;  %v2471_v13 = vld [vmem:[#allocation7 + $0x90] ss:$12 sps:$4 sm:$0xff]   ;;  %v2472_v47 = vld [vmem:[#allocation7 + $0xac] ss:$12 sps:$4 sm:$0xff]   ;;  %v2474_v18 = vld [vmem:[#allocation7 + $0xa8] ss:$12 sps:$4 sm:$0xff]  }
 0x237   : > { %1448 = vmatpush1.bf16.msra.mxu0 %v2459_v17  ;;  %2308 = vmatprep.subr.bf16.mxu1 %v2487_v33  ;;  %v2480_v9 = vld [vmem:[#allocation7 + $0xdc] ss:$12 sps:$4 sm:$0xff]   ;;  %v2483_v49 = vld [vmem:[#allocation7 + $0xd8] ss:$12 sps:$4 sm:$0xff]   ;;  %v2502_v17 = vld [vmem:[#allocation7 + $0x140] ss:$12 sps:$4 sm:$0xff]  }
 0x238   : > { %v1017_v40 = vrot.slane %v1016_v45, 4  ;;  %v1028_v20 = vadd.f32 %v1027_v16, %v1007_v21  ;;  %1449 = vmatprep.subr.bf16.mxu0 %v2460_v43  ;;  %v2488_v21 = vld [vmem:[#allocation7 + $0xf0] ss:$12 sps:$4 sm:$0xff]   ;;  %v2490_v16 = vld [vmem:[#allocation7 + $0x10c] ss:$12 sps:$4 sm:$0xff]  }
 0x239   : > { %v2500_v1 = vld [vmem:[#allocation7 + $0x13c] ss:$12 sps:$4 sm:$0xff]   ;;  %v2504_v43 = vld [vmem:[#allocation7 + $0x80] ss:$12 sps:$4 sm:$0xff]   ;;  %v2507_v4 = vld [vmem:[#allocation7 + $0x158] ss:$12 sps:$4 sm:$0xff]  }
 0x23a   : > { %v1018_v3 = vadd.f32 %v1017_v40, %v1016_v45  ;;  %v1029_v30 = vadd.f32 %v1028_v20, %v1009_v6  ;;  %2309 = vmatpush3.bf16.msra.mxu1 %v2489_v10  ;;  %v2478_v45 = vld [vmem:[#allocation7 + $0xc0] ss:$12 sps:$4 sm:$0xff]   ;;  %v2495_v6 = vld [vmem:[#allocation7 + $0x124] ss:$12 sps:$4 sm:$0xff]   ;;  %v2513_v10 = vld [vmem:[#allocation7 + $0x168] ss:$12 sps:$4 sm:$0xff]  }
 0x23b   : > { %1450 = vmatpush1.bf16.msra.mxu0 %v2462_v31  ;;  %2310 = vmatprep.subr.bf16.mxu1 %v2492_v46  ;;  %v2485_v40 = vld [vmem:[#allocation7 + $0xf4] ss:$12 sps:$4 sm:$0xff]   ;;  %v2508_v33 = vld [vmem:[#allocation7 + $0x150] ss:$12 sps:$4 sm:$0xff]   ;;  %v2510_v31 = vld [vmem:[#allocation7 + $0x16c] ss:$12 sps:$4 sm:$0xff]  }
 0x23c   : > { %v1019_v56 = vrot.slane %v1018_v3, 2  ;;  %v1030_v36 = vrot.slane %v1029_v30, 4  ;;  %1451 = vmatprep.subr.bf16.mxu0 %v2463_v41  ;;  %v2498_v20 = vld [vmem:[#allocation7 + $0x120] ss:$12 sps:$4 sm:$0xff]   ;;  %v2512_v41 = vld [vmem:[#allocation7 + $0x170] ss:$12 sps:$4 sm:$0xff]  }
 0x23d   : > { %v2514_v46 = vld [vmem:[#allocation7 + $0xb0] ss:$12 sps:$4 sm:$0xff]  }
 0x23e   : > { %v1020_v8 = vadd.f32 %v1019_v56, %v1018_v3  ;;  %v1031_v26 = vadd.f32 %v1030_v36, %v1029_v30  ;;  %2311 = vmatpush3.bf16.msra.mxu1 %v2494_v58  ;;  %v2493_v3 = vld [vmem:[#allocation7 + $0x108] ss:$12 sps:$4 sm:$0xff]  }
 0x23f   : > { %1452 = vmatpush1.bf16.msra.mxu0 %v2465_v50  ;;  %2312 = vmatprep.subr.bf16.mxu1 %v2497_v11 }
 0x240   : > { %v1021_v57 = vrot.slane %v1020_v8, 1  ;;  %v1032_v15 = vrot.slane %v1031_v26, 2  ;;  %1453 = vmatprep.subr.bf16.mxu0 %v2466_v28 }
 0x242   : > { %v3708_v37 = vadd.f32 %v1021_v57, %v1020_v8  ;;  %v1033_v38 = vadd.f32 %v1032_v15, %v1031_v26  ;;  %2313 = vmatpush3.bf16.msra.mxu1 %v2499_v48 }
 0x243   : > { %1454 = vmatpush1.bf16.msra.mxu0 %v2468_v29  ;;  %2314 = vmatprep.subr.bf16.mxu1 %v2502_v17 }
 0x244   : > { %1041 = vrot.lane.b32.xlu0 %v3708_v37, %s2750_s15  ;;  %1037 = vrot.lane.b32.xlu1 %v3708_v37, %s2748_s24  ;;  %v1034_v24 = vrot.slane %v1033_v38, 1 }
 0x245   : > { %1455 = vmatprep.subr.bf16.mxu0 %v2469_v55 }
 0x246   : > { %v3716_v25 = vadd.f32 %v1034_v24, %v1033_v38  ;;  %2315 = vmatpush3.bf16.msra.mxu1 %v2504_v43 }
 0x247   : > { %1456 = vmatpush1.bf16.msra.mxu0 %v2471_v13  ;;  %2316 = vmatprep.subr.bf16.mxu1 %v2507_v4 }
 0x248   : > { %1045 = vrot.lane.b32.xlu1 %v3708_v37, %s2749_s26  ;;  %1051 = vrot.lane.b32.xlu0 %v3716_v25, %s2748_s24 }
 0x249   : > { %1457 = vmatprep.subr.bf16.mxu0 %v2472_v47 }
 0x24b   : > { %1458 = vmatpush1.bf16.msra.mxu0 %v2474_v18 }
 0x24c   : > { %1055 = vrot.lane.b32.xlu1 %v3716_v25, %s2750_s15  ;;  %1059 = vrot.lane.b32.xlu0 %v3716_v25, %s2749_s26 }
 0x24d   : > { %1459 = vmatprep.subr.bf16.mxu0 %v2475_v62 }
 0x24f   : > { %1460 = vmatpush1.bf16.msra.mxu0 %v2478_v45 }
 0x250   : > { %1461 = vmatprep.subr.bf16.mxu0 %v2480_v9 }
 0x253   : > { %1462 = vmatpush1.bf16.msra.mxu0 %v2483_v49 }
 0x254   : > { %1463 = vmatprep.subr.bf16.mxu0 %v2485_v40 }
 0x257   : > { %1464 = vmatpush1.bf16.msra.mxu0 %v2488_v21 }
 0x258   : > { %1465 = vmatprep.subr.bf16.mxu0 %v2490_v16 }
 0x25b   : > { %1466 = vmatpush1.bf16.msra.mxu0 %v2493_v3 }
 0x25c   : > { %1467 = vmatprep.subr.bf16.mxu0 %v2495_v6 }
 0x25f   : > { %1468 = vmatpush1.bf16.msra.mxu0 %v2498_v20 }
 0x260   : > { %1469 = vmatprep.subr.bf16.mxu0 %v2500_v1 }
 0x263   : > { %1470 = vmatpush1.bf16.msra.mxu0 %v2503_v27 }
 0x2b6   : > { %v1038_v56 = vpop.permute.xlu1 %1037  ;;  %v1042_v30 = vpop.permute.xlu0 %1041 }
 0x2b7   : > { %v1040_v8 = vadd.f32 %v1038_v56, %v3708_v37  ;;  %v2505_v37 = vld [vmem:[#allocation7 + $0x154] ss:$12 sps:$4 sm:$0xff]  }
 0x2b8   : > { %1471 = vmatprep.subr.bf16.mxu0 %v2505_v37 }
 0x2b9   : > { %v1044_v36 = vadd.f32 %v1042_v30, %v1040_v8  ;;  %1472 = vmatpush1.bf16.msra.mxu0 %v2508_v33 }
 0x2ba   : > { %v1046_v57 = vpop.permute.xlu1 %1045  ;;  %v1052_v15 = vpop.permute.xlu0 %1051  ;;  %1473 = vmatprep.subr.bf16.mxu0 %v2510_v31 }
 0x2bb   : > { %v1048_v26 = vadd.f32 %v1046_v57, %v1044_v36 }
 0x2bd   : > { %v1049_v38 = vadd.f32 %v1048_v26, %v3716_v25  ;;  %v2509_v25 = vld [vmem:[#allocation7 + $0x98] ss:$12 sps:$4 sm:$0xff]   ;;  %1474 = vmatpush1.bf16.msra.mxu0 %v2513_v10 }
 0x2be   : > { %v1056_v5 = vpop.permute.xlu1 %1055  ;;  %v1060_v39 = vpop.permute.xlu0 %1059  ;;  %2317 = vmatpush3.bf16.msra.mxu1 %v2509_v25 }
 0x2bf   : > { %v1054_v24 = vadd.f32 %v1052_v15, %v1049_v38  ;;  %2318 = vmatprep.subr.bf16.mxu1 %v2512_v41 }
 0x2c1   : > { %v1058_v61 = vadd.f32 %v1056_v5, %v1054_v24 }
 0x2c2   : > { %2319 = vmatpush3.bf16.msra.mxu1 %v2514_v46 }
 0x2c3   : > { %v1062_v23 = vadd.f32 %v1060_v39, %v1058_v61 }
 0x2c5   : > { %v1063_v0 = vmul.f32 0.015625, %v1062_v23 }
 0x2c7   : > { %v1064_v22 = vadd.f32 1e-05, %v1063_v0 }
 0x2c9   : > { %2515 = vrsqrt.f32 %v1064_v22 }
 0x2d3   : > { %v2516_v50 = vpop.eup %2515 }
 0x2d4   : > { %1070 = vrot.lane.b32.xlu0 %v2516_v50, %s2750_s15  ;;  %1067 = vrot.lane.b32.xlu1 %v2516_v50, %s2749_s26 }
 0x2d8   : > { %1073 = vrot.lane.b32.xlu1 %v2516_v50, %s2748_s24 }
 0x346   : > { %v1068_v28 = vpop.permute.xlu1 %1067  ;;  %v1071_v58 = vpop.permute.xlu0 %1070 }
 0x347   : > { %v1076_v11 = vsel %vm952_vm0, %v2516_v50, %v1068_v28 }
 0x348   : > { %v1077_v29 = vsel %vm954_vm1, %v1076_v11, %v1071_v58 }
 0x34a   : > { %v1074_v55 = vpop.permute.xlu1 %1073 }
 0x34b   : > { %v1078_v48 = vsel %vm956_vm2, %v1077_v29, %v1074_v55 }
 0x34c   : > { %v1082_v13 = vrot.slane %v1078_v48, %v4405_v53 }
 0x34e   : > { %v1084_v47 = vmul.f32 %v1082_v13, %v3654_v52  ;;  %v1086_v18 = vmul.f32 %v1082_v13, %v3656_v59  ;;  %v1083_v62 = vmul.f32 %v1082_v13, %v3618_v7  ;;  %v1085_v45 = vmul.f32 %v1082_v13, %v3620_v2 }
 0x34f   : > { %v1088_v9 = vmul.f32 %v1082_v13, %v3660_v60  ;;  %v1090_v49 = vmul.f32 %v1082_v13, %v3670_v44  ;;  %v1087_v52 = vmul.f32 %v1082_v13, %v3622_v19  ;;  %v1089_v59 = vmul.f32 %v1082_v13, %v3628_v54 }
 0x350   : > { %v1100_v40 = vmax.f32 %v1084_v47, 0.0  ;;  %v1102_v21 = vmax.f32 %v1086_v18, 0.0  ;;  %v1099_v16 = vmax.f32 %v1083_v62, 0.0  ;;  %v1101_v3 = vmax.f32 %v1085_v45, 0.0 }
 0x351   : > { %v1104_v6 = vmax.f32 %v1088_v9, 0.0  ;;  %v1106_v20 = vmax.f32 %v1090_v49, 0.0  ;;  %v1092_v2 = vmul.f32 %v1082_v13, %v3681_v14  ;;  %v1094_v60 = vmul.f32 %v1082_v13, %v3690_v34 }
 0x352   : > { %v1116_v56 = vpack.c.bf16 %v1102_v21, %v1100_v40  ;;  %v1115_v30 = vpack.c.bf16 %v1101_v3, %v1099_v16  ;;  %v1103_v44 = vmax.f32 %v1087_v52, 0.0  ;;  %v1105_v8 = vmax.f32 %v1089_v59, 0.0 }
 0x353   : > { %v1118_v7 = vpack.c.bf16 %v1106_v20, %v1104_v6  ;;  %v1108_v36 = vmax.f32 %v1092_v2, 0.0  ;;  %v1110_v57 = vmax.f32 %v1094_v60, 0.0  ;;  %v1091_v19 = vmul.f32 %v1082_v13, %v3636_v63 }
 0x354   : > { %1475 = vmatprep.mubr.bf16.mxu0 %v1116_v56  ;;  %1548 = vmatprep.mubr.bf16.mxu1 %v1116_v56  ;;  %v1117_v26 = vpack.c.bf16 %v1105_v8, %v1103_v44  ;;  %v1093_v54 = vmul.f32 %v1082_v13, %v3648_v35  ;;  %v1096_v38 = vmul.f32 %v1082_v13, %v3696_v12 }
 0x355   : > { %1476 = vmatmul.mubr.bf16.vlgmr.msra.gmra.mrb[0].mxu0 %v1115_v30  ;;  %1549 = vmatmul.mubr.bf16.vlgmr.msra.gmra.mrb[0].mxu1 %v1115_v30  ;;  %v1120_v15 = vpack.c.bf16 %v1110_v57, %v1108_v36  ;;  %v1098_v14 = vmul.f32 %v1082_v13, %v3700_v51  ;;  %v1107_v34 = vmax.f32 %v1091_v19, 0.0  ;;  %v1095_v23 = vmul.f32 %v1082_v13, %v3662_v42 }
 0x356   : > { %1485 = vmatprep.mubr.bf16.mxu0 %v1118_v7  ;;  %1556 = vmatprep.mubr.bf16.mxu1 %v1118_v7  ;;  %v1109_v24 = vmax.f32 %v1093_v54, 0.0  ;;  %v1112_v5 = vmax.f32 %v1096_v38, 0.0  ;;  %v1097_v63 = vmul.f32 %v1082_v13, %v3674_v32 }
 0x357   : > { %v1114_v61 = vmax.f32 %v1098_v14, 0.0  ;;  %v1111_v35 = vmax.f32 %v1095_v23, 0.0 }
 0x358   : > { %v1119_v39 = vpack.c.bf16 %v1109_v24, %v1107_v34  ;;  %v1113_v12 = vmax.f32 %v1097_v63, 0.0 }
 0x359   : > { %v1122_v0 = vpack.c.bf16 %v1114_v61, %v1112_v5 }
 0x35a   : > { %v1121_v51 = vpack.c.bf16 %v1113_v12, %v1111_v35 }
 0x35d   : > { %1486 = vmatmul.mubr.bf16.gmra.mrb[4].mxu0 %v1117_v26  ;;  %1557 = vmatmul.mubr.bf16.gmra.mrb[4].mxu1 %v1117_v26 }
 0x35e   : > { %1495 = vmatprep.mubr.bf16.mxu0 %v1120_v15  ;;  %1564 = vmatprep.mubr.bf16.mxu1 %v1120_v15 }
 0x365   : > { %1496 = vmatmul.mubr.bf16.gmra.mrb[8].mxu0 %v1119_v39  ;;  %1565 = vmatmul.mubr.bf16.gmra.mrb[8].mxu1 %v1119_v39 }
 0x366   : > { %1505 = vmatprep.mubr.bf16.mxu0 %v1122_v0  ;;  %1572 = vmatprep.mubr.bf16.mxu1 %v1122_v0 }
 0x36d   : > { %1506 = vmatmul.mubr.bf16.gmra.mrb[12].mxu0 %v1121_v51  ;;  %1573 = vmatmul.mubr.bf16.gmra.mrb[12].mxu1 %v1121_v51 }
 0x428   : > { %v3749_v22 = vpop.f32.mrb[0].mxu0  ;;  %v2320_v1 = vpop.f32.mrb[0].mxu1 }
 0x429   : > { %v3751_v17 = vpop.f32.mrb[1].mxu0  ;;  %v2321_v27 = vpop.f32.mrb[1].mxu1 }
 0x42a   : > { %v3753_v43 = vadd.f32 %v2321_v27, %v2320_v1  ;;  %v3755_v42 = vpop.f32.mrb[2].mxu0  ;;  %v2323_v32 = vpop.f32.mrb[2].mxu1 }
 0x42b   : > { %v1581_v37 = vadd.f32 %v3755_v42, %v3749_v22  ;;  %v3759_v4 = vpop.f32.mrb[3].mxu0  ;;  %v2324_v33 = vpop.f32.mrb[3].mxu1 }
 0x42c   : > { %v1594_v25 = vadd.f32 %v3759_v4, %v3751_v17  ;;  %v3763_v31 = vadd.f32 %v2324_v33, %v2323_v32 }
 0x42e   : > { %v1607_v45 = vadd.f32 %v3763_v31, %v3753_v43 }
 0x430   : > { %v3765_v41 = vpop.f32.mrb[4].mxu0  ;;  %v2326_v10 = vpop.f32.mrb[4].mxu1 }
 0x431   : > { %v1582_v46 = vadd.f32 %v1581_v37, %v3765_v41  ;;  %v3768_v50 = vpop.f32.mrb[5].mxu0  ;;  %v2327_v28 = vpop.f32.mrb[5].mxu1 }
 0x432   : > { %v1595_v58 = vadd.f32 %v1594_v25, %v3768_v50  ;;  %v3771_v11 = vadd.f32 %v2327_v28, %v2326_v10  ;;  %v3773_v29 = vpop.f32.mrb[6].mxu0  ;;  %v2329_v55 = vpop.f32.mrb[6].mxu1 }
 0x433   : > { %v1583_v48 = vadd.f32 %v1582_v46, %v3773_v29  ;;  %v3776_v13 = vpop.f32.mrb[7].mxu0  ;;  %v2330_v47 = vpop.f32.mrb[7].mxu1 }
 0x434   : > { %v1596_v18 = vadd.f32 %v1595_v58, %v3776_v13  ;;  %v3779_v62 = vadd.f32 %v2330_v47, %v2329_v55  ;;  %v1608_v9 = vadd.f32 %v3771_v11, %v1607_v45 }
 0x436   : > { %v1609_v2 = vadd.f32 %v3779_v62, %v1608_v9 }
 0x438   : > { %v3784_v49 = vpop.f32.mrb[8].mxu0  ;;  %v2332_v40 = vpop.f32.mrb[8].mxu1 }
 0x439   : > { %v1584_v21 = vadd.f32 %v1583_v48, %v3784_v49  ;;  %v3787_v16 = vpop.f32.mrb[9].mxu0  ;;  %v2333_v3 = vpop.f32.mrb[9].mxu1 }
 0x43a   : > { %v1597_v6 = vadd.f32 %v1596_v18, %v3787_v16  ;;  %v3790_v20 = vadd.f32 %v2333_v3, %v2332_v40  ;;  %v3792_v56 = vpop.f32.mrb[10].mxu0  ;;  %v2335_v30 = vpop.f32.mrb[10].mxu1 }
 0x43b   : > { %v1585_v52 = vadd.f32 %v1584_v21, %v3792_v56  ;;  %v3795_v59 = vpop.f32.mrb[11].mxu0  ;;  %v2336_v7 = vpop.f32.mrb[11].mxu1 }
 0x43c   : > { %v1598_v60 = vadd.f32 %v1597_v6, %v3795_v59  ;;  %v3799_v44 = vadd.f32 %v2336_v7, %v2335_v30  ;;  %v1610_v8 = vadd.f32 %v3790_v20, %v1609_v2 }
 0x43e   : > { %v1611_v15 = vadd.f32 %v3799_v44, %v1610_v8 }
 0x440   : > { %v3802_v36 = vpop.f32.mrb[12].mxu0  ;;  %v2338_v57 = vpop.f32.mrb[12].mxu1 }
 0x441   : > { %v1586_v26 = vadd.f32 %v1585_v52, %v3802_v36  ;;  %v3805_v19 = vpop.f32.mrb[13].mxu0  ;;  %v2339_v54 = vpop.f32.mrb[13].mxu1 }
 0x442   : > { %v1599_v38 = vadd.f32 %v1598_v60, %v3805_v19  ;;  %v3809_v14 = vadd.f32 %v2339_v54, %v2338_v57  ;;  %v3811_v34 = vpop.f32.mrb[14].mxu0  ;;  %v2341_v24 = vpop.f32.mrb[14].mxu1 }
 0x443   : > { %v1587_v5 = vadd.f32 %v1586_v26, %v3811_v34  ;;  %v3814_v61 = vpop.f32.mrb[15].mxu0  ;;  %v2342_v39 = vpop.f32.mrb[15].mxu1 }
 0x444   : > { %v1612_v23 = vadd.f32 %v3809_v14, %v1611_v15  ;;  %v1600_v63 = vadd.f32 %v1599_v38, %v3814_v61  ;;  %v3818_v0 = vadd.f32 %v2342_v39, %v2341_v24 }
 0x445   : > { %v1588_v35 = vrot.slane %v1587_v5, 4 }
 0x446   : > { %v1601_v12 = vrot.slane %v1600_v63, 4  ;;  %v1613_v51 = vadd.f32 %v3818_v0, %v1612_v23 }
 0x447   : > { %v1589_v1 = vadd.f32 %v1588_v35, %v1587_v5  ;;  %v3841_v35 = vld [vmem:[#allocation10 + $0xc] sm:$0xff] }
 0x448   : > { %v1602_v27 = vadd.f32 %v1601_v12, %v1600_v63  ;;  %v1614_v32 = vrot.slane %v1613_v51, 4  ;;  %v3839_v63 = vld [vmem:[#allocation10] sm:$0xff]  ;;  %v3843_v12 = vld [vmem:[#allocation10 + $0x18] sm:$0xff] }
 0x449   : > { %v1590_v37 = vrot.slane %v1589_v1, 2 }
 0x44a   : > { %v1603_v33 = vrot.slane %v1602_v27, 2  ;;  %v1615_v10 = vadd.f32 %v1614_v32, %v1613_v51 }
 0x44b   : > { %v1591_v25 = vadd.f32 %v1590_v37, %v1589_v1  ;;  %v3848_v37 = vld [vmem:[#allocation10 + $0x30] sm:$0xff] }
 0x44c   : > { %v1604_v46 = vadd.f32 %v1603_v33, %v1602_v27  ;;  %v1616_v55 = vrot.slane %v1615_v10, 2  ;;  %v3845_v27 = vld [vmem:[#allocation10 + $0x24] sm:$0xff]  ;;  %v3850_v33 = vld [vmem:[#allocation10 + $0x3c] sm:$0xff] }
 0x44d   : > { %v1592_v28 = vrot.slane %v1591_v25, 1 }
 0x44e   : > { %v1605_v58 = vrot.slane %v1604_v46, 1  ;;  %v1617_v18 = vadd.f32 %v1616_v55, %v1615_v10 }
 0x44f   : > { %v1593_v48 = vadd.f32 %v1592_v28, %v1591_v25  ;;  %v342_v25 = vunpack.c.l.bf16 %v3839_v63  ;;  %v345_v28 = vunpack.c.l.bf16 %v3841_v35 }
 0x450   : > { %v1606_v47 = vadd.f32 %v1605_v58, %v1604_v46  ;;  %v1618_v45 = vrot.slane %v1617_v18, 1  ;;  %v343_v46 = vunpack.c.h.bf16 %v3839_v63  ;;  %v348_v58 = vunpack.c.l.bf16 %v3843_v12 }
 0x451   : > { %1626 = vrot.lane.b32.xlu1 %v1593_v48, %s2749_s26  ;;  %1621 = vrot.lane.b32.xlu0 %v1593_v48, %s2751_s16 }
 0x452   : > { %v1619_v9 = vadd.f32 %v1618_v45, %v1617_v18  ;;  %v349_v18 = vunpack.c.h.bf16 %v3843_v12  ;;  %v351_v45 = vunpack.c.l.bf16 %v3845_v27  ;;  %v3896_v12 = vld [vmem:[#allocation10 + $0x20] ss:$12 sps:$4 sm:$0xff]  }
 0x455   : > { %1633 = vrot.lane.b32.xlu1 %v1606_v47, %s2752_s13  ;;  %1628 = vrot.lane.b32.xlu0 %v1606_v47, %s2749_s26 }
 0x459   : > { %1642 = vrot.lane.b32.xlu1 %v1606_v47, %s2753_s27  ;;  %1637 = vrot.lane.b32.xlu0 %v1606_v47, %s2750_s15  ;;  %v346_v47 = vunpack.c.h.bf16 %v3841_v35 }
 0x45d   : > { %1650 = vrot.lane.b32.xlu1 %v1619_v9, %s2748_s24  ;;  %1644 = vrot.lane.b32.xlu0 %v1619_v9, %s2753_s27 }
 0x461   : > { %1654 = vrot.lane.b32.xlu0 %v1619_v9, %s2754_s17 }
 0x4c3   : > { %v1627_v40 = vpop.permute.xlu1 %1626  ;;  %v1622_v21 = vpop.permute.xlu0 %1621 }
 0x4c4   : > { %v1624_v3 = vadd.f32 %v1622_v21, %v1593_v48  ;;  %v3860_v48 = vld [vmem:[#allocation10 + $0x48] sm:$0xff]  ;;  %v3865_v21 = vld [vmem:[#allocation10 + $0x54] sm:$0xff] }
 0x4c5   : > { %v364_v63 = vunpack.c.h.bf16 %v3865_v21 }
 0x4c7   : > { %v1634_v6 = vpop.permute.xlu1 %1633  ;;  %v1629_v30 = vpop.permute.xlu0 %1628 }
 0x4c8   : > { %v1630_v52 = vsel %vm952_vm0, %v1627_v40, %v1629_v30  ;;  %v355_v30 = vunpack.c.h.bf16 %v3848_v37 }
 0x4c9   : > { %v1632_v7 = vadd.f32 %v1630_v52, %v1624_v3  ;;  %v352_v3 = vunpack.c.h.bf16 %v3845_v27  ;;  %v357_v52 = vunpack.c.l.bf16 %v3850_v33 }
 0x4cb   : > { %v1636_v2 = vadd.f32 %v1634_v6, %v1632_v7  ;;  %v1638_v60 = vpop.permute.xlu0 %1637  ;;  %v1643_v8 = vpop.permute.xlu1 %1642  ;;  %v354_v6 = vunpack.c.l.bf16 %v3848_v37 }
 0x4cd   : > { %v1640_v57 = vadd.f32 %v1638_v60, %v1636_v2 }
 0x4cf   : > { %v1645_v26 = vpop.permute.xlu0 %1644  ;;  %v1651_v38 = vpop.permute.xlu1 %1650 }
 0x4d0   : > { %v1647_v54 = vsel %vm1646_vm3, %v1643_v8, %v1645_v26  ;;  %v358_v26 = vunpack.c.h.bf16 %v3850_v33 }
 0x4d1   : > { %v1649_v15 = vadd.f32 %v1647_v54, %v1640_v57  ;;  %v3878_v57 = vld [vmem:[#allocation10 + $0x8] ss:$12 sps:$4 sm:$0xff]   ;;  %v360_v54 = vunpack.c.l.bf16 %v3860_v48 }
 0x4d2   : > { %v347_v27 = vunpack.c.h.bf16 %v3878_v57 }
 0x4d3   : > { %v1653_v24 = vadd.f32 %v1651_v38, %v1649_v15  ;;  %v1655_v5 = vpop.permute.xlu0 %1654  ;;  %v361_v15 = vunpack.c.h.bf16 %v3860_v48 }
 0x4d5   : > { %v1657_v39 = vadd.f32 %v1655_v5, %v1653_v24  ;;  %v363_v24 = vunpack.c.l.bf16 %v3865_v21 }
 0x4d7   : > { %v1658_v23 = vmul.f32 0.015625, %v1657_v39 }
 0x4d9   : > { %1663 = vrot.lane.b32.xlu0 %v1658_v23, %s2748_s24  ;;  %1660 = vrot.lane.b32.xlu1 %v1658_v23, %s2754_s17 }
 0x4dd   : > { %1669 = vrot.lane.b32.xlu0 %v1658_v23, %s2750_s15  ;;  %1666 = vrot.lane.b32.xlu1 %v1658_v23, %s2753_s27 }
 0x4e1   : > { %1675 = vrot.lane.b32.xlu0 %v1658_v23, %s2749_s26  ;;  %1672 = vrot.lane.b32.xlu1 %v1658_v23, %s2752_s13 }
 0x4e5   : > { %1678 = vrot.lane.b32.xlu1 %v1658_v23, %s2751_s16 }
 0x54b   : > { %v1664_v51 = vpop.permute.xlu0 %1663  ;;  %v1661_v1 = vpop.permute.xlu1 %1660 }
 0x54c   : > { %v1682_v32 = vsel %vm1681_vm4, %v1658_v23, %v1661_v1 }
 0x54d   : > { %v1683_v10 = vsel %vm956_vm2, %v1682_v32, %v1664_v51 }
 0x54e   : > { %v3858_v55 = vrot.slane %v1683_v10, %v4405_v53 }
 0x54f   : > { %v1670_v9 = vpop.permute.xlu0 %1669  ;;  %v1667_v40 = vpop.permute.xlu1 %1666 }
 0x550   : > { %v1684_v7 = vsel %vm1646_vm3, %v1664_v51, %v1667_v40  ;;  %v1703_v2 = vsub.f32 %v3749_v22, %v3858_v55  ;;  %v1706_v60 = vsub.f32 %v3755_v42, %v3858_v55  ;;  %v1709_v8 = vsub.f32 %v3765_v41, %v3858_v55 }
 0x551   : > { %v1712_v38 = vsub.f32 %v3773_v29, %v3858_v55  ;;  %v1715_v22 = vsub.f32 %v3784_v49, %v3858_v55  ;;  %v1685_v39 = vsel %vm954_vm1, %v1684_v7, %v1670_v9  ;;  %v344_v29 = vunpack.c.l.bf16 %v3878_v57 }
 0x552   : > { %v3888_v42 = vmul.f32 %v1703_v2, %v342_v25  ;;  %v3890_v5 = vmul.f32 %v1706_v60, %v345_v28  ;;  %v3894_v35 = vmul.f32 %v1709_v8, %v348_v58  ;;  %v1718_v49 = vsub.f32 %v3792_v56, %v3858_v55 }
 0x553   : > { %v1676_v41 = vpop.permute.xlu0 %1675  ;;  %v1673_v23 = vpop.permute.xlu1 %1672  ;;  %v1721_v1 = vsub.f32 %v3802_v36, %v3858_v55  ;;  %v3906_v25 = vmul.f32 %v1712_v38, %v351_v45  ;;  %v1724_v56 = vsub.f32 %v3811_v34, %v3858_v55  ;;  %v3915_v9 = vmul.f32 %v1715_v22, %v354_v6 }
 0x554   : > { %v1687_v51 = vsel %vm1686_vm5, %v1685_v39, %v1673_v23  ;;  %v1751_v10 = vmul.f32 %v3888_v42, %v3888_v42  ;;  %v1754_v28 = vmul.f32 %v3890_v5, %v3890_v5  ;;  %v1688_v58 = vsel %vm952_vm0, %v1673_v23, %v1676_v41 }
 0x555   : > { %v1698_v32 = vrot.slane %v1687_v51, %v4405_v53  ;;  %v350_v36 = vunpack.c.l.bf16 %v3896_v12  ;;  %v1757_v45 = vmul.f32 %v3894_v35, %v3894_v35  ;;  %v353_v34 = vunpack.c.h.bf16 %v3896_v12 }
 0x556   : > { %v1775_v7 = vadd.f32 %v1754_v28, %v1751_v10  ;;  %v3926_v55 = vmul.f32 %v1718_v49, %v357_v52  ;;  %v3928_v6 = vmul.f32 %v1721_v1, %v360_v54  ;;  %v1760_v22 = vmul.f32 %v3906_v25, %v3906_v25  ;;  %v335_v1 = vld [vmem:[#allocation10 + $0x38] ss:$12 sps:$4 sm:$0xff]  }
 0x557   : > { %v1679_v40 = vpop.permute.xlu1 %1678  ;;  %v1704_v2 = vsub.f32 %v3751_v17, %v1698_v32  ;;  %v1707_v60 = vsub.f32 %v3759_v4, %v1698_v32  ;;  %v1710_v57 = vsub.f32 %v3768_v50, %v1698_v32  ;;  %v1713_v38 = vsub.f32 %v3776_v13, %v1698_v32 }
 0x558   : > { %v1690_v8 = vsel %vm1689_vm6, %v1688_v58, %v1679_v40  ;;  %v1776_v41 = vadd.f32 %v1775_v7, %v1757_v45  ;;  %v1716_v17 = vsub.f32 %v3787_v16, %v1698_v32  ;;  %v3942_v13 = vmul.f32 %v1724_v56, %v363_v24 }
 0x559   : > { %v3933_v39 = vmul.f32 %v1704_v2, %v343_v46  ;;  %v3935_v4 = vmul.f32 %v1707_v60, %v346_v47  ;;  %v3937_v23 = vmul.f32 %v1710_v57, %v349_v18  ;;  %v3940_v50 = vrot.slane %v1690_v8, %v4405_v53  ;;  %v339_v57 = vld [vmem:[#allocation10 + $0x50] ss:$12 sps:$4 sm:$0xff]  }
 0x55a   : > { %v1763_v52 = vmul.f32 %v3915_v9, %v3915_v9  ;;  %v1777_v54 = vadd.f32 %v1776_v41, %v1760_v22  ;;  %v1719_v12 = vsub.f32 %v3795_v59, %v1698_v32  ;;  %v3947_v51 = vmul.f32 %v1713_v38, %v352_v3 }
 0x55b   : > { %v1752_v16 = vmul.f32 %v3933_v39, %v3933_v39  ;;  %v1755_v46 = vmul.f32 %v3935_v4, %v3935_v4  ;;  %v1766_v47 = vmul.f32 %v3926_v55, %v3926_v55  ;;  %v1769_v18 = vmul.f32 %v3928_v6, %v3928_v6 }
 0x55c   : > { %v1778_v24 = vadd.f32 %v1777_v54, %v1763_v52  ;;  %v1722_v49 = vsub.f32 %v3805_v19, %v1698_v32  ;;  %v1725_v59 = vsub.f32 %v3814_v61, %v1698_v32  ;;  %v3961_v3 = vmul.f32 %v1716_v17, %v355_v30 }
 0x55d   : > { %v1758_v10 = vmul.f32 %v3937_v23, %v3937_v23  ;;  %v1788_v28 = vadd.f32 %v1755_v46, %v1752_v16  ;;  %v1705_v56 = vsub.f32 %v3753_v43, %v3940_v50  ;;  %v1708_v40 = vsub.f32 %v3763_v31, %v3940_v50 }
 0x55e   : > { %v1779_v58 = vadd.f32 %v1778_v24, %v1766_v47  ;;  %v1711_v19 = vsub.f32 %v3771_v11, %v3940_v50  ;;  %v3973_v61 = vmul.f32 %v1719_v12, %v358_v26  ;;  %v1761_v37 = vmul.f32 %v3947_v51, %v3947_v51 }
 0x55f   : > { %v1789_v30 = vadd.f32 %v1788_v28, %v1758_v10  ;;  %v356_v32 = vunpack.c.l.bf16 %v335_v1  ;;  %v1772_v45 = vmul.f32 %v3942_v13, %v3942_v13  ;;  %v1714_v43 = vsub.f32 %v3779_v62, %v3940_v50 }
 0x560   : > { %v1780_v7 = vadd.f32 %v1779_v58, %v1769_v18  ;;  %v3981_v31 = vmul.f32 %v1705_v56, %v344_v29  ;;  %v3985_v11 = vmul.f32 %v1722_v49, %v361_v15  ;;  %v1764_v33 = vmul.f32 %v3961_v3, %v3961_v3 }
 0x561   : > { %v1790_v26 = vadd.f32 %v1789_v30, %v1761_v37  ;;  %v3989_v2 = vmul.f32 %v1708_v40, %v347_v27  ;;  %v3993_v8 = vmul.f32 %v1725_v59, %v364_v63  ;;  %v1717_v62 = vsub.f32 %v3790_v20, %v3940_v50 }
 0x562   : > { %v1781_v60 = vadd.f32 %v1780_v7, %v1772_v45  ;;  %v3997_v29 = vmul.f32 %v1711_v19, %v350_v36  ;;  %v1767_v48 = vmul.f32 %v3973_v61, %v3973_v61  ;;  %v1753_v38 = vmul.f32 %v3981_v31, %v3981_v31 }
 0x563   : > { %v1791_v15 = vadd.f32 %v1790_v26, %v1764_v33  ;;  %v1756_v27 = vmul.f32 %v3989_v2, %v3989_v2  ;;  %v359_v21 = vunpack.c.h.bf16 %v335_v1  ;;  %v1720_v63 = vsub.f32 %v3799_v44, %v3940_v50 }
 0x564   : > { %v1782_v22 = vrot.slane %v1781_v60, 4  ;;  %v4007_v41 = vmul.f32 %v1714_v43, %v353_v34  ;;  %v1770_v20 = vmul.f32 %v3985_v11, %v3985_v11  ;;  %v362_v17 = vunpack.c.l.bf16 %v339_v57 }
 0x565   : > { %v1792_v36 = vadd.f32 %v1791_v15, %v1767_v48  ;;  %v1723_v52 = vsub.f32 %v3809_v14, %v3940_v50  ;;  %v4013_v12 = vmul.f32 %v1717_v62, %v356_v32  ;;  %v1759_v16 = vmul.f32 %v3997_v29, %v3997_v29 }
 0x566   : > { %v1783_v54 = vadd.f32 %v1782_v22, %v1781_v60  ;;  %v1801_v46 = vadd.f32 %v1756_v27, %v1753_v38  ;;  %v1773_v44 = vmul.f32 %v3993_v8, %v3993_v8  ;;  %v365_v47 = vunpack.c.h.bf16 %v339_v57 }
 0x567   : > { %v1793_v34 = vadd.f32 %v1792_v36, %v1770_v20  ;;  %v1726_v18 = vsub.f32 %v3818_v0, %v3940_v50  ;;  %v4021_v49 = vmul.f32 %v1720_v63, %v359_v21  ;;  %v1762_v14 = vmul.f32 %v4007_v41, %v4007_v41 }
 0x568   : > { %v1784_v24 = vrot.slane %v1783_v54, 2  ;;  %v1802_v1 = vadd.f32 %v1801_v46, %v1759_v16  ;;  %v4025_v28 = vmul.f32 %v1723_v52, %v362_v17  ;;  %v1765_v58 = vmul.f32 %v4013_v12, %v4013_v12 }
 0x569   : > { %v1794_v59 = vadd.f32 %v1793_v34, %v1773_v44  ;;  %v4029_v37 = vmul.f32 %v1726_v18, %v365_v47  ;;  %v1768_v0 = vmul.f32 %v4021_v49, %v4021_v49 }
 0x56a   : > { %v1785_v10 = vadd.f32 %v1784_v24, %v1783_v54  ;;  %v1803_v56 = vadd.f32 %v1802_v1, %v1762_v14  ;;  %v1771_v45 = vmul.f32 %v4025_v28, %v4025_v28 }
 0x56b   : > { %v1795_v40 = vrot.slane %v1794_v59, 4  ;;  %v1774_v33 = vmul.f32 %v4029_v37, %v4029_v37 }
 0x56c   : > { %v1786_v19 = vrot.slane %v1785_v10, 1  ;;  %v1804_v50 = vadd.f32 %v1803_v56, %v1765_v58 }
 0x56d   : > { %v1796_v30 = vadd.f32 %v1795_v40, %v1794_v59 }
 0x56e   : > { %v1787_v32 = vadd.f32 %v1786_v19, %v1785_v10  ;;  %v1805_v7 = vadd.f32 %v1804_v50, %v1768_v0 }
 0x56f   : > { %v1797_v43 = vrot.slane %v1796_v30, 2 }
 0x570   : > { %1820 = vrot.lane.b32.xlu1 %v1787_v32, %s2749_s26  ;;  %1815 = vrot.lane.b32.xlu0 %v1787_v32, %s2751_s16  ;;  %v1806_v26 = vadd.f32 %v1805_v7, %v1771_v45 }
 0x571   : > { %v1798_v60 = vadd.f32 %v1797_v43, %v1796_v30 }
 0x572   : > { %v1807_v57 = vadd.f32 %v1806_v26, %v1774_v33 }
 0x573   : > { %v1799_v62 = vrot.slane %v1798_v60, 1 }
 0x574   : > { %v1808_v48 = vrot.slane %v1807_v57, 4 }
 0x575   : > { %v1800_v15 = vadd.f32 %v1799_v62, %v1798_v60 }
 0x576   : > { %v1809_v38 = vadd.f32 %v1808_v48, %v1807_v57 }
 0x577   : > { %1827 = vrot.lane.b32.xlu1 %v1800_v15, %s2752_s13  ;;  %1822 = vrot.lane.b32.xlu0 %v1800_v15, %s2749_s26 }
 0x578   : > { %v1810_v27 = vrot.slane %v1809_v38, 2 }
 0x57a   : > { %v1811_v22 = vadd.f32 %v1810_v27, %v1809_v38 }
 0x57b   : > { %1836 = vrot.lane.b32.xlu1 %v1800_v15, %s2753_s27  ;;  %1831 = vrot.lane.b32.xlu0 %v1800_v15, %s2750_s15 }
 0x57c   : > { %v1812_v21 = vrot.slane %v1811_v22, 1 }
 0x57e   : > { %v1813_v63 = vadd.f32 %v1812_v21, %v1811_v22 }
 0x580   : > { %1843 = vrot.lane.b32.xlu1 %v1813_v63, %s2748_s24  ;;  %1838 = vrot.lane.b32.xlu0 %v1813_v63, %s2753_s27 }
 0x584   : > { %1847 = vrot.lane.b32.xlu0 %v1813_v63, %s2754_s17 }
 0x5e2   : > { %v1816_v20 = vpop.permute.xlu0 %1815  ;;  %v1821_v36 = vpop.permute.xlu1 %1820 }
 0x5e3   : > { %v1818_v17 = vadd.f32 %v1816_v20, %v1787_v32 }
 0x5e9   : > { %v1823_v52 = vpop.permute.xlu0 %1822  ;;  %v1828_v54 = vpop.permute.xlu1 %1827 }
 0x5ea   : > { %v1824_v16 = vsel %vm952_vm0, %v1821_v36, %v1823_v52 }
 0x5eb   : > { %v1826_v46 = vadd.f32 %v1824_v16, %v1818_v17 }
 0x5ed   : > { %v1832_v44 = vpop.permute.xlu0 %1831  ;;  %v1830_v34 = vadd.f32 %v1828_v54, %v1826_v46  ;;  %v1837_v47 = vpop.permute.xlu1 %1836 }
 0x5ef   : > { %v1834_v18 = vadd.f32 %v1832_v44, %v1830_v34 }
 0x5f2   : > { %v1839_v24 = vpop.permute.xlu0 %1838  ;;  %v1844_v59 = vpop.permute.xlu1 %1843 }
 0x5f3   : > { %v1840_v14 = vsel %vm1646_vm3, %v1837_v47, %v1839_v24 }
 0x5f4   : > { %v1842_v1 = vadd.f32 %v1840_v14, %v1834_v18 }
 0x5f6   : > { %v1846_v10 = vadd.f32 %v1844_v59, %v1842_v1  ;;  %v1848_v58 = vpop.permute.xlu0 %1847 }
 0x5f8   : > { %v1850_v56 = vadd.f32 %v1848_v58, %v1846_v10 }
 0x5fa   : > { %v1851_v40 = vmul.f32 0.015625, %v1850_v56 }
 0x5fc   : > { %v1852_v19 = vadd.f32 1e-05, %v1851_v40 }
 0x5fe   : > { %2517 = vrsqrt.f32 %v1852_v19 }
 0x608   : > { %v2518_v0 = vpop.eup %2517 }
 0x609   : > { %1861 = vrot.lane.b32.xlu0 %v2518_v0, %s2753_s27  ;;  %1858 = vrot.lane.b32.xlu1 %v2518_v0, %s2748_s24  ;;  %s2755_s24 = smov [#allocation11]  }
 0x60d   : > { %1864 = vrot.lane.b32.xlu0 %v2518_v0, %s2750_s15  ;;  %1855 = vrot.lane.b32.xlu1 %v2518_v0, %s2754_s17 }
 0x611   : > { %1870 = vrot.lane.b32.xlu0 %v2518_v0, %s2749_s26  ;;  %1867 = vrot.lane.b32.xlu1 %v2518_v0, %s2752_s13  ;;  %s2665_s26 = sshll.u32 %s2755_s24, 4  ;;  %s2666_s26 = int_to_ptr.vmem [resolvable:$false] %s2665_s26 }
 0x612   : > { %s2667_s15 = scalar_lea.vmem %s2666_s26, 3072  ;;  %p2668_p12 = scmp.lt.s32.totalorder %s4107_s14, %s2666_s26 }
 0x613   : > { %p2669_p2 = scmp.lt.s32.totalorder %s2667_s15, %s2661_s11 }
 0x615   : > { %1873 = vrot.lane.b32.xlu1 %v2518_v0, %s2751_s16  ;;  %p2670_p1 = por %p2669_p2, %p2668_p12 }
 0x617   : > { %p2671_p13 = pnand %p2670_p1, %p2664_p7 }
 0x67b   : > { %v1862_v50 = vpop.permute.xlu0 %1861  ;;  %v1859_v30 = vpop.permute.xlu1 %1858 }
 0x67c   : > { %v1878_v27 = vsel %vm1646_vm3, %v1859_v30, %v1862_v50 }
 0x67f   : > { %v1865_v32 = vpop.permute.xlu0 %1864  ;;  %v1856_v45 = vpop.permute.xlu1 %1855 }
 0x680   : > { %v1876_v7 = vsel %vm1681_vm4, %v2518_v0, %v1856_v45 }
 0x681   : > { %v1877_v43 = vsel %vm956_vm2, %v1876_v7, %v1859_v30 }
 0x682   : > { %v1886_v33 = vrot.slane %v1877_v43, %v4405_v53 }
 0x683   : > { %v1868_v26 = vpop.permute.xlu1 %1867  ;;  %v1871_v38 = vpop.permute.xlu0 %1870 }
 0x684   : > { %v1895_v60 = vmul.f32 %v1886_v33, %v3888_v42  ;;  %v1898_v57 = vmul.f32 %v1886_v33, %v3890_v5  ;;  %v1901_v62 = vmul.f32 %v1886_v33, %v3894_v35  ;;  %v1904_v48 = vmul.f32 %v1886_v33, %v3906_v25 }
 0x685   : > { %v1907_v15 = vmul.f32 %v1886_v33, %v3915_v9  ;;  %v1910_v22 = vmul.f32 %v1886_v33, %v3926_v55  ;;  %v1913_v21 = vmul.f32 %v1886_v33, %v3928_v6  ;;  %v1916_v63 = vmul.f32 %v1886_v33, %v3942_v13 }
 0x686   : > { %v1879_v42 = vsel %vm954_vm1, %v1878_v27, %v1865_v32  ;;  %v1919_v20 = vmax.f32 %v1895_v60, 0.0  ;;  %v1922_v36 = vmax.f32 %v1898_v57, 0.0  ;;  %v1925_v35 = vmax.f32 %v1901_v62, 0.0 }
 0x687   : > { %v1874_v5 = vpop.permute.xlu1 %1873  ;;  %v1880_v25 = vsel %vm1686_vm5, %v1879_v42, %v1868_v26  ;;  %v1881_v9 = vsel %vm952_vm0, %v1868_v26, %v1871_v38  ;;  %v1928_v17 = vmax.f32 %v1904_v48, 0.0  ;;  %v1931_v52 = vmax.f32 %v1907_v15, 0.0 }
 0x688   : > { %v1890_v54 = vrot.slane %v1880_v25, %v4405_v53  ;;  %v1882_v55 = vsel %vm1689_vm6, %v1881_v9, %v1874_v5  ;;  %v1934_v6 = vmax.f32 %v1910_v22, 0.0  ;;  %v1937_v16 = vmax.f32 %v1913_v21, 0.0 }
 0x689   : > { %v1940_v46 = vmax.f32 %v1916_v63, 0.0  ;;  %v1894_v13 = vrot.slane %v1882_v55, %v4405_v53 }
 0x68a   : > { %v1896_v44 = vmul.f32 %v1890_v54, %v3933_v39  ;;  %v1899_v34 = vmul.f32 %v1890_v54, %v3935_v4  ;;  %v1902_v47 = vmul.f32 %v1890_v54, %v3937_v23  ;;  %v1905_v18 = vmul.f32 %v1890_v54, %v3947_v51 }
 0x68b   : > { %v1908_v24 = vmul.f32 %v1890_v54, %v3961_v3  ;;  %v1911_v14 = vmul.f32 %v1890_v54, %v3973_v61  ;;  %v1914_v1 = vmul.f32 %v1890_v54, %v3985_v11  ;;  %v1917_v59 = vmul.f32 %v1890_v54, %v3993_v8 }
 0x68c   : > { %v1920_v10 = vmax.f32 %v1896_v44, 0.0  ;;  %v1923_v58 = vmax.f32 %v1899_v34, 0.0  ;;  %v1926_v56 = vmax.f32 %v1902_v47, 0.0  ;;  %v1929_v53 = vmax.f32 %v1905_v18, 0.0 }
 0x68d   : > { %v1932_v40 = vmax.f32 %v1908_v24, 0.0  ;;  %v1935_v39 = vmax.f32 %v1911_v14, 0.0  ;;  %v1938_v19 = vmax.f32 %v1914_v1, 0.0  ;;  %v1941_v4 = vmax.f32 %v1917_v59, 0.0 }
 0x68e   : > { %v2288_v0 = vpack.c.bf16 %v1920_v10, %v1919_v20  ;;  %v2290_v23 = vpack.c.bf16 %v1923_v58, %v1922_v36  ;;  %v2292_v51 = vpack.c.bf16 %v1926_v56, %v1925_v35  ;;  %v2294_v50 = vpack.c.bf16 %v1929_v53, %v1928_v17 }
 0x68f   : > { %v2296_v3 = vpack.c.bf16 %v1932_v40, %v1931_v52  ;;  %v2298_v30 = vpack.c.bf16 %v1935_v39, %v1934_v6  ;;  %v2300_v61 = vpack.c.bf16 %v1938_v19, %v1937_v16  ;;  %v2302_v32 = vpack.c.bf16 %v1941_v4, %v1940_v46 }
 0x690   : > { %2023 = vst [vmem:[%s4082_s10] sm:$0xff] %v2288_v0  ;;  %2025 = vst [vmem:[%s4082_s10 + $0xc] sm:$0xff] %v2290_v23  ;;  %v1897_v11 = vmul.f32 %v1894_v13, %v3981_v31  ;;  %v1900_v8 = vmul.f32 %v1894_v13, %v3989_v2  ;;  %v1903_v45 = vmul.f32 %v1894_v13, %v3997_v29 }
 0x691   : > { %2027 = vst [vmem:[%s4082_s10 + $0x18] sm:$0xff] %v2292_v51  ;;  %2029 = vst [vmem:[%s4082_s10 + $0x24] sm:$0xff] %v2294_v50  ;;  %v1906_v7 = vmul.f32 %v1894_v13, %v4007_v41  ;;  %v1909_v43 = vmul.f32 %v1894_v13, %v4013_v12  ;;  %v1912_v33 = vmul.f32 %v1894_v13, %v4021_v49 }
 0x692   : > { %2031 = vst [vmem:[%s4082_s10 + $0x30] sm:$0xff] %v2296_v3  ;;  %2033 = vst [vmem:[%s4082_s10 + $0x3c] sm:$0xff] %v2298_v30  ;;  %v1915_v26 = vmul.f32 %v1894_v13, %v4025_v28  ;;  %v1918_v60 = vmul.f32 %v1894_v13, %v4029_v37  ;;  %v1921_v31 = vmax.f32 %v1897_v11, 0.0  ;;  %v1924_v2 = vmax.f32 %v1900_v8, 0.0 }
 0x693   : > { %2035 = vst [vmem:[%s4082_s10 + $0x48] sm:$0xff] %v2300_v61  ;;  %2037 = vst [vmem:[%s4082_s10 + $0x54] sm:$0xff] %v2302_v32  ;;  %v1927_v57 = vmax.f32 %v1903_v45, 0.0  ;;  %v1930_v29 = vmax.f32 %v1906_v7, 0.0  ;;  %v1933_v41 = vmax.f32 %v1909_v43, 0.0  ;;  %v1936_v62 = vmax.f32 %v1912_v33, 0.0 }
 0x694   : > { %v1939_v48 = vmax.f32 %v1915_v26, 0.0  ;;  %v1942_v12 = vmax.f32 %v1918_v60, 0.0  ;;  %v2289_v49 = vpack.c.bf16 %v1921_v31, %v1921_v31  ;;  %v2291_v28 = vpack.c.bf16 %v1924_v2, %v1924_v2 }
 0x695   : > { %v2293_v37 = vpack.c.bf16 %v1927_v57, %v1927_v57  ;;  %v2295_v15 = vpack.c.bf16 %v1930_v29, %v1930_v29  ;;  %v2297_v38 = vpack.c.bf16 %v1933_v41, %v1933_v41  ;;  %v2299_v27 = vpack.c.bf16 %v1936_v62, %v1936_v62 }
 0x696   : > { %v2301_v22 = vpack.c.bf16 %v1939_v48, %v1939_v48  ;;  %v2303_v21 = vpack.c.bf16 %v1942_v12, %v1942_v12  ;;  %2024 = vst [vmem:[%s4082_s10 + $0x8] sm:$0xf] %v2289_v49  ;;  %2026 = vst [vmem:[%s4082_s10 + $0x14] sm:$0xf] %v2291_v28 }
 0x697   : > { %2028 = vst [vmem:[%s4082_s10 + $0x20] sm:$0xf] %v2293_v37  ;;  %2030 = vst [vmem:[%s4082_s10 + $0x2c] sm:$0xf] %v2295_v15 }
 0x698   : > { %2032 = vst [vmem:[%s4082_s10 + $0x38] sm:$0xf] %v2297_v38  ;;  %2034 = vst [vmem:[%s4082_s10 + $0x44] sm:$0xf] %v2299_v27 }
 0x699   : > { %2036 = vst [vmem:[%s4082_s10 + $0x50] sm:$0xf] %v2301_v22  ;;  %2038 = vst [vmem:[%s4082_s10 + $0x5c] sm:$0xf] %v2303_v21 }
 0x69a   : > { %2674 = shalt.err (!%p2671_p13)
}
 0x69b   : > { %s2675_s16 = scalar_lea.hbm %s4105_s28, 1536  ;;  %s2679_s17 = scalar_lea.hbm %s4164_s5, 3072 }
 0x69c   : > { %p2676_p9 = scmp.ne.s32.totalorder %s4105_s28, %s2675_s16  ;;  %p2680_p4 = scmp.lt.u32.totalorder %s4105_s28, %s4164_s5 }
 0x69d   : > { %p2681_p8 = scmp.lt.u32.totalorder %s2679_s17, %s2675_s16  ;;  %p2683_p3 = scmp.lt.u32.totalorder %s2675_s16, %s4105_s28 }
 0x69e   : > { %p2677_p0 = pnand %p2676_p9, %p2947_p10 }
 0x69f   : > { %p2682_p6 = por %p2681_p8, %p2680_p4 }
 0x6a0   : > { %p2678_p11 = pneg %p2677_p0 }
 0x6a1   : > { %p2684_p5 = por %p2683_p3, %p2682_p6 }
 0x6a3   : > { %p2685_p7 = pnand %p2684_p5, %p2678_p11 }
 0x6a5   : > { %2688 = shalt.err (!%p2685_p7)
}
 0x6a6   : > { %s2756_s6 = smov 192   ;;  %s2757_s22 = smov 12  }
 0x6a7   : > { %2367 = dma.vmem_to_hbm [thread:$0]  (%p2947_p10), %s4107_s14, 1536, %s4105_s28, %s2040_s7, %s2756_s6, %s2756_s6, %s2757_s22  }
 0x6a8 PF: > { %s2068_s23 = sand.u32 1, %s2723_s18   ;;  %p4414_p12 = scmp.ne.s32.totalorder %s4257_s25, 0 }
 0x6a9   : > { %p4415_p2 = scmp.ge.s32.totalorder %s2735_s21, 2  ;;  %s2069_s11 = scalar_lea.sflag [#allocation4], %s2068_s23 }
 0x6ab   : > { %p2387_p1 = pnand %p4415_p2, %p4414_p12 }
 0x6ad   : > { %2718 = dma.done.wait (!%p2387_p1), %s2069_s11, 1536  }
 0x6ae   : > { %2720 = vsyncadd (!%p2387_p1), %s2069_s11, 4294965760  ;;  %p20_p13 = scmp.ge.s32.totalorder %s2937_s12, 4   ;;  %s4416_s18 = smov %s2727_s19 }
 0x6af   : > { %s4417_s19 = smov %s2731_s20  ;;  %s4418_s20 = smov %s2953_s8 }
 0x6b0   : > { %s4419_s21 = smov %s2937_s12  ;;  %22 = sbr.rel (!%p20_p13) target bundleno = 7 (0x7), region = 106 }
 0x6b7   :  { %2074 = vsyncpa [#allocation3], 1 }
 0x6b8   :  { %2076 = vsyncpa [#allocation3 + $0x1], 1 }
 0x6b9   :  { %2077 = vsyncpa [#allocation6], 1 }
 0x6ba   :  { %2078 = vsyncpa [#allocation9], 1 }
 0x6bb   :  { %2079 = vsyncpa [#allocation4], 1 }
 0x6bc   :  { %2081 = vsyncpa [#allocation4 + $0x1], 1 }

// kernel: tile.19
= control target key start
LH: loop header
LB: loop body
LE: loop exit
PB: predicated region body
PF: predicated region fallthrough
CT: control target
= control target key end

     0   :  { %vm38_vm0 = vcmask 261120   ;;  %vm34_vm1 = vcmask 130048   ;;  %s293_s14 = smov 96   ;;  %vm18_vm2 = vcmask 1044481   ;;  %s294_s19 = smov 112   ;;  %vm22_vm3 = vcmask 1047557   ;;  %s465_s0 = inlined_call_operand.vmem [shape: f32[9,8,48], index: 0, kind: input, shape index: {}]   ;;  %s466_s1 = inlined_call_operand.hbm [shape: f32[9,384], index: 1, kind: output, shape index: {}]  }
   0x1   :  { %v240_v0 = vld [vmem:[%s465_s0 + $0x3a] sm:$0x1]   ;;  %v241_v1 = vld [vmem:[%s465_s0 + $0x42] sm:$0x1]   ;;  %v233_v3 = vld [vmem:[%s465_s0 + $0x3d] sm:$0x1]  }
   0x2   :  { %v94_v2 = vsel %vm38_vm0, %v241_v1, %v240_v0  ;;  %v234_v4 = vld [vmem:[%s465_s0 + $0x3d] sm:$0x1]   ;;  %v227_v6 = vld [vmem:[%s465_s0 + $0x45] sm:$0x1]   ;;  %vm5_vm4 = vcmask 1047556   ;;  %s295_s23 = smov 80  }
   0x3   :  { %95 = vrot.lane.b32.xlu1 %v94_v2, %s293_s14  ;;  %v53_v5 = vsel %vm34_vm1, %v234_v4, %v233_v3  ;;  %v228_v7 = vld [vmem:[%s465_s0 - $0x3] ss:$8 sm:$0x1e]   ;;  %v235_v15 = vld [vmem:[%s465_s0 + $0x42] sm:$0x1]   ;;  %vm7_vm5 = vcmask 392192  }
   0x4   :  { %54 = vrot.lane.b32.xlu0 %v53_v5, %s294_s19  ;;  %v19_v8 = vsel %vm18_vm2, %v228_v7, %v227_v6  ;;  %v229_v9 = vld [vmem:[%s465_s0 - $0x3] ss:$8 sm:$0xe0]   ;;  %v236_v16 = vld [vmem:[%s465_s0 - $0x6] ss:$8 sm:$0x1e]  }
   0x5   :  { %v230_v10 = vld [vmem:[%s465_s0 + $0x45] sm:$0x1]   ;;  %v23_v11 = vsel %vm22_vm3, %v229_v9, %v19_v8  ;;  %v67_v18 = vsel %vm18_vm2, %v236_v16, %v235_v15  ;;  %v237_v19 = vld [vmem:[%s465_s0 - $0x6] ss:$8 sm:$0xe0]   ;;  %s296_s9 = smov 64  }
   0x6   :  { %v231_v12 = vld [vmem:[%s465_s0 - $0x3] ss:$8 sm:$0x1e]   ;;  %v238_v20 = vld [vmem:[%s465_s0 + $0x2] ss:$8 sm:$0xf]   ;;  %v71_v22 = vsel %vm22_vm3, %v237_v19, %v67_v18 }
   0x7   :  { %v232_v13 = vld [vmem:[%s465_s0 - $0x3] ss:$8 sm:$0xe0]   ;;  %v29_v14 = vsel %vm18_vm2, %v231_v12, %v230_v10  ;;  %v239_v23 = vld [vmem:[%s465_s0 + $0x2] ss:$8 sm:$0xf0]  }
   0x8   :  { %v33_v17 = vsel %vm22_vm3, %v232_v13, %v29_v14  ;;  %v242_v24 = vld [vmem:[%s465_s0 + $0x47] sm:$0x1]   ;;  %v77_v25 = vsel %vm5_vm4, %v239_v23, %v238_v20  ;;  %v246_v30 = vld [vmem:[%s465_s0 + $0x44] sm:$0x1]   ;;  %v245_v34 = vld [vmem:[%s465_s0 + $0x3f] sm:$0x1]  }
   0x9   :  { %v35_v21 = vsel %vm34_vm1, %v33_v17, %v23_v11  ;;  %v243_v26 = vld [vmem:[%s465_s0 - $0x1] ss:$8 sm:$0x1e]   ;;  %v79_v28 = vsel %vm38_vm0, %v77_v25, %v71_v22  ;;  %v247_v32 = vld [vmem:[%s465_s0 - $0x4] ss:$8 sm:$0x1e]  }
   0xa   :  { %36 = vrot.lane.b32.xlu0 %v35_v21, %s294_s19  ;;  %v244_v27 = vld [vmem:[%s465_s0 - $0x1] ss:$8 sm:$0xe0]   ;;  %v108_v29 = vsel %vm18_vm2, %v243_v26, %v242_v24  ;;  %80 = vrot.lane.b32.xlu1 %v79_v28, %s293_s14  ;;  %v248_v33 = vld [vmem:[%s465_s0 - $0x4] ss:$8 sm:$0xe0]   ;;  %v132_v35 = vsel %vm18_vm2, %v247_v32, %v246_v30 }
   0xb   :  { %v112_v31 = vsel %vm22_vm3, %v244_v27, %v108_v29  ;;  %v3_v36 = vld [vmem:[%s465_s0] ss:$8 sm:$0xf]   ;;  %v136_v37 = vsel %vm22_vm3, %v248_v33, %v132_v35  ;;  %v249_v38 = vld [vmem:[%s465_s0 + $0x3c] sm:$0x1]  }
   0xc   :  { %v4_v39 = vld [vmem:[%s465_s0] ss:$8 sm:$0xf0]   ;;  %v250_v40 = vld [vmem:[%s465_s0 + $0x1] ss:$8 sm:$0xf]  }
   0xd   :  { %v251_v41 = vld [vmem:[%s465_s0 + $0x1] ss:$8 sm:$0xf0]   ;;  %v6_v42 = vsel %vm5_vm4, %v4_v39, %v3_v36  ;;  %v253_v43 = vld [vmem:[%s465_s0 + $0x46] sm:$0x1]  }
   0xe   :  { %113 = vrot.lane.b32.xlu0 %v112_v31, %s295_s23  ;;  %122 = vrot.lane.b32.xlu1 %v245_v34, %s295_s23  ;;  %v254_v44 = vld [vmem:[%s465_s0 - $0x2] ss:$8 sm:$0x1e]   ;;  %8 = vst.msk [vmem:[#allocation0] sm:$0xff] %vm7_vm5, %v6_v42   ;;  %v156_v45 = vsel %vm5_vm4, %v251_v41, %v250_v40  ;;  %v252_v47 = vld [vmem:[%s465_s0 + $0x41] sm:$0x1]  }
   0xf   :  { %v255_v46 = vld [vmem:[%s465_s0 - $0x2] ss:$8 sm:$0xe0]   ;;  %v173_v48 = vsel %vm18_vm2, %v254_v44, %v253_v43  ;;  %v257_v49 = vld [vmem:[%s465_s0 + $0x43] sm:$0x1]  }
  0x10   :  { %v226_v50 = vld [vmem:[%s465_s0 + $0x40] sm:$0x1]   ;;  %v258_v51 = vld [vmem:[%s465_s0 - $0x5] ss:$8 sm:$0x1e]  }
  0x11   :  { %13 = vst.msk [vmem:[#allocation0 + $0x18] sm:$0x1] %vm7_vm5, %v226_v50  }
  0x12   :  { %137 = vrot.lane.b32.xlu0 %v136_v37, %s296_s9  ;;  %146 = vrot.lane.b32.xlu1 %v249_v38, %s296_s9 }
  0x13   :  { %2 = vsyncpa [#allocation1], 0  ;;  %s297_s20 = smov 48   ;;  %v177_v52 = vsel %vm22_vm3, %v255_v46, %v173_v48  ;;  %v197_v53 = vsel %vm18_vm2, %v258_v51, %v257_v49  ;;  %v259_v54 = vld [vmem:[%s465_s0 - $0x5] ss:$8 sm:$0xe0]  }
  0x14   :  { %v256_v55 = vld [vmem:[%s465_s0 + $0x3e] sm:$0x1]   ;;  %s298_s25 = smov 32   ;;  %v201_v56 = vsel %vm22_vm3, %v259_v54, %v197_v53  ;;  %v260_v57 = vld [vmem:[%s465_s0 + $0x3b] sm:$0x1]   ;;  %s299_s0 = smov 16  }
  0x15   :  { %vm87_vm6 = vcmask 1048320   ;;  %vm43_vm7 = vcmask 1048448   ;;  %vm115_vm8 = vcmask 1048192   ;;  %vm139_vm9 = vcmask 916992   ;;  %s300_s28 = smov [#allocation0]  }
  0x16   :  { %157 = vrot.lane.b32.xlu0 %v156_v45, %s297_s20  ;;  %163 = vrot.lane.b32.xlu1 %v252_v47, %s297_s20  ;;  %vm159_vm10 = vcmask 785792   ;;  %vm180_vm11 = vcmask 654592   ;;  %vm204_vm12 = vcmask 523392   ;;  %s220_s29 = sshll.u32 %s300_s28, 4  ;;  %s221_s29 = int_to_ptr.vmem [resolvable:$true] %s220_s29 }
  0x17   :  { %s269_s30 = scalar_lea.vmem %s221_s29, 768  ;;  %p274_p1 = scmp.lt.s32.totalorder %s221_s29, %s221_s29 }
  0x18   :  { %p270_p0 = scmp.ne.s32.totalorder %s221_s29, %s269_s30  ;;  %p275_p2 = scmp.lt.s32.totalorder %s269_s30, %s269_s30 }
  0x1a   :  { %178 = vrot.lane.b32.xlu0 %v177_v52, %s298_s25  ;;  %187 = vrot.lane.b32.xlu1 %v256_v55, %s298_s25  ;;  %p276_p3 = por %p275_p2, %p274_p1 }
  0x1c   :  { %p277_p4 = pnand %p276_p3, %p270_p0 }
  0x1e   :  { %202 = vrot.lane.b32.xlu0 %v201_v56, %s299_s0  ;;  %211 = vrot.lane.b32.xlu1 %v260_v57, %s299_s0 }
  0x75   :  { %v96_v58 = vpop.permute.xlu1 %95  }
  0x76   :  { %102 = vst.msk [vmem:[#allocation0 + $0x18] sm:$0x1] %vm87_vm6, %v96_v58   ;;  %v55_v59 = vpop.permute.xlu0 %54  }
  0x77   :  { %58 = vst.msk [vmem:[#allocation0 + $0x17] sm:$0x1] %vm38_vm0, %v55_v59  }
  0x78   :  { %61 = vst.msk [vmem:[#allocation0 + $0xf] sm:$0x1] %vm43_vm7, %v55_v59  }
  0x79   :  { %99 = vst.msk [vmem:[#allocation0 + $0xf] sm:$0x1] %vm34_vm1, %v96_v58  }
  0x7c   :  { %v37_v60 = vpop.permute.xlu0 %36   ;;  %v81_v61 = vpop.permute.xlu1 %80  }
  0x7d   :  { %45 = vst.msk [vmem:[#allocation0 + $0x20] ss:$-24 sm:$0x3] %vm43_vm7, %v37_v60   ;;  %47 = vst.msk [vmem:[#allocation0 + $0x7] sm:$0xfc] %vm43_vm7, %v37_v60  }
  0x7e   :  { %40 = vst.msk [vmem:[#allocation0 + $0x28] ss:$-24 sm:$0x3] %vm38_vm0, %v37_v60   ;;  %42 = vst.msk [vmem:[#allocation0 + $0xf] sm:$0xfc] %vm38_vm0, %v37_v60  }
  0x7f   :  { %84 = vst.msk [vmem:[#allocation0 + $0x20] ss:$-24 sm:$0x3] %vm34_vm1, %v81_v61   ;;  %86 = vst.msk [vmem:[#allocation0 + $0x7] sm:$0xfc] %vm34_vm1, %v81_v61  }
  0x80   :  { %88 = vst.msk [vmem:[#allocation0] sm:$0xff] %vm87_vm6, %v81_v61   ;;  %v114_v62 = vpop.permute.xlu0 %113   ;;  %v123_v63 = vpop.permute.xlu1 %122  }
  0x81   :  { %117 = vst.msk [vmem:[#allocation0 + $0x28] ss:$-24 sm:$0x3] %vm115_vm8, %v114_v62   ;;  %119 = vst.msk [vmem:[#allocation0 + $0xf] sm:$0xfc] %vm115_vm8, %v114_v62  }
  0x82   :  { %126 = vst.msk [vmem:[#allocation0 + $0x17] sm:$0x1] %vm115_vm8, %v123_v63  }
  0x84   :  { %v138_v0 = vpop.permute.xlu0 %137   ;;  %v147_v1 = vpop.permute.xlu1 %146  }
  0x85   :  { %141 = vst.msk [vmem:[#allocation0 + $0x20] ss:$-24 sm:$0x3] %vm139_vm9, %v138_v0   ;;  %143 = vst.msk [vmem:[#allocation0 + $0x7] sm:$0xfc] %vm139_vm9, %v138_v0  }
  0x86   :  { %150 = vst.msk [vmem:[#allocation0 + $0xf] sm:$0x1] %vm139_vm9, %v147_v1  }
  0x88   :  { %v158_v2 = vpop.permute.xlu0 %157   ;;  %v164_v3 = vpop.permute.xlu1 %163  }
  0x89   :  { %160 = vst.msk [vmem:[#allocation0] sm:$0xff] %vm159_vm10, %v158_v2   ;;  %167 = vst.msk [vmem:[#allocation0 + $0x18] sm:$0x1] %vm159_vm10, %v164_v3  }
  0x8c   :  { %v179_v4 = vpop.permute.xlu0 %178   ;;  %v188_v5 = vpop.permute.xlu1 %187  }
  0x8d   :  { %182 = vst.msk [vmem:[#allocation0 + $0x28] ss:$-24 sm:$0x3] %vm180_vm11, %v179_v4   ;;  %184 = vst.msk [vmem:[#allocation0 + $0xf] sm:$0xfc] %vm180_vm11, %v179_v4  }
  0x8e   :  { %191 = vst.msk [vmem:[#allocation0 + $0x17] sm:$0x1] %vm180_vm11, %v188_v5  }
  0x90   :  { %v203_v6 = vpop.permute.xlu0 %202   ;;  %v212_v7 = vpop.permute.xlu1 %211  }
  0x91   :  { %206 = vst.msk [vmem:[#allocation0 + $0x20] ss:$-24 sm:$0x3] %vm204_vm12, %v203_v6   ;;  %208 = vst.msk [vmem:[#allocation0 + $0x7] sm:$0xfc] %vm204_vm12, %v203_v6  }
  0x92   :  { %215 = vst.msk [vmem:[#allocation0 + $0xf] sm:$0x1] %vm204_vm12, %v212_v7  }
  0x93   :  { %280 = shalt.err (!%p277_p4)
}
  0x94   :  { %s281_s4 = scalar_lea.hbm %s466_s1, 768 }
  0x95   :  { %p282_p5 = scmp.ne.s32.totalorder %s466_s1, %s281_s4  ;;  %p285_p6 = scmp.lt.u32.totalorder %s281_s4, %s466_s1 }
  0x97   :  { %p287_p7 = pnand %p285_p6, %p282_p5 }
  0x99   :  { %290 = shalt.err (!%p287_p7)
}
  0x9a   :  { %223 = dma.vmem_to_hbm [thread:$0]  %s221_s29, 768, %s466_s1, [#allocation1]  }
  0x9b   :  { %291 = dma.done.wait [#allocation1], 768  }
  0x9c   :  { %292 = vsyncadd [#allocation1], 4294966528 }
  0x9d   :  { %225 = vsyncpa [#allocation1], 1 }

// kernel: learning_to_downsample.5
= control target key start
LH: loop header
LB: loop body
LE: loop exit
PB: predicated region body
PF: predicated region fallthrough
CT: control target
= control target key end

     0   :  { %10 = vsyncpa [#allocation3], 0  ;;  %s4022_s0 = inlined_call_operand.hbm [shape: bf16[2,6,40,384], index: 0, kind: input, shape index: {}]   ;;  %s4023_s1 = inlined_call_operand.hbm [shape: f32[9,384], index: 1, kind: input, shape index: {}]   ;;  %s4024_s2 = inlined_call_operand.hbm [shape: bf16[384,512], index: 2, kind: input, shape index: {}]   ;;  %s4025_s3 = inlined_call_operand.hbm [shape: bf16[32,384], index: 3, kind: input, shape index: {}]   ;;  %s4026_s4 = inlined_call_operand.hbm [shape: bf16[32,512], index: 4, kind: input, shape index: {}]   ;;  %s4027_s5 = inlined_call_operand.hbm [shape: f32[2,32,512], index: 5, kind: output, shape index: {}]  }
   0x1   :  { %12 = vsyncpa [#allocation3 + $0x1], 0 }
   0x2   :  { %13 = vsyncpa [#allocation6], 0 }
   0x3   :  { %14 = vsyncpa [#allocation9], 0 }
   0x4   :  { %15 = vsyncpa [#allocation4], 0 }
   0x5   :  { %17 = vsyncpa [#allocation4 + $0x1], 0  ;;  %s2953_s18 = smov 0   ;;  %s2955_s19 = smov 0  }
   0x6   :  { %s2957_s20 = smov 0   ;;  %s2959_s21 = smov 0  }
   0x7 LB: > { %s2974_s22 = sadd.s32 4294967295, %s2900_s21   ;;  %s2252_s23 = sadd.s32 4294967294, %s2900_s21   ;;  %s2900_s21 = sphi %s2959_s21, %s4130_s21   ;;  %s2896_s20 = sphi %s2957_s20, %s4129_s20   ;;  %s2892_s19 = sphi %s2955_s19, %s4128_s19   ;;  %s2888_s18 = sphi %s2953_s18, %s4127_s18  }
   0x8   : > { %p43_p0 = scmp.ne.s32.totalorder %s2892_s19, %s2888_s18  ;;  %p4028_p1 = scmp.eq.s32.totalorder %s2974_s22, 0 }
   0x9   : > { %p157_p3 = scmp.eq.s32.totalorder %s2252_s23, 1  ;;  %p2253_p5 = scmp.ge.s32.totalorder %s2900_s21, 1 }
   0xa   : > { %p2983_p4 = por %p4028_p1, %p43_p0  ;;  %p164_p7 = scmp.lt.s32.totalorder %s2900_s21, 3 }
   0xb   : > { %p2988_p6 = por %p157_p3, %p43_p0  ;;  %s2902_s27 = smov [#allocation5]  }
   0xc   : > { %s4060_s24 = scalar_select %p2983_p4, 1, 0 }
   0xd   : > { %s4061_s25 = scalar_select %p2988_p6, 1, 0 }
   0xe   : > { %p2993_p8 = pnand %p2253_p5, %p164_p7  ;;  %s176_s28 = sshll.u32 %s2902_s27, 4  ;;  %s2997_s28 = int_to_ptr.vmem [resolvable:$true] %s176_s28 }
   0xf   : > { %s2903_s30 = smov [#allocation8]   ;;  %s2684_s9 = scalar_lea.hbm %s4023_s1, 768 }
  0x10   : > { %s4062_s26 = scalar_select %p2993_p8, 1, 0 }
  0x11   : > { %p2454_p9 = pneg %p2993_p8  ;;  %s202_s6 = sshll.u32 %s2903_s30, 4  ;;  %s3008_s6 = int_to_ptr.vmem [resolvable:$true] %s202_s6 }
  0x12   : > { %p2685_p12 = scmp.ne.s32.totalorder %s4023_s1, %s2684_s9  ;;  %p2691_p5 = scmp.lt.u32.totalorder %s2684_s9, %s4023_s1 }
  0x13   : > { %p3004_p11 = pnand %p2454_p9, %p4028_p1 }
  0x15   : > { %p3018_p13 = pneg %p3004_p11 }
  0x17   : > { %p2687_p0 = pnand %p3018_p13, %p2685_p12 }
  0x19   : > { %p2688_p3 = pneg %p2687_p0 }
  0x1b   : > { %p2693_p7 = pnand %p2691_p5, %p2688_p3 }
  0x1d   : > { %2696 = shalt.err (!%p2693_p7)
}
  0x1e   : > { %s2697_s15 = scalar_lea.vmem %s2997_s28, 768  ;;  %p2705_p2 = scmp.lt.s32.totalorder %s2997_s28, %s2997_s28 }
  0x1f   : > { %p2698_p9 = scmp.ne.s32.totalorder %s2997_s28, %s2697_s15  ;;  %p2706_p6 = scmp.lt.s32.totalorder %s2697_s15, %s2697_s15 }
  0x21   : > { %p2700_p10 = pnand %p2698_p9, %p3018_p13  ;;  %p2707_p12 = por %p2706_p6, %p2705_p2 }
  0x23   : > { %p2701_p1 = pneg %p2700_p10 }
  0x25   : > { %p2708_p0 = pnand %p2707_p12, %p2701_p1 }
  0x27   : > { %2711 = shalt.err (!%p2708_p0)
}
  0x28   : > { %s2904_s16 = smov 384   ;;  %s2905_s17 = smov 24  }
  0x29   : > { %2457 = dma.hbm_to_vmem [thread:$0]  (!%p3004_p11), %s4023_s1, 768, %s2997_s28, [#allocation6], %s2904_s16, %s2904_s16, %s2905_s17  }
  0x2a   : > { %s2712_s8 = scalar_lea.hbm %s4025_s3, 768 }
  0x2b   : > { %p2713_p2 = scmp.ne.s32.totalorder %s4025_s3, %s2712_s8  ;;  %p2719_p10 = scmp.lt.u32.totalorder %s2712_s8, %s4025_s3 }
  0x2d   : > { %p2715_p1 = pnand %p2713_p2, %p3018_p13 }
  0x2f   : > { %p2716_p6 = pneg %p2715_p1 }
  0x31   : > { %p2721_p3 = pnand %p2719_p10, %p2716_p6 }
  0x33   : > { %2724 = shalt.err (!%p2721_p3)
}
  0x34   : > { %s2725_s28 = scalar_lea.vmem %s3008_s6, 768  ;;  %p2733_p12 = scmp.lt.s32.totalorder %s3008_s6, %s3008_s6 }
  0x35   : > { %p2726_p5 = scmp.ne.s32.totalorder %s3008_s6, %s2725_s28  ;;  %p2734_p0 = scmp.lt.s32.totalorder %s2725_s28, %s2725_s28 }
  0x37   : > { %p2728_p7 = pnand %p2726_p5, %p3018_p13  ;;  %p2735_p2 = por %p2734_p0, %p2733_p12 }
  0x39   : > { %p2729_p9 = pneg %p2728_p7 }
  0x3b   : > { %p2736_p1 = pnand %p2735_p2, %p2729_p9 }
  0x3d   : > { %2739 = shalt.err (!%p2736_p1)
}
  0x3e   : > { %s4031_s14 = smov 192   ;;  %s2907_s15 = smov 12  }
  0x3f   : > { %2463 = dma.hbm_to_vmem [thread:$0]  (!%p3004_p11), %s4025_s3, 768, %s3008_s6, [#allocation9], %s4031_s14, %s4031_s14, %s2907_s15  }
  0x40   : > { %s2908_s23 = smov [#allocation7]   ;;  %s2740_s8 = scalar_lea.hbm %s4024_s2, 12288 }
  0x41   : > { %s189_s27 = sshll.u32 %s2908_s23, 4  ;;  %p2741_p6 = scmp.ne.s32.totalorder %s4024_s2, %s2740_s8  ;;  %s190_s27 = int_to_ptr.vmem [resolvable:$true] %s189_s27 }
  0x42   : > { %p2747_p5 = scmp.lt.u32.totalorder %s2740_s8, %s4024_s2 }
  0x43   : > { %p2743_p10 = pnand %p2741_p6, %p3018_p13 }
  0x45   : > { %p2744_p3 = pneg %p2743_p10 }
  0x47   : > { %p2749_p7 = pnand %p2747_p5, %p2744_p3 }
  0x49   : > { %2752 = shalt.err (!%p2749_p7)
}
  0x4a   : > { %s2753_s6 = scalar_lea.vmem %s190_s27, 12288  ;;  %p2761_p2 = scmp.lt.s32.totalorder %s190_s27, %s190_s27 }
  0x4b   : > { %p2754_p9 = scmp.ne.s32.totalorder %s190_s27, %s2753_s6  ;;  %p2762_p1 = scmp.lt.s32.totalorder %s2753_s6, %s2753_s6 }
  0x4d   : > { %p2756_p12 = pnand %p2754_p9, %p3018_p13  ;;  %p2763_p4 = por %p2762_p1, %p2761_p2 }
  0x4f   : > { %p2757_p0 = pneg %p2756_p12 }
  0x51   : > { %p2764_p8 = pnand %p2763_p4, %p2757_p0 }
  0x53   : > { %2767 = shalt.err (!%p2764_p8)
}
  0x54   : > { %s2909_s28 = smov 256   ;;  %s2910_s16 = smov 16  }
  0x55   : > { %2460 = dma.hbm_to_vmem [thread:$0]  (!%p3004_p11), %s4024_s2, 12288, %s190_s27, [#allocation6], %s2909_s28, %s2909_s28, %s2910_s16  }
  0x56   : > { %s2911_s30 = smov [#allocation10]   ;;  %s2768_s10 = scalar_lea.hbm %s4026_s4, 1024 }
  0x57   : > { %s215_s7 = sshll.u32 %s2911_s30, 4  ;;  %p2769_p4 = scmp.ne.s32.totalorder %s4026_s4, %s2768_s10  ;;  %s216_s7 = int_to_ptr.vmem [resolvable:$true] %s215_s7 }
  0x58   : > { %p2775_p10 = scmp.lt.u32.totalorder %s2768_s10, %s4026_s4 }
  0x59   : > { %p2771_p8 = pnand %p2769_p4, %p3018_p13 }
  0x5b   : > { %p2772_p6 = pneg %p2771_p8 }
  0x5d   : > { %p2777_p3 = pnand %p2775_p10, %p2772_p6 }
  0x5f   : > { %2780 = shalt.err (!%p2777_p3)
}
  0x60   : > { %s2781_s27 = scalar_lea.vmem %s216_s7, 1024  ;;  %p2789_p12 = scmp.lt.s32.totalorder %s216_s7, %s216_s7 }
  0x61   : > { %p2782_p5 = scmp.ne.s32.totalorder %s216_s7, %s2781_s27  ;;  %p2790_p0 = scmp.lt.s32.totalorder %s2781_s27, %s2781_s27 }
  0x63   : > { %p2784_p7 = pnand %p2782_p5, %p3018_p13  ;;  %p2791_p2 = por %p2790_p0, %p2789_p12 }
  0x65   : > { %p2785_p9 = pneg %p2784_p7 }
  0x67   : > { %p2792_p1 = pnand %p2791_p2, %p2785_p9 }
  0x69   : > { %2795 = shalt.err (!%p2792_p1)
}
  0x6a   : > { %2466 = dma.hbm_to_vmem [thread:$0]  (!%p3004_p11), %s4026_s4, 1024, %s216_s7, [#allocation9], %s2909_s28, %s2909_s28, %s2910_s16  }
  0x6b   : > { %s3102_s12 = sadd.s32 1, %s2900_s21   ;;  %s30_s14 = sadd.s32 1, %s2896_s20 }
  0x6c   : > { %s27_s29 = ssub.s32 %s2900_s21, %s3102_s12  ;;  %p37_p13 = scmp.ne.s32.totalorder %s2896_s20, %s2892_s19 }
  0x6d   : > { %p28_p4 = scmp.eq.s32.totalorder %s27_s29, 0  ;;  %p38_p8 = scmp.eq.s32.totalorder %s2900_s21, 0 }
  0x6e   : > { %p4065_p6 = scmp.eq.s32.totalorder %s2974_s22, 1  ;;  %p2479_p3 = scmp.lt.s32.totalorder %s2900_s21, 2 }
  0x6f   : > { %s3118_s8 = scalar_select %p28_p4, %s2896_s20, %s30_s14  }
  0x70   : > { %p3112_p10 = por %p4065_p6, %p37_p13  ;;  %p39_p5 = por %p38_p8, %p37_p13 }
  0x71   : > { %s229_s9 = sand.u32 1, %s2896_s20   ;;  %s2432_s28 = smul.u32 5760, %s2900_s21 }
  0x72   : > { %s2431_s10 = smul.u32 360, %s229_s9  ;;  %p3122_p11 = pnand %p2479_p3, %p39_p5 }
  0x73   : > { %s3129_s13 = scalar_lea.hbm %s4022_s0, %s2432_s28  ;;  %s3133_s17 = scalar_lea.sflag [#allocation3], %s229_s9 }
  0x74   : > { %s233_s6 = scalar_lea.vmem [#allocation2], %s2431_s10  ;;  %s2796_s23 = scalar_lea.hbm %s3129_s13, 5760 }
  0x75   : > { %s240_s27 = sshll.u32 %s233_s6, 4  ;;  %p2797_p7 = scmp.ne.s32.totalorder %s3129_s13, %s2796_s23  ;;  %s3131_s27 = int_to_ptr.vmem [resolvable:$true] %s240_s27 }
  0x76   : > { %p2798_p9 = pneg %p3122_p11  ;;  %s2801_s28 = scalar_lea.hbm %s4022_s0, 11520 }
  0x77   : > { %p2802_p2 = scmp.lt.u32.totalorder %s3129_s13, %s4022_s0  ;;  %p2803_p1 = scmp.lt.u32.totalorder %s2801_s28, %s2796_s23 }
  0x78   : > { %p2799_p12 = pnand %p2798_p9, %p2797_p7  ;;  %p2805_p4 = scmp.lt.u32.totalorder %s2796_s23, %s3129_s13 }
  0x79   : > { %p2804_p13 = por %p2803_p1, %p2802_p2 }
  0x7a   : > { %p2800_p0 = pneg %p2799_p12 }
  0x7b   : > { %p2806_p8 = por %p2805_p4, %p2804_p13 }
  0x7d   : > { %p2807_p6 = pnand %p2806_p8, %p2800_p0 }
  0x7f   : > { %2810 = shalt.err (!%p2807_p6)
}
  0x80   : > { %s2811_s9 = scalar_lea.vmem %s3131_s27, 5760  ;;  %s2912_s10 = smov [#allocation2]  }
  0x81   : > { %p2812_p3 = scmp.ne.s32.totalorder %s3131_s27, %s2811_s9  ;;  %s2816_s6 = sshll.u32 %s2912_s10, 4  ;;  %s2817_s6 = int_to_ptr.vmem [resolvable:$false] %s2816_s6 }
  0x82   : > { %s2818_s14 = scalar_lea.vmem %s2817_s6, 11520  ;;  %p2819_p12 = scmp.lt.s32.totalorder %s3131_s27, %s2817_s6 }
  0x83   : > { %p2814_p5 = pnand %p2812_p3, %p2798_p9  ;;  %p2820_p2 = scmp.lt.s32.totalorder %s2818_s14, %s2811_s9 }
  0x85   : > { %p2815_p7 = pneg %p2814_p5  ;;  %p2821_p1 = por %p2820_p2, %p2819_p12 }
  0x87   : > { %p2822_p13 = pnand %p2821_p1, %p2815_p7 }
  0x89   : > { %2825 = shalt.err (!%p2822_p13)
}
  0x8a   : > { %s4068_s23 = smov 192   ;;  %p4069_p9 = scmp.ne.s32.totalorder %s4062_s26, 0 }
  0x8b   : > { %2470 = dma.hbm_to_vmem [thread:$0]  (!%p3122_p11), %s3129_s13, 5760, %s3131_s27, %s3133_s17, %s4068_s23, %s4068_s23, %s2907_s15  }
  0x8c   : > { %252 = sbr.rel (%p4069_p9) target bundleno = 1654 (0x676), region = 40 }
  0x93   : > { %s3167_s29 = sand.u32 1, %s2892_s19   ;;  %p4070_p0 = scmp.ne.s32.totalorder %s4060_s24, 0 }
  0x94   : > { %s2433_s28 = smul.u32 360, %s3167_s29  ;;  %s255_s7 = scalar_lea.sflag [#allocation3], %s3167_s29 }
  0x96   : > { %s3171_s11 = scalar_lea.vmem [#allocation2], %s2433_s28 }
  0x97   : > { %2871 = dma.done.wait (%p4070_p0), %s255_s7, 5760  }
  0x98   : > { %2873 = vsyncadd (%p4070_p0), %s255_s7, 4294961536  ;;  %p4071_p11 = scmp.eq.s32.totalorder %s2974_s22, 0 }
  0x9a   : > { %2875 = dma.done.wait (%p4071_p11), [#allocation6], 13056   ;;  %p4072_p4 = pmov %p4071_p11 }
  0x9c   : > { %2877 = vsyncadd (%p4072_p4), [#allocation6], 4294954240  ;;  %p4073_p8 = pmov %p4072_p4 }
  0x9d   : > { %p4074_p6 = pmov %p4072_p4 }
  0x9e   : > { %2879 = dma.done.wait (%p4073_p8), [#allocation9], 1792  }
  0x9f   : > { %2881 = vsyncadd (%p4074_p6), [#allocation9], 4294965504  ;;  %v372_v0 = vlaneseq  ;;  %v3193_v6 = vld [vmem:[#allocation5] sm:$0xff]  ;;  %v3195_v7 = vld [vmem:[#allocation5 + $0x8] sm:$0xff]  ;;  %s2913_s24 = smov 80   ;;  %s2914_s26 = smov 32  }
  0xa0   : > { %v3206_v12 = vld [vmem:[%s3171_s11] sm:$0xff]  ;;  %v3209_v13 = vld [vmem:[%s3171_s11 + $0xc] sm:$0xff]  ;;  %v3212_v14 = vld [vmem:[%s3171_s11 + $0x18] sm:$0xff]  ;;  %s2915_s15 = smov 64   ;;  %s2916_s16 = smov 112   ;;  %vm853_vm0 = vcmask 261120  }
  0xa1   : > { %v373_v1 = vshrl.u32 %v372_v0, 7  ;;  %v3227_v19 = vld [vmem:[%s3171_s11 + $0x24] sm:$0xff]  ;;  %v360_v20 = vunpack.c.l.bf16 %v3206_v12  ;;  %v4049_v22 = vunpack.c.l.bf16 %v3209_v13  ;;  %v4037_v23 = vunpack.c.h.bf16 %v3209_v13  ;;  %v3234_v24 = vld [vmem:[%s3171_s11 + $0x3c] sm:$0xff]  ;;  %v3244_v30 = vld [vmem:[%s3171_s11 + $0x54] sm:$0xff]  ;;  %s2917_s13 = smov 16   ;;  %s2918_s27 = smov 96  }
  0xa2   : > { %v4048_v25 = vunpack.c.l.bf16 %v3212_v14  ;;  %v4036_v26 = vunpack.c.h.bf16 %v3212_v14  ;;  %v4047_v27 = vunpack.c.l.bf16 %v3227_v19  ;;  %v4035_v28 = vunpack.c.h.bf16 %v3227_v19  ;;  %v3241_v29 = vld [vmem:[%s3171_s11 + $0x48] sm:$0xff]  ;;  %v3252_v34 = vld [vmem:[%s3171_s11 + $0x60] sm:$0xff]  ;;  %v3266_v40 = vld [vmem:[%s3171_s11 + $0x78] sm:$0xff]  ;;  %s2919_s17 = smov 48   ;;  %s2265_s9 = sshll.u32 %s3167_s29, 7 }
  0xa3   : > { %v3185_v2 = vsub.s32 0, %v373_v1  ;;  %v3187_v3 = vsub.s32 1, %v373_v1  ;;  %v3189_v4 = vsub.s32 2, %v373_v1  ;;  %v3191_v5 = vsub.s32 3, %v373_v1  ;;  %v3283_v52 = vld [vmem:[%s3171_s11 + $0x84] sm:$0xff]  ;;  %v3295_v58 = vld [vmem:[%s3171_s11 + $0x90] sm:$0xff] }
  0xa4   : > { %v3197_v8 = vsub.s32 4, %v373_v1  ;;  %v3199_v9 = vsub.s32 5, %v373_v1  ;;  %v3201_v10 = vsub.s32 6, %v373_v1  ;;  %v3203_v11 = vsub.s32 7, %v373_v1  ;;  %v3298_v59 = vld [vmem:[%s3171_s11 + $0x9c] sm:$0xff]  ;;  %v3302_v0 = vld [vmem:[%s3171_s11 + $0xb4] sm:$0xff] }
  0xa5   : > { %4075 = vst [vmem:[#allocation16_spill] sm:$0xff] %v3185_v2  ;;  %4076 = vst [vmem:[#allocation17_spill] sm:$0xff] %v3187_v3  ;;  %v375_v15 = vrot.slane %v3193_v6, %v3185_v2  ;;  %v3218_v16 = vrot.slane %v3195_v7, %v3185_v2  ;;  %v432_v17 = vrot.slane %v3193_v6, %v3187_v3  ;;  %v417_v35 = vunpack.c.l.bf16 %v3234_v24  ;;  %v3409_v2 = vld [vmem:[%s3171_s11 + $0xa8] sm:$0xff]  ;;  %s2414_s10 = sshll.u32 %s2974_s22, 11  ;;  %s3953_s6 = scalar_lea.vmem [#allocation11], %s2265_s9 }
  0xa6   : > { %4077 = vst [vmem:[#allocation18_spill] sm:$0xff] %v3189_v4  ;;  %4078 = vst [vmem:[#allocation19_spill] sm:$0xff] %v3191_v5  ;;  %v3224_v18 = vrot.slane %v3195_v7, %v3187_v3  ;;  %v4042_v42 = vunpack.c.l.bf16 %v3241_v29  ;;  %v4034_v43 = vunpack.c.h.bf16 %v3241_v29  ;;  %v4041_v44 = vunpack.c.l.bf16 %v3244_v30  ;;  %s2141_s14 = sshll.u32 %s3953_s6, 4  ;;  %s3963_s28 = scalar_lea.hbm %s4027_s5, %s2414_s10  ;;  %s3969_s14 = int_to_ptr.vmem [resolvable:$true] %s2141_s14 }
  0xa7   : > { %v384_v31 = vmul.f32 %v375_v15, %v360_v20  ;;  %v387_v32 = vmul.f32 %v375_v15, %v4049_v22  ;;  %v388_v33 = vmul.f32 %v3218_v16, %v4037_v23  ;;  %v390_v36 = vmul.f32 %v375_v15, %v4048_v25  ;;  %v3337_v23 = vld [vmem:[%s3171_s11 + $0xfc] sm:$0xff]  ;;  %s2128_s7 = scalar_lea.sflag [#allocation4], %s3167_s29 }
  0xa8   : > { %v391_v37 = vmul.f32 %v3218_v16, %v4036_v26  ;;  %v393_v38 = vmul.f32 %v375_v15, %v4047_v27  ;;  %v394_v39 = vmul.f32 %v3218_v16, %v4035_v28  ;;  %v4033_v45 = vunpack.c.h.bf16 %v3244_v30  ;;  %v3388_v27 = vld [vmem:[%s3171_s11 + $0x30] sm:$0xff] }
  0xa9   : > { %v4040_v46 = vunpack.c.l.bf16 %v3252_v34  ;;  %v4032_v47 = vunpack.c.h.bf16 %v3252_v34  ;;  %v441_v48 = vmul.f32 %v432_v17, %v417_v35  ;;  %v444_v49 = vmul.f32 %v432_v17, %v4042_v42  ;;  %v2284_v35 = vld [vmem:[%s3171_s11 + $0xc0] sm:$0xff] }
  0xaa   : > { %v445_v50 = vmul.f32 %v3224_v18, %v4034_v43  ;;  %v447_v51 = vmul.f32 %v432_v17, %v4041_v44  ;;  %v474_v53 = vunpack.c.l.bf16 %v3266_v40  ;;  %v448_v54 = vmul.f32 %v3224_v18, %v4033_v45  ;;  %v3352_v44 = vld [vmem:[%s3171_s11 + $0x114] sm:$0xff] }
  0xab   : > { %v450_v55 = vmul.f32 %v432_v17, %v4040_v46  ;;  %v451_v56 = vmul.f32 %v3224_v18, %v4032_v47  ;;  %v453_v57 = vadd.f32 %v441_v48, %v384_v31  ;;  %v456_v60 = vadd.f32 %v444_v49, %v387_v32  ;;  %v3307_v31 = vld [vmem:[%s3171_s11 + $0xcc] sm:$0xff] }
  0xac   : > { %v457_v61 = vadd.f32 %v445_v50, %v388_v33  ;;  %v459_v62 = vadd.f32 %v447_v51, %v390_v36  ;;  %v460_v1 = vadd.f32 %v448_v54, %v391_v37  ;;  %v4044_v20 = vunpack.c.l.bf16 %v3283_v52  ;;  %v3322_v50 = vld [vmem:[%s3171_s11 + $0xd8] sm:$0xff]  ;;  %v3327_v47 = vld [vmem:[%s3171_s11 + $0xf0] sm:$0xff]  ;;  %v3340_v51 = vld [vmem:[%s3171_s11 + $0x108] sm:$0xff] }
  0xad   : > { %v462_v15 = vadd.f32 %v450_v55, %v393_v38  ;;  %v463_v17 = vadd.f32 %v451_v56, %v394_v39  ;;  %v4038_v48 = vunpack.c.h.bf16 %v3283_v52  ;;  %v4039_v32 = vunpack.c.l.bf16 %v3295_v58 }
  0xae   : > { %v4043_v33 = vunpack.c.h.bf16 %v3295_v58  ;;  %v4045_v36 = vunpack.c.l.bf16 %v3298_v59  ;;  %v4046_v37 = vunpack.c.h.bf16 %v3298_v59  ;;  %v489_v38 = vrot.slane %v3193_v6, %v3189_v4 }
  0xaf   : > { %v3318_v39 = vrot.slane %v3195_v7, %v3189_v4  ;;  %v531_v49 = vunpack.c.l.bf16 %v3302_v0  ;;  %v534_v54 = vunpack.c.l.bf16 %v2284_v35  ;;  %v535_v55 = vunpack.c.h.bf16 %v2284_v35 }
  0xb0   : > { %v537_v56 = vunpack.c.l.bf16 %v3307_v31  ;;  %v498_v45 = vmul.f32 %v489_v38, %v474_v53  ;;  %v501_v43 = vmul.f32 %v489_v38, %v4044_v20  ;;  %v504_v26 = vmul.f32 %v489_v38, %v4039_v32 }
  0xb1   : > { %v502_v28 = vmul.f32 %v3318_v39, %v4038_v48  ;;  %v505_v35 = vmul.f32 %v3318_v39, %v4043_v33  ;;  %v507_v53 = vmul.f32 %v489_v38, %v4045_v36  ;;  %v508_v63 = vmul.f32 %v3318_v39, %v4046_v37  ;;  %v2310_v48 = vld [vmem:[#allocation5 + $0x18] ss:$0 sm:$0xff] }
  0xb2   : > { %v510_v41 = vadd.f32 %v498_v45, %v453_v57  ;;  %v513_v21 = vadd.f32 %v501_v43, %v456_v60  ;;  %v516_v46 = vadd.f32 %v504_v26, %v459_v62  ;;  %v540_v38 = vunpack.c.l.bf16 %v3322_v50  ;;  %v3368_v43 = vld [vmem:[%s3171_s11 + $0x12c] sm:$0xff]  ;;  %v3375_v62 = vld [vmem:[%s3171_s11 + $0x138] sm:$0xff] }
  0xb3   : > { %v514_v32 = vadd.f32 %v502_v28, %v457_v61  ;;  %v3354_v42 = vadd.f32 %v505_v35, %v460_v1  ;;  %v519_v33 = vadd.f32 %v507_v53, %v462_v15  ;;  %v3356_v20 = vadd.f32 %v508_v63, %v463_v17  ;;  %4079 = vst [vmem:[#allocation20_spill] sm:$0xff] %v3375_v62  ;;  %v3378_v63 = vld [vmem:[%s3171_s11 + $0x144] sm:$0xff]  ;;  %v3385_v60 = vld [vmem:[%s3171_s11 + $0x150] sm:$0xff] }
  0xb4   : > { %v546_v37 = vrot.slane %v3193_v6, %v3191_v5  ;;  %v3364_v28 = vrot.slane %v3195_v7, %v3191_v5  ;;  %v588_v26 = vunpack.c.l.bf16 %v3327_v47  ;;  %v591_v57 = vunpack.c.l.bf16 %v3337_v23  ;;  %4080 = vst [vmem:[#allocation21_spill] sm:$0xff] %v3378_v63  ;;  %4081 = vst [vmem:[#allocation22_spill] sm:$0xff] %v3385_v60 }
  0xb5   : > { %v594_v61 = vunpack.c.l.bf16 %v3340_v51  ;;  %v597_v45 = vunpack.c.l.bf16 %v3352_v44  ;;  %v651_v36 = vunpack.c.l.bf16 %v3378_v63  ;;  %v4090_v63 = vunpack.c.l.bf16 %v3298_v59 }
  0xb6   : > { %v555_v1 = vmul.f32 %v546_v37, %v531_v49  ;;  %v558_v15 = vmul.f32 %v546_v37, %v534_v54  ;;  %v559_v17 = vmul.f32 %v3364_v28, %v535_v55  ;;  %v561_v35 = vmul.f32 %v546_v37, %v537_v56 }
  0xb7   : > { %v564_v53 = vmul.f32 %v546_v37, %v540_v38  ;;  %v603_v37 = vrot.slane %v3193_v6, %v3197_v8  ;;  %v645_v55 = vunpack.c.l.bf16 %v3368_v43  ;;  %v648_v38 = vunpack.c.l.bf16 %v3375_v62 }
  0xb8   : > { %v567_v25 = vadd.f32 %v555_v1, %v510_v41  ;;  %v570_v22 = vadd.f32 %v558_v15, %v513_v21  ;;  %v3390_v5 = vadd.f32 %v559_v17, %v514_v32  ;;  %v573_v49 = vadd.f32 %v561_v35, %v516_v46  ;;  %v3401_v41 = vld [vmem:[%s3171_s11 + $0x6c] sm:$0xff] }
  0xb9   : > { %v576_v54 = vadd.f32 %v564_v53, %v519_v33  ;;  %v612_v46 = vmul.f32 %v603_v37, %v588_v26  ;;  %v615_v32 = vmul.f32 %v603_v37, %v591_v57  ;;  %v618_v33 = vmul.f32 %v603_v37, %v594_v61 }
  0xba   : > { %v621_v1 = vmul.f32 %v603_v37, %v597_v45  ;;  %v654_v15 = vunpack.c.l.bf16 %v3385_v60  ;;  %v660_v35 = vrot.slane %v3193_v6, %v3199_v9  ;;  %v695_v53 = vunpack.c.l.bf16 %v3388_v27 }
  0xbb   : > { %v624_v56 = vadd.f32 %v612_v46, %v567_v25  ;;  %v627_v4 = vadd.f32 %v615_v32, %v570_v22  ;;  %v630_v3 = vadd.f32 %v618_v33, %v573_v49  ;;  %v696_v37 = vunpack.c.h.bf16 %v3388_v27 }
  0xbc   : > { %v633_v21 = vadd.f32 %v621_v1, %v576_v54  ;;  %v669_v26 = vmul.f32 %v660_v35, %v645_v55  ;;  %v672_v57 = vmul.f32 %v660_v35, %v648_v38  ;;  %v675_v61 = vmul.f32 %v660_v35, %v651_v36 }
  0xbd   : > { %v678_v45 = vmul.f32 %v660_v35, %v654_v15  ;;  %v701_v17 = vrot.slane %v3193_v6, %v3201_v10  ;;  %v736_v60 = vunpack.c.l.bf16 %v3401_v41  ;;  %v4082_v54 = vunpack.c.l.bf16 %v3209_v13 }
  0xbe   : > { %v681_v62 = vadd.f32 %v669_v26, %v624_v56  ;;  %v684_v25 = vadd.f32 %v672_v57, %v627_v4  ;;  %v687_v22 = vadd.f32 %v675_v61, %v630_v3  ;;  %v4083_v55 = vunpack.c.l.bf16 %v3212_v14 }
  0xbf   : > { %v690_v49 = vadd.f32 %v678_v45, %v633_v21  ;;  %v710_v46 = vmul.f32 %v701_v17, %v4082_v54  ;;  %v4084_v38 = vunpack.c.l.bf16 %v3227_v19  ;;  %v719_v33 = vmul.f32 %v701_v17, %v695_v53 }
  0xc0   : > { %v713_v36 = vmul.f32 %v701_v17, %v4083_v55  ;;  %v742_v1 = vrot.slane %v3193_v6, %v3203_v11  ;;  %v777_v15 = vunpack.c.l.bf16 %v3409_v2  ;;  %v4085_v3 = vunpack.c.l.bf16 %v3283_v52 }
  0xc1   : > { %v716_v32 = vmul.f32 %v701_v17, %v4084_v38  ;;  %v722_v21 = vadd.f32 %v710_v46, %v681_v62  ;;  %v731_v57 = vadd.f32 %v719_v33, %v690_v49  ;;  %v4086_v61 = vunpack.c.l.bf16 %v3241_v29 }
  0xc2   : > { %v792_v4 = vmul.f32 %v2310_v48, %v4085_v3  ;;  %v725_v35 = vadd.f32 %v713_v36, %v684_v25  ;;  %v4087_v54 = vunpack.c.l.bf16 %v3244_v30  ;;  %v4088_v53 = vunpack.c.l.bf16 %v3252_v34 }
  0xc3   : > { %v728_v26 = vadd.f32 %v716_v32, %v687_v22  ;;  %v751_v45 = vmul.f32 %v742_v1, %v4086_v61  ;;  %v760_v55 = vmul.f32 %v742_v1, %v736_v60  ;;  %v4089_v38 = vunpack.c.l.bf16 %v3295_v58 }
  0xc4   : > { %v754_v17 = vmul.f32 %v742_v1, %v4087_v54  ;;  %v757_v6 = vmul.f32 %v742_v1, %v4088_v53  ;;  %v798_v3 = vmul.f32 %v2310_v48, %v4090_v63  ;;  %v801_v62 = vmul.f32 %v2310_v48, %v777_v15 }
  0xc5   : > { %v795_v56 = vmul.f32 %v2310_v48, %v4089_v38  ;;  %v4091_v25 = vunpack.c.h.bf16 %v3206_v12  ;;  %v763_v49 = vadd.f32 %v751_v45, %v722_v21  ;;  %v772_v32 = vadd.f32 %v760_v55, %v731_v57 }
  0xc6   : > { %v766_v46 = vadd.f32 %v754_v17, %v725_v35  ;;  %v769_v36 = vadd.f32 %v757_v6, %v728_v26  ;;  %v4092_v33 = vunpack.c.h.bf16 %v3234_v24  ;;  %v4093_v60 = vunpack.c.h.bf16 %v3266_v40 }
  0xc7   : > { %v385_v22 = vmul.f32 %v3218_v16, %v4091_v25  ;;  %v4094_v54 = vunpack.c.h.bf16 %v3302_v0  ;;  %v4095_v12 = vunpack.c.h.bf16 %v3307_v31  ;;  %v3453_v63 = vadd.f32 %v792_v4, %v763_v49 }
  0xc8   : > { %v442_v61 = vmul.f32 %v3224_v18, %v4092_v33  ;;  %v499_v1 = vmul.f32 %v3318_v39, %v4093_v60  ;;  %v3455_v15 = vadd.f32 %v795_v56, %v766_v46  ;;  %v3457_v21 = vadd.f32 %v798_v3, %v769_v36  ;;  %v4104_v46 = vld [vmem:[#allocation21_spill] sm:$0xff] }
  0xc9   : > { %v556_v48 = vmul.f32 %v3364_v28, %v4094_v54  ;;  %v562_v16 = vmul.f32 %v3364_v28, %v4095_v12  ;;  %v3459_v24 = vadd.f32 %v801_v62, %v772_v32  ;;  %v4096_v40 = vunpack.c.h.bf16 %v3322_v50 }
  0xca   : > { %v454_v18 = vadd.f32 %v442_v61, %v385_v22  ;;  %v607_v31 = vrot.slane %v3195_v7, %v3197_v8  ;;  %v816_v4 = vadd.f32 %v3455_v15, %v3453_v63  ;;  %v664_v56 = vrot.slane %v3195_v7, %v3199_v9  ;;  %v4102_v22 = vld [vmem:[#allocation20_spill] sm:$0xff]  ;;  %v4106_v61 = vld [vmem:[#allocation22_spill] sm:$0xff] }
  0xcb   : > { %v565_v39 = vmul.f32 %v3364_v28, %v4096_v40  ;;  %v574_v0 = vadd.f32 %v562_v16, %v3354_v42  ;;  %v705_v35 = vrot.slane %v3195_v7, %v3201_v10  ;;  %v746_v26 = vrot.slane %v3195_v7, %v3203_v11 }
  0xcc   : > { %v511_v50 = vadd.f32 %v499_v1, %v454_v18  ;;  %v4097_v42 = vunpack.c.h.bf16 %v3327_v47  ;;  %v4098_v45 = vunpack.c.h.bf16 %v3337_v23  ;;  %v817_v53 = vadd.f32 %v816_v4, %v3457_v21  ;;  %v2311_v18 = vld [vmem:[#allocation5 + $0x20] ss:$0 sm:$0xff] }
  0xcd   : > { %v577_v28 = vadd.f32 %v565_v39, %v3356_v20  ;;  %v4099_v6 = vunpack.c.h.bf16 %v3340_v51  ;;  %v4100_v38 = vunpack.c.h.bf16 %v3352_v44  ;;  %v4101_v62 = vunpack.c.h.bf16 %v3368_v43 }
  0xce   : > { %v613_v57 = vmul.f32 %v607_v31, %v4097_v42  ;;  %v616_v17 = vmul.f32 %v607_v31, %v4098_v45  ;;  %v568_v25 = vadd.f32 %v556_v48, %v511_v50  ;;  %v4103_v47 = vunpack.c.h.bf16 %v4102_v22 }
  0xcf   : > { %v619_v55 = vmul.f32 %v607_v31, %v4099_v6  ;;  %v622_v3 = vmul.f32 %v607_v31, %v4100_v38  ;;  %v670_v7 = vmul.f32 %v664_v56, %v4101_v62  ;;  %v4105_v23 = vunpack.c.h.bf16 %v4104_v46  ;;  %v3514_v38 = vld [vmem:[%s3171_s11 + $0x8] ss:$12 sps:$4 sm:$0xff]  }
  0xd0   : > { %v628_v20 = vadd.f32 %v616_v17, %v3390_v5  ;;  %v673_v49 = vmul.f32 %v664_v56, %v4103_v47  ;;  %v818_v32 = vadd.f32 %v817_v53, %v3459_v24  ;;  %v4107_v60 = vunpack.c.h.bf16 %v4106_v61  ;;  %v3525_v47 = vld [vmem:[#allocation5 + $0x10] sm:$0xff] }
  0xd1   : > { %v676_v36 = vmul.f32 %v664_v56, %v4105_v23  ;;  %v631_v33 = vadd.f32 %v619_v55, %v574_v0  ;;  %v634_v51 = vadd.f32 %v622_v3, %v577_v28  ;;  %v625_v1 = vadd.f32 %v613_v57, %v568_v25 }
  0xd2   : > { %v679_v44 = vmul.f32 %v664_v56, %v4107_v60  ;;  %v685_v54 = vadd.f32 %v673_v49, %v628_v20  ;;  %v4108_v43 = vunpack.c.h.bf16 %v3209_v13  ;;  %v4109_v5 = vunpack.c.h.bf16 %v3212_v14  ;;  %v3528_v49 = vld [vmem:[%s3171_s11 + $0x44] ss:$12 sps:$4 sm:$0xff]  }
  0xd3   : > { %v819_v16 = vrot.slane %v818_v32, 4  ;;  %v688_v40 = vadd.f32 %v676_v36, %v631_v33  ;;  %v4110_v31 = vunpack.c.h.bf16 %v3227_v19  ;;  %v682_v4 = vadd.f32 %v670_v7, %v625_v1 }
  0xd4   : > { %v711_v48 = vmul.f32 %v705_v35, %v4108_v43  ;;  %v714_v12 = vmul.f32 %v705_v35, %v4109_v5  ;;  %v691_v39 = vadd.f32 %v679_v44, %v634_v51  ;;  %v720_v56 = vmul.f32 %v705_v35, %v696_v37  ;;  %v4119_v44 = vld [vmem:[#allocation16_spill] sm:$0xff] }
  0xd5   : > { %v717_v0 = vmul.f32 %v705_v35, %v4110_v31  ;;  %v4111_v13 = vunpack.c.h.bf16 %v3241_v29  ;;  %v820_v42 = vadd.f32 %v819_v16, %v818_v32  ;;  %v4112_v57 = vunpack.c.h.bf16 %v3244_v30  ;;  %v3535_v32 = vld [vmem:[%s3171_s11 + $0x5c] ss:$12 sps:$4 sm:$0xff]   ;;  %v3549_v43 = vld [vmem:[%s3171_s11 + $0x80] ss:$12 sps:$4 sm:$0xff]  }
  0xd6   : > { %v726_v50 = vadd.f32 %v714_v12, %v685_v54  ;;  %v4113_v17 = vunpack.c.h.bf16 %v3252_v34  ;;  %v723_v19 = vadd.f32 %v711_v48, %v682_v4  ;;  %v732_v6 = vadd.f32 %v720_v56, %v691_v39  ;;  %v3519_v34 = vld [vmem:[%s3171_s11 + $0x20] ss:$12 sps:$4 sm:$0xff]  }
  0xd7   : > { %v752_v28 = vmul.f32 %v746_v26, %v4111_v13  ;;  %v729_v14 = vadd.f32 %v717_v0, %v688_v40  ;;  %v755_v45 = vmul.f32 %v746_v26, %v4112_v57  ;;  %v4114_v55 = vunpack.c.h.bf16 %v3401_v41 }
  0xd8   : > { %v758_v53 = vmul.f32 %v746_v26, %v4113_v17  ;;  %v4115_v37 = vunpack.c.h.bf16 %v3283_v52  ;;  %v821_v29 = vrot.slane %v820_v42, 2  ;;  %v4116_v30 = vunpack.c.h.bf16 %v3295_v58 }
  0xd9   : > { %v761_v27 = vmul.f32 %v746_v26, %v4114_v55  ;;  %v767_v3 = vadd.f32 %v755_v45, %v726_v50  ;;  %v764_v25 = vadd.f32 %v752_v28, %v723_v19  ;;  %v4117_v22 = vunpack.c.h.bf16 %v3298_v59  ;;  %v4120_v50 = vld [vmem:[#allocation17_spill] sm:$0xff]  ;;  %v4121_v45 = vld [vmem:[#allocation18_spill] sm:$0xff] }
  0xda   : > { %v793_v35 = vmul.f32 %v2311_v18, %v4115_v37  ;;  %v770_v62 = vadd.f32 %v758_v53, %v729_v14  ;;  %v796_v7 = vmul.f32 %v2311_v18, %v4116_v30  ;;  %v4118_v26 = vunpack.c.h.bf16 %v3409_v2 }
  0xdb   : > { %v773_v20 = vadd.f32 %v761_v27, %v732_v6  ;;  %v799_v41 = vmul.f32 %v2311_v18, %v4117_v22  ;;  %v822_v46 = vadd.f32 %v821_v29, %v820_v42  ;;  %v362_v58 = vunpack.c.l.bf16 %v3514_v38  ;;  %v2283_v27 = vld [vmem:[%s3171_s11 + $0xbc] ss:$12 sps:$4 sm:$0xff]  }
  0xdc   : > { %v802_v52 = vmul.f32 %v2311_v18, %v4118_v26  ;;  %v3530_v23 = vadd.f32 %v796_v7, %v767_v3  ;;  %v365_v36 = vunpack.c.h.bf16 %v3514_v38  ;;  %v3537_v59 = vadd.f32 %v793_v35, %v764_v25  ;;  %v3557_v18 = vld [vmem:[%s3171_s11 + $0x98] ss:$12 sps:$4 sm:$0xff]  }
  0xdd   : > { %v3539_v33 = vadd.f32 %v799_v41, %v770_v62  ;;  %v368_v51 = vunpack.c.l.bf16 %v3519_v34  ;;  %v823_v61 = vrot.slane %v822_v46, 1  ;;  %v371_v60 = vunpack.c.h.bf16 %v3519_v34 }
  0xde   : > { %v3541_v2 = vadd.f32 %v802_v52, %v773_v20  ;;  %v383_v1 = vrot.slane %v3525_v47, %v4119_v44  ;;  %v419_v54 = vunpack.c.l.bf16 %v3528_v49  ;;  %v825_v48 = vadd.f32 %v3530_v23, %v3537_v59  ;;  %v2287_v20 = vld [vmem:[%s3171_s11 + $0xd4] ss:$12 sps:$4 sm:$0xff]  }
  0xdf   : > { %v422_v5 = vunpack.c.h.bf16 %v3528_v49  ;;  %v425_v12 = vunpack.c.l.bf16 %v3535_v32  ;;  %v428_v16 = vunpack.c.h.bf16 %v3535_v32  ;;  %v3559_v40 = vadd.f32 %v823_v61, %v822_v46  ;;  %v2291_v46 = vld [vmem:[%s3171_s11 + $0xf8] ss:$12 sps:$4 sm:$0xff]  }
  0xe0   : > { %v386_v39 = vmul.f32 %v383_v1, %v362_v58  ;;  %v389_v31 = vmul.f32 %v383_v1, %v365_v36  ;;  %v392_v0 = vmul.f32 %v383_v1, %v368_v51  ;;  %v826_v4 = vadd.f32 %v825_v48, %v3539_v33  ;;  %v2295_v58 = vld [vmem:[%s3171_s11 + $0x110] ss:$12 sps:$4 sm:$0xff]  }
  0xe1   : > { %v395_v56 = vmul.f32 %v383_v1, %v371_v60  ;;  %v440_v13 = vrot.slane %v3525_v47, %v4120_v50  ;;  %v476_v28 = vunpack.c.l.bf16 %v3549_v43  ;;  %844 = vrot.lane.b32.xlu0 %v3559_v40, %s2913_s24  ;;  %v479_v42 = vunpack.c.h.bf16 %v3549_v43 }
  0xe2   : > { %v4059_v14 = vunpack.c.l.bf16 %v3557_v18  ;;  %v4058_v57 = vunpack.c.h.bf16 %v3557_v18  ;;  %v497_v17 = vrot.slane %v3525_v47, %v4121_v45  ;;  %v827_v53 = vadd.f32 %v826_v4, %v3541_v2  ;;  %v4122_v4 = vld [vmem:[#allocation19_spill] sm:$0xff] }
  0xe3   : > { %v443_v19 = vmul.f32 %v440_v13, %v419_v54  ;;  %v446_v6 = vmul.f32 %v440_v13, %v422_v5  ;;  %v449_v55 = vmul.f32 %v440_v13, %v425_v12  ;;  %v452_v37 = vmul.f32 %v440_v13, %v428_v16  ;;  %v2299_v13 = vld [vmem:[%s3171_s11 + $0x134] ss:$12 sps:$4 sm:$0xff]  }
  0xe4   : > { %v500_v35 = vmul.f32 %v497_v17, %v476_v28  ;;  %v503_v29 = vmul.f32 %v497_v17, %v479_v42  ;;  %v506_v3 = vmul.f32 %v497_v17, %v4059_v14  ;;  %v828_v62 = vrot.slane %v827_v53, 4 }
  0xe5   : > { %v455_v30 = vadd.f32 %v443_v19, %v386_v39  ;;  %v458_v7 = vadd.f32 %v446_v6, %v389_v31  ;;  %v461_v25 = vadd.f32 %v449_v55, %v392_v0  ;;  %849 = vrot.lane.b32.xlu0 %v3559_v40, %s2914_s26  ;;  %v464_v22 = vadd.f32 %v452_v37, %v395_v56 }
  0xe6   : > { %v509_v41 = vmul.f32 %v497_v17, %v4058_v57  ;;  %v533_v26 = vunpack.c.l.bf16 %v2283_v27  ;;  %v536_v52 = vunpack.c.h.bf16 %v2283_v27  ;;  %v829_v61 = vadd.f32 %v828_v62, %v827_v53 }
  0xe7   : > { %v512_v1 = vadd.f32 %v500_v35, %v455_v30  ;;  %v515_v54 = vadd.f32 %v503_v29, %v458_v7  ;;  %v518_v48 = vadd.f32 %v506_v3, %v461_v25  ;;  %v539_v31 = vunpack.c.l.bf16 %v2287_v20  ;;  %v2303_v29 = vld [vmem:[%s3171_s11 + $0x14c] ss:$12 sps:$4 sm:$0xff]  }
  0xe8   : > { %v521_v39 = vadd.f32 %v509_v41, %v464_v22  ;;  %v542_v0 = vunpack.c.h.bf16 %v2287_v20  ;;  %v554_v50 = vrot.slane %v3525_v47, %v4122_v4  ;;  %v830_v56 = vrot.slane %v829_v61, 2  ;;  %v2309_v4 = vld [vmem:[%s3171_s11 + $0xb0] sm:$0xf] }
  0xe9   : > { %v590_v28 = vunpack.c.l.bf16 %v2291_v46  ;;  %v593_v45 = vunpack.c.h.bf16 %v2291_v46  ;;  %v596_v17 = vunpack.c.l.bf16 %v2295_v58  ;;  %v599_v37 = vunpack.c.h.bf16 %v2295_v58  ;;  %v2312_v46 = vld [vmem:[#allocation5 + $0x28] ss:$0 sm:$0xff] }
  0xea   : > { %v557_v19 = vmul.f32 %v554_v50, %v533_v26  ;;  %v560_v6 = vmul.f32 %v554_v50, %v536_v52  ;;  %v563_v55 = vmul.f32 %v554_v50, %v539_v31  ;;  %v566_v53 = vmul.f32 %v554_v50, %v542_v0  ;;  %v694_v52 = vld [vmem:[%s3171_s11 + $0x38] ss:$60 sps:$4 sm:$0xff]   ;;  %s2826_s11 = scalar_lea.vmem %s3969_s14, 2048 }
  0xeb   : > { %v831_v27 = vadd.f32 %v830_v56, %v829_v61  ;;  %v611_v35 = vrot.slane %v3525_v47, %v3197_v8  ;;  %v647_v3 = vunpack.c.l.bf16 %v2299_v13  ;;  %v650_v0 = vunpack.c.h.bf16 %v2299_v13  ;;  %p2827_p3 = scmp.ne.s32.totalorder %s3969_s14, %s2826_s11 }
  0xec   : > { %v569_v62 = vadd.f32 %v557_v19, %v512_v1  ;;  %v572_v30 = vadd.f32 %v560_v6, %v515_v54  ;;  %v575_v7 = vadd.f32 %v563_v55, %v518_v48  ;;  %v578_v25 = vadd.f32 %v566_v53, %v521_v39 }
  0xed   : > { %v832_v20 = vrot.slane %v831_v27, 1  ;;  %v614_v22 = vmul.f32 %v611_v35, %v590_v28  ;;  %v617_v41 = vmul.f32 %v611_v35, %v593_v45  ;;  %v620_v26 = vmul.f32 %v611_v35, %v596_v17  ;;  %p2828_p5 = pnand %p2827_p3, %p3112_p10 }
  0xee   : > { %v623_v31 = vmul.f32 %v611_v35, %v599_v37  ;;  %v653_v61 = vunpack.c.l.bf16 %v2303_v29  ;;  %v656_v58 = vunpack.c.h.bf16 %v2303_v29  ;;  %v668_v1 = vrot.slane %v3525_v47, %v3199_v9 }
  0xef   : > { %v833_v50 = vadd.f32 %v832_v20, %v831_v27  ;;  %v626_v8 = vadd.f32 %v614_v22, %v569_v62  ;;  %v629_v56 = vadd.f32 %v617_v41, %v572_v30  ;;  %v632_v57 = vadd.f32 %v620_v26, %v575_v7  ;;  %p2829_p7 = pneg %p2828_p5 }
  0xf0   : > { %v635_v14 = vadd.f32 %v623_v31, %v578_v25  ;;  %v697_v54 = vunpack.c.l.bf16 %v694_v52  ;;  %v709_v48 = vrot.slane %v3525_v47, %v3201_v10  ;;  %v738_v39 = vunpack.c.h.bf16 %v694_v52 }
  0xf1   : > { %851 = vrot.lane.b32.xlu1 %v833_v50, %s2914_s26  ;;  %861 = vrot.lane.b32.xlu0 %v833_v50, %s2915_s15  ;;  %v750_v13 = vrot.slane %v3525_v47, %v3203_v11  ;;  %v779_v28 = vunpack.c.l.bf16 %v2309_v4  ;;  %v794_v45 = vmul.f32 %v2312_v46, %v479_v42  ;;  %v671_v17 = vmul.f32 %v668_v1, %v647_v3 }
  0xf2   : > { %v674_v19 = vmul.f32 %v668_v1, %v650_v0  ;;  %v677_v9 = vmul.f32 %v668_v1, %v653_v61  ;;  %v680_v6 = vmul.f32 %v668_v1, %v656_v58  ;;  %v712_v10 = vmul.f32 %v709_v48, %v365_v36 }
  0xf3   : > { %v715_v55 = vmul.f32 %v709_v48, %v368_v51  ;;  %v718_v53 = vmul.f32 %v709_v48, %v371_v60  ;;  %v721_v27 = vmul.f32 %v709_v48, %v697_v54  ;;  %v683_v37 = vadd.f32 %v671_v17, %v626_v8 }
  0xf4   : > { %v686_v11 = vadd.f32 %v674_v19, %v629_v56  ;;  %v689_v47 = vadd.f32 %v677_v9, %v632_v57  ;;  %v692_v35 = vadd.f32 %v680_v6, %v635_v14  ;;  %v753_v43 = vmul.f32 %v750_v13, %v422_v5 }
  0xf5   : > { %857 = vrot.lane.b32.xlu1 %v833_v50, %s2916_s16  ;;  %v756_v38 = vmul.f32 %v750_v13, %v425_v12  ;;  %v759_v36 = vmul.f32 %v750_v13, %v428_v16  ;;  %v762_v51 = vmul.f32 %v750_v13, %v738_v39  ;;  %v724_v34 = vadd.f32 %v712_v10, %v683_v37  ;;  %v302_v37 = vld [vmem:[#allocation8] sm:$0xff] }
  0xf6   : > { %v727_v60 = vadd.f32 %v715_v55, %v686_v11  ;;  %v730_v42 = vadd.f32 %v718_v53, %v689_v47  ;;  %v733_v29 = vadd.f32 %v721_v27, %v692_v35  ;;  %v4123_v57 = vunpack.c.l.bf16 %v3557_v18  ;;  %v304_v11 = vld [vmem:[#allocation8 + $0xc] sm:$0xff]  ;;  %v306_v47 = vld [vmem:[#allocation8 + $0x18] sm:$0xff] }
  0xf7   : > { %v4124_v3 = vunpack.c.h.bf16 %v3557_v18  ;;  %v803_v30 = vmul.f32 %v2312_v46, %v779_v28  ;;  %v765_v49 = vadd.f32 %v753_v43, %v724_v34  ;;  %vm870_vm1 = vcmask 130048   ;;  %v308_v43 = vld [vmem:[#allocation8 + $0x24] sm:$0xff] }
  0xf8   : > { %v797_v14 = vmul.f32 %v2312_v46, %v4123_v57  ;;  %v768_v5 = vadd.f32 %v756_v38, %v727_v60  ;;  %v771_v7 = vadd.f32 %v759_v36, %v730_v42  ;;  %v774_v25 = vadd.f32 %v762_v51, %v733_v29 }
  0xf9   : > { %v800_v62 = vmul.f32 %v2312_v46, %v4124_v3  ;;  %866 = vrot.lane.b32.xlu1 %v833_v50, %s2917_s13  ;;  %v3633_v32 = vadd.f32 %v794_v45, %v765_v49  ;;  %vm905_vm2 = vcmask 392192   ;;  %vm907_vm3 = vcmask 785408  }
  0xfa   : > { %v3635_v12 = vadd.f32 %v797_v14, %v768_v5  ;;  %v3639_v20 = vadd.f32 %v803_v30, %v774_v25  ;;  %v310_v36 = vunpack.c.l.bf16 %v302_v37  ;;  %v313_v51 = vunpack.c.l.bf16 %v304_v11 }
  0xfb   : > { %v3637_v16 = vadd.f32 %v800_v62, %v771_v7  ;;  %v316_v34 = vunpack.c.l.bf16 %v306_v47  ;;  %vm910_vm4 = vcmask 523264   ;;  %v319_v57 = vunpack.c.l.bf16 %v308_v43 }
  0xfc   : > { %v834_v18 = vadd.f32 %v3635_v12, %v3633_v32  ;;  %vm912_vm5 = vcmask 916480   ;;  %vm915_vm6 = vcmask 654336  }
  0xfe   : > { %v835_v22 = vadd.f32 %v834_v18, %v3637_v16 }
 0x100   : > { %v836_v41 = vadd.f32 %v835_v22, %v3639_v20 }
 0x102   : > { %v837_v26 = vrot.slane %v836_v41, 4 }
 0x104   : > { %v838_v52 = vadd.f32 %v837_v26, %v836_v41 }
 0x106   : > { %v839_v46 = vrot.slane %v838_v52, 2 }
 0x108   : > { %v840_v31 = vadd.f32 %v839_v46, %v838_v52  ;;  %v314_v52 = vunpack.c.h.bf16 %v304_v11  ;;  %v317_v46 = vunpack.c.h.bf16 %v306_v47 }
 0x10a   : > { %v841_v0 = vrot.slane %v840_v31, 1 }
 0x10c   : > { %v842_v61 = vadd.f32 %v841_v0, %v840_v31  ;;  %v320_v0 = vunpack.c.h.bf16 %v308_v43 }
 0x10e   : > { %868 = vrot.lane.b32.xlu0 %v842_v61, %s2917_s13  ;;  %874 = vrot.lane.b32.xlu1 %v842_v61, %s2918_s27 }
 0x112   : > { %878 = vrot.lane.b32.xlu0 %v842_v61, %s2919_s17 }
 0x153   : > { %v845_v58 = vpop.permute.xlu0 %844 }
 0x154   : > { %v847_v1 = vadd.f32 %v845_v58, %v3559_v40  ;;  %v303_v58 = vld [vmem:[#allocation8 + $0x8] ss:$12 sps:$4 sm:$0xff]  }
 0x157   : > { %v850_v50 = vpop.permute.xlu0 %849 }
 0x163   : > { %v852_v4 = vpop.permute.xlu1 %851  ;;  %v862_v48 = vpop.permute.xlu0 %861 }
 0x164   : > { %v854_v8 = vsel %vm853_vm0, %v850_v50, %v852_v4 }
 0x165   : > { %v856_v54 = vadd.f32 %v854_v8, %v847_v1 }
 0x167   : > { %v858_v56 = vpop.permute.xlu1 %857 }
 0x168   : > { %v860_v13 = vadd.f32 %v858_v56, %v856_v54 }
 0x16a   : > { %v864_v28 = vadd.f32 %v862_v48, %v860_v13 }
 0x16b   : > { %v867_v39 = vpop.permute.xlu1 %866 }
 0x180   : > { %v869_v45 = vpop.permute.xlu0 %868  ;;  %v875_v19 = vpop.permute.xlu1 %874 }
 0x181   : > { %v871_v17 = vsel %vm870_vm1, %v867_v39, %v869_v45  ;;  %v307_v39 = vld [vmem:[#allocation8 + $0x20] ss:$12 sps:$4 sm:$0xff]  }
 0x182   : > { %v873_v9 = vadd.f32 %v871_v17, %v864_v28 }
 0x184   : > { %v877_v6 = vadd.f32 %v875_v19, %v873_v9  ;;  %v879_v10 = vpop.permute.xlu0 %878 }
 0x186   : > { %v881_v55 = vadd.f32 %v879_v10, %v877_v6  ;;  %v318_v6 = vunpack.c.l.bf16 %v307_v39 }
 0x188   : > { %v882_v53 = vmul.f32 0.0625, %v881_v55 }
 0x18a   : > { %887 = vrot.lane.b32.xlu0 %v882_v53, %s2918_s27  ;;  %884 = vrot.lane.b32.xlu1 %v882_v53, %s2919_s17 }
 0x18e   : > { %893 = vrot.lane.b32.xlu0 %v882_v53, %s2915_s15  ;;  %890 = vrot.lane.b32.xlu1 %v882_v53, %s2917_s13 }
 0x192   : > { %899 = vrot.lane.b32.xlu0 %v882_v53, %s2914_s26  ;;  %896 = vrot.lane.b32.xlu1 %v882_v53, %s2916_s16 }
 0x196   : > { %902 = vrot.lane.b32.xlu1 %v882_v53, %s2913_s24 }
 0x1fc   : > { %v888_v40 = vpop.permute.xlu0 %887  ;;  %v885_v27 = vpop.permute.xlu1 %884 }
 0x1fd   : > { %v906_v35 = vsel %vm905_vm2, %v882_v53, %v885_v27 }
 0x1fe   : > { %v908_v38 = vsel %vm907_vm3, %v906_v35, %v888_v40 }
 0x1ff   : > { %v920_v60 = vrot.slane %v908_v38, %v4119_v44 }
 0x200   : > { %v894_v42 = vpop.permute.xlu0 %893  ;;  %v891_v29 = vpop.permute.xlu1 %890 }
 0x201   : > { %v929_v14 = vsub.f32 %v3453_v63, %v920_v60  ;;  %v932_v3 = vsub.f32 %v3455_v15, %v920_v60  ;;  %v935_v62 = vsub.f32 %v3457_v21, %v920_v60  ;;  %v938_v30 = vsub.f32 %v3459_v24, %v920_v60 }
 0x202   : > { %v909_v49 = vsel %vm870_vm1, %v888_v40, %v891_v29  ;;  %v311_v63 = vunpack.c.h.bf16 %v302_v37  ;;  %v321_v40 = vunpack.c.h.bf16 %v307_v39  ;;  %v2544_v39 = vld [vmem:[#allocation7 + $0x2c] ss:$16 sps:$4 sm:$0xff]  }
 0x203   : > { %v3666_v5 = vmul.f32 %v929_v14, %v310_v36  ;;  %v3668_v7 = vmul.f32 %v932_v3, %v313_v51  ;;  %v3670_v25 = vmul.f32 %v935_v62, %v316_v34  ;;  %v911_v22 = vsel %vm910_vm4, %v909_v49, %v894_v42 }
 0x204   : > { %v900_v18 = vpop.permute.xlu0 %899  ;;  %v897_v41 = vpop.permute.xlu1 %896  ;;  %v3674_v26 = vmul.f32 %v938_v30, %v319_v57 }
 0x205   : > { %v913_v15 = vsel %vm912_vm5, %v911_v22, %v897_v41  ;;  %v953_v21 = vmul.f32 %v3666_v5, %v3666_v5  ;;  %v956_v24 = vmul.f32 %v3668_v7, %v3668_v7  ;;  %v914_v61 = vsel %vm853_vm0, %v897_v41, %v900_v18 }
 0x206   : > { %v924_v31 = vrot.slane %v913_v15, %v4119_v44  ;;  %v959_v4 = vmul.f32 %v3670_v25, %v3670_v25  ;;  %v962_v28 = vmul.f32 %v3674_v26, %v3674_v26 }
 0x207   : > { %v965_v50 = vadd.f32 %v956_v24, %v953_v21 }
 0x208   : > { %v930_v8 = vsub.f32 %v3537_v59, %v924_v31  ;;  %v933_v56 = vsub.f32 %v3530_v23, %v924_v31  ;;  %v936_v1 = vsub.f32 %v3539_v33, %v924_v31  ;;  %v939_v54 = vsub.f32 %v3541_v2, %v924_v31  ;;  %v903_v48 = vpop.permute.xlu1 %902 }
 0x209   : > { %v916_v13 = vsel %vm915_vm6, %v914_v61, %v903_v48  ;;  %v966_v45 = vadd.f32 %v965_v50, %v959_v4  ;;  %v312_v59 = vunpack.c.l.bf16 %v303_v58  ;;  %v315_v23 = vunpack.c.h.bf16 %v303_v58  ;;  %v2542_v48 = vld [vmem:[#allocation7 + $0x24] ss:$16 sps:$4 sm:$0xff]  }
 0x20a   : > { %v3691_v17 = vmul.f32 %v930_v8, %v311_v63  ;;  %v3693_v19 = vmul.f32 %v933_v56, %v314_v52  ;;  %v3695_v9 = vmul.f32 %v936_v1, %v317_v46  ;;  %v928_v33 = vrot.slane %v916_v13, %v4119_v44  ;;  %v2536_v8 = vld [vmem:[#allocation7 + $0x4] ss:$16 sps:$4 sm:$0xff]   ;;  %v2538_v56 = vld [vmem:[#allocation7 + $0xc] ss:$16 sps:$4 sm:$0xff]   ;;  %v2540_v1 = vld [vmem:[#allocation7] ss:$16 sps:$4 sm:$0xff]  }
 0x20b   : > { %v967_v2 = vadd.f32 %v966_v45, %v962_v28  ;;  %v3698_v10 = vmul.f32 %v939_v54, %v320_v0  ;;  %v2541_v54 = vld [vmem:[#allocation7 + $0x8] ss:$16 sps:$4 sm:$0xff]   ;;  %1679 = vmatprep.subr.bf16.mxu0 %v2536_v8  ;;  %1785 = vmatprep.subr.bf16.mxu1 %v2538_v56  ;;  %v2546_v13 = vld [vmem:[#allocation7 + $0x20] ss:$16 sps:$4 sm:$0xff]   ;;  %v2548_v45 = vld [vmem:[#allocation7 + $0x44] ss:$16 sps:$4 sm:$0xff]  }
 0x20c   : > { %v954_v55 = vmul.f32 %v3691_v17, %v3691_v17  ;;  %v957_v53 = vmul.f32 %v3693_v19, %v3693_v19  ;;  %v931_v27 = vsub.f32 %v3633_v32, %v928_v33  ;;  %v934_v37 = vsub.f32 %v3635_v12, %v928_v33  ;;  %1680 = vmatpush1.bf16.msra.mxu0 %v2540_v1  ;;  %v2547_v28 = vld [vmem:[#allocation7 + $0x28] ss:$16 sps:$4 sm:$0xff]  }
 0x20d   : > { %v937_v11 = vsub.f32 %v3637_v16, %v928_v33  ;;  %v940_v47 = vsub.f32 %v3639_v20, %v928_v33  ;;  %v960_v35 = vmul.f32 %v3695_v9, %v3695_v9  ;;  %v968_v38 = vrot.slane %v967_v2, 4  ;;  %1786 = vmatpush1.bf16.msra.mxu1 %v2541_v54  ;;  %1681 = vmatprep.subr.bf16.mxu0 %v2542_v48  ;;  %v2554_v33 = vld [vmem:[#allocation7 + $0x64] ss:$16 sps:$4 sm:$0xff]  }
 0x20e   : > { %v974_v43 = vadd.f32 %v957_v53, %v954_v55  ;;  %v3710_v36 = vmul.f32 %v931_v27, %v312_v59  ;;  %v3712_v51 = vmul.f32 %v934_v37, %v315_v23  ;;  %v963_v32 = vmul.f32 %v3698_v10, %v3698_v10  ;;  %1787 = vmatprep.subr.bf16.mxu1 %v2544_v39  ;;  %v2550_v59 = vld [vmem:[#allocation7 + $0x4c] ss:$16 sps:$4 sm:$0xff]   ;;  %v2552_v23 = vld [vmem:[#allocation7 + $0x40] ss:$16 sps:$4 sm:$0xff]   ;;  %v2559_v53 = vld [vmem:[#allocation7 + $0x68] ss:$16 sps:$4 sm:$0xff]  }
 0x20f   : > { %v3714_v34 = vmul.f32 %v937_v11, %v318_v6  ;;  %v969_v60 = vadd.f32 %v968_v38, %v967_v2  ;;  %v3718_v42 = vmul.f32 %v940_v47, %v321_v40  ;;  %v2553_v6 = vld [vmem:[#allocation7 + $0x48] ss:$16 sps:$4 sm:$0xff]   ;;  %v2556_v2 = vld [vmem:[#allocation7 + $0x6c] ss:$16 sps:$4 sm:$0xff]   ;;  %v2558_v55 = vld [vmem:[#allocation7 + $0x60] ss:$16 sps:$4 sm:$0xff]  }
 0x210   : > { %v975_v12 = vadd.f32 %v974_v43, %v960_v35  ;;  %v955_v16 = vmul.f32 %v3710_v36, %v3710_v36  ;;  %v958_v20 = vmul.f32 %v3712_v51, %v3712_v51  ;;  %1682 = vmatpush1.bf16.msra.mxu0 %v2546_v13  ;;  %v2560_v40 = vld [vmem:[#allocation7 + $0x84] ss:$16 sps:$4 sm:$0xff]   ;;  %v2562_v27 = vld [vmem:[#allocation7 + $0x8c] ss:$16 sps:$4 sm:$0xff]   ;;  %v2564_v37 = vld [vmem:[#allocation7 + $0x80] ss:$16 sps:$4 sm:$0xff]  }
 0x211   : > { %v970_v29 = vrot.slane %v969_v60, 2  ;;  %v961_v14 = vmul.f32 %v3714_v34, %v3714_v34  ;;  %v964_v49 = vmul.f32 %v3718_v42, %v3718_v42  ;;  %1788 = vmatpush1.bf16.msra.mxu1 %v2547_v28  ;;  %1683 = vmatprep.subr.bf16.mxu0 %v2548_v45  ;;  %v2565_v11 = vld [vmem:[#allocation7 + $0x88] ss:$16 sps:$4 sm:$0xff]   ;;  %v2566_v47 = vld [vmem:[#allocation7 + $0xa4] ss:$16 sps:$4 sm:$0xff]  }
 0x212   : > { %v976_v57 = vadd.f32 %v975_v12, %v963_v32  ;;  %v983_v3 = vadd.f32 %v958_v20, %v955_v16  ;;  %1789 = vmatprep.subr.bf16.mxu1 %v2550_v59  ;;  %v2568_v35 = vld [vmem:[#allocation7 + $0xac] ss:$16 sps:$4 sm:$0xff]   ;;  %v2570_v43 = vld [vmem:[#allocation7 + $0xa0] ss:$16 sps:$4 sm:$0xff]   ;;  %v2571_v38 = vld [vmem:[#allocation7 + $0xa8] ss:$16 sps:$4 sm:$0xff]  }
 0x213   : > { %v971_v62 = vadd.f32 %v970_v29, %v969_v60  ;;  %v2572_v32 = vld [vmem:[#allocation7 + $0xc4] ss:$16 sps:$4 sm:$0xff]   ;;  %v2574_v60 = vld [vmem:[#allocation7 + $0xcc] ss:$16 sps:$4 sm:$0xff]   ;;  %v2576_v12 = vld [vmem:[#allocation7 + $0xc0] ss:$16 sps:$4 sm:$0xff]  }
 0x214   : > { %v977_v30 = vrot.slane %v976_v57, 4  ;;  %v984_v18 = vadd.f32 %v983_v3, %v961_v14  ;;  %1684 = vmatpush1.bf16.msra.mxu0 %v2552_v23  ;;  %v2577_v16 = vld [vmem:[#allocation7 + $0xc8] ss:$16 sps:$4 sm:$0xff]   ;;  %v2578_v20 = vld [vmem:[#allocation7 + $0xe4] ss:$16 sps:$4 sm:$0xff]  }
 0x215   : > { %v972_v22 = vrot.slane %v971_v62, 1  ;;  %1790 = vmatpush1.bf16.msra.mxu1 %v2553_v6  ;;  %1685 = vmatprep.subr.bf16.mxu0 %v2554_v33  ;;  %v2580_v29 = vld [vmem:[#allocation7 + $0xec] ss:$16 sps:$4 sm:$0xff]   ;;  %v2583_v14 = vld [vmem:[#allocation7 + $0xe8] ss:$16 sps:$4 sm:$0xff]  }
 0x216   : > { %v978_v41 = vadd.f32 %v977_v30, %v976_v57  ;;  %v985_v63 = vadd.f32 %v984_v18, %v964_v49  ;;  %1791 = vmatprep.subr.bf16.mxu1 %v2556_v2  ;;  %v2582_v57 = vld [vmem:[#allocation7 + $0xe0] ss:$16 sps:$4 sm:$0xff]   ;;  %v2584_v3 = vld [vmem:[#allocation7 + $0x104] ss:$16 sps:$4 sm:$0xff]   ;;  %v2589_v49 = vld [vmem:[#allocation7 + $0x108] ss:$16 sps:$4 sm:$0xff]  }
 0x217   : > { %v3728_v15 = vadd.f32 %v972_v22, %v971_v62  ;;  %v2586_v62 = vld [vmem:[#allocation7 + $0x10c] ss:$16 sps:$4 sm:$0xff]   ;;  %v2588_v30 = vld [vmem:[#allocation7 + $0x100] ss:$16 sps:$4 sm:$0xff]   ;;  %v2590_v18 = vld [vmem:[#allocation7 + $0x124] ss:$16 sps:$4 sm:$0xff]  }
 0x218   : > { %v979_v21 = vrot.slane %v978_v41, 2  ;;  %v986_v24 = vrot.slane %v985_v63, 4  ;;  %1686 = vmatpush1.bf16.msra.mxu0 %v2558_v55  ;;  %v2592_v22 = vld [vmem:[#allocation7 + $0x12c] ss:$16 sps:$4 sm:$0xff]  }
 0x219   : > { %998 = vrot.lane.b32.xlu1 %v3728_v15, %s2914_s26  ;;  %993 = vrot.lane.b32.xlu0 %v3728_v15, %s2913_s24 }
 0x21a   : > { %v980_v52 = vadd.f32 %v979_v21, %v978_v41  ;;  %v987_v46 = vadd.f32 %v986_v24, %v985_v63  ;;  %1792 = vmatpush1.bf16.msra.mxu1 %v2559_v53  ;;  %1687 = vmatprep.subr.bf16.mxu0 %v2560_v40  ;;  %v2594_v41 = vld [vmem:[#allocation7 + $0x120] ss:$16 sps:$4 sm:$0xff]   ;;  %v2595_v63 = vld [vmem:[#allocation7 + $0x128] ss:$16 sps:$4 sm:$0xff]   ;;  %v2596_v21 = vld [vmem:[#allocation7 + $0x144] ss:$16 sps:$4 sm:$0xff]  }
 0x21b   : > { %1793 = vmatprep.subr.bf16.mxu1 %v2562_v27  ;;  %v2598_v24 = vld [vmem:[#allocation7 + $0x14c] ss:$16 sps:$4 sm:$0xff]  }
 0x21c   : > { %v981_v31 = vrot.slane %v980_v52, 1  ;;  %v988_v0 = vrot.slane %v987_v46, 2  ;;  %1688 = vmatpush1.bf16.msra.mxu0 %v2564_v37  ;;  %v2610_v37 = vld [vmem:[#allocation7 + $0x18c] ss:$16 sps:$4 sm:$0xff]  }
 0x21d   : > { %1689 = vmatprep.subr.bf16.mxu0 %v2566_v47  ;;  %v2613_v47 = vld [vmem:[#allocation7 + $0x188] ss:$16 sps:$4 sm:$0xff]  }
 0x21e   : > { %v982_v61 = vadd.f32 %v981_v31, %v980_v52  ;;  %v989_v58 = vadd.f32 %v988_v0, %v987_v46  ;;  %1794 = vmatpush1.bf16.msra.mxu1 %v2565_v11  ;;  %v2600_v52 = vld [vmem:[#allocation7 + $0x140] ss:$16 sps:$4 sm:$0xff]   ;;  %v2601_v46 = vld [vmem:[#allocation7 + $0x148] ss:$16 sps:$4 sm:$0xff]   ;;  %v2602_v31 = vld [vmem:[#allocation7 + $0x164] ss:$16 sps:$4 sm:$0xff]  }
 0x21f   : > { %1795 = vmatprep.subr.bf16.mxu1 %v2568_v35  ;;  %v2604_v0 = vld [vmem:[#allocation7 + $0x16c] ss:$16 sps:$4 sm:$0xff]   ;;  %v2612_v11 = vld [vmem:[#allocation7 + $0x180] ss:$16 sps:$4 sm:$0xff]   ;;  %v2614_v35 = vld [vmem:[#allocation7 + $0x1a4] ss:$16 sps:$4 sm:$0xff]  }
 0x220   : > { %1005 = vrot.lane.b32.xlu1 %v982_v61, %s2916_s16  ;;  %1000 = vrot.lane.b32.xlu0 %v982_v61, %s2914_s26  ;;  %v990_v4 = vrot.slane %v989_v58, 1 }
 0x221   : > { %1690 = vmatpush1.bf16.msra.mxu0 %v2570_v43  ;;  %v2616_v43 = vld [vmem:[#allocation7 + $0x1ac] ss:$16 sps:$4 sm:$0xff]  }
 0x222   : > { %v991_v50 = vadd.f32 %v990_v4, %v989_v58  ;;  %1796 = vmatpush1.bf16.msra.mxu1 %v2571_v38  ;;  %1691 = vmatprep.subr.bf16.mxu0 %v2572_v32  ;;  %v2607_v58 = vld [vmem:[#allocation7 + $0x168] ss:$16 sps:$4 sm:$0xff]   ;;  %v2618_v38 = vld [vmem:[#allocation7 + $0x1a0] ss:$16 sps:$4 sm:$0xff]  }
 0x223   : > { %1797 = vmatprep.subr.bf16.mxu1 %v2574_v60  ;;  %v2619_v32 = vld [vmem:[#allocation7 + $0x1a8] ss:$16 sps:$4 sm:$0xff]   ;;  %v2620_v60 = vld [vmem:[#allocation7 + $0x1c4] ss:$16 sps:$4 sm:$0xff]  }
 0x224   : > { %1014 = vrot.lane.b32.xlu1 %v982_v61, %s2917_s13  ;;  %1009 = vrot.lane.b32.xlu0 %v982_v61, %s2915_s15  ;;  %v2606_v61 = vld [vmem:[#allocation7 + $0x160] ss:$16 sps:$4 sm:$0xff]  }
 0x225   : > { %1692 = vmatpush1.bf16.msra.mxu0 %v2576_v12  ;;  %v2622_v12 = vld [vmem:[#allocation7 + $0x1cc] ss:$16 sps:$4 sm:$0xff]  }
 0x226   : > { %1798 = vmatpush1.bf16.msra.mxu1 %v2577_v16  ;;  %1693 = vmatprep.subr.bf16.mxu0 %v2578_v20  ;;  %v2624_v16 = vld [vmem:[#allocation7 + $0x1c0] ss:$16 sps:$4 sm:$0xff]   ;;  %v2625_v20 = vld [vmem:[#allocation7 + $0x1c8] ss:$16 sps:$4 sm:$0xff]  }
 0x227   : > { %1799 = vmatprep.subr.bf16.mxu1 %v2580_v29 }
 0x228   : > { %1021 = vrot.lane.b32.xlu1 %v991_v50, %s2918_s27  ;;  %1016 = vrot.lane.b32.xlu0 %v991_v50, %s2917_s13 }
 0x229   : > { %1694 = vmatpush1.bf16.msra.mxu0 %v2582_v57  ;;  %v2626_v57 = vld [vmem:[#allocation7 + $0x1e4] ss:$16 sps:$4 sm:$0xff]  }
 0x22a   : > { %1800 = vmatpush1.bf16.msra.mxu1 %v2583_v14  ;;  %1695 = vmatprep.subr.bf16.mxu0 %v2584_v3  ;;  %v2628_v14 = vld [vmem:[#allocation7 + $0x1ec] ss:$16 sps:$4 sm:$0xff]   ;;  %v2630_v3 = vld [vmem:[#allocation7 + $0x1e0] ss:$16 sps:$4 sm:$0xff]  }
 0x22b   : > { %1801 = vmatprep.subr.bf16.mxu1 %v2586_v62  ;;  %v2631_v62 = vld [vmem:[#allocation7 + $0x1e8] ss:$16 sps:$4 sm:$0xff]  }
 0x22c   : > { %1025 = vrot.lane.b32.xlu0 %v991_v50, %s2919_s17 }
 0x22d   : > { %1696 = vmatpush1.bf16.msra.mxu0 %v2588_v30  ;;  %v2634_v30 = vld [vmem:[#allocation7 + $0x204] ss:$16 sps:$4 sm:$0xff]  }
 0x22e   : > { %1802 = vmatpush1.bf16.msra.mxu1 %v2589_v49  ;;  %1697 = vmatprep.subr.bf16.mxu0 %v2590_v18  ;;  %v2637_v49 = vld [vmem:[#allocation7 + $0x20c] ss:$16 sps:$4 sm:$0xff]  }
 0x22f   : > { %1803 = vmatprep.subr.bf16.mxu1 %v2592_v22 }
 0x231   : > { %1698 = vmatpush1.bf16.msra.mxu0 %v2594_v41 }
 0x232   : > { %1804 = vmatpush1.bf16.msra.mxu1 %v2595_v63  ;;  %1699 = vmatprep.subr.bf16.mxu0 %v2596_v21 }
 0x233   : > { %1805 = vmatprep.subr.bf16.mxu1 %v2598_v24 }
 0x235   : > { %1700 = vmatpush1.bf16.msra.mxu0 %v2600_v52 }
 0x236   : > { %1806 = vmatpush1.bf16.msra.mxu1 %v2601_v46  ;;  %1701 = vmatprep.subr.bf16.mxu0 %v2602_v31 }
 0x237   : > { %1807 = vmatprep.subr.bf16.mxu1 %v2604_v0 }
 0x239   : > { %1702 = vmatpush1.bf16.msra.mxu0 %v2606_v61 }
 0x23a   : > { %1808 = vmatpush1.bf16.msra.mxu1 %v2607_v58 }
 0x23b   : > { %1809 = vmatprep.subr.bf16.mxu1 %v2610_v37 }
 0x23e   : > { %1810 = vmatpush1.bf16.msra.mxu1 %v2613_v47  ;;  %v2655_v47 = vld [vmem:[#allocation7 + $0x26c] ss:$16 sps:$4 sm:$0xff]  }
 0x23f   : > { %1811 = vmatprep.subr.bf16.mxu1 %v2616_v43  ;;  %v2653_v43 = vld [vmem:[#allocation7 + $0x268] ss:$16 sps:$4 sm:$0xff]  }
 0x242   : > { %1812 = vmatpush1.bf16.msra.mxu1 %v2619_v32  ;;  %v2661_v32 = vld [vmem:[#allocation7 + $0x28c] ss:$16 sps:$4 sm:$0xff]  }
 0x243   : > { %1813 = vmatprep.subr.bf16.mxu1 %v2622_v12  ;;  %v2920_v12 = vmov 0  }
 0x246   : > { %1814 = vmatpush1.bf16.msra.mxu1 %v2625_v20  ;;  %v2656_v20 = vld [vmem:[#allocation7 + $0x280] ss:$16 sps:$4 sm:$0xff]  }
 0x247   : > { %1815 = vmatprep.subr.bf16.mxu1 %v2628_v14  ;;  %v2664_v14 = vld [vmem:[#allocation7 + $0x2a4] ss:$16 sps:$4 sm:$0xff]  }
 0x24a   : > { %1816 = vmatpush1.bf16.msra.mxu1 %v2631_v62 }
 0x24b   : > { %1838 = vmatprep.subr.bf16.mxu1 %v2637_v49  ;;  %v2665_v49 = vld [vmem:[#allocation7 + $0x2a8] ss:$16 sps:$4 sm:$0xff]  }
 0x28b   : > { %v999_v4 = vpop.permute.xlu1 %998  ;;  %v994_v50 = vpop.permute.xlu0 %993 }
 0x28c   : > { %v996_v8 = vadd.f32 %v994_v50, %v3728_v15  ;;  %v2608_v15 = vld [vmem:[#allocation7 + $0x184] ss:$16 sps:$4 sm:$0xff]  }
 0x28d   : > { %1703 = vmatprep.subr.bf16.mxu0 %v2608_v15 }
 0x28e   : > { %1704 = vmatpush1.bf16.msra.mxu0 %v2612_v11  ;;  %v2652_v11 = vld [vmem:[#allocation7 + $0x264] ss:$16 sps:$4 sm:$0xff]  }
 0x28f   : > { %1705 = vmatprep.subr.bf16.mxu0 %v2614_v35  ;;  %v2650_v35 = vld [vmem:[#allocation7 + $0x260] ss:$16 sps:$4 sm:$0xff]  }
 0x292   : > { %v1006_v56 = vpop.permute.xlu1 %1005  ;;  %v1001_v1 = vpop.permute.xlu0 %1000  ;;  %1706 = vmatpush1.bf16.msra.mxu0 %v2618_v38  ;;  %v2658_v38 = vld [vmem:[#allocation7 + $0x284] ss:$16 sps:$4 sm:$0xff]  }
 0x293   : > { %v1002_v54 = vsel %vm853_vm0, %v999_v4, %v1001_v1  ;;  %1707 = vmatprep.subr.bf16.mxu0 %v2620_v60 }
 0x294   : > { %v1004_v48 = vadd.f32 %v1002_v54, %v996_v8 }
 0x296   : > { %v1008_v39 = vadd.f32 %v1006_v56, %v1004_v48  ;;  %v1010_v13 = vpop.permute.xlu0 %1009  ;;  %v1015_v28 = vpop.permute.xlu1 %1014  ;;  %1708 = vmatpush1.bf16.msra.mxu0 %v2624_v16 }
 0x297   : > { %1709 = vmatprep.subr.bf16.mxu0 %v2626_v57 }
 0x298   : > { %v1012_v45 = vadd.f32 %v1010_v13, %v1008_v39 }
 0x29a   : > { %v1017_v59 = vpop.permute.xlu0 %1016  ;;  %v1022_v33 = vpop.permute.xlu1 %1021  ;;  %1710 = vmatpush1.bf16.msra.mxu0 %v2630_v3  ;;  %v2667_v3 = vld [vmem:[#allocation7 + $0x2ac] ss:$16 sps:$4 sm:$0xff]  }
 0x29b   : > { %v1018_v23 = vsel %vm870_vm1, %v1015_v28, %v1017_v59  ;;  %1732 = vmatprep.subr.bf16.mxu0 %v2634_v30  ;;  %v2662_v30 = vld [vmem:[#allocation7 + $0x2a0] ss:$16 sps:$4 sm:$0xff]  }
 0x29c   : > { %v1020_v6 = vadd.f32 %v1018_v23, %v1012_v45 }
 0x29e   : > { %v1024_v2 = vadd.f32 %v1022_v33, %v1020_v6  ;;  %v1026_v55 = vpop.permute.xlu0 %1025  ;;  %v2635_v6 = vld [vmem:[#allocation7 + $0x208] ss:$16 sps:$4 sm:$0xff]  }
 0x2a0   : > { %v1028_v53 = vadd.f32 %v1026_v55, %v1024_v2  ;;  %v2638_v2 = vld [vmem:[#allocation7 + $0x220] ss:$16 sps:$4 sm:$0xff]   ;;  %v2641_v55 = vld [vmem:[#allocation7 + $0x228] ss:$16 sps:$4 sm:$0xff]  }
 0x2a2   : > { %v1029_v40 = vmul.f32 0.0625, %v1028_v53  ;;  %v2646_v53 = vld [vmem:[#allocation7 + $0x244] ss:$16 sps:$4 sm:$0xff]  }
 0x2a4   : > { %v1030_v27 = vadd.f32 1e-05, %v1029_v40  ;;  %v2649_v40 = vld [vmem:[#allocation7 + $0x24c] ss:$16 sps:$4 sm:$0xff]  }
 0x2a6   : > { %2680 = vrsqrt.f32 %v1030_v27 }
 0x2b0   : > { %v2681_v29 = vpop.eup %2680 }
 0x2b1   : > { %1039 = vrot.lane.b32.xlu0 %v2681_v29, %s2917_s13  ;;  %1036 = vrot.lane.b32.xlu1 %v2681_v29, %s2918_s27 }
 0x2b5   : > { %1033 = vrot.lane.b32.xlu0 %v2681_v29, %s2919_s17  ;;  %1042 = vrot.lane.b32.xlu1 %v2681_v29, %s2915_s15 }
 0x2b9   : > { %1048 = vrot.lane.b32.xlu0 %v2681_v29, %s2914_s26  ;;  %1045 = vrot.lane.b32.xlu1 %v2681_v29, %s2916_s16 }
 0x2bd   : > { %1051 = vrot.lane.b32.xlu1 %v2681_v29, %s2913_s24  ;;  %s2921_s24 = smov [#allocation11]  }
 0x323   : > { %v1040_v18 = vpop.permute.xlu0 %1039  ;;  %v1037_v22 = vpop.permute.xlu1 %1036 }
 0x324   : > { %v1056_v52 = vsel %vm870_vm1, %v1037_v22, %v1040_v18 }
 0x327   : > { %v1034_v41 = vpop.permute.xlu0 %1033  ;;  %v1043_v63 = vpop.permute.xlu1 %1042 }
 0x328   : > { %v1054_v21 = vsel %vm905_vm2, %v2681_v29, %v1034_v41  ;;  %v1057_v31 = vsel %vm910_vm4, %v1056_v52, %v1043_v63  ;;  %v2659_v29 = vld [vmem:[#allocation7 + $0x288] ss:$16 sps:$4 sm:$0xff]   ;;  %v2673_v41 = vld [vmem:[#allocation7 + $0x2cc] ss:$16 sps:$4 sm:$0xff]   ;;  %v2668_v63 = vld [vmem:[#allocation7 + $0x2c0] ss:$16 sps:$4 sm:$0xff]  }
 0x329   : > { %v1055_v24 = vsel %vm907_vm3, %v1054_v21, %v1037_v22  ;;  %v2670_v22 = vld [vmem:[#allocation7 + $0x2c4] ss:$16 sps:$4 sm:$0xff]   ;;  %v2671_v21 = vld [vmem:[#allocation7 + $0x2c8] ss:$16 sps:$4 sm:$0xff]  }
 0x32a   : > { %v1064_v46 = vrot.slane %v1055_v24, %v4119_v44 }
 0x32b   : > { %v3756_v0 = vpop.permute.xlu1 %1045  ;;  %v1049_v60 = vpop.permute.xlu0 %1048 }
 0x32c   : > { %v1058_v61 = vsel %vm912_vm5, %v1057_v31, %v3756_v0  ;;  %v1073_v58 = vmul.f32 %v1064_v46, %v3666_v5  ;;  %v1076_v4 = vmul.f32 %v1064_v46, %v3668_v7  ;;  %v2632_v5 = vld [vmem:[#allocation7 + $0x200] ss:$16 sps:$4 sm:$0xff]   ;;  %v1079_v33 = vmul.f32 %v1064_v46, %v3670_v25  ;;  %v2679_v31 = vld [vmem:[#allocation7 + $0x2ec] ss:$16 sps:$4 sm:$0xff]  }
 0x32d   : > { %v1068_v50 = vrot.slane %v1058_v61, %v4119_v44  ;;  %v2644_v25 = vld [vmem:[#allocation7 + $0x240] ss:$16 sps:$4 sm:$0xff]   ;;  %v1059_v57 = vsel %vm853_vm0, %v3756_v0, %v1049_v60  ;;  %v2677_v61 = vld [vmem:[#allocation7 + $0x2e8] ss:$16 sps:$4 sm:$0xff]  }
 0x32e   : > { %v1085_v48 = vmax.f32 %v1073_v58, 0.0  ;;  %v1088_v39 = vmax.f32 %v1076_v4, 0.0  ;;  %v1091_v27 = vmax.f32 %v1079_v33, 0.0  ;;  %v2674_v0 = vld [vmem:[#allocation7 + $0x2e0] ss:$16 sps:$4 sm:$0xff]  }
 0x32f   : > { %v1074_v8 = vmul.f32 %v1068_v50, %v3691_v17  ;;  %v1077_v56 = vmul.f32 %v1068_v50, %v3693_v19  ;;  %v1080_v1 = vmul.f32 %v1068_v50, %v3695_v9  ;;  %v1083_v54 = vmul.f32 %v1068_v50, %v3698_v10  ;;  %v2640_v19 = vld [vmem:[#allocation7 + $0x224] ss:$16 sps:$4 sm:$0xff]   ;;  %v2643_v9 = vld [vmem:[#allocation7 + $0x22c] ss:$16 sps:$4 sm:$0xff]   ;;  %v1052_v16 = vpop.permute.xlu1 %1051 }
 0x330   : > { %v1097_v7 = vpack.c.bf16 %v1088_v39, %v1085_v48  ;;  %v1082_v17 = vmul.f32 %v1064_v46, %v3674_v26  ;;  %v2647_v26 = vld [vmem:[#allocation7 + $0x248] ss:$16 sps:$4 sm:$0xff]   ;;  %v1060_v62 = vsel %vm915_vm6, %v1059_v57, %v1052_v16  ;;  %v2676_v46 = vld [vmem:[#allocation7 + $0x2e4] ss:$16 sps:$4 sm:$0xff]  }
 0x331   : > { %v1086_v13 = vmax.f32 %v1074_v8, 0.0  ;;  %v1089_v28 = vmax.f32 %v1077_v56, 0.0  ;;  %v1092_v45 = vmax.f32 %v1080_v1, 0.0  ;;  %v1095_v59 = vmax.f32 %v1083_v54, 0.0 }
 0x332   : > { %v1094_v15 = vmax.f32 %v1082_v17, 0.0  ;;  %v1072_v18 = vrot.slane %v1060_v62, %v4119_v44 }
 0x333   : > { %v1098_v23 = vpack.c.bf16 %v1089_v28, %v1086_v13  ;;  %v1101_v10 = vpack.c.bf16 %v1095_v59, %v1092_v45 }
 0x334   : > { %v1100_v37 = vpack.c.bf16 %v1094_v15, %v1091_v27  ;;  %v1075_v24 = vmul.f32 %v1072_v18, %v3710_v36  ;;  %v1078_v52 = vmul.f32 %v1072_v18, %v3712_v51  ;;  %v1081_v8 = vmul.f32 %v1072_v18, %v3714_v34 }
 0x335   : > { %1711 = vmatprep.mubr.bf16.mxu0 %v1098_v23  ;;  %1817 = vmatprep.mubr.bf16.mxu1 %v1098_v23  ;;  %v1084_v36 = vmul.f32 %v1072_v18, %v3718_v42 }
 0x336   : > { %1712 = vmatmul.mubr.bf16.vlgmr.msra.gmra.mrb[0].mxu0 %v1097_v7  ;;  %1818 = vmatmul.mubr.bf16.vlgmr.msra.gmra.mrb[0].mxu1 %v1097_v7  ;;  %v1087_v58 = vmax.f32 %v1075_v24, 0.0  ;;  %v1090_v4 = vmax.f32 %v1078_v52, 0.0  ;;  %v1093_v51 = vmax.f32 %v1081_v8, 0.0 }
 0x337   : > { %1733 = vmatpush1.bf16.msra.mxu0 %v2632_v5  ;;  %1839 = vmatpush1.bf16.msra.mxu1 %v2635_v6  ;;  %v1096_v56 = vmax.f32 %v1084_v36, 0.0 }
 0x338   : > { %1721 = vmatprep.mubr.bf16.mxu0 %v1101_v10  ;;  %1827 = vmatprep.mubr.bf16.mxu1 %v1101_v10  ;;  %v1099_v50 = vpack.c.bf16 %v1090_v4, %v1087_v58 }
 0x339   : > { %1734 = vmatprep.subr.bf16.mxu0 %v2640_v19  ;;  %1840 = vmatprep.subr.bf16.mxu1 %v2643_v9  ;;  %v1102_v1 = vpack.c.bf16 %v1096_v56, %v1093_v51 }
 0x33b   : > { %1735 = vmatpush1.bf16.msra.mxu0 %v2638_v2  ;;  %1841 = vmatpush1.bf16.msra.mxu1 %v2641_v55 }
 0x33c   : > { %1736 = vmatprep.subr.bf16.mxu0 %v2646_v53  ;;  %1842 = vmatprep.subr.bf16.mxu1 %v2649_v40 }
 0x33e   : > { %1722 = vmatmul.mubr.bf16.gmra.mrb[4].mxu0 %v1100_v37  ;;  %1828 = vmatmul.mubr.bf16.gmra.mrb[4].mxu1 %v1100_v37 }
 0x33f   : > { %1737 = vmatpush1.bf16.msra.mxu0 %v2644_v25  ;;  %1843 = vmatpush1.bf16.msra.mxu1 %v2647_v26 }
 0x340   : > { %1738 = vmatprep.subr.bf16.mxu0 %v2652_v11  ;;  %1844 = vmatprep.subr.bf16.mxu1 %v2655_v47 }
 0x341   : > { %1764 = vmatprep.mubr.bf16.mxu0 %v2920_v12  ;;  %1870 = vmatprep.mubr.bf16.mxu1 %v2920_v12 }
 0x343   : > { %1739 = vmatpush1.bf16.msra.mxu0 %v2650_v35  ;;  %1845 = vmatpush1.bf16.msra.mxu1 %v2653_v43 }
 0x344   : > { %1740 = vmatprep.subr.bf16.mxu0 %v2658_v38  ;;  %1846 = vmatprep.subr.bf16.mxu1 %v2661_v32 }
 0x347   : > { %1741 = vmatpush1.bf16.msra.mxu0 %v2656_v20  ;;  %1847 = vmatpush1.bf16.msra.mxu1 %v2659_v29 }
 0x348   : > { %1742 = vmatprep.subr.bf16.mxu0 %v2664_v14  ;;  %1848 = vmatprep.subr.bf16.mxu1 %v2667_v3 }
 0x34b   : > { %1743 = vmatpush1.bf16.msra.mxu0 %v2662_v30  ;;  %1849 = vmatpush1.bf16.msra.mxu1 %v2665_v49 }
 0x34c   : > { %1744 = vmatprep.subr.bf16.mxu0 %v2670_v22  ;;  %1850 = vmatprep.subr.bf16.mxu1 %v2673_v41 }
 0x34f   : > { %1745 = vmatpush1.bf16.msra.mxu0 %v2668_v63  ;;  %1851 = vmatpush1.bf16.msra.mxu1 %v2671_v21 }
 0x350   : > { %1746 = vmatprep.subr.bf16.mxu0 %v2676_v46  ;;  %1852 = vmatprep.subr.bf16.mxu1 %v2679_v31 }
 0x353   : > { %1747 = vmatpush1.bf16.msra.mxu0 %v2674_v0  ;;  %1853 = vmatpush1.bf16.msra.mxu1 %v2677_v61 }
 0x356   : > { %1765 = vmatmul.mubr.bf16.vlgmr.msra.gmra.mrb[0].mxu0 %v1099_v50  ;;  %1871 = vmatmul.mubr.bf16.vlgmr.msra.gmra.mrb[0].mxu1 %v1099_v50 }
 0x357   : > { %1774 = vmatprep.mubr.bf16.mxu0 %v2920_v12  ;;  %1880 = vmatprep.mubr.bf16.mxu1 %v2920_v12 }
 0x35e   : > { %1775 = vmatmul.mubr.bf16.gmra.mrb[4].mxu0 %v1102_v1  ;;  %1881 = vmatmul.mubr.bf16.gmra.mrb[4].mxu1 %v1102_v1 }
 0x429   : > { %v3777_v54 = vpop.f32.mrb[0].mxu0  ;;  %v3779_v48 = vpop.f32.mrb[0].mxu1 }
 0x42a   : > { %v3781_v39 = vpop.f32.mrb[1].mxu0  ;;  %v3783_v13 = vpop.f32.mrb[1].mxu1 }
 0x42b   : > { %v3785_v34 = vpop.f32.mrb[2].mxu0  ;;  %v3787_v42 = vpop.f32.mrb[2].mxu1 }
 0x42c   : > { %v1891_v28 = vadd.f32 %v3785_v34, %v3777_v54  ;;  %v1909_v45 = vadd.f32 %v3787_v42, %v3779_v48  ;;  %v3793_v59 = vpop.f32.mrb[3].mxu0  ;;  %v3795_v23 = vpop.f32.mrb[3].mxu1 }
 0x42d   : > { %v1900_v5 = vadd.f32 %v3793_v59, %v3781_v39  ;;  %v1918_v6 = vadd.f32 %v3795_v23, %v3783_v13 }
 0x431   : > { %v3801_v7 = vpop.f32.mrb[4].mxu0  ;;  %v3803_v33 = vpop.f32.mrb[4].mxu1 }
 0x432   : > { %v1892_v17 = vadd.f32 %v1891_v28, %v3801_v7  ;;  %v1910_v19 = vadd.f32 %v1909_v45, %v3803_v33  ;;  %v3807_v9 = vpop.f32.mrb[5].mxu0  ;;  %v3809_v10 = vpop.f32.mrb[5].mxu1  ;;  %v322_v45 = vld [vmem:[#allocation10] sm:$0xff] }
 0x433   : > { %v1901_v2 = vadd.f32 %v1900_v5, %v3807_v9  ;;  %v1919_v55 = vadd.f32 %v1918_v6, %v3809_v10  ;;  %v3813_v53 = vpop.f32.mrb[6].mxu0  ;;  %v3815_v40 = vpop.f32.mrb[6].mxu1  ;;  %v324_v5 = vld [vmem:[#allocation10 + $0x10] sm:$0xff]  ;;  %v326_v6 = vld [vmem:[#allocation10 + $0x20] sm:$0xff] }
 0x434   : > { %v1893_v27 = vadd.f32 %v1892_v17, %v3813_v53  ;;  %v1911_v15 = vadd.f32 %v1910_v19, %v3815_v40  ;;  %v3819_v25 = vpop.f32.mrb[7].mxu0  ;;  %v3821_v26 = vpop.f32.mrb[7].mxu1  ;;  %v328_v17 = vld [vmem:[#allocation10 + $0x30] sm:$0xff]  ;;  %v331_v19 = vunpack.c.h.bf16 %v322_v45 }
 0x435   : > { %v1902_v37 = vadd.f32 %v1901_v2, %v3819_v25  ;;  %v1920_v11 = vadd.f32 %v1919_v55, %v3821_v26  ;;  %v3830_v2 = vld [vmem:[#allocation10 + $0x8] sm:$0xff]  ;;  %v3832_v55 = vld [vmem:[#allocation10 + $0x18] sm:$0xff] }
 0x436   : > { %v1894_v47 = vrot.slane %v1893_v27, 4  ;;  %v1912_v35 = vrot.slane %v1911_v15, 4 }
 0x437   : > { %v1903_v43 = vrot.slane %v1902_v37, 4  ;;  %v1921_v38 = vrot.slane %v1920_v11, 4 }
 0x438   : > { %v1895_v32 = vadd.f32 %v1894_v47, %v1893_v27  ;;  %v1913_v60 = vadd.f32 %v1912_v35, %v1911_v15  ;;  %v3834_v27 = vld [vmem:[#allocation10 + $0x28] sm:$0xff]  ;;  %v343_v47 = vunpack.c.h.bf16 %v328_v17  ;;  %v330_v35 = vunpack.c.l.bf16 %v322_v45 }
 0x439   : > { %v1904_v12 = vadd.f32 %v1903_v43, %v1902_v37  ;;  %v1922_v16 = vadd.f32 %v1921_v38, %v1920_v11  ;;  %v335_v37 = vunpack.c.h.bf16 %v324_v5  ;;  %v339_v11 = vunpack.c.h.bf16 %v326_v6  ;;  %v3836_v43 = vld [vmem:[#allocation10 + $0x38] sm:$0xff] }
 0x43a   : > { %v1896_v20 = vrot.slane %v1895_v32, 2  ;;  %v1914_v29 = vrot.slane %v1913_v60, 2 }
 0x43b   : > { %v1905_v57 = vrot.slane %v1904_v12, 2  ;;  %v1923_v14 = vrot.slane %v1922_v16, 2 }
 0x43c   : > { %v1897_v3 = vadd.f32 %v1896_v20, %v1895_v32  ;;  %v1915_v62 = vadd.f32 %v1914_v29, %v1913_v60  ;;  %v334_v32 = vunpack.c.l.bf16 %v324_v5  ;;  %v338_v60 = vunpack.c.l.bf16 %v326_v6 }
 0x43d   : > { %v1906_v30 = vadd.f32 %v1905_v57, %v1904_v12  ;;  %v1924_v49 = vadd.f32 %v1923_v14, %v1922_v16  ;;  %v342_v12 = vunpack.c.l.bf16 %v328_v17  ;;  %v333_v20 = vunpack.c.h.bf16 %v3830_v2 }
 0x43e   : > { %v1898_v18 = vrot.slane %v1897_v3, 1  ;;  %v1916_v63 = vrot.slane %v1915_v62, 1  ;;  %v337_v29 = vunpack.c.h.bf16 %v3832_v55  ;;  %v341_v57 = vunpack.c.h.bf16 %v3834_v27 }
 0x43f   : > { %v1907_v22 = vrot.slane %v1906_v30, 1  ;;  %v1925_v24 = vrot.slane %v1924_v49, 1  ;;  %v345_v14 = vunpack.c.h.bf16 %v3836_v43 }
 0x440   : > { %v1899_v41 = vadd.f32 %v1898_v18, %v1897_v3  ;;  %v1917_v52 = vadd.f32 %v1916_v63, %v1915_v62  ;;  %v332_v3 = vunpack.c.l.bf16 %v3830_v2  ;;  %v336_v62 = vunpack.c.l.bf16 %v3832_v55 }
 0x441   : > { %v1908_v21 = vadd.f32 %v1907_v22, %v1906_v30  ;;  %v1926_v46 = vadd.f32 %v1925_v24, %v1924_v49  ;;  %v340_v30 = vunpack.c.l.bf16 %v3834_v27 }
 0x442   : > { %1928 = vrot.lane.b32.xlu0 %v1899_v41, %s2915_s15 }
 0x443   : > { %1934 = vrot.lane.b32.xlu1 %v1908_v21, %s2915_s15 }
 0x446   : > { %1940 = vrot.lane.b32.xlu0 %v1917_v52, %s2915_s15 }
 0x447   : > { %1946 = vrot.lane.b32.xlu1 %v1926_v46, %s2915_s15 }
 0x4b4   : > { %v1929_v31 = vpop.permute.xlu0 %1928 }
 0x4b5   : > { %v1931_v0 = vadd.f32 %v1929_v31, %v1899_v41  ;;  %v1935_v58 = vpop.permute.xlu1 %1934 }
 0x4b7   : > { %v1932_v61 = vadd.f32 %v1931_v0, %v1908_v21 }
 0x4b8   : > { %v1941_v8 = vpop.permute.xlu0 %1940 }
 0x4b9   : > { %v1937_v4 = vadd.f32 %v1935_v58, %v1932_v61  ;;  %v1947_v56 = vpop.permute.xlu1 %1946 }
 0x4bb   : > { %v1938_v50 = vadd.f32 %v1937_v4, %v1917_v52 }
 0x4bd   : > { %v1943_v36 = vadd.f32 %v1941_v8, %v1938_v50 }
 0x4bf   : > { %v1944_v51 = vadd.f32 %v1943_v36, %v1926_v46 }
 0x4c1   : > { %v1949_v1 = vadd.f32 %v1947_v56, %v1944_v51 }
 0x4c3   : > { %v1950_v28 = vmul.f32 0.0625, %v1949_v1 }
 0x4c5   : > { %1952 = vrot.lane.b32.xlu0 %v1950_v28, %s2915_s15 }
 0x537   : > { %v1953_v15 = vpop.permute.xlu0 %1952 }
 0x538   : > { %v1955_v38 = vsel %vm910_vm4, %v1950_v28, %v1953_v15 }
 0x539   : > { %v1959_v16 = vrot.slane %v1955_v38, %v4119_v44 }
 0x53b   : > { %v1961_v49 = vsub.f32 %v3781_v39, %v1959_v16  ;;  %v1965_v18 = vsub.f32 %v3793_v59, %v1959_v16  ;;  %v1969_v22 = vsub.f32 %v3807_v9, %v1959_v16  ;;  %v1973_v41 = vsub.f32 %v3819_v25, %v1959_v16 }
 0x53c   : > { %v1960_v63 = vsub.f32 %v3777_v54, %v1959_v16  ;;  %v1964_v21 = vsub.f32 %v3785_v34, %v1959_v16  ;;  %v1968_v24 = vsub.f32 %v3801_v7, %v1959_v16  ;;  %v1972_v52 = vsub.f32 %v3813_v53, %v1959_v16 }
 0x53d   : > { %v3855_v46 = vmul.f32 %v1961_v49, %v331_v19  ;;  %v3857_v31 = vmul.f32 %v1965_v18, %v335_v37  ;;  %v3859_v0 = vmul.f32 %v1969_v22, %v339_v11  ;;  %v3861_v39 = vmul.f32 %v1973_v41, %v343_v47 }
 0x53e   : > { %v3863_v59 = vmul.f32 %v1960_v63, %v330_v35  ;;  %v3865_v9 = vmul.f32 %v1964_v21, %v334_v32  ;;  %v3867_v25 = vmul.f32 %v1968_v24, %v338_v60  ;;  %v344_v54 = vunpack.c.l.bf16 %v3836_v43 }
 0x53f   : > { %v1993_v34 = vmul.f32 %v3855_v46, %v3855_v46  ;;  %v1997_v7 = vmul.f32 %v3857_v31, %v3857_v31  ;;  %v2001_v53 = vmul.f32 %v3859_v0, %v3859_v0  ;;  %v3876_v61 = vmul.f32 %v1972_v52, %v342_v12 }
 0x540   : > { %v2005_v58 = vmul.f32 %v3861_v39, %v3861_v39  ;;  %v1992_v4 = vmul.f32 %v3863_v59, %v3863_v59  ;;  %v1996_v50 = vmul.f32 %v3865_v9, %v3865_v9  ;;  %v2000_v8 = vmul.f32 %v3867_v25, %v3867_v25 }
 0x541   : > { %v2017_v36 = vadd.f32 %v1997_v7, %v1993_v34  ;;  %v1963_v51 = vsub.f32 %v3783_v13, %v1959_v16  ;;  %v1967_v56 = vsub.f32 %v3795_v23, %v1959_v16  ;;  %v1971_v1 = vsub.f32 %v3809_v10, %v1959_v16 }
 0x542   : > { %v2008_v28 = vadd.f32 %v1996_v50, %v1992_v4  ;;  %v1975_v45 = vsub.f32 %v3821_v26, %v1959_v16  ;;  %v1962_v5 = vsub.f32 %v3779_v48, %v1959_v16  ;;  %v1966_v6 = vsub.f32 %v3787_v42, %v1959_v16 }
 0x543   : > { %v2018_v17 = vadd.f32 %v2017_v36, %v2001_v53  ;;  %v3892_v19 = vmul.f32 %v1963_v51, %v333_v20  ;;  %v3894_v2 = vmul.f32 %v1967_v56, %v337_v29  ;;  %v3896_v55 = vmul.f32 %v1971_v1, %v341_v57 }
 0x544   : > { %v2004_v13 = vmul.f32 %v3876_v61, %v3876_v61  ;;  %v2009_v23 = vadd.f32 %v2008_v28, %v2000_v8  ;;  %v1970_v10 = vsub.f32 %v3803_v33, %v1959_v16  ;;  %v1974_v27 = vsub.f32 %v3815_v40, %v1959_v16 }
 0x545   : > { %v2019_v26 = vadd.f32 %v2018_v17, %v2005_v58  ;;  %v3902_v15 = vmul.f32 %v1975_v45, %v345_v14  ;;  %v1995_v48 = vmul.f32 %v3892_v19, %v3892_v19  ;;  %v1999_v42 = vmul.f32 %v3894_v2, %v3894_v2 }
 0x546   : > { %v2010_v37 = vadd.f32 %v2009_v23, %v2004_v13  ;;  %v3908_v11 = vmul.f32 %v1962_v5, %v332_v3  ;;  %v3910_v47 = vmul.f32 %v1966_v6, %v336_v62  ;;  %v2003_v33 = vmul.f32 %v3896_v55, %v3896_v55 }
 0x547   : > { %v2020_v35 = vrot.slane %v2019_v26, 4  ;;  %v2035_v43 = vadd.f32 %v1999_v42, %v1995_v48  ;;  %v3914_v40 = vmul.f32 %v1970_v10, %v340_v30  ;;  %v3916_v32 = vmul.f32 %v1974_v27, %v344_v54 }
 0x548   : > { %v2011_v38 = vrot.slane %v2010_v37, 4  ;;  %v1994_v60 = vmul.f32 %v3908_v11, %v3908_v11  ;;  %v1998_v12 = vmul.f32 %v3910_v47, %v3910_v47  ;;  %v2007_v20 = vmul.f32 %v3902_v15, %v3902_v15 }
 0x549   : > { %v2021_v16 = vadd.f32 %v2020_v35, %v2019_v26  ;;  %v2036_v29 = vadd.f32 %v2035_v43, %v2003_v33  ;;  %v2002_v14 = vmul.f32 %v3914_v40, %v3914_v40  ;;  %v2006_v18 = vmul.f32 %v3916_v32, %v3916_v32 }
 0x54a   : > { %v2012_v57 = vadd.f32 %v2011_v38, %v2010_v37  ;;  %v2026_v3 = vadd.f32 %v1998_v12, %v1994_v60 }
 0x54b   : > { %v2022_v62 = vrot.slane %v2021_v16, 2  ;;  %v2037_v30 = vadd.f32 %v2036_v29, %v2007_v20 }
 0x54c   : > { %v2013_v49 = vrot.slane %v2012_v57, 2  ;;  %v2027_v22 = vadd.f32 %v2026_v3, %v2002_v14 }
 0x54d   : > { %v2023_v41 = vadd.f32 %v2022_v62, %v2021_v16  ;;  %v2038_v63 = vrot.slane %v2037_v30, 4 }
 0x54e   : > { %v2014_v21 = vadd.f32 %v2013_v49, %v2012_v57  ;;  %v2028_v24 = vadd.f32 %v2027_v22, %v2006_v18 }
 0x54f   : > { %v2024_v52 = vrot.slane %v2023_v41, 1  ;;  %v2039_v54 = vadd.f32 %v2038_v63, %v2037_v30 }
 0x550   : > { %v2015_v34 = vrot.slane %v2014_v21, 1  ;;  %v2029_v7 = vrot.slane %v2028_v24, 4 }
 0x551   : > { %v2025_v53 = vadd.f32 %v2024_v52, %v2023_v41  ;;  %v2040_v58 = vrot.slane %v2039_v54, 2 }
 0x552   : > { %v2016_v4 = vadd.f32 %v2015_v34, %v2014_v21  ;;  %v2030_v50 = vadd.f32 %v2029_v7, %v2028_v24 }
 0x553   : > { %2051 = vrot.lane.b32.xlu0 %v2025_v53, %s2915_s15  ;;  %v2041_v8 = vadd.f32 %v2040_v58, %v2039_v54 }
 0x554   : > { %2045 = vrot.lane.b32.xlu1 %v2016_v4, %s2915_s15  ;;  %v2031_v36 = vrot.slane %v2030_v50, 2 }
 0x555   : > { %v2042_v51 = vrot.slane %v2041_v8, 1 }
 0x556   : > { %v2032_v56 = vadd.f32 %v2031_v36, %v2030_v50 }
 0x557   : > { %v2043_v1 = vadd.f32 %v2042_v51, %v2041_v8 }
 0x558   : > { %v2033_v28 = vrot.slane %v2032_v56, 1 }
 0x559   : > { %2063 = vrot.lane.b32.xlu0 %v2043_v1, %s2915_s15 }
 0x55a   : > { %v2034_v45 = vadd.f32 %v2033_v28, %v2032_v56 }
 0x55c   : > { %2057 = vrot.lane.b32.xlu1 %v2034_v45, %s2915_s15 }
 0x5c5   : > { %v2052_v13 = vpop.permute.xlu0 %2051 }
 0x5c6   : > { %v2046_v5 = vpop.permute.xlu1 %2045 }
 0x5c7   : > { %v2048_v6 = vadd.f32 %v2046_v5, %v2016_v4 }
 0x5c9   : > { %v2049_v17 = vadd.f32 %v2048_v6, %v2025_v53 }
 0x5cb   : > { %v2054_v23 = vadd.f32 %v2052_v13, %v2049_v17  ;;  %v2064_v42 = vpop.permute.xlu0 %2063 }
 0x5cd   : > { %v2055_v10 = vadd.f32 %v2054_v23, %v2034_v45 }
 0x5ce   : > { %v2058_v27 = vpop.permute.xlu1 %2057 }
 0x5cf   : > { %v2060_v26 = vadd.f32 %v2058_v27, %v2055_v10 }
 0x5d1   : > { %v2061_v48 = vadd.f32 %v2060_v26, %v2043_v1 }
 0x5d3   : > { %v2066_v37 = vadd.f32 %v2064_v42, %v2061_v48 }
 0x5d5   : > { %v2067_v35 = vmul.f32 0.0625, %v2066_v37 }
 0x5d7   : > { %v2068_v33 = vadd.f32 1e-05, %v2067_v35 }
 0x5d9   : > { %2682 = vrsqrt.f32 %v2068_v33 }
 0x5e3   : > { %v2683_v43 = vpop.eup %2682 }
 0x5e4   : > { %2071 = vrot.lane.b32.xlu1 %v2683_v43, %s2915_s15  ;;  %s2830_s15 = sshll.u32 %s2921_s24, 4  ;;  %s2831_s15 = int_to_ptr.vmem [resolvable:$false] %s2830_s15 }
 0x5e5   : > { %s2832_s16 = scalar_lea.vmem %s2831_s15, 4096  ;;  %p2833_p12 = scmp.lt.s32.totalorder %s3969_s14, %s2831_s15 }
 0x5e6   : > { %p2834_p2 = scmp.lt.s32.totalorder %s2832_s16, %s2826_s11 }
 0x5e8   : > { %p2835_p1 = por %p2834_p2, %p2833_p12 }
 0x5ea   : > { %p2836_p13 = pnand %p2835_p1, %p2829_p7 }
 0x656   : > { %v2072_v38 = vpop.permute.xlu1 %2071 }
 0x657   : > { %v2074_v60 = vsel %vm910_vm4, %v2683_v43, %v2072_v38 }
 0x658   : > { %v2078_v12 = vrot.slane %v2074_v60, %v4119_v44 }
 0x65a   : > { %v2079_v16 = vmul.f32 %v2078_v12, %v3863_v59  ;;  %v2080_v20 = vmul.f32 %v2078_v12, %v3855_v46  ;;  %v2081_v29 = vmul.f32 %v2078_v12, %v3908_v11  ;;  %v2082_v57 = vmul.f32 %v2078_v12, %v3892_v19 }
 0x65b   : > { %v2083_v14 = vmul.f32 %v2078_v12, %v3865_v9  ;;  %v2084_v3 = vmul.f32 %v2078_v12, %v3857_v31  ;;  %v2085_v62 = vmul.f32 %v2078_v12, %v3910_v47  ;;  %v2086_v30 = vmul.f32 %v2078_v12, %v3894_v2 }
 0x65c   : > { %v2087_v44 = vmul.f32 %v2078_v12, %v3867_v25  ;;  %v2088_v49 = vmul.f32 %v2078_v12, %v3859_v0  ;;  %v2089_v59 = vmul.f32 %v2078_v12, %v3914_v40  ;;  %v2090_v46 = vmul.f32 %v2078_v12, %v3896_v55 }
 0x65d   : > { %v2091_v11 = vmul.f32 %v2078_v12, %v3876_v61  ;;  %v2092_v19 = vmul.f32 %v2078_v12, %v3861_v39  ;;  %v2093_v9 = vmul.f32 %v2078_v12, %v3916_v32  ;;  %v2094_v31 = vmul.f32 %v2078_v12, %v3902_v15 }
 0x65e   : > { %v2095_v47 = vmax.f32 %v2079_v16, 0.0  ;;  %v2096_v18 = vmax.f32 %v2080_v20, 0.0  ;;  %v2097_v2 = vmax.f32 %v2081_v29, 0.0  ;;  %v2098_v22 = vmax.f32 %v2082_v57, 0.0 }
 0x65f   : > { %v2099_v0 = vmax.f32 %v2083_v14, 0.0  ;;  %v2100_v25 = vmax.f32 %v2084_v3, 0.0  ;;  %v2101_v39 = vmax.f32 %v2085_v62, 0.0  ;;  %v2102_v61 = vmax.f32 %v2086_v30, 0.0 }
 0x660   : > { %v2103_v55 = vmax.f32 %v2087_v44, 0.0  ;;  %v2104_v15 = vmax.f32 %v2088_v49, 0.0  ;;  %v2105_v40 = vmax.f32 %v2089_v59, 0.0  ;;  %v2106_v32 = vmax.f32 %v2090_v46, 0.0  ;;  %2111 = vst [vmem:[%s3953_s6] sm:$0xff] %v2095_v47  ;;  %2112 = vst [vmem:[%s3953_s6 + $0x8] sm:$0xff] %v2096_v18 }
 0x661   : > { %2113 = vst [vmem:[%s3953_s6 + $0x10] sm:$0xff] %v2097_v2  ;;  %2114 = vst [vmem:[%s3953_s6 + $0x18] sm:$0xff] %v2098_v22  ;;  %v2107_v41 = vmax.f32 %v2091_v11, 0.0  ;;  %v2108_v63 = vmax.f32 %v2092_v19, 0.0  ;;  %v2109_v21 = vmax.f32 %v2093_v9, 0.0  ;;  %v2110_v24 = vmax.f32 %v2094_v31, 0.0 }
 0x662   : > { %2115 = vst [vmem:[%s3953_s6 + $0x20] sm:$0xff] %v2099_v0  ;;  %2116 = vst [vmem:[%s3953_s6 + $0x28] sm:$0xff] %v2100_v25 }
 0x663   : > { %2117 = vst [vmem:[%s3953_s6 + $0x30] sm:$0xff] %v2101_v39  ;;  %2118 = vst [vmem:[%s3953_s6 + $0x38] sm:$0xff] %v2102_v61 }
 0x664   : > { %2119 = vst [vmem:[%s3953_s6 + $0x40] sm:$0xff] %v2103_v55  ;;  %2120 = vst [vmem:[%s3953_s6 + $0x48] sm:$0xff] %v2104_v15 }
 0x665   : > { %2121 = vst [vmem:[%s3953_s6 + $0x50] sm:$0xff] %v2105_v40  ;;  %2122 = vst [vmem:[%s3953_s6 + $0x58] sm:$0xff] %v2106_v32 }
 0x666   : > { %2123 = vst [vmem:[%s3953_s6 + $0x60] sm:$0xff] %v2107_v41  ;;  %2124 = vst [vmem:[%s3953_s6 + $0x68] sm:$0xff] %v2108_v63 }
 0x667   : > { %2125 = vst [vmem:[%s3953_s6 + $0x70] sm:$0xff] %v2109_v21  ;;  %2126 = vst [vmem:[%s3953_s6 + $0x78] sm:$0xff] %v2110_v24 }
 0x668   : > { %2839 = shalt.err (!%p2836_p13)
}
 0x669   : > { %s2840_s13 = scalar_lea.hbm %s3963_s28, 2048  ;;  %s2844_s9 = scalar_lea.hbm %s4027_s5, 4096 }
 0x66a   : > { %p2841_p9 = scmp.ne.s32.totalorder %s3963_s28, %s2840_s13  ;;  %p2845_p4 = scmp.lt.u32.totalorder %s3963_s28, %s4027_s5 }
 0x66b   : > { %p2846_p8 = scmp.lt.u32.totalorder %s2844_s9, %s2840_s13  ;;  %p2848_p3 = scmp.lt.u32.totalorder %s2840_s13, %s3963_s28 }
 0x66c   : > { %p2842_p0 = pnand %p2841_p9, %p3112_p10 }
 0x66d   : > { %p2847_p6 = por %p2846_p8, %p2845_p4 }
 0x66e   : > { %p2843_p11 = pneg %p2842_p0 }
 0x66f   : > { %p2849_p5 = por %p2848_p3, %p2847_p6 }
 0x671   : > { %p2850_p7 = pnand %p2849_p5, %p2843_p11 }
 0x673   : > { %2853 = shalt.err (!%p2850_p7)
}
 0x674   : > { %s2922_s22 = smov 512  }
 0x675   : > { %2452 = dma.vmem_to_hbm [thread:$0]  (%p3112_p10), %s3969_s14, 2048, %s3963_s28, %s2128_s7, %s2922_s22, %s2922_s22, %s2914_s26  }
 0x676 PF: > { %s2156_s23 = sand.u32 1, %s2888_s18   ;;  %p4125_p12 = scmp.ne.s32.totalorder %s4061_s25, 0 }
 0x677   : > { %p4126_p2 = scmp.ge.s32.totalorder %s2900_s21, 2  ;;  %s2157_s11 = scalar_lea.sflag [#allocation4], %s2156_s23 }
 0x679   : > { %p2472_p1 = pnand %p4126_p2, %p4125_p12 }
 0x67b   : > { %2883 = dma.done.wait (!%p2472_p1), %s2157_s11, 2048  }
 0x67c   : > { %2885 = vsyncadd (!%p2472_p1), %s2157_s11, 4294965248  ;;  %p20_p13 = scmp.ge.s32.totalorder %s3102_s12, 4   ;;  %s4127_s18 = smov %s2892_s19 }
 0x67d   : > { %s4128_s19 = smov %s2896_s20  ;;  %s4129_s20 = smov %s3118_s8 }
 0x67e   : > { %s4130_s21 = smov %s3102_s12  ;;  %22 = sbr.rel (!%p20_p13) target bundleno = 7 (0x7), region = 106 }
 0x685   :  { %2162 = vsyncpa [#allocation3], 1 }
 0x686   :  { %2164 = vsyncpa [#allocation3 + $0x1], 1 }
 0x687   :  { %2165 = vsyncpa [#allocation6], 1 }
 0x688   :  { %2166 = vsyncpa [#allocation9], 1 }
 0x689   :  { %2167 = vsyncpa [#allocation4], 1 }
 0x68a   :  { %2169 = vsyncpa [#allocation4 + $0x1], 1 }

</bundles_post_ra>
